<compile_context>
chip_gen: v5e
topology: v5e:2x2
jax: 0.10.0
libtpu: 0.0.40
codegen_flags: <defaults>
</compile_context>

<pallas_src>
import jax
import jax.numpy as jnp
from jax import lax
from jax.experimental import pallas as pl
from jax.experimental.pallas import tpu as pltpu


# ----------------------------------------------------------------------------
# Fused conv kernel: multi-tap stride-1/2 conv + folded BN (+ residual) (+ReLU)
# ----------------------------------------------------------------------------
def conv3d_fused(x, wk, shift, *, stride, pad_lo, pad_hi, n_taps,
                 residual=None, relu=True):
    """Fused 3D conv with contiguous per-dim tap offsets 0..t-1.

    x:        (N, D, H, W, Cin)  activations (cast to bf16 internally).
    wk:       (td, th*tw, Cin, Cout) f32 weights, BN scale already folded.
    shift:    (Cout,) f32 folded BN shift.
    n_taps:   (td, th, tw) taps per dim.
    stride:   1 or 2 (same for all spatial dims).
    pad_lo/hi: per-dim (d, h, w) zero padding.
    residual: optional (N, Do, Ho, Wo, Cout), added before ReLU.
    returns   (N, Do, Ho, Wo, Cout) bf16.
    """
    n, d, h, w, cin = x.shape
    td, thw, _, cout = wk.shape
    _, th, tw = n_taps
    assert td == n_taps[0] and thw == th * tw

    dp = d + pad_lo[0] + pad_hi[0]
    hp = h + pad_lo[1] + pad_hi[1]
    wp = w + pad_lo[2] + pad_hi[2]
    do = (dp - td) // stride + 1
    ho = (hp - th) // stride + 1
    wo = (wp - tw) // stride + 1

    # Pad + flatten H,W so every (kh, kw) tap is a contiguous row window.
    xp = jnp.pad(x.astype(jnp.bfloat16),
                 ((0, 0),
                  (pad_lo[0], pad_hi[0]),
                  (pad_lo[1], pad_hi[1]),
                  (pad_lo[2], pad_hi[2]),
                  (0, 0)))
    xf = xp.reshape(n, dp, hp * wp, cin)

    M = ho * wp                                  # output rows per depth plane
    offsets = [kh * wp + kw for kh in range(th) for kw in range(tw)]

    if stride == 1:
        L = max(hp * wp, M + max(offsets))
        if L > hp * wp:
            xf = jnp.pad(xf, ((0, 0), (0, 0), (0, L - hp * wp), (0, 0)))
        x_list, x_lens = [xf], [L]
        taps = [(0, c) for c in offsets]
    else:
        # Row-parity split keeps in-kernel tap reads contiguous for stride 2.
        taps = [(c % 2, c // 2) for c in offsets]
        x_list, x_lens = [], []
        for pi, arr in enumerate((xf[:, :, 0::2, :], xf[:, :, 1::2, :])):
            offs = [o for (xi, o) in taps if xi == pi]
            need = M + (max(offs) if offs else 0)
            L = max(arr.shape[2], need)
            if L > arr.shape[2]:
                arr = jnp.pad(arr, ((0, 0), (0, 0), (0, L - arr.shape[2]), (0, 0)))
            x_list.append(arr)
            x_lens.append(L)

    wkb = wk.astype(jnp.bfloat16)
    shift2 = shift.reshape(1, cout).astype(jnp.float32)

    has_res = residual is not None
    if has_res:
        res = residual
        if wo < wp:
            res = jnp.pad(res, ((0, 0), (0, 0), (0, 0), (0, wp - wo), (0, 0)))
        res = res.reshape(n, do, M, cout).astype(jnp.bfloat16)

    nx = len(x_list)
    n_kd = td

    def kernel(*refs):
        x_refs = refs[:nx]
        w_ref = refs[nx]
        shift_ref = refs[nx + 1]
        res_ref = refs[-3] if has_res else None
        o_ref = refs[-2]
        acc_ref = refs[-1]

        t = pl.program_id(2)

        @pl.when(t == 0)
        def _init():
            acc_ref[...] = jnp.zeros_like(acc_ref)

        acc = acc_ref[...]
        for j, (xi, off) in enumerate(taps):          # static unrolled taps
            lhs = x_refs[xi][off:off + M, :]          # (M, Cin) bf16, contiguous
            acc = acc + jnp.dot(lhs, w_ref[j],
                                preferred_element_type=jnp.float32)
        acc_ref[...] = acc

        @pl.when(t == n_kd - 1)
        def _finalize():
            y = acc + shift_ref[...]
            if has_res:
                y = y + res_ref[...].astype(jnp.float32)
            if relu:
                y = jnp.maximum(y, 0.0)
            o_ref[...] = y.astype(o_ref.dtype)

    def x_index_map(b, od, t):
        return (b, stride * od + t, 0, 0)

    in_specs = [pl.BlockSpec((None, None, Lx, cin), x_index_map)
                for Lx in x_lens]
    in_specs.append(
        pl.BlockSpec((None, thw, cin, cout), lambda b, od, t: (t, 0, 0, 0)))
    in_specs.append(pl.BlockSpec((1, cout), lambda b, od, t: (0, 0)))
    args = list(x_list) + [wkb, shift2]
    if has_res:
        in_specs.append(
            pl.BlockSpec((None, None, M, cout), lambda b, od, t: (b, od, 0, 0)))
        args.append(res)

    out = pl.pallas_call(
        kernel,
        out_shape=jax.ShapeDtypeStruct((n, do, M, cout), jnp.bfloat16),
        grid=(n, do, n_kd),
        in_specs=in_specs,
        out_specs=pl.BlockSpec((None, None, M, cout),
                               lambda b, od, t: (b, od, 0, 0)),
        scratch_shapes=[pltpu.VMEM((M, cout), jnp.float32)],
        compiler_params=pltpu.CompilerParams(
            dimension_semantics=("parallel", "parallel", "arbitrary")),
    )(*args)

    # Drop junk columns (flattened-plane pitch is wp, only ow < wo is valid).
    return out.reshape(n, do, ho, wp, cout)[:, :, :, :wo, :]


# ----------------------------------------------------------------------------
# Layer wrappers
# ----------------------------------------------------------------------------
def convbn3d(x, w, scale, shift, *, stride, pad, relu=True):
    """Conv3d (PyTorch weight layout (Cout, Cin, k, k, k), no bias) + folded BN."""
    cout, cin, k = w.shape[0], w.shape[1], w.shape[2]
    wk = jnp.transpose(w, (2, 3, 4, 1, 0)) * scale        # fold BN scale
    wk = wk.reshape(k, k * k, cin, cout)
    return conv3d_fused(x, wk, shift, stride=stride,
                        pad_lo=(pad, pad, pad), pad_hi=(pad, pad, pad),
                        n_taps=(k, k, k), relu=relu)


def deconvbn3d_add_relu(x, w_t, scale, shift, residual):
    """ConvTranspose3d(k=3, s=2, p=1, op=1, no bias) + BN + residual + ReLU.

    Sub-pixel decomposition: each of the 8 output parities is a small stride-1
    conv over the un-dilated input using only the non-zero taps.
    x: (N, D, H, W, Cin); w_t: PyTorch layout (Cin, Cout, 3, 3, 3);
    residual: (N, 2D, 2H, 2W, Cout).
    """
    n, d, h, w, cin = x.shape
    cout = w_t.shape[1]
    # flipped forward-conv kernel, BN scale folded: (kd, kh, kw, Cin, Cout)
    wf = jnp.transpose(w_t[:, :, ::-1, ::-1, ::-1], (2, 3, 4, 0, 1)) * scale

    out = jnp.zeros((n, 2 * d, 2 * h, 2 * w, cout), jnp.bfloat16)
    # output parity -> static slice of contributing taps of wf (per dim):
    #   even outputs use only tap 1; odd outputs use taps 0 and 2 (input
    #   offsets 0 and 1, needing one element of high padding).
    sel = (slice(1, 2), slice(0, 3, 2))
    nsel = (1, 2)
    for pd in (0, 1):
        for ph in (0, 1):
            for pw in (0, 1):
                nd, nh, nw = nsel[pd], nsel[ph], nsel[pw]
                wsub = wf[sel[pd], sel[ph], sel[pw], :, :]
                wsub = wsub.reshape(nd, nh * nw, cin, cout)
                res_p = residual[:, pd::2, ph::2, pw::2, :]
                y = conv3d_fused(x, wsub, shift, stride=1,
                                 pad_lo=(0, 0, 0), pad_hi=(pd, ph, pw),
                                 n_taps=(nd, nh, nw),
                                 residual=res_p, relu=True)
                out = out.at[:, pd::2, ph::2, pw::2, :].set(y)
    return out


# ----------------------------------------------------------------------------
# Parameter construction (deterministic, synthetic)
# ----------------------------------------------------------------------------
def _bn_fold(key, c):
    k1, k2, k3, k4 = jax.random.split(key, 4)
    gamma = 1.0 + 0.1 * jax.random.normal(k1, (c,), jnp.float32)
    beta = 0.1 * jax.random.normal(k2, (c,), jnp.float32)
    mean = 0.1 * jax.random.normal(k3, (c,), jnp.float32)
    var = 1.0 + 0.5 * jax.random.uniform(k4, (c,), jnp.float32)
    eps = 1e-5
    scale = gamma / jnp.sqrt(var + eps)
    shift = beta - mean * scale
    return scale, shift


def make_params(in_channels, key):
    c = in_channels
    keys = jax.random.split(key, 16)
    p = {}

    def conv_w(k, shape):
        return 0.1 * jax.random.normal(k, shape, jnp.float32)

    # conv weights in PyTorch layouts
    p["conv1_w"] = conv_w(keys[0], (2 * c, c, 3, 3, 3))
    p["conv2_w"] = conv_w(keys[1], (2 * c, 2 * c, 3, 3, 3))
    p["conv3_w"] = conv_w(keys[2], (4 * c, 2 * c, 3, 3, 3))
    p["conv4_w"] = conv_w(keys[3], (4 * c, 4 * c, 3, 3, 3))
    p["conv5_w"] = conv_w(keys[4], (4 * c, 2 * c, 3, 3, 3))   # ConvTranspose3d: (Cin, Cout, k,k,k)
    p["conv6_w"] = conv_w(keys[5], (2 * c, c, 3, 3, 3))
    p["redir1_w"] = conv_w(keys[6], (c, c, 1, 1, 1))
    p["redir2_w"] = conv_w(keys[7], (2 * c, 2 * c, 1, 1, 1))

    p["conv1_s"], p["conv1_b"] = _bn_fold(keys[8], 2 * c)
    p["conv2_s"], p["conv2_b"] = _bn_fold(keys[9], 2 * c)
    p["conv3_s"], p["conv3_b"] = _bn_fold(keys[10], 4 * c)
    p["conv4_s"], p["conv4_b"] = _bn_fold(keys[11], 4 * c)
    p["conv5_s"], p["conv5_b"] = _bn_fold(keys[12], 2 * c)
    p["conv6_s"], p["conv6_b"] = _bn_fold(keys[13], c)
    p["redir1_s"], p["redir1_b"] = _bn_fold(keys[14], c)
    p["redir2_s"], p["redir2_b"] = _bn_fold(keys[15], 2 * c)
    return p


# ----------------------------------------------------------------------------
# hourglass forward (Pallas path)
# ----------------------------------------------------------------------------
def hourglass_forward(x_ncdhw, p):
    x = jnp.transpose(x_ncdhw, (0, 2, 3, 4, 1)).astype(jnp.bfloat16)  # NDHWC

    c1 = convbn3d(x, p["conv1_w"], p["conv1_s"], p["conv1_b"], stride=2, pad=1)
    c2 = convbn3d(c1, p["conv2_w"], p["conv2_s"], p["conv2_b"], stride=1, pad=1)
    c3 = convbn3d(c2, p["conv3_w"], p["conv3_s"], p["conv3_b"], stride=2, pad=1)
    c4 = convbn3d(c3, p["conv4_w"], p["conv4_s"], p["conv4_b"], stride=1, pad=1)

    r2 = convbn3d(c2, p["redir2_w"], p["redir2_s"], p["redir2_b"],
                  stride=1, pad=0, relu=False)
    c5 = deconvbn3d_add_relu(c4, p["conv5_w"], p["conv5_s"], p["conv5_b"], r2)

    r1 = convbn3d(x, p["redir1_w"], p["redir1_s"], p["redir1_b"],
                  stride=1, pad=0, relu=False)
    c6 = deconvbn3d_add_relu(c5, p["conv6_w"], p["conv6_s"], p["conv6_b"], r1)

    to_ncdhw = lambda t: jnp.transpose(t, (0, 4, 1, 2, 3))
    return to_ncdhw(c4), to_ncdhw(c5), to_ncdhw(c6)


# ----------------------------------------------------------------------------
# Pure-JAX (lax.conv) reference with identical bf16 rounding points
# ----------------------------------------------------------------------------
_DN = ("NDHWC", "DHWIO", "NDHWC")


def _ref_convbn(x, w, scale, shift, stride, pad, relu):
    wk = (jnp.transpose(w, (2, 3, 4, 1, 0)) * scale).astype(jnp.bfloat16)
    y = lax.conv_general_dilated(x.astype(jnp.bfloat16), wk, (stride,) * 3,
                                 [(pad, pad)] * 3, dimension_numbers=_DN,
                                 preferred_element_type=jnp.float32)
    y = y + shift
    if relu:
        y = jnp.maximum(y, 0.0)
    return y.astype(jnp.bfloat16)


def _ref_deconvbn(x, w_t, scale, shift, residual):
    wf = (jnp.transpose(w_t[:, :, ::-1, ::-1, ::-1], (2, 3, 4, 0, 1))
          * scale).astype(jnp.bfloat16)
    y = lax.conv_general_dilated(x.astype(jnp.bfloat16), wf, (1, 1, 1),
                                 [(1, 2)] * 3, lhs_dilation=(2, 2, 2),
                                 dimension_numbers=_DN,
                                 preferred_element_type=jnp.float32)
    y = y + shift + residual.astype(jnp.float32)
    return jnp.maximum(y, 0.0).astype(jnp.bfloat16)


def hourglass_forward_ref(x_ncdhw, p):
    x = jnp.transpose(x_ncdhw, (0, 2, 3, 4, 1)).astype(jnp.bfloat16)
    c1 = _ref_convbn(x, p["conv1_w"], p["conv1_s"], p["conv1_b"], 2, 1, True)
    c2 = _ref_convbn(c1, p["conv2_w"], p["conv2_s"], p["conv2_b"], 1, 1, True)
    c3 = _ref_convbn(c2, p["conv3_w"], p["conv3_s"], p["conv3_b"], 2, 1, True)
    c4 = _ref_convbn(c3, p["conv4_w"], p["conv4_s"], p["conv4_b"], 1, 1, True)
    r2 = _ref_convbn(c2, p["redir2_w"], p["redir2_s"], p["redir2_b"], 1, 0, False)
    c5 = _ref_deconvbn(c4, p["conv5_w"], p["conv5_s"], p["conv5_b"], r2)
    r1 = _ref_convbn(x, p["redir1_w"], p["redir1_s"], p["redir1_b"], 1, 0, False)
    c6 = _ref_deconvbn(c5, p["conv6_w"], p["conv6_s"], p["conv6_b"], r1)
    to_ncdhw = lambda t: jnp.transpose(t, (0, 4, 1, 2, 3))
    return to_ncdhw(c4), to_ncdhw(c5), to_ncdhw(c6)


# ----------------------------------------------------------------------------
if __name__ == "__main__":
    key = jax.random.PRNGKey(0)
    k_x, k_p = jax.random.split(key)

    N, C, D, H, W = 2, 4, 8, 8, 8          # NCDHW, small shapes (D,H,W % 4 == 0)
    x = jax.random.normal(k_x, (N, C, D, H, W), jnp.float32)
    params = make_params(C, k_p)

    fwd = jax.jit(hourglass_forward)
    ref = jax.jit(hourglass_forward_ref)

    c4, c5, c6 = jax.block_until_ready(fwd(x, params))
    r4, r5, r6 = jax.block_until_ready(ref(x, params))

    assert c4.shape == (N, 4 * C, D // 4, H // 4, W // 4), c4.shape
    assert c5.shape == (N, 2 * C, D // 2, H // 2, W // 2), c5.shape
    assert c6.shape == (N, C, D, H, W), c6.shape

    for a, b in ((c4, r4), (c5, r5), (c6, r6)):
        a32, b32 = a.astype(jnp.float32), b.astype(jnp.float32)
        err = float(jnp.max(jnp.abs(a32 - b32)))
        assert jnp.allclose(a32, b32, rtol=3e-2, atol=3e-2), err

    print("KERNEL_OK")
</pallas_src>

<mosaic_0001>
module attributes {stable_mosaic.version = 11 : i64} {
  func.func @kernel(%arg0: i32, %arg1: i32, %arg2: i32, %arg3: memref<1x1x51x4xbf16, #tpu.memory_space<vmem>>, %arg4: memref<1x1x50x4xbf16, #tpu.memory_space<vmem>>, %arg5: memref<1x9x4x8xbf16, #tpu.memory_space<vmem>>, %arg6: memref<1x8xf32, #tpu.memory_space<vmem>>, %arg7: memref<1x1x40x8xbf16, #tpu.memory_space<vmem>>, %arg8: memref<40x8xf32, #tpu.memory_space<vmem>>) attributes {dimension_semantics = [#tpu.dimension_semantics<parallel>, #tpu.dimension_semantics<parallel>, #tpu.dimension_semantics<arbitrary>], iteration_bounds = array<i64: 2, 4, 3>, scalar_prefetch = 0 : i64, scratch_operands = 1 : i64, tpu.core_type = #tpu.core_type<tc>, window_params = [{transform_indices = @transform_0, window_bounds = array<i64: 1, 1, 51, 4>}, {transform_indices = @transform_1, window_bounds = array<i64: 1, 1, 50, 4>}, {transform_indices = @transform_2, window_bounds = array<i64: 1, 9, 4, 8>}, {pipeline_mode = #tpu.pipeline_mode<synchronous>, transform_indices = @transform_3, window_bounds = array<i64: 1, 8>}, {transform_indices = @transform_4, window_bounds = array<i64: 1, 1, 40, 8>}]} {
    %c0_i32 = arith.constant 0 : i32
    %0 = arith.cmpi eq, %arg2, %c0_i32 : i32
    %1 = arith.extui %0 : i1 to i32
    %c0_i32_0 = arith.constant 0 : i32
    %2 = arith.cmpi ne, %1, %c0_i32_0 : i32
    scf.if %2 {
      %cst_75 = arith.constant 0.000000e+00 : f32
      %62 = vector.broadcast %cst_75 : f32 to vector<40x8xf32>
      %c0_76 = arith.constant 0 : index
      %c0_77 = arith.constant 0 : index
      %63 = vector.load %arg8[%c0_76, %c0_77] : memref<40x8xf32, #tpu.memory_space<vmem>>, vector<40x8xf32>
      tpu.vector_store %arg8[%c0_76, %c0_77], %62 {strides = array<i32>} : memref<40x8xf32, #tpu.memory_space<vmem>>, vector<40x8xf32>,
    } else {
    }
    %c0 = arith.constant 0 : index
    %c0_1 = arith.constant 0 : index
    %3 = vector.load %arg8[%c0, %c0_1] : memref<40x8xf32, #tpu.memory_space<vmem>>, vector<40x8xf32>
    %c0_2 = arith.constant 0 : index
    %c0_3 = arith.constant 0 : index
    %c0_4 = arith.constant 0 : index
    %c0_5 = arith.constant 0 : index
    %4 = vector.load %arg3[%c0_2, %c0_3, %c0_4, %c0_5] : memref<1x1x51x4xbf16, #tpu.memory_space<vmem>>, vector<1x1x40x4xbf16>
    %5 = vector.shape_cast %4 : vector<1x1x40x4xbf16> to vector<40x4xbf16>
    %c0_6 = arith.constant 0 : index
    %c0_7 = arith.constant 0 : index
    %c0_8 = arith.constant 0 : index
    %c0_9 = arith.constant 0 : index
    %6 = vector.load %arg5[%c0_6, %c0_7, %c0_8, %c0_9] : memref<1x9x4x8xbf16, #tpu.memory_space<vmem>>, vector<1x1x4x8xbf16>
    %7 = vector.shape_cast %6 : vector<1x1x4x8xbf16> to vector<4x8xbf16>
    %cst = arith.constant dense<0.000000e+00> : vector<40x8xf32>
    %8 = tpu.matmul %5, %7, %cst {dimension_numbers = #tpu.dot_dimension_numbers<[1], [0], [0], [1], [0, 0, 1, 1], [], []>} : vector<40x4xbf16>, vector<4x8xbf16>, vector<40x8xf32> -> vector<40x8xf32>
    %9 = arith.addf %3, %8 : vector<40x8xf32>
    %c0_10 = arith.constant 0 : index
    %c0_11 = arith.constant 0 : index
    %c0_12 = arith.constant 0 : index
    %c0_13 = arith.constant 0 : index
    %10 = vector.load %arg4[%c0_10, %c0_11, %c0_12, %c0_13] : memref<1x1x50x4xbf16, #tpu.memory_space<vmem>>, vector<1x1x40x4xbf16>
    %11 = vector.shape_cast %10 : vector<1x1x40x4xbf16> to vector<40x4xbf16>
    %c0_14 = arith.constant 0 : index
    %c1 = arith.constant 1 : index
    %c0_15 = arith.constant 0 : index
    %c0_16 = arith.constant 0 : index
    %12 = vector.load %arg5[%c0_14, %c1, %c0_15, %c0_16] : memref<1x9x4x8xbf16, #tpu.memory_space<vmem>>, vector<1x1x4x8xbf16>
    %13 = vector.shape_cast %12 : vector<1x1x4x8xbf16> to vector<4x8xbf16>
    %cst_17 = arith.constant dense<0.000000e+00> : vector<40x8xf32>
    %14 = tpu.matmul %11, %13, %cst_17 {dimension_numbers = #tpu.dot_dimension_numbers<[1], [0], [0], [1], [0, 0, 1, 1], [], []>} : vector<40x4xbf16>, vector<4x8xbf16>, vector<40x8xf32> -> vector<40x8xf32>
    %15 = arith.addf %9, %14 : vector<40x8xf32>
    %c0_18 = arith.constant 0 : index
    %c0_19 = arith.constant 0 : index
    %c1_20 = arith.constant 1 : index
    %c0_21 = arith.constant 0 : index
    %16 = vector.load %arg3[%c0_18, %c0_19, %c1_20, %c0_21] : memref<1x1x51x4xbf16, #tpu.memory_space<vmem>>, vector<1x1x40x4xbf16>
    %17 = vector.shape_cast %16 : vector<1x1x40x4xbf16> to vector<40x4xbf16>
    %c0_22 = arith.constant 0 : index
    %c2 = arith.constant 2 : index
    %c0_23 = arith.constant 0 : index
    %c0_24 = arith.constant 0 : index
    %18 = vector.load %arg5[%c0_22, %c2, %c0_23, %c0_24] : memref<1x9x4x8xbf16, #tpu.memory_space<vmem>>, vector<1x1x4x8xbf16>
    %19 = vector.shape_cast %18 : vector<1x1x4x8xbf16> to vector<4x8xbf16>
    %cst_25 = arith.constant dense<0.000000e+00> : vector<40x8xf32>
    %20 = tpu.matmul %17, %19, %cst_25 {dimension_numbers = #tpu.dot_dimension_numbers<[1], [0], [0], [1], [0, 0, 1, 1], [], []>} : vector<40x4xbf16>, vector<4x8xbf16>, vector<40x8xf32> -> vector<40x8xf32>
    %21 = arith.addf %15, %20 : vector<40x8xf32>
    %c0_26 = arith.constant 0 : index
    %c0_27 = arith.constant 0 : index
    %c5 = arith.constant 5 : index
    %c0_28 = arith.constant 0 : index
    %22 = vector.load %arg3[%c0_26, %c0_27, %c5, %c0_28] : memref<1x1x51x4xbf16, #tpu.memory_space<vmem>>, vector<1x1x40x4xbf16>
    %23 = vector.shape_cast %22 : vector<1x1x40x4xbf16> to vector<40x4xbf16>
    %c0_29 = arith.constant 0 : index
    %c3 = arith.constant 3 : index
    %c0_30 = arith.constant 0 : index
    %c0_31 = arith.constant 0 : index
    %24 = vector.load %arg5[%c0_29, %c3, %c0_30, %c0_31] : memref<1x9x4x8xbf16, #tpu.memory_space<vmem>>, vector<1x1x4x8xbf16>
    %25 = vector.shape_cast %24 : vector<1x1x4x8xbf16> to vector<4x8xbf16>
    %cst_32 = arith.constant dense<0.000000e+00> : vector<40x8xf32>
    %26 = tpu.matmul %23, %25, %cst_32 {dimension_numbers = #tpu.dot_dimension_numbers<[1], [0], [0], [1], [0, 0, 1, 1], [], []>} : vector<40x4xbf16>, vector<4x8xbf16>, vector<40x8xf32> -> vector<40x8xf32>
    %27 = arith.addf %21, %26 : vector<40x8xf32>
    %c0_33 = arith.constant 0 : index
    %c0_34 = arith.constant 0 : index
    %c5_35 = arith.constant 5 : index
    %c0_36 = arith.constant 0 : index
    %28 = vector.load %arg4[%c0_33, %c0_34, %c5_35, %c0_36] : memref<1x1x50x4xbf16, #tpu.memory_space<vmem>>, vector<1x1x40x4xbf16>
    %29 = vector.shape_cast %28 : vector<1x1x40x4xbf16> to vector<40x4xbf16>
    %c0_37 = arith.constant 0 : index
    %c4 = arith.constant 4 : index
    %c0_38 = arith.constant 0 : index
    %c0_39 = arith.constant 0 : index
    %30 = vector.load %arg5[%c0_37, %c4, %c0_38, %c0_39] : memref<1x9x4x8xbf16, #tpu.memory_space<vmem>>, vector<1x1x4x8xbf16>
    %31 = vector.shape_cast %30 : vector<1x1x4x8xbf16> to vector<4x8xbf16>
    %cst_40 = arith.constant dense<0.000000e+00> : vector<40x8xf32>
    %32 = tpu.matmul %29, %31, %cst_40 {dimension_numbers = #tpu.dot_dimension_numbers<[1], [0], [0], [1], [0, 0, 1, 1], [], []>} : vector<40x4xbf16>, vector<4x8xbf16>, vector<40x8xf32> -> vector<40x8xf32>
    %33 = arith.addf %27, %32 : vector<40x8xf32>
    %c0_41 = arith.constant 0 : index
    %c0_42 = arith.constant 0 : index
    %c6 = arith.constant 6 : index
    %c0_43 = arith.constant 0 : index
    %34 = vector.load %arg3[%c0_41, %c0_42, %c6, %c0_43] : memref<1x1x51x4xbf16, #tpu.memory_space<vmem>>, vector<1x1x40x4xbf16>
    %35 = vector.shape_cast %34 : vector<1x1x40x4xbf16> to vector<40x4xbf16>
    %c0_44 = arith.constant 0 : index
    %c5_45 = arith.constant 5 : index
    %c0_46 = arith.constant 0 : index
    %c0_47 = arith.constant 0 : index
    %36 = vector.load %arg5[%c0_44, %c5_45, %c0_46, %c0_47] : memref<1x9x4x8xbf16, #tpu.memory_space<vmem>>, vector<1x1x4x8xbf16>
    %37 = vector.shape_cast %36 : vector<1x1x4x8xbf16> to vector<4x8xbf16>
    %cst_48 = arith.constant dense<0.000000e+00> : vector<40x8xf32>
    %38 = tpu.matmul %35, %37, %cst_48 {dimension_numbers = #tpu.dot_dimension_numbers<[1], [0], [0], [1], [0, 0, 1, 1], [], []>} : vector<40x4xbf16>, vector<4x8xbf16>, vector<40x8xf32> -> vector<40x8xf32>
    %39 = arith.addf %33, %38 : vector<40x8xf32>
    %c0_49 = arith.constant 0 : index
    %c0_50 = arith.constant 0 : index
    %c10 = arith.constant 10 : index
    %c0_51 = arith.constant 0 : index
    %40 = vector.load %arg3[%c0_49, %c0_50, %c10, %c0_51] : memref<1x1x51x4xbf16, #tpu.memory_space<vmem>>, vector<1x1x40x4xbf16>
    %41 = vector.shape_cast %40 : vector<1x1x40x4xbf16> to vector<40x4xbf16>
    %c0_52 = arith.constant 0 : index
    %c6_53 = arith.constant 6 : index
    %c0_54 = arith.constant 0 : index
    %c0_55 = arith.constant 0 : index
    %42 = vector.load %arg5[%c0_52, %c6_53, %c0_54, %c0_55] : memref<1x9x4x8xbf16, #tpu.memory_space<vmem>>, vector<1x1x4x8xbf16>
    %43 = vector.shape_cast %42 : vector<1x1x4x8xbf16> to vector<4x8xbf16>
    %cst_56 = arith.constant dense<0.000000e+00> : vector<40x8xf32>
    %44 = tpu.matmul %41, %43, %cst_56 {dimension_numbers = #tpu.dot_dimension_numbers<[1], [0], [0], [1], [0, 0, 1, 1], [], []>} : vector<40x4xbf16>, vector<4x8xbf16>, vector<40x8xf32> -> vector<40x8xf32>
    %45 = arith.addf %39, %44 : vector<40x8xf32>
    %c0_57 = arith.constant 0 : index
    %c0_58 = arith.constant 0 : index
    %c10_59 = arith.constant 10 : index
    %c0_60 = arith.constant 0 : index
    %46 = vector.load %arg4[%c0_57, %c0_58, %c10_59, %c0_60] : memref<1x1x50x4xbf16, #tpu.memory_space<vmem>>, vector<1x1x40x4xbf16>
    %47 = vector.shape_cast %46 : vector<1x1x40x4xbf16> to vector<40x4xbf16>
    %c0_61 = arith.constant 0 : index
    %c7 = arith.constant 7 : index
    %c0_62 = arith.constant 0 : index
    %c0_63 = arith.constant 0 : index
    %48 = vector.load %arg5[%c0_61, %c7, %c0_62, %c0_63] : memref<1x9x4x8xbf16, #tpu.memory_space<vmem>>, vector<1x1x4x8xbf16>
    %49 = vector.shape_cast %48 : vector<1x1x4x8xbf16> to vector<4x8xbf16>
    %cst_64 = arith.constant dense<0.000000e+00> : vector<40x8xf32>
    %50 = tpu.matmul %47, %49, %cst_64 {dimension_numbers = #tpu.dot_dimension_numbers<[1], [0], [0], [1], [0, 0, 1, 1], [], []>} : vector<40x4xbf16>, vector<4x8xbf16>, vector<40x8xf32> -> vector<40x8xf32>
    %51 = arith.addf %45, %50 : vector<40x8xf32>
    %c0_65 = arith.constant 0 : index
    %c0_66 = arith.constant 0 : index
    %c11 = arith.constant 11 : index
    %c0_67 = arith.constant 0 : index
    %52 = vector.load %arg3[%c0_65, %c0_66, %c11, %c0_67] : memref<1x1x51x4xbf16, #tpu.memory_space<vmem>>, vector<1x1x40x4xbf16>
    %53 = vector.shape_cast %52 : vector<1x1x40x4xbf16> to vector<40x4xbf16>
    %c0_68 = arith.constant 0 : index
    %c8 = arith.constant 8 : index
    %c0_69 = arith.constant 0 : index
    %c0_70 = arith.constant 0 : index
    %54 = vector.load %arg5[%c0_68, %c8, %c0_69, %c0_70] : memref<1x9x4x8xbf16, #tpu.memory_space<vmem>>, vector<1x1x4x8xbf16>
    %55 = vector.shape_cast %54 : vector<1x1x4x8xbf16> to vector<4x8xbf16>
    %cst_71 = arith.constant dense<0.000000e+00> : vector<40x8xf32>
    %56 = tpu.matmul %53, %55, %cst_71 {dimension_numbers = #tpu.dot_dimension_numbers<[1], [0], [0], [1], [0, 0, 1, 1], [], []>} : vector<40x4xbf16>, vector<4x8xbf16>, vector<40x8xf32> -> vector<40x8xf32>
    %57 = arith.addf %51, %56 : vector<40x8xf32>
    %c0_72 = arith.constant 0 : index
    %c0_73 = arith.constant 0 : index
    %58 = vector.load %arg8[%c0_72, %c0_73] : memref<40x8xf32, #tpu.memory_space<vmem>>, vector<40x8xf32>
    tpu.vector_store %arg8[%c0_72, %c0_73], %57 {strides = array<i32>} : memref<40x8xf32, #tpu.memory_space<vmem>>, vector<40x8xf32>,
    %c2_i32 = arith.constant 2 : i32
    %59 = arith.cmpi eq, %arg2, %c2_i32 : i32
    %60 = arith.extui %59 : i1 to i32
    %c0_i32_74 = arith.constant 0 : i32
    %61 = arith.cmpi ne, %60, %c0_i32_74 : i32
    scf.if %61 {
      %c0_75 = arith.constant 0 : index
      %c0_76 = arith.constant 0 : index
      %62 = vector.load %arg6[%c0_75, %c0_76] : memref<1x8xf32, #tpu.memory_space<vmem>>, vector<1x8xf32>
      %63 = vector.broadcast %62 : vector<1x8xf32> to vector<40x8xf32>
      %64 = arith.addf %57, %63 : vector<40x8xf32>
      %cst_77 = arith.constant 0.000000e+00 : f32
      %65 = vector.broadcast %cst_77 : f32 to vector<40x8xf32>
      %66 = arith.maximumf %64, %65 : vector<40x8xf32>
      %67 = arith.truncf %66 : vector<40x8xf32> to vector<40x8xbf16>
      %c0_78 = arith.constant 0 : index
      %c0_79 = arith.constant 0 : index
      %c0_80 = arith.constant 0 : index
      %c0_81 = arith.constant 0 : index
      %68 = vector.load %arg7[%c0_78, %c0_79, %c0_80, %c0_81] : memref<1x1x40x8xbf16, #tpu.memory_space<vmem>>, vector<1x1x40x8xbf16>
      %69 = vector.shape_cast %68 : vector<1x1x40x8xbf16> to vector<40x8xbf16>
      %70 = vector.shape_cast %67 : vector<40x8xbf16> to vector<1x1x40x8xbf16>
      tpu.vector_store %arg7[%c0_78, %c0_79, %c0_80, %c0_81], %70 {strides = array<i32>} : memref<1x1x40x8xbf16, #tpu.memory_space<vmem>>, vector<1x1x40x8xbf16>,
    } else {
    }
    return
  }
  func.func @transform_0(%arg0: i32, %arg1: i32, %arg2: i32) -> (i32, i32, i32, i32) {
    %c2_i32 = arith.constant 2 : i32
    %0 = arith.muli %c2_i32, %arg1 : i32
    %1 = arith.addi %0, %arg2 : i32
    %c0_i32 = arith.constant 0 : i32
    %c0_i32_0 = arith.constant 0 : i32
    %c0_i32_1 = arith.constant 0 : i32
    return %arg0, %1, %c0_i32, %c0_i32_0 : i32, i32, i32, i32
  }
  func.func @transform_1(%arg0: i32, %arg1: i32, %arg2: i32) -> (i32, i32, i32, i32) {
    %c2_i32 = arith.constant 2 : i32
    %0 = arith.muli %c2_i32, %arg1 : i32
    %1 = arith.addi %0, %arg2 : i32
    %c0_i32 = arith.constant 0 : i32
    %c0_i32_0 = arith.constant 0 : i32
    %c0_i32_1 = arith.constant 0 : i32
    return %arg0, %1, %c0_i32, %c0_i32_0 : i32, i32, i32, i32
  }
  func.func @transform_2(%arg0: i32, %arg1: i32, %arg2: i32) -> (i32, i32, i32, i32) {
    %c0_i32 = arith.constant 0 : i32
    %c0_i32_0 = arith.constant 0 : i32
    %c0_i32_1 = arith.constant 0 : i32
    %c0_i32_2 = arith.constant 0 : i32
    return %arg2, %c0_i32, %c0_i32_0, %c0_i32_1 : i32, i32, i32, i32
  }
  func.func @transform_3(%arg0: i32, %arg1: i32, %arg2: i32) -> (i32, i32) {
    %c0_i32 = arith.constant 0 : i32
    %c0_i32_0 = arith.constant 0 : i32
    %c0_i32_1 = arith.constant 0 : i32
    return %c0_i32, %c0_i32_0 : i32, i32
  }
  func.func @transform_4(%arg0: i32, %arg1: i32, %arg2: i32) -> (i32, i32, i32, i32) {
    %c0_i32 = arith.constant 0 : i32
    %c0_i32_0 = arith.constant 0 : i32
    %c0_i32_1 = arith.constant 0 : i32
    return %arg0, %arg1, %c0_i32, %c0_i32_0 : i32, i32, i32, i32
  }
}

module attributes {stable_mosaic.version = 11 : i64} {
  func.func @kernel(%arg0: i32, %arg1: i32, %arg2: i32, %arg3: memref<1x1x38x8xbf16, #tpu.memory_space<vmem>>, %arg4: memref<1x9x8x8xbf16, #tpu.memory_space<vmem>>, %arg5: memref<1x8xf32, #tpu.memory_space<vmem>>, %arg6: memref<1x1x24x8xbf16, #tpu.memory_space<vmem>>, %arg7: memref<24x8xf32, #tpu.memory_space<vmem>>) attributes {dimension_semantics = [#tpu.dimension_semantics<parallel>, #tpu.dimension_semantics<parallel>, #tpu.dimension_semantics<arbitrary>], iteration_bounds = array<i64: 2, 4, 3>, scalar_prefetch = 0 : i64, scratch_operands = 1 : i64, tpu.core_type = #tpu.core_type<tc>, window_params = [{transform_indices = @transform_0, window_bounds = array<i64: 1, 1, 38, 8>}, {transform_indices = @transform_1, window_bounds = array<i64: 1, 9, 8, 8>}, {pipeline_mode = #tpu.pipeline_mode<synchronous>, transform_indices = @transform_2, window_bounds = array<i64: 1, 8>}, {transform_indices = @transform_3, window_bounds = array<i64: 1, 1, 24, 8>}]} {
    %c0_i32 = arith.constant 0 : i32
    %0 = arith.cmpi eq, %arg2, %c0_i32 : i32
    %1 = arith.extui %0 : i1 to i32
    %c0_i32_0 = arith.constant 0 : i32
    %2 = arith.cmpi ne, %1, %c0_i32_0 : i32
    scf.if %2 {
      %cst_74 = arith.constant 0.000000e+00 : f32
      %62 = vector.broadcast %cst_74 : f32 to vector<24x8xf32>
      %c0_75 = arith.constant 0 : index
      %c0_76 = arith.constant 0 : index
      %63 = vector.load %arg7[%c0_75, %c0_76] : memref<24x8xf32, #tpu.memory_space<vmem>>, vector<24x8xf32>
      tpu.vector_store %arg7[%c0_75, %c0_76], %62 {strides = array<i32>} : memref<24x8xf32, #tpu.memory_space<vmem>>, vector<24x8xf32>,
    } else {
    }
    %c0 = arith.constant 0 : index
    %c0_1 = arith.constant 0 : index
    %3 = vector.load %arg7[%c0, %c0_1] : memref<24x8xf32, #tpu.memory_space<vmem>>, vector<24x8xf32>
    %c0_2 = arith.constant 0 : index
    %c0_3 = arith.constant 0 : index
    %c0_4 = arith.constant 0 : index
    %c0_5 = arith.constant 0 : index
    %4 = vector.load %arg3[%c0_2, %c0_3, %c0_4, %c0_5] : memref<1x1x38x8xbf16, #tpu.memory_space<vmem>>, vector<1x1x24x8xbf16>
    %5 = vector.shape_cast %4 : vector<1x1x24x8xbf16> to vector<24x8xbf16>
    %c0_6 = arith.constant 0 : index
    %c0_7 = arith.constant 0 : index
    %c0_8 = arith.constant 0 : index
    %c0_9 = arith.constant 0 : index
    %6 = vector.load %arg4[%c0_6, %c0_7, %c0_8, %c0_9] : memref<1x9x8x8xbf16, #tpu.memory_space<vmem>>, vector<1x1x8x8xbf16>
    %7 = vector.shape_cast %6 : vector<1x1x8x8xbf16> to vector<8x8xbf16>
    %cst = arith.constant dense<0.000000e+00> : vector<24x8xf32>
    %8 = tpu.matmul %5, %7, %cst {dimension_numbers = #tpu.dot_dimension_numbers<[1], [0], [0], [1], [0, 0, 1, 1], [], []>} : vector<24x8xbf16>, vector<8x8xbf16>, vector<24x8xf32> -> vector<24x8xf32>
    %9 = arith.addf %3, %8 : vector<24x8xf32>
    %c0_10 = arith.constant 0 : index
    %c0_11 = arith.constant 0 : index
    %c1 = arith.constant 1 : index
    %c0_12 = arith.constant 0 : index
    %10 = vector.load %arg3[%c0_10, %c0_11, %c1, %c0_12] : memref<1x1x38x8xbf16, #tpu.memory_space<vmem>>, vector<1x1x24x8xbf16>
    %11 = vector.shape_cast %10 : vector<1x1x24x8xbf16> to vector<24x8xbf16>
    %c0_13 = arith.constant 0 : index
    %c1_14 = arith.constant 1 : index
    %c0_15 = arith.constant 0 : index
    %c0_16 = arith.constant 0 : index
    %12 = vector.load %arg4[%c0_13, %c1_14, %c0_15, %c0_16] : memref<1x9x8x8xbf16, #tpu.memory_space<vmem>>, vector<1x1x8x8xbf16>
    %13 = vector.shape_cast %12 : vector<1x1x8x8xbf16> to vector<8x8xbf16>
    %cst_17 = arith.constant dense<0.000000e+00> : vector<24x8xf32>
    %14 = tpu.matmul %11, %13, %cst_17 {dimension_numbers = #tpu.dot_dimension_numbers<[1], [0], [0], [1], [0, 0, 1, 1], [], []>} : vector<24x8xbf16>, vector<8x8xbf16>, vector<24x8xf32> -> vector<24x8xf32>
    %15 = arith.addf %9, %14 : vector<24x8xf32>
    %c0_18 = arith.constant 0 : index
    %c0_19 = arith.constant 0 : index
    %c2 = arith.constant 2 : index
    %c0_20 = arith.constant 0 : index
    %16 = vector.load %arg3[%c0_18, %c0_19, %c2, %c0_20] : memref<1x1x38x8xbf16, #tpu.memory_space<vmem>>, vector<1x1x24x8xbf16>
    %17 = vector.shape_cast %16 : vector<1x1x24x8xbf16> to vector<24x8xbf16>
    %c0_21 = arith.constant 0 : index
    %c2_22 = arith.constant 2 : index
    %c0_23 = arith.constant 0 : index
    %c0_24 = arith.constant 0 : index
    %18 = vector.load %arg4[%c0_21, %c2_22, %c0_23, %c0_24] : memref<1x9x8x8xbf16, #tpu.memory_space<vmem>>, vector<1x1x8x8xbf16>
    %19 = vector.shape_cast %18 : vector<1x1x8x8xbf16> to vector<8x8xbf16>
    %cst_25 = arith.constant dense<0.000000e+00> : vector<24x8xf32>
    %20 = tpu.matmul %17, %19, %cst_25 {dimension_numbers = #tpu.dot_dimension_numbers<[1], [0], [0], [1], [0, 0, 1, 1], [], []>} : vector<24x8xbf16>, vector<8x8xbf16>, vector<24x8xf32> -> vector<24x8xf32>
    %21 = arith.addf %15, %20 : vector<24x8xf32>
    %c0_26 = arith.constant 0 : index
    %c0_27 = arith.constant 0 : index
    %c6 = arith.constant 6 : index
    %c0_28 = arith.constant 0 : index
    %22 = vector.load %arg3[%c0_26, %c0_27, %c6, %c0_28] : memref<1x1x38x8xbf16, #tpu.memory_space<vmem>>, vector<1x1x24x8xbf16>
    %23 = vector.shape_cast %22 : vector<1x1x24x8xbf16> to vector<24x8xbf16>
    %c0_29 = arith.constant 0 : index
    %c3 = arith.constant 3 : index
    %c0_30 = arith.constant 0 : index
    %c0_31 = arith.constant 0 : index
    %24 = vector.load %arg4[%c0_29, %c3, %c0_30, %c0_31] : memref<1x9x8x8xbf16, #tpu.memory_space<vmem>>, vector<1x1x8x8xbf16>
    %25 = vector.shape_cast %24 : vector<1x1x8x8xbf16> to vector<8x8xbf16>
    %cst_32 = arith.constant dense<0.000000e+00> : vector<24x8xf32>
    %26 = tpu.matmul %23, %25, %cst_32 {dimension_numbers = #tpu.dot_dimension_numbers<[1], [0], [0], [1], [0, 0, 1, 1], [], []>} : vector<24x8xbf16>, vector<8x8xbf16>, vector<24x8xf32> -> vector<24x8xf32>
    %27 = arith.addf %21, %26 : vector<24x8xf32>
    %c0_33 = arith.constant 0 : index
    %c0_34 = arith.constant 0 : index
    %c7 = arith.constant 7 : index
    %c0_35 = arith.constant 0 : index
    %28 = vector.load %arg3[%c0_33, %c0_34, %c7, %c0_35] : memref<1x1x38x8xbf16, #tpu.memory_space<vmem>>, vector<1x1x24x8xbf16>
    %29 = vector.shape_cast %28 : vector<1x1x24x8xbf16> to vector<24x8xbf16>
    %c0_36 = arith.constant 0 : index
    %c4 = arith.constant 4 : index
    %c0_37 = arith.constant 0 : index
    %c0_38 = arith.constant 0 : index
    %30 = vector.load %arg4[%c0_36, %c4, %c0_37, %c0_38] : memref<1x9x8x8xbf16, #tpu.memory_space<vmem>>, vector<1x1x8x8xbf16>
    %31 = vector.shape_cast %30 : vector<1x1x8x8xbf16> to vector<8x8xbf16>
    %cst_39 = arith.constant dense<0.000000e+00> : vector<24x8xf32>
    %32 = tpu.matmul %29, %31, %cst_39 {dimension_numbers = #tpu.dot_dimension_numbers<[1], [0], [0], [1], [0, 0, 1, 1], [], []>} : vector<24x8xbf16>, vector<8x8xbf16>, vector<24x8xf32> -> vector<24x8xf32>
    %33 = arith.addf %27, %32 : vector<24x8xf32>
    %c0_40 = arith.constant 0 : index
    %c0_41 = arith.constant 0 : index
    %c8 = arith.constant 8 : index
    %c0_42 = arith.constant 0 : index
    %34 = vector.load %arg3[%c0_40, %c0_41, %c8, %c0_42] : memref<1x1x38x8xbf16, #tpu.memory_space<vmem>>, vector<1x1x24x8xbf16>
    %35 = vector.shape_cast %34 : vector<1x1x24x8xbf16> to vector<24x8xbf16>
    %c0_43 = arith.constant 0 : index
    %c5 = arith.constant 5 : index
    %c0_44 = arith.constant 0 : index
    %c0_45 = arith.constant 0 : index
    %36 = vector.load %arg4[%c0_43, %c5, %c0_44, %c0_45] : memref<1x9x8x8xbf16, #tpu.memory_space<vmem>>, vector<1x1x8x8xbf16>
    %37 = vector.shape_cast %36 : vector<1x1x8x8xbf16> to vector<8x8xbf16>
    %cst_46 = arith.constant dense<0.000000e+00> : vector<24x8xf32>
    %38 = tpu.matmul %35, %37, %cst_46 {dimension_numbers = #tpu.dot_dimension_numbers<[1], [0], [0], [1], [0, 0, 1, 1], [], []>} : vector<24x8xbf16>, vector<8x8xbf16>, vector<24x8xf32> -> vector<24x8xf32>
    %39 = arith.addf %33, %38 : vector<24x8xf32>
    %c0_47 = arith.constant 0 : index
    %c0_48 = arith.constant 0 : index
    %c12 = arith.constant 12 : index
    %c0_49 = arith.constant 0 : index
    %40 = vector.load %arg3[%c0_47, %c0_48, %c12, %c0_49] : memref<1x1x38x8xbf16, #tpu.memory_space<vmem>>, vector<1x1x24x8xbf16>
    %41 = vector.shape_cast %40 : vector<1x1x24x8xbf16> to vector<24x8xbf16>
    %c0_50 = arith.constant 0 : index
    %c6_51 = arith.constant 6 : index
    %c0_52 = arith.constant 0 : index
    %c0_53 = arith.constant 0 : index
    %42 = vector.load %arg4[%c0_50, %c6_51, %c0_52, %c0_53] : memref<1x9x8x8xbf16, #tpu.memory_space<vmem>>, vector<1x1x8x8xbf16>
    %43 = vector.shape_cast %42 : vector<1x1x8x8xbf16> to vector<8x8xbf16>
    %cst_54 = arith.constant dense<0.000000e+00> : vector<24x8xf32>
    %44 = tpu.matmul %41, %43, %cst_54 {dimension_numbers = #tpu.dot_dimension_numbers<[1], [0], [0], [1], [0, 0, 1, 1], [], []>} : vector<24x8xbf16>, vector<8x8xbf16>, vector<24x8xf32> -> vector<24x8xf32>
    %45 = arith.addf %39, %44 : vector<24x8xf32>
    %c0_55 = arith.constant 0 : index
    %c0_56 = arith.constant 0 : index
    %c13 = arith.constant 13 : index
    %c0_57 = arith.constant 0 : index
    %46 = vector.load %arg3[%c0_55, %c0_56, %c13, %c0_57] : memref<1x1x38x8xbf16, #tpu.memory_space<vmem>>, vector<1x1x24x8xbf16>
    %47 = vector.shape_cast %46 : vector<1x1x24x8xbf16> to vector<24x8xbf16>
    %c0_58 = arith.constant 0 : index
    %c7_59 = arith.constant 7 : index
    %c0_60 = arith.constant 0 : index
    %c0_61 = arith.constant 0 : index
    %48 = vector.load %arg4[%c0_58, %c7_59, %c0_60, %c0_61] : memref<1x9x8x8xbf16, #tpu.memory_space<vmem>>, vector<1x1x8x8xbf16>
    %49 = vector.shape_cast %48 : vector<1x1x8x8xbf16> to vector<8x8xbf16>
    %cst_62 = arith.constant dense<0.000000e+00> : vector<24x8xf32>
    %50 = tpu.matmul %47, %49, %cst_62 {dimension_numbers = #tpu.dot_dimension_numbers<[1], [0], [0], [1], [0, 0, 1, 1], [], []>} : vector<24x8xbf16>, vector<8x8xbf16>, vector<24x8xf32> -> vector<24x8xf32>
    %51 = arith.addf %45, %50 : vector<24x8xf32>
    %c0_63 = arith.constant 0 : index
    %c0_64 = arith.constant 0 : index
    %c14 = arith.constant 14 : index
    %c0_65 = arith.constant 0 : index
    %52 = vector.load %arg3[%c0_63, %c0_64, %c14, %c0_65] : memref<1x1x38x8xbf16, #tpu.memory_space<vmem>>, vector<1x1x24x8xbf16>
    %53 = vector.shape_cast %52 : vector<1x1x24x8xbf16> to vector<24x8xbf16>
    %c0_66 = arith.constant 0 : index
    %c8_67 = arith.constant 8 : index
    %c0_68 = arith.constant 0 : index
    %c0_69 = arith.constant 0 : index
    %54 = vector.load %arg4[%c0_66, %c8_67, %c0_68, %c0_69] : memref<1x9x8x8xbf16, #tpu.memory_space<vmem>>, vector<1x1x8x8xbf16>
    %55 = vector.shape_cast %54 : vector<1x1x8x8xbf16> to vector<8x8xbf16>
    %cst_70 = arith.constant dense<0.000000e+00> : vector<24x8xf32>
    %56 = tpu.matmul %53, %55, %cst_70 {dimension_numbers = #tpu.dot_dimension_numbers<[1], [0], [0], [1], [0, 0, 1, 1], [], []>} : vector<24x8xbf16>, vector<8x8xbf16>, vector<24x8xf32> -> vector<24x8xf32>
    %57 = arith.addf %51, %56 : vector<24x8xf32>
    %c0_71 = arith.constant 0 : index
    %c0_72 = arith.constant 0 : index
    %58 = vector.load %arg7[%c0_71, %c0_72] : memref<24x8xf32, #tpu.memory_space<vmem>>, vector<24x8xf32>
    tpu.vector_store %arg7[%c0_71, %c0_72], %57 {strides = array<i32>} : memref<24x8xf32, #tpu.memory_space<vmem>>, vector<24x8xf32>,
    %c2_i32 = arith.constant 2 : i32
    %59 = arith.cmpi eq, %arg2, %c2_i32 : i32
    %60 = arith.extui %59 : i1 to i32
    %c0_i32_73 = arith.constant 0 : i32
    %61 = arith.cmpi ne, %60, %c0_i32_73 : i32
    scf.if %61 {
      %c0_74 = arith.constant 0 : index
      %c0_75 = arith.constant 0 : index
      %62 = vector.load %arg5[%c0_74, %c0_75] : memref<1x8xf32, #tpu.memory_space<vmem>>, vector<1x8xf32>
      %63 = vector.broadcast %62 : vector<1x8xf32> to vector<24x8xf32>
      %64 = arith.addf %57, %63 : vector<24x8xf32>
      %cst_76 = arith.constant 0.000000e+00 : f32
      %65 = vector.broadcast %cst_76 : f32 to vector<24x8xf32>
      %66 = arith.maximumf %64, %65 : vector<24x8xf32>
      %67 = arith.truncf %66 : vector<24x8xf32> to vector<24x8xbf16>
      %c0_77 = arith.constant 0 : index
      %c0_78 = arith.constant 0 : index
      %c0_79 = arith.constant 0 : index
      %c0_80 = arith.constant 0 : index
      %68 = vector.load %arg6[%c0_77, %c0_78, %c0_79, %c0_80] : memref<1x1x24x8xbf16, #tpu.memory_space<vmem>>, vector<1x1x24x8xbf16>
      %69 = vector.shape_cast %68 : vector<1x1x24x8xbf16> to vector<24x8xbf16>
      %70 = vector.shape_cast %67 : vector<24x8xbf16> to vector<1x1x24x8xbf16>
      tpu.vector_store %arg6[%c0_77, %c0_78, %c0_79, %c0_80], %70 {strides = array<i32>} : memref<1x1x24x8xbf16, #tpu.memory_space<vmem>>, vector<1x1x24x8xbf16>,
    } else {
    }
    return
  }
  func.func @transform_0(%arg0: i32, %arg1: i32, %arg2: i32) -> (i32, i32, i32, i32) {
    %c1_i32 = arith.constant 1 : i32
    %0 = arith.muli %c1_i32, %arg1 : i32
    %1 = arith.addi %0, %arg2 : i32
    %c0_i32 = arith.constant 0 : i32
    %c0_i32_0 = arith.constant 0 : i32
    %c0_i32_1 = arith.constant 0 : i32
    return %arg0, %1, %c0_i32, %c0_i32_0 : i32, i32, i32, i32
  }
  func.func @transform_1(%arg0: i32, %arg1: i32, %arg2: i32) -> (i32, i32, i32, i32) {
    %c0_i32 = arith.constant 0 : i32
    %c0_i32_0 = arith.constant 0 : i32
    %c0_i32_1 = arith.constant 0 : i32
    %c0_i32_2 = arith.constant 0 : i32
    return %arg2, %c0_i32, %c0_i32_0, %c0_i32_1 : i32, i32, i32, i32
  }
  func.func @transform_2(%arg0: i32, %arg1: i32, %arg2: i32) -> (i32, i32) {
    %c0_i32 = arith.constant 0 : i32
    %c0_i32_0 = arith.constant 0 : i32
    %c0_i32_1 = arith.constant 0 : i32
    return %c0_i32, %c0_i32_0 : i32, i32
  }
  func.func @transform_3(%arg0: i32, %arg1: i32, %arg2: i32) -> (i32, i32, i32, i32) {
    %c0_i32 = arith.constant 0 : i32
    %c0_i32_0 = arith.constant 0 : i32
    %c0_i32_1 = arith.constant 0 : i32
    return %arg0, %arg1, %c0_i32, %c0_i32_0 : i32, i32, i32, i32
  }
}

module attributes {stable_mosaic.version = 11 : i64} {
  func.func @kernel(%arg0: i32, %arg1: i32, %arg2: i32, %arg3: memref<1x1x19x8xbf16, #tpu.memory_space<vmem>>, %arg4: memref<1x1x18x8xbf16, #tpu.memory_space<vmem>>, %arg5: memref<1x9x8x16xbf16, #tpu.memory_space<vmem>>, %arg6: memref<1x16xf32, #tpu.memory_space<vmem>>, %arg7: memref<1x1x12x16xbf16, #tpu.memory_space<vmem>>, %arg8: memref<12x16xf32, #tpu.memory_space<vmem>>) attributes {dimension_semantics = [#tpu.dimension_semantics<parallel>, #tpu.dimension_semantics<parallel>, #tpu.dimension_semantics<arbitrary>], iteration_bounds = array<i64: 2, 2, 3>, scalar_prefetch = 0 : i64, scratch_operands = 1 : i64, tpu.core_type = #tpu.core_type<tc>, window_params = [{transform_indices = @transform_0, window_bounds = array<i64: 1, 1, 19, 8>}, {transform_indices = @transform_1, window_bounds = array<i64: 1, 1, 18, 8>}, {transform_indices = @transform_2, window_bounds = array<i64: 1, 9, 8, 16>}, {pipeline_mode = #tpu.pipeline_mode<synchronous>, transform_indices = @transform_3, window_bounds = array<i64: 1, 16>}, {transform_indices = @transform_4, window_bounds = array<i64: 1, 1, 12, 16>}]} {
    %c0_i32 = arith.constant 0 : i32
    %0 = arith.cmpi eq, %arg2, %c0_i32 : i32
    %1 = arith.extui %0 : i1 to i32
    %c0_i32_0 = arith.constant 0 : i32
    %2 = arith.cmpi ne, %1, %c0_i32_0 : i32
    scf.if %2 {
      %cst_77 = arith.constant 0.000000e+00 : f32
      %62 = vector.broadcast %cst_77 : f32 to vector<12x16xf32>
      %c0_78 = arith.constant 0 : index
      %c0_79 = arith.constant 0 : index
      %63 = vector.load %arg8[%c0_78, %c0_79] : memref<12x16xf32, #tpu.memory_space<vmem>>, vector<12x16xf32>
      tpu.vector_store %arg8[%c0_78, %c0_79], %62 {strides = array<i32>} : memref<12x16xf32, #tpu.memory_space<vmem>>, vector<12x16xf32>,
    } else {
    }
    %c0 = arith.constant 0 : index
    %c0_1 = arith.constant 0 : index
    %3 = vector.load %arg8[%c0, %c0_1] : memref<12x16xf32, #tpu.memory_space<vmem>>, vector<12x16xf32>
    %c0_2 = arith.constant 0 : index
    %c0_3 = arith.constant 0 : index
    %c0_4 = arith.constant 0 : index
    %c0_5 = arith.constant 0 : index
    %4 = vector.load %arg3[%c0_2, %c0_3, %c0_4, %c0_5] : memref<1x1x19x8xbf16, #tpu.memory_space<vmem>>, vector<1x1x12x8xbf16>
    %5 = vector.shape_cast %4 : vector<1x1x12x8xbf16> to vector<12x8xbf16>
    %c0_6 = arith.constant 0 : index
    %c0_7 = arith.constant 0 : index
    %c0_8 = arith.constant 0 : index
    %c0_9 = arith.constant 0 : index
    %6 = vector.load %arg5[%c0_6, %c0_7, %c0_8, %c0_9] : memref<1x9x8x16xbf16, #tpu.memory_space<vmem>>, vector<1x1x8x16xbf16>
    %7 = vector.shape_cast %6 : vector<1x1x8x16xbf16> to vector<8x16xbf16>
    %cst = arith.constant dense<0.000000e+00> : vector<12x16xf32>
    %8 = tpu.matmul %5, %7, %cst {dimension_numbers = #tpu.dot_dimension_numbers<[1], [0], [0], [1], [0, 0, 1, 1], [], []>} : vector<12x8xbf16>, vector<8x16xbf16>, vector<12x16xf32> -> vector<12x16xf32>
    %9 = arith.addf %3, %8 : vector<12x16xf32>
    %c0_10 = arith.constant 0 : index
    %c0_11 = arith.constant 0 : index
    %c0_12 = arith.constant 0 : index
    %c0_13 = arith.constant 0 : index
    %10 = vector.load %arg4[%c0_10, %c0_11, %c0_12, %c0_13] : memref<1x1x18x8xbf16, #tpu.memory_space<vmem>>, vector<1x1x12x8xbf16>
    %11 = vector.shape_cast %10 : vector<1x1x12x8xbf16> to vector<12x8xbf16>
    %c0_14 = arith.constant 0 : index
    %c1 = arith.constant 1 : index
    %c0_15 = arith.constant 0 : index
    %c0_16 = arith.constant 0 : index
    %12 = vector.load %arg5[%c0_14, %c1, %c0_15, %c0_16] : memref<1x9x8x16xbf16, #tpu.memory_space<vmem>>, vector<1x1x8x16xbf16>
    %13 = vector.shape_cast %12 : vector<1x1x8x16xbf16> to vector<8x16xbf16>
    %cst_17 = arith.constant dense<0.000000e+00> : vector<12x16xf32>
    %14 = tpu.matmul %11, %13, %cst_17 {dimension_numbers = #tpu.dot_dimension_numbers<[1], [0], [0], [1], [0, 0, 1, 1], [], []>} : vector<12x8xbf16>, vector<8x16xbf16>, vector<12x16xf32> -> vector<12x16xf32>
    %15 = arith.addf %9, %14 : vector<12x16xf32>
    %c0_18 = arith.constant 0 : index
    %c0_19 = arith.constant 0 : index
    %c1_20 = arith.constant 1 : index
    %c0_21 = arith.constant 0 : index
    %16 = vector.load %arg3[%c0_18, %c0_19, %c1_20, %c0_21] : memref<1x1x19x8xbf16, #tpu.memory_space<vmem>>, vector<1x1x12x8xbf16>
    %17 = vector.shape_cast %16 : vector<1x1x12x8xbf16> to vector<12x8xbf16>
    %c0_22 = arith.constant 0 : index
    %c2 = arith.constant 2 : index
    %c0_23 = arith.constant 0 : index
    %c0_24 = arith.constant 0 : index
    %18 = vector.load %arg5[%c0_22, %c2, %c0_23, %c0_24] : memref<1x9x8x16xbf16, #tpu.memory_space<vmem>>, vector<1x1x8x16xbf16>
    %19 = vector.shape_cast %18 : vector<1x1x8x16xbf16> to vector<8x16xbf16>
    %cst_25 = arith.constant dense<0.000000e+00> : vector<12x16xf32>
    %20 = tpu.matmul %17, %19, %cst_25 {dimension_numbers = #tpu.dot_dimension_numbers<[1], [0], [0], [1], [0, 0, 1, 1], [], []>} : vector<12x8xbf16>, vector<8x16xbf16>, vector<12x16xf32> -> vector<12x16xf32>
    %21 = arith.addf %15, %20 : vector<12x16xf32>
    %c0_26 = arith.constant 0 : index
    %c0_27 = arith.constant 0 : index
    %c3 = arith.constant 3 : index
    %c0_28 = arith.constant 0 : index
    %22 = vector.load %arg3[%c0_26, %c0_27, %c3, %c0_28] : memref<1x1x19x8xbf16, #tpu.memory_space<vmem>>, vector<1x1x12x8xbf16>
    %23 = vector.shape_cast %22 : vector<1x1x12x8xbf16> to vector<12x8xbf16>
    %c0_29 = arith.constant 0 : index
    %c3_30 = arith.constant 3 : index
    %c0_31 = arith.constant 0 : index
    %c0_32 = arith.constant 0 : index
    %24 = vector.load %arg5[%c0_29, %c3_30, %c0_31, %c0_32] : memref<1x9x8x16xbf16, #tpu.memory_space<vmem>>, vector<1x1x8x16xbf16>
    %25 = vector.shape_cast %24 : vector<1x1x8x16xbf16> to vector<8x16xbf16>
    %cst_33 = arith.constant dense<0.000000e+00> : vector<12x16xf32>
    %26 = tpu.matmul %23, %25, %cst_33 {dimension_numbers = #tpu.dot_dimension_numbers<[1], [0], [0], [1], [0, 0, 1, 1], [], []>} : vector<12x8xbf16>, vector<8x16xbf16>, vector<12x16xf32> -> vector<12x16xf32>
    %27 = arith.addf %21, %26 : vector<12x16xf32>
    %c0_34 = arith.constant 0 : index
    %c0_35 = arith.constant 0 : index
    %c3_36 = arith.constant 3 : index
    %c0_37 = arith.constant 0 : index
    %28 = vector.load %arg4[%c0_34, %c0_35, %c3_36, %c0_37] : memref<1x1x18x8xbf16, #tpu.memory_space<vmem>>, vector<1x1x12x8xbf16>
    %29 = vector.shape_cast %28 : vector<1x1x12x8xbf16> to vector<12x8xbf16>
    %c0_38 = arith.constant 0 : index
    %c4 = arith.constant 4 : index
    %c0_39 = arith.constant 0 : index
    %c0_40 = arith.constant 0 : index
    %30 = vector.load %arg5[%c0_38, %c4, %c0_39, %c0_40] : memref<1x9x8x16xbf16, #tpu.memory_space<vmem>>, vector<1x1x8x16xbf16>
    %31 = vector.shape_cast %30 : vector<1x1x8x16xbf16> to vector<8x16xbf16>
    %cst_41 = arith.constant dense<0.000000e+00> : vector<12x16xf32>
    %32 = tpu.matmul %29, %31, %cst_41 {dimension_numbers = #tpu.dot_dimension_numbers<[1], [0], [0], [1], [0, 0, 1, 1], [], []>} : vector<12x8xbf16>, vector<8x16xbf16>, vector<12x16xf32> -> vector<12x16xf32>
    %33 = arith.addf %27, %32 : vector<12x16xf32>
    %c0_42 = arith.constant 0 : index
    %c0_43 = arith.constant 0 : index
    %c4_44 = arith.constant 4 : index
    %c0_45 = arith.constant 0 : index
    %34 = vector.load %arg3[%c0_42, %c0_43, %c4_44, %c0_45] : memref<1x1x19x8xbf16, #tpu.memory_space<vmem>>, vector<1x1x12x8xbf16>
    %35 = vector.shape_cast %34 : vector<1x1x12x8xbf16> to vector<12x8xbf16>
    %c0_46 = arith.constant 0 : index
    %c5 = arith.constant 5 : index
    %c0_47 = arith.constant 0 : index
    %c0_48 = arith.constant 0 : index
    %36 = vector.load %arg5[%c0_46, %c5, %c0_47, %c0_48] : memref<1x9x8x16xbf16, #tpu.memory_space<vmem>>, vector<1x1x8x16xbf16>
    %37 = vector.shape_cast %36 : vector<1x1x8x16xbf16> to vector<8x16xbf16>
    %cst_49 = arith.constant dense<0.000000e+00> : vector<12x16xf32>
    %38 = tpu.matmul %35, %37, %cst_49 {dimension_numbers = #tpu.dot_dimension_numbers<[1], [0], [0], [1], [0, 0, 1, 1], [], []>} : vector<12x8xbf16>, vector<8x16xbf16>, vector<12x16xf32> -> vector<12x16xf32>
    %39 = arith.addf %33, %38 : vector<12x16xf32>
    %c0_50 = arith.constant 0 : index
    %c0_51 = arith.constant 0 : index
    %c6 = arith.constant 6 : index
    %c0_52 = arith.constant 0 : index
    %40 = vector.load %arg3[%c0_50, %c0_51, %c6, %c0_52] : memref<1x1x19x8xbf16, #tpu.memory_space<vmem>>, vector<1x1x12x8xbf16>
    %41 = vector.shape_cast %40 : vector<1x1x12x8xbf16> to vector<12x8xbf16>
    %c0_53 = arith.constant 0 : index
    %c6_54 = arith.constant 6 : index
    %c0_55 = arith.constant 0 : index
    %c0_56 = arith.constant 0 : index
    %42 = vector.load %arg5[%c0_53, %c6_54, %c0_55, %c0_56] : memref<1x9x8x16xbf16, #tpu.memory_space<vmem>>, vector<1x1x8x16xbf16>
    %43 = vector.shape_cast %42 : vector<1x1x8x16xbf16> to vector<8x16xbf16>
    %cst_57 = arith.constant dense<0.000000e+00> : vector<12x16xf32>
    %44 = tpu.matmul %41, %43, %cst_57 {dimension_numbers = #tpu.dot_dimension_numbers<[1], [0], [0], [1], [0, 0, 1, 1], [], []>} : vector<12x8xbf16>, vector<8x16xbf16>, vector<12x16xf32> -> vector<12x16xf32>
    %45 = arith.addf %39, %44 : vector<12x16xf32>
    %c0_58 = arith.constant 0 : index
    %c0_59 = arith.constant 0 : index
    %c6_60 = arith.constant 6 : index
    %c0_61 = arith.constant 0 : index
    %46 = vector.load %arg4[%c0_58, %c0_59, %c6_60, %c0_61] : memref<1x1x18x8xbf16, #tpu.memory_space<vmem>>, vector<1x1x12x8xbf16>
    %47 = vector.shape_cast %46 : vector<1x1x12x8xbf16> to vector<12x8xbf16>
    %c0_62 = arith.constant 0 : index
    %c7 = arith.constant 7 : index
    %c0_63 = arith.constant 0 : index
    %c0_64 = arith.constant 0 : index
    %48 = vector.load %arg5[%c0_62, %c7, %c0_63, %c0_64] : memref<1x9x8x16xbf16, #tpu.memory_space<vmem>>, vector<1x1x8x16xbf16>
    %49 = vector.shape_cast %48 : vector<1x1x8x16xbf16> to vector<8x16xbf16>
    %cst_65 = arith.constant dense<0.000000e+00> : vector<12x16xf32>
    %50 = tpu.matmul %47, %49, %cst_65 {dimension_numbers = #tpu.dot_dimension_numbers<[1], [0], [0], [1], [0, 0, 1, 1], [], []>} : vector<12x8xbf16>, vector<8x16xbf16>, vector<12x16xf32> -> vector<12x16xf32>
    %51 = arith.addf %45, %50 : vector<12x16xf32>
    %c0_66 = arith.constant 0 : index
    %c0_67 = arith.constant 0 : index
    %c7_68 = arith.constant 7 : index
    %c0_69 = arith.constant 0 : index
    %52 = vector.load %arg3[%c0_66, %c0_67, %c7_68, %c0_69] : memref<1x1x19x8xbf16, #tpu.memory_space<vmem>>, vector<1x1x12x8xbf16>
    %53 = vector.shape_cast %52 : vector<1x1x12x8xbf16> to vector<12x8xbf16>
    %c0_70 = arith.constant 0 : index
    %c8 = arith.constant 8 : index
    %c0_71 = arith.constant 0 : index
    %c0_72 = arith.constant 0 : index
    %54 = vector.load %arg5[%c0_70, %c8, %c0_71, %c0_72] : memref<1x9x8x16xbf16, #tpu.memory_space<vmem>>, vector<1x1x8x16xbf16>
    %55 = vector.shape_cast %54 : vector<1x1x8x16xbf16> to vector<8x16xbf16>
    %cst_73 = arith.constant dense<0.000000e+00> : vector<12x16xf32>
    %56 = tpu.matmul %53, %55, %cst_73 {dimension_numbers = #tpu.dot_dimension_numbers<[1], [0], [0], [1], [0, 0, 1, 1], [], []>} : vector<12x8xbf16>, vector<8x16xbf16>, vector<12x16xf32> -> vector<12x16xf32>
    %57 = arith.addf %51, %56 : vector<12x16xf32>
    %c0_74 = arith.constant 0 : index
    %c0_75 = arith.constant 0 : index
    %58 = vector.load %arg8[%c0_74, %c0_75] : memref<12x16xf32, #tpu.memory_space<vmem>>, vector<12x16xf32>
    tpu.vector_store %arg8[%c0_74, %c0_75], %57 {strides = array<i32>} : memref<12x16xf32, #tpu.memory_space<vmem>>, vector<12x16xf32>,
    %c2_i32 = arith.constant 2 : i32
    %59 = arith.cmpi eq, %arg2, %c2_i32 : i32
    %60 = arith.extui %59 : i1 to i32
    %c0_i32_76 = arith.constant 0 : i32
    %61 = arith.cmpi ne, %60, %c0_i32_76 : i32
    scf.if %61 {
      %c0_77 = arith.constant 0 : index
      %c0_78 = arith.constant 0 : index
      %62 = vector.load %arg6[%c0_77, %c0_78] : memref<1x16xf32, #tpu.memory_space<vmem>>, vector<1x16xf32>
      %63 = vector.broadcast %62 : vector<1x16xf32> to vector<12x16xf32>
      %64 = arith.addf %57, %63 : vector<12x16xf32>
      %cst_79 = arith.constant 0.000000e+00 : f32
      %65 = vector.broadcast %cst_79 : f32 to vector<12x16xf32>
      %66 = arith.maximumf %64, %65 : vector<12x16xf32>
      %67 = arith.truncf %66 : vector<12x16xf32> to vector<12x16xbf16>
      %c0_80 = arith.constant 0 : index
      %c0_81 = arith.constant 0 : index
      %c0_82 = arith.constant 0 : index
      %c0_83 = arith.constant 0 : index
      %68 = vector.load %arg7[%c0_80, %c0_81, %c0_82, %c0_83] : memref<1x1x12x16xbf16, #tpu.memory_space<vmem>>, vector<1x1x12x16xbf16>
      %69 = vector.shape_cast %68 : vector<1x1x12x16xbf16> to vector<12x16xbf16>
      %70 = vector.shape_cast %67 : vector<12x16xbf16> to vector<1x1x12x16xbf16>
      tpu.vector_store %arg7[%c0_80, %c0_81, %c0_82, %c0_83], %70 {strides = array<i32>} : memref<1x1x12x16xbf16, #tpu.memory_space<vmem>>, vector<1x1x12x16xbf16>,
    } else {
    }
    return
  }
  func.func @transform_0(%arg0: i32, %arg1: i32, %arg2: i32) -> (i32, i32, i32, i32) {
    %c2_i32 = arith.constant 2 : i32
    %0 = arith.muli %c2_i32, %arg1 : i32
    %1 = arith.addi %0, %arg2 : i32
    %c0_i32 = arith.constant 0 : i32
    %c0_i32_0 = arith.constant 0 : i32
    %c0_i32_1 = arith.constant 0 : i32
    return %arg0, %1, %c0_i32, %c0_i32_0 : i32, i32, i32, i32
  }
  func.func @transform_1(%arg0: i32, %arg1: i32, %arg2: i32) -> (i32, i32, i32, i32) {
    %c2_i32 = arith.constant 2 : i32
    %0 = arith.muli %c2_i32, %arg1 : i32
    %1 = arith.addi %0, %arg2 : i32
    %c0_i32 = arith.constant 0 : i32
    %c0_i32_0 = arith.constant 0 : i32
    %c0_i32_1 = arith.constant 0 : i32
    return %arg0, %1, %c0_i32, %c0_i32_0 : i32, i32, i32, i32
  }
  func.func @transform_2(%arg0: i32, %arg1: i32, %arg2: i32) -> (i32, i32, i32, i32) {
    %c0_i32 = arith.constant 0 : i32
    %c0_i32_0 = arith.constant 0 : i32
    %c0_i32_1 = arith.constant 0 : i32
    %c0_i32_2 = arith.constant 0 : i32
    return %arg2, %c0_i32, %c0_i32_0, %c0_i32_1 : i32, i32, i32, i32
  }
  func.func @transform_3(%arg0: i32, %arg1: i32, %arg2: i32) -> (i32, i32) {
    %c0_i32 = arith.constant 0 : i32
    %c0_i32_0 = arith.constant 0 : i32
    %c0_i32_1 = arith.constant 0 : i32
    return %c0_i32, %c0_i32_0 : i32, i32
  }
  func.func @transform_4(%arg0: i32, %arg1: i32, %arg2: i32) -> (i32, i32, i32, i32) {
    %c0_i32 = arith.constant 0 : i32
    %c0_i32_0 = arith.constant 0 : i32
    %c0_i32_1 = arith.constant 0 : i32
    return %arg0, %arg1, %c0_i32, %c0_i32_0 : i32, i32, i32, i32
  }
}

module attributes {stable_mosaic.version = 11 : i64} {
  func.func @kernel(%arg0: i32, %arg1: i32, %arg2: i32, %arg3: memref<1x1x18x16xbf16, #tpu.memory_space<vmem>>, %arg4: memref<1x9x16x16xbf16, #tpu.memory_space<vmem>>, %arg5: memref<1x16xf32, #tpu.memory_space<vmem>>, %arg6: memref<1x1x8x16xbf16, #tpu.memory_space<vmem>>, %arg7: memref<8x16xf32, #tpu.memory_space<vmem>>) attributes {dimension_semantics = [#tpu.dimension_semantics<parallel>, #tpu.dimension_semantics<parallel>, #tpu.dimension_semantics<arbitrary>], iteration_bounds = array<i64: 2, 2, 3>, scalar_prefetch = 0 : i64, scratch_operands = 1 : i64, tpu.core_type = #tpu.core_type<tc>, window_params = [{transform_indices = @transform_0, window_bounds = array<i64: 1, 1, 18, 16>}, {transform_indices = @transform_1, window_bounds = array<i64: 1, 9, 16, 16>}, {pipeline_mode = #tpu.pipeline_mode<synchronous>, transform_indices = @transform_2, window_bounds = array<i64: 1, 16>}, {transform_indices = @transform_3, window_bounds = array<i64: 1, 1, 8, 16>}]} {
    %c0_i32 = arith.constant 0 : i32
    %0 = arith.cmpi eq, %arg2, %c0_i32 : i32
    %1 = arith.extui %0 : i1 to i32
    %c0_i32_0 = arith.constant 0 : i32
    %2 = arith.cmpi ne, %1, %c0_i32_0 : i32
    scf.if %2 {
      %cst_75 = arith.constant 0.000000e+00 : f32
      %62 = vector.broadcast %cst_75 : f32 to vector<8x16xf32>
      %c0_76 = arith.constant 0 : index
      %c0_77 = arith.constant 0 : index
      %63 = vector.load %arg7[%c0_76, %c0_77] : memref<8x16xf32, #tpu.memory_space<vmem>>, vector<8x16xf32>
      tpu.vector_store %arg7[%c0_76, %c0_77], %62 {strides = array<i32>} : memref<8x16xf32, #tpu.memory_space<vmem>>, vector<8x16xf32>,
    } else {
    }
    %c0 = arith.constant 0 : index
    %c0_1 = arith.constant 0 : index
    %3 = vector.load %arg7[%c0, %c0_1] : memref<8x16xf32, #tpu.memory_space<vmem>>, vector<8x16xf32>
    %c0_2 = arith.constant 0 : index
    %c0_3 = arith.constant 0 : index
    %c0_4 = arith.constant 0 : index
    %c0_5 = arith.constant 0 : index
    %4 = vector.load %arg3[%c0_2, %c0_3, %c0_4, %c0_5] : memref<1x1x18x16xbf16, #tpu.memory_space<vmem>>, vector<1x1x8x16xbf16>
    %5 = vector.shape_cast %4 : vector<1x1x8x16xbf16> to vector<8x16xbf16>
    %c0_6 = arith.constant 0 : index
    %c0_7 = arith.constant 0 : index
    %c0_8 = arith.constant 0 : index
    %c0_9 = arith.constant 0 : index
    %6 = vector.load %arg4[%c0_6, %c0_7, %c0_8, %c0_9] : memref<1x9x16x16xbf16, #tpu.memory_space<vmem>>, vector<1x1x16x16xbf16>
    %7 = vector.shape_cast %6 : vector<1x1x16x16xbf16> to vector<16x16xbf16>
    %cst = arith.constant dense<0.000000e+00> : vector<8x16xf32>
    %8 = tpu.matmul %5, %7, %cst {dimension_numbers = #tpu.dot_dimension_numbers<[1], [0], [0], [1], [0, 0, 1, 1], [], []>} : vector<8x16xbf16>, vector<16x16xbf16>, vector<8x16xf32> -> vector<8x16xf32>
    %9 = arith.addf %3, %8 : vector<8x16xf32>
    %c0_10 = arith.constant 0 : index
    %c0_11 = arith.constant 0 : index
    %c1 = arith.constant 1 : index
    %c0_12 = arith.constant 0 : index
    %10 = vector.load %arg3[%c0_10, %c0_11, %c1, %c0_12] : memref<1x1x18x16xbf16, #tpu.memory_space<vmem>>, vector<1x1x8x16xbf16>
    %11 = vector.shape_cast %10 : vector<1x1x8x16xbf16> to vector<8x16xbf16>
    %c0_13 = arith.constant 0 : index
    %c1_14 = arith.constant 1 : index
    %c0_15 = arith.constant 0 : index
    %c0_16 = arith.constant 0 : index
    %12 = vector.load %arg4[%c0_13, %c1_14, %c0_15, %c0_16] : memref<1x9x16x16xbf16, #tpu.memory_space<vmem>>, vector<1x1x16x16xbf16>
    %13 = vector.shape_cast %12 : vector<1x1x16x16xbf16> to vector<16x16xbf16>
    %cst_17 = arith.constant dense<0.000000e+00> : vector<8x16xf32>
    %14 = tpu.matmul %11, %13, %cst_17 {dimension_numbers = #tpu.dot_dimension_numbers<[1], [0], [0], [1], [0, 0, 1, 1], [], []>} : vector<8x16xbf16>, vector<16x16xbf16>, vector<8x16xf32> -> vector<8x16xf32>
    %15 = arith.addf %9, %14 : vector<8x16xf32>
    %c0_18 = arith.constant 0 : index
    %c0_19 = arith.constant 0 : index
    %c2 = arith.constant 2 : index
    %c0_20 = arith.constant 0 : index
    %16 = vector.load %arg3[%c0_18, %c0_19, %c2, %c0_20] : memref<1x1x18x16xbf16, #tpu.memory_space<vmem>>, vector<1x1x8x16xbf16>
    %17 = vector.shape_cast %16 : vector<1x1x8x16xbf16> to vector<8x16xbf16>
    %c0_21 = arith.constant 0 : index
    %c2_22 = arith.constant 2 : index
    %c0_23 = arith.constant 0 : index
    %c0_24 = arith.constant 0 : index
    %18 = vector.load %arg4[%c0_21, %c2_22, %c0_23, %c0_24] : memref<1x9x16x16xbf16, #tpu.memory_space<vmem>>, vector<1x1x16x16xbf16>
    %19 = vector.shape_cast %18 : vector<1x1x16x16xbf16> to vector<16x16xbf16>
    %cst_25 = arith.constant dense<0.000000e+00> : vector<8x16xf32>
    %20 = tpu.matmul %17, %19, %cst_25 {dimension_numbers = #tpu.dot_dimension_numbers<[1], [0], [0], [1], [0, 0, 1, 1], [], []>} : vector<8x16xbf16>, vector<16x16xbf16>, vector<8x16xf32> -> vector<8x16xf32>
    %21 = arith.addf %15, %20 : vector<8x16xf32>
    %c0_26 = arith.constant 0 : index
    %c0_27 = arith.constant 0 : index
    %c4 = arith.constant 4 : index
    %c0_28 = arith.constant 0 : index
    %22 = vector.load %arg3[%c0_26, %c0_27, %c4, %c0_28] : memref<1x1x18x16xbf16, #tpu.memory_space<vmem>>, vector<1x1x8x16xbf16>
    %23 = vector.shape_cast %22 : vector<1x1x8x16xbf16> to vector<8x16xbf16>
    %c0_29 = arith.constant 0 : index
    %c3 = arith.constant 3 : index
    %c0_30 = arith.constant 0 : index
    %c0_31 = arith.constant 0 : index
    %24 = vector.load %arg4[%c0_29, %c3, %c0_30, %c0_31] : memref<1x9x16x16xbf16, #tpu.memory_space<vmem>>, vector<1x1x16x16xbf16>
    %25 = vector.shape_cast %24 : vector<1x1x16x16xbf16> to vector<16x16xbf16>
    %cst_32 = arith.constant dense<0.000000e+00> : vector<8x16xf32>
    %26 = tpu.matmul %23, %25, %cst_32 {dimension_numbers = #tpu.dot_dimension_numbers<[1], [0], [0], [1], [0, 0, 1, 1], [], []>} : vector<8x16xbf16>, vector<16x16xbf16>, vector<8x16xf32> -> vector<8x16xf32>
    %27 = arith.addf %21, %26 : vector<8x16xf32>
    %c0_33 = arith.constant 0 : index
    %c0_34 = arith.constant 0 : index
    %c5 = arith.constant 5 : index
    %c0_35 = arith.constant 0 : index
    %28 = vector.load %arg3[%c0_33, %c0_34, %c5, %c0_35] : memref<1x1x18x16xbf16, #tpu.memory_space<vmem>>, vector<1x1x8x16xbf16>
    %29 = vector.shape_cast %28 : vector<1x1x8x16xbf16> to vector<8x16xbf16>
    %c0_36 = arith.constant 0 : index
    %c4_37 = arith.constant 4 : index
    %c0_38 = arith.constant 0 : index
    %c0_39 = arith.constant 0 : index
    %30 = vector.load %arg4[%c0_36, %c4_37, %c0_38, %c0_39] : memref<1x9x16x16xbf16, #tpu.memory_space<vmem>>, vector<1x1x16x16xbf16>
    %31 = vector.shape_cast %30 : vector<1x1x16x16xbf16> to vector<16x16xbf16>
    %cst_40 = arith.constant dense<0.000000e+00> : vector<8x16xf32>
    %32 = tpu.matmul %29, %31, %cst_40 {dimension_numbers = #tpu.dot_dimension_numbers<[1], [0], [0], [1], [0, 0, 1, 1], [], []>} : vector<8x16xbf16>, vector<16x16xbf16>, vector<8x16xf32> -> vector<8x16xf32>
    %33 = arith.addf %27, %32 : vector<8x16xf32>
    %c0_41 = arith.constant 0 : index
    %c0_42 = arith.constant 0 : index
    %c6 = arith.constant 6 : index
    %c0_43 = arith.constant 0 : index
    %34 = vector.load %arg3[%c0_41, %c0_42, %c6, %c0_43] : memref<1x1x18x16xbf16, #tpu.memory_space<vmem>>, vector<1x1x8x16xbf16>
    %35 = vector.shape_cast %34 : vector<1x1x8x16xbf16> to vector<8x16xbf16>
    %c0_44 = arith.constant 0 : index
    %c5_45 = arith.constant 5 : index
    %c0_46 = arith.constant 0 : index
    %c0_47 = arith.constant 0 : index
    %36 = vector.load %arg4[%c0_44, %c5_45, %c0_46, %c0_47] : memref<1x9x16x16xbf16, #tpu.memory_space<vmem>>, vector<1x1x16x16xbf16>
    %37 = vector.shape_cast %36 : vector<1x1x16x16xbf16> to vector<16x16xbf16>
    %cst_48 = arith.constant dense<0.000000e+00> : vector<8x16xf32>
    %38 = tpu.matmul %35, %37, %cst_48 {dimension_numbers = #tpu.dot_dimension_numbers<[1], [0], [0], [1], [0, 0, 1, 1], [], []>} : vector<8x16xbf16>, vector<16x16xbf16>, vector<8x16xf32> -> vector<8x16xf32>
    %39 = arith.addf %33, %38 : vector<8x16xf32>
    %c0_49 = arith.constant 0 : index
    %c0_50 = arith.constant 0 : index
    %c8 = arith.constant 8 : index
    %c0_51 = arith.constant 0 : index
    %40 = vector.load %arg3[%c0_49, %c0_50, %c8, %c0_51] : memref<1x1x18x16xbf16, #tpu.memory_space<vmem>>, vector<1x1x8x16xbf16>
    %41 = vector.shape_cast %40 : vector<1x1x8x16xbf16> to vector<8x16xbf16>
    %c0_52 = arith.constant 0 : index
    %c6_53 = arith.constant 6 : index
    %c0_54 = arith.constant 0 : index
    %c0_55 = arith.constant 0 : index
    %42 = vector.load %arg4[%c0_52, %c6_53, %c0_54, %c0_55] : memref<1x9x16x16xbf16, #tpu.memory_space<vmem>>, vector<1x1x16x16xbf16>
    %43 = vector.shape_cast %42 : vector<1x1x16x16xbf16> to vector<16x16xbf16>
    %cst_56 = arith.constant dense<0.000000e+00> : vector<8x16xf32>
    %44 = tpu.matmul %41, %43, %cst_56 {dimension_numbers = #tpu.dot_dimension_numbers<[1], [0], [0], [1], [0, 0, 1, 1], [], []>} : vector<8x16xbf16>, vector<16x16xbf16>, vector<8x16xf32> -> vector<8x16xf32>
    %45 = arith.addf %39, %44 : vector<8x16xf32>
    %c0_57 = arith.constant 0 : index
    %c0_58 = arith.constant 0 : index
    %c9 = arith.constant 9 : index
    %c0_59 = arith.constant 0 : index
    %46 = vector.load %arg3[%c0_57, %c0_58, %c9, %c0_59] : memref<1x1x18x16xbf16, #tpu.memory_space<vmem>>, vector<1x1x8x16xbf16>
    %47 = vector.shape_cast %46 : vector<1x1x8x16xbf16> to vector<8x16xbf16>
    %c0_60 = arith.constant 0 : index
    %c7 = arith.constant 7 : index
    %c0_61 = arith.constant 0 : index
    %c0_62 = arith.constant 0 : index
    %48 = vector.load %arg4[%c0_60, %c7, %c0_61, %c0_62] : memref<1x9x16x16xbf16, #tpu.memory_space<vmem>>, vector<1x1x16x16xbf16>
    %49 = vector.shape_cast %48 : vector<1x1x16x16xbf16> to vector<16x16xbf16>
    %cst_63 = arith.constant dense<0.000000e+00> : vector<8x16xf32>
    %50 = tpu.matmul %47, %49, %cst_63 {dimension_numbers = #tpu.dot_dimension_numbers<[1], [0], [0], [1], [0, 0, 1, 1], [], []>} : vector<8x16xbf16>, vector<16x16xbf16>, vector<8x16xf32> -> vector<8x16xf32>
    %51 = arith.addf %45, %50 : vector<8x16xf32>
    %c0_64 = arith.constant 0 : index
    %c0_65 = arith.constant 0 : index
    %c10 = arith.constant 10 : index
    %c0_66 = arith.constant 0 : index
    %52 = vector.load %arg3[%c0_64, %c0_65, %c10, %c0_66] : memref<1x1x18x16xbf16, #tpu.memory_space<vmem>>, vector<1x1x8x16xbf16>
    %53 = vector.shape_cast %52 : vector<1x1x8x16xbf16> to vector<8x16xbf16>
    %c0_67 = arith.constant 0 : index
    %c8_68 = arith.constant 8 : index
    %c0_69 = arith.constant 0 : index
    %c0_70 = arith.constant 0 : index
    %54 = vector.load %arg4[%c0_67, %c8_68, %c0_69, %c0_70] : memref<1x9x16x16xbf16, #tpu.memory_space<vmem>>, vector<1x1x16x16xbf16>
    %55 = vector.shape_cast %54 : vector<1x1x16x16xbf16> to vector<16x16xbf16>
    %cst_71 = arith.constant dense<0.000000e+00> : vector<8x16xf32>
    %56 = tpu.matmul %53, %55, %cst_71 {dimension_numbers = #tpu.dot_dimension_numbers<[1], [0], [0], [1], [0, 0, 1, 1], [], []>} : vector<8x16xbf16>, vector<16x16xbf16>, vector<8x16xf32> -> vector<8x16xf32>
    %57 = arith.addf %51, %56 : vector<8x16xf32>
    %c0_72 = arith.constant 0 : index
    %c0_73 = arith.constant 0 : index
    %58 = vector.load %arg7[%c0_72, %c0_73] : memref<8x16xf32, #tpu.memory_space<vmem>>, vector<8x16xf32>
    tpu.vector_store %arg7[%c0_72, %c0_73], %57 {strides = array<i32>} : memref<8x16xf32, #tpu.memory_space<vmem>>, vector<8x16xf32>,
    %c2_i32 = arith.constant 2 : i32
    %59 = arith.cmpi eq, %arg2, %c2_i32 : i32
    %60 = arith.extui %59 : i1 to i32
    %c0_i32_74 = arith.constant 0 : i32
    %61 = arith.cmpi ne, %60, %c0_i32_74 : i32
    scf.if %61 {
      %c0_75 = arith.constant 0 : index
      %c0_76 = arith.constant 0 : index
      %62 = vector.load %arg5[%c0_75, %c0_76] : memref<1x16xf32, #tpu.memory_space<vmem>>, vector<1x16xf32>
      %63 = vector.broadcast %62 : vector<1x16xf32> to vector<8x16xf32>
      %64 = arith.addf %57, %63 : vector<8x16xf32>
      %cst_77 = arith.constant 0.000000e+00 : f32
      %65 = vector.broadcast %cst_77 : f32 to vector<8x16xf32>
      %66 = arith.maximumf %64, %65 : vector<8x16xf32>
      %67 = arith.truncf %66 : vector<8x16xf32> to vector<8x16xbf16>
      %c0_78 = arith.constant 0 : index
      %c0_79 = arith.constant 0 : index
      %c0_80 = arith.constant 0 : index
      %c0_81 = arith.constant 0 : index
      %68 = vector.load %arg6[%c0_78, %c0_79, %c0_80, %c0_81] : memref<1x1x8x16xbf16, #tpu.memory_space<vmem>>, vector<1x1x8x16xbf16>
      %69 = vector.shape_cast %68 : vector<1x1x8x16xbf16> to vector<8x16xbf16>
      %70 = vector.shape_cast %67 : vector<8x16xbf16> to vector<1x1x8x16xbf16>
      tpu.vector_store %arg6[%c0_78, %c0_79, %c0_80, %c0_81], %70 {strides = array<i32>} : memref<1x1x8x16xbf16, #tpu.memory_space<vmem>>, vector<1x1x8x16xbf16>,
    } else {
    }
    return
  }
  func.func @transform_0(%arg0: i32, %arg1: i32, %arg2: i32) -> (i32, i32, i32, i32) {
    %c1_i32 = arith.constant 1 : i32
    %0 = arith.muli %c1_i32, %arg1 : i32
    %1 = arith.addi %0, %arg2 : i32
    %c0_i32 = arith.constant 0 : i32
    %c0_i32_0 = arith.constant 0 : i32
    %c0_i32_1 = arith.constant 0 : i32
    return %arg0, %1, %c0_i32, %c0_i32_0 : i32, i32, i32, i32
  }
  func.func @transform_1(%arg0: i32, %arg1: i32, %arg2: i32) -> (i32, i32, i32, i32) {
    %c0_i32 = arith.constant 0 : i32
    %c0_i32_0 = arith.constant 0 : i32
    %c0_i32_1 = arith.constant 0 : i32
    %c0_i32_2 = arith.constant 0 : i32
    return %arg2, %c0_i32, %c0_i32_0, %c0_i32_1 : i32, i32, i32, i32
  }
  func.func @transform_2(%arg0: i32, %arg1: i32, %arg2: i32) -> (i32, i32) {
    %c0_i32 = arith.constant 0 : i32
    %c0_i32_0 = arith.constant 0 : i32
    %c0_i32_1 = arith.constant 0 : i32
    return %c0_i32, %c0_i32_0 : i32, i32
  }
  func.func @transform_3(%arg0: i32, %arg1: i32, %arg2: i32) -> (i32, i32, i32, i32) {
    %c0_i32 = arith.constant 0 : i32
    %c0_i32_0 = arith.constant 0 : i32
    %c0_i32_1 = arith.constant 0 : i32
    return %arg0, %arg1, %c0_i32, %c0_i32_0 : i32, i32, i32, i32
  }
}

module attributes {stable_mosaic.version = 11 : i64} {
  func.func @kernel(%arg0: i32, %arg1: i32, %arg2: i32, %arg3: memref<1x1x16x8xbf16, #tpu.memory_space<vmem>>, %arg4: memref<1x1x8x8xbf16, #tpu.memory_space<vmem>>, %arg5: memref<1x8xf32, #tpu.memory_space<vmem>>, %arg6: memref<1x1x16x8xbf16, #tpu.memory_space<vmem>>, %arg7: memref<16x8xf32, #tpu.memory_space<vmem>>) attributes {dimension_semantics = [#tpu.dimension_semantics<parallel>, #tpu.dimension_semantics<parallel>, #tpu.dimension_semantics<arbitrary>], iteration_bounds = array<i64: 2, 4, 1>, scalar_prefetch = 0 : i64, scratch_operands = 1 : i64, tpu.core_type = #tpu.core_type<tc>, window_params = [{transform_indices = @transform_0, window_bounds = array<i64: 1, 1, 16, 8>}, {transform_indices = @transform_1, window_bounds = array<i64: 1, 1, 8, 8>}, {pipeline_mode = #tpu.pipeline_mode<synchronous>, transform_indices = @transform_2, window_bounds = array<i64: 1, 8>}, {transform_indices = @transform_3, window_bounds = array<i64: 1, 1, 16, 8>}]} {
    %c0_i32 = arith.constant 0 : i32
    %0 = arith.cmpi eq, %arg2, %c0_i32 : i32
    %1 = arith.extui %0 : i1 to i32
    %c0_i32_0 = arith.constant 0 : i32
    %2 = arith.cmpi ne, %1, %c0_i32_0 : i32
    scf.if %2 {
      %cst_14 = arith.constant 0.000000e+00 : f32
      %14 = vector.broadcast %cst_14 : f32 to vector<16x8xf32>
      %c0_15 = arith.constant 0 : index
      %c0_16 = arith.constant 0 : index
      %15 = vector.load %arg7[%c0_15, %c0_16] : memref<16x8xf32, #tpu.memory_space<vmem>>, vector<16x8xf32>
      tpu.vector_store %arg7[%c0_15, %c0_16], %14 {strides = array<i32>} : memref<16x8xf32, #tpu.memory_space<vmem>>, vector<16x8xf32>,
    } else {
    }
    %c0 = arith.constant 0 : index
    %c0_1 = arith.constant 0 : index
    %3 = vector.load %arg7[%c0, %c0_1] : memref<16x8xf32, #tpu.memory_space<vmem>>, vector<16x8xf32>
    %c0_2 = arith.constant 0 : index
    %c0_3 = arith.constant 0 : index
    %c0_4 = arith.constant 0 : index
    %c0_5 = arith.constant 0 : index
    %4 = vector.load %arg3[%c0_2, %c0_3, %c0_4, %c0_5] : memref<1x1x16x8xbf16, #tpu.memory_space<vmem>>, vector<1x1x16x8xbf16>
    %5 = vector.shape_cast %4 : vector<1x1x16x8xbf16> to vector<16x8xbf16>
    %c0_6 = arith.constant 0 : index
    %c0_7 = arith.constant 0 : index
    %c0_8 = arith.constant 0 : index
    %c0_9 = arith.constant 0 : index
    %6 = vector.load %arg4[%c0_6, %c0_7, %c0_8, %c0_9] : memref<1x1x8x8xbf16, #tpu.memory_space<vmem>>, vector<1x1x8x8xbf16>
    %7 = vector.shape_cast %6 : vector<1x1x8x8xbf16> to vector<8x8xbf16>
    %cst = arith.constant dense<0.000000e+00> : vector<16x8xf32>
    %8 = tpu.matmul %5, %7, %cst {dimension_numbers = #tpu.dot_dimension_numbers<[1], [0], [0], [1], [0, 0, 1, 1], [], []>} : vector<16x8xbf16>, vector<8x8xbf16>, vector<16x8xf32> -> vector<16x8xf32>
    %9 = arith.addf %3, %8 : vector<16x8xf32>
    %c0_10 = arith.constant 0 : index
    %c0_11 = arith.constant 0 : index
    %10 = vector.load %arg7[%c0_10, %c0_11] : memref<16x8xf32, #tpu.memory_space<vmem>>, vector<16x8xf32>
    tpu.vector_store %arg7[%c0_10, %c0_11], %9 {strides = array<i32>} : memref<16x8xf32, #tpu.memory_space<vmem>>, vector<16x8xf32>,
    %c0_i32_12 = arith.constant 0 : i32
    %11 = arith.cmpi eq, %arg2, %c0_i32_12 : i32
    %12 = arith.extui %11 : i1 to i32
    %c0_i32_13 = arith.constant 0 : i32
    %13 = arith.cmpi ne, %12, %c0_i32_13 : i32
    scf.if %13 {
      %c0_14 = arith.constant 0 : index
      %c0_15 = arith.constant 0 : index
      %14 = vector.load %arg5[%c0_14, %c0_15] : memref<1x8xf32, #tpu.memory_space<vmem>>, vector<1x8xf32>
      %15 = vector.broadcast %14 : vector<1x8xf32> to vector<16x8xf32>
      %16 = arith.addf %9, %15 : vector<16x8xf32>
      %17 = arith.truncf %16 : vector<16x8xf32> to vector<16x8xbf16>
      %c0_16 = arith.constant 0 : index
      %c0_17 = arith.constant 0 : index
      %c0_18 = arith.constant 0 : index
      %c0_19 = arith.constant 0 : index
      %18 = vector.load %arg6[%c0_16, %c0_17, %c0_18, %c0_19] : memref<1x1x16x8xbf16, #tpu.memory_space<vmem>>, vector<1x1x16x8xbf16>
      %19 = vector.shape_cast %18 : vector<1x1x16x8xbf16> to vector<16x8xbf16>
      %20 = vector.shape_cast %17 : vector<16x8xbf16> to vector<1x1x16x8xbf16>
      tpu.vector_store %arg6[%c0_16, %c0_17, %c0_18, %c0_19], %20 {strides = array<i32>} : memref<1x1x16x8xbf16, #tpu.memory_space<vmem>>, vector<1x1x16x8xbf16>,
    } else {
    }
    return
  }
  func.func @transform_0(%arg0: i32, %arg1: i32, %arg2: i32) -> (i32, i32, i32, i32) {
    %c1_i32 = arith.constant 1 : i32
    %0 = arith.muli %c1_i32, %arg1 : i32
    %1 = arith.addi %0, %arg2 : i32
    %c0_i32 = arith.constant 0 : i32
    %c0_i32_0 = arith.constant 0 : i32
    %c0_i32_1 = arith.constant 0 : i32
    return %arg0, %1, %c0_i32, %c0_i32_0 : i32, i32, i32, i32
  }
  func.func @transform_1(%arg0: i32, %arg1: i32, %arg2: i32) -> (i32, i32, i32, i32) {
    %c0_i32 = arith.constant 0 : i32
    %c0_i32_0 = arith.constant 0 : i32
    %c0_i32_1 = arith.constant 0 : i32
    %c0_i32_2 = arith.constant 0 : i32
    return %arg2, %c0_i32, %c0_i32_0, %c0_i32_1 : i32, i32, i32, i32
  }
  func.func @transform_2(%arg0: i32, %arg1: i32, %arg2: i32) -> (i32, i32) {
    %c0_i32 = arith.constant 0 : i32
    %c0_i32_0 = arith.constant 0 : i32
    %c0_i32_1 = arith.constant 0 : i32
    return %c0_i32, %c0_i32_0 : i32, i32
  }
  func.func @transform_3(%arg0: i32, %arg1: i32, %arg2: i32) -> (i32, i32, i32, i32) {
    %c0_i32 = arith.constant 0 : i32
    %c0_i32_0 = arith.constant 0 : i32
    %c0_i32_1 = arith.constant 0 : i32
    return %arg0, %arg1, %c0_i32, %c0_i32_0 : i32, i32, i32, i32
  }
}

module attributes {stable_mosaic.version = 11 : i64} {
  func.func @kernel(%arg0: i32, %arg1: i32, %arg2: i32, %arg3: memref<1x1x4x16xbf16, #tpu.memory_space<vmem>>, %arg4: memref<1x1x16x8xbf16, #tpu.memory_space<vmem>>, %arg5: memref<1x8xf32, #tpu.memory_space<vmem>>, %arg6: memref<1x1x4x8xbf16, #tpu.memory_space<vmem>>, %arg7: memref<1x1x4x8xbf16, #tpu.memory_space<vmem>>, %arg8: memref<4x8xf32, #tpu.memory_space<vmem>>) attributes {dimension_semantics = [#tpu.dimension_semantics<parallel>, #tpu.dimension_semantics<parallel>, #tpu.dimension_semantics<arbitrary>], iteration_bounds = array<i64: 2, 2, 1>, scalar_prefetch = 0 : i64, scratch_operands = 1 : i64, tpu.core_type = #tpu.core_type<tc>, window_params = [{transform_indices = @transform_0, window_bounds = array<i64: 1, 1, 4, 16>}, {transform_indices = @transform_1, window_bounds = array<i64: 1, 1, 16, 8>}, {pipeline_mode = #tpu.pipeline_mode<synchronous>, transform_indices = @transform_2, window_bounds = array<i64: 1, 8>}, {transform_indices = @transform_3, window_bounds = array<i64: 1, 1, 4, 8>}, {transform_indices = @transform_4, window_bounds = array<i64: 1, 1, 4, 8>}]} {
    %c0_i32 = arith.constant 0 : i32
    %0 = arith.cmpi eq, %arg2, %c0_i32 : i32
    %1 = arith.extui %0 : i1 to i32
    %c0_i32_0 = arith.constant 0 : i32
    %2 = arith.cmpi ne, %1, %c0_i32_0 : i32
    scf.if %2 {
      %cst_14 = arith.constant 0.000000e+00 : f32
      %14 = vector.broadcast %cst_14 : f32 to vector<4x8xf32>
      %c0_15 = arith.constant 0 : index
      %c0_16 = arith.constant 0 : index
      %15 = vector.load %arg8[%c0_15, %c0_16] : memref<4x8xf32, #tpu.memory_space<vmem>>, vector<4x8xf32>
      tpu.vector_store %arg8[%c0_15, %c0_16], %14 {strides = array<i32>} : memref<4x8xf32, #tpu.memory_space<vmem>>, vector<4x8xf32>,
    } else {
    }
    %c0 = arith.constant 0 : index
    %c0_1 = arith.constant 0 : index
    %3 = vector.load %arg8[%c0, %c0_1] : memref<4x8xf32, #tpu.memory_space<vmem>>, vector<4x8xf32>
    %c0_2 = arith.constant 0 : index
    %c0_3 = arith.constant 0 : index
    %c0_4 = arith.constant 0 : index
    %c0_5 = arith.constant 0 : index
    %4 = vector.load %arg3[%c0_2, %c0_3, %c0_4, %c0_5] : memref<1x1x4x16xbf16, #tpu.memory_space<vmem>>, vector<1x1x4x16xbf16>
    %5 = vector.shape_cast %4 : vector<1x1x4x16xbf16> to vector<4x16xbf16>
    %c0_6 = arith.constant 0 : index
    %c0_7 = arith.constant 0 : index
    %c0_8 = arith.constant 0 : index
    %c0_9 = arith.constant 0 : index
    %6 = vector.load %arg4[%c0_6, %c0_7, %c0_8, %c0_9] : memref<1x1x16x8xbf16, #tpu.memory_space<vmem>>, vector<1x1x16x8xbf16>
    %7 = vector.shape_cast %6 : vector<1x1x16x8xbf16> to vector<16x8xbf16>
    %cst = arith.constant dense<0.000000e+00> : vector<4x8xf32>
    %8 = tpu.matmul %5, %7, %cst {dimension_numbers = #tpu.dot_dimension_numbers<[1], [0], [0], [1], [0, 0, 1, 1], [], []>} : vector<4x16xbf16>, vector<16x8xbf16>, vector<4x8xf32> -> vector<4x8xf32>
    %9 = arith.addf %3, %8 : vector<4x8xf32>
    %c0_10 = arith.constant 0 : index
    %c0_11 = arith.constant 0 : index
    %10 = vector.load %arg8[%c0_10, %c0_11] : memref<4x8xf32, #tpu.memory_space<vmem>>, vector<4x8xf32>
    tpu.vector_store %arg8[%c0_10, %c0_11], %9 {strides = array<i32>} : memref<4x8xf32, #tpu.memory_space<vmem>>, vector<4x8xf32>,
    %c0_i32_12 = arith.constant 0 : i32
    %11 = arith.cmpi eq, %arg2, %c0_i32_12 : i32
    %12 = arith.extui %11 : i1 to i32
    %c0_i32_13 = arith.constant 0 : i32
    %13 = arith.cmpi ne, %12, %c0_i32_13 : i32
    scf.if %13 {
      %c0_14 = arith.constant 0 : index
      %c0_15 = arith.constant 0 : index
      %14 = vector.load %arg5[%c0_14, %c0_15] : memref<1x8xf32, #tpu.memory_space<vmem>>, vector<1x8xf32>
      %15 = vector.broadcast %14 : vector<1x8xf32> to vector<4x8xf32>
      %16 = arith.addf %9, %15 : vector<4x8xf32>
      %c0_16 = arith.constant 0 : index
      %c0_17 = arith.constant 0 : index
      %c0_18 = arith.constant 0 : index
      %c0_19 = arith.constant 0 : index
      %17 = vector.load %arg6[%c0_16, %c0_17, %c0_18, %c0_19] : memref<1x1x4x8xbf16, #tpu.memory_space<vmem>>, vector<1x1x4x8xbf16>
      %18 = vector.shape_cast %17 : vector<1x1x4x8xbf16> to vector<4x8xbf16>
      %19 = arith.extf %18 : vector<4x8xbf16> to vector<4x8xf32>
      %20 = arith.addf %16, %19 : vector<4x8xf32>
      %cst_20 = arith.constant 0.000000e+00 : f32
      %21 = vector.broadcast %cst_20 : f32 to vector<4x8xf32>
      %22 = arith.maximumf %20, %21 : vector<4x8xf32>
      %23 = arith.truncf %22 : vector<4x8xf32> to vector<4x8xbf16>
      %c0_21 = arith.constant 0 : index
      %c0_22 = arith.constant 0 : index
      %c0_23 = arith.constant 0 : index
      %c0_24 = arith.constant 0 : index
      %24 = vector.load %arg7[%c0_21, %c0_22, %c0_23, %c0_24] : memref<1x1x4x8xbf16, #tpu.memory_space<vmem>>, vector<1x1x4x8xbf16>
      %25 = vector.shape_cast %24 : vector<1x1x4x8xbf16> to vector<4x8xbf16>
      %26 = vector.shape_cast %23 : vector<4x8xbf16> to vector<1x1x4x8xbf16>
      tpu.vector_store %arg7[%c0_21, %c0_22, %c0_23, %c0_24], %26 {strides = array<i32>} : memref<1x1x4x8xbf16, #tpu.memory_space<vmem>>, vector<1x1x4x8xbf16>,
    } else {
    }
    return
  }
  func.func @transform_0(%arg0: i32, %arg1: i32, %arg2: i32) -> (i32, i32, i32, i32) {
    %c1_i32 = arith.constant 1 : i32
    %0 = arith.muli %c1_i32, %arg1 : i32
    %1 = arith.addi %0, %arg2 : i32
    %c0_i32 = arith.constant 0 : i32
    %c0_i32_0 = arith.constant 0 : i32
    %c0_i32_1 = arith.constant 0 : i32
    return %arg0, %1, %c0_i32, %c0_i32_0 : i32, i32, i32, i32
  }
  func.func @transform_1(%arg0: i32, %arg1: i32, %arg2: i32) -> (i32, i32, i32, i32) {
    %c0_i32 = arith.constant 0 : i32
    %c0_i32_0 = arith.constant 0 : i32
    %c0_i32_1 = arith.constant 0 : i32
    %c0_i32_2 = arith.constant 0 : i32
    return %arg2, %c0_i32, %c0_i32_0, %c0_i32_1 : i32, i32, i32, i32
  }
  func.func @transform_2(%arg0: i32, %arg1: i32, %arg2: i32) -> (i32, i32) {
    %c0_i32 = arith.constant 0 : i32
    %c0_i32_0 = arith.constant 0 : i32
    %c0_i32_1 = arith.constant 0 : i32
    return %c0_i32, %c0_i32_0 : i32, i32
  }
  func.func @transform_3(%arg0: i32, %arg1: i32, %arg2: i32) -> (i32, i32, i32, i32) {
    %c0_i32 = arith.constant 0 : i32
    %c0_i32_0 = arith.constant 0 : i32
    %c0_i32_1 = arith.constant 0 : i32
    return %arg0, %arg1, %c0_i32, %c0_i32_0 : i32, i32, i32, i32
  }
  func.func @transform_4(%arg0: i32, %arg1: i32, %arg2: i32) -> (i32, i32, i32, i32) {
    %c0_i32 = arith.constant 0 : i32
    %c0_i32_0 = arith.constant 0 : i32
    %c0_i32_1 = arith.constant 0 : i32
    return %arg0, %arg1, %c0_i32, %c0_i32_0 : i32, i32, i32, i32
  }
}

module attributes {stable_mosaic.version = 11 : i64} {
  func.func @kernel(%arg0: i32, %arg1: i32, %arg2: i32, %arg3: memref<1x1x7x16xbf16, #tpu.memory_space<vmem>>, %arg4: memref<1x2x16x8xbf16, #tpu.memory_space<vmem>>, %arg5: memref<1x8xf32, #tpu.memory_space<vmem>>, %arg6: memref<1x1x6x8xbf16, #tpu.memory_space<vmem>>, %arg7: memref<1x1x6x8xbf16, #tpu.memory_space<vmem>>, %arg8: memref<6x8xf32, #tpu.memory_space<vmem>>) attributes {dimension_semantics = [#tpu.dimension_semantics<parallel>, #tpu.dimension_semantics<parallel>, #tpu.dimension_semantics<arbitrary>], iteration_bounds = array<i64: 2, 2, 1>, scalar_prefetch = 0 : i64, scratch_operands = 1 : i64, tpu.core_type = #tpu.core_type<tc>, window_params = [{transform_indices = @transform_0, window_bounds = array<i64: 1, 1, 7, 16>}, {transform_indices = @transform_1, window_bounds = array<i64: 1, 2, 16, 8>}, {pipeline_mode = #tpu.pipeline_mode<synchronous>, transform_indices = @transform_2, window_bounds = array<i64: 1, 8>}, {transform_indices = @transform_3, window_bounds = array<i64: 1, 1, 6, 8>}, {transform_indices = @transform_4, window_bounds = array<i64: 1, 1, 6, 8>}]} {
    %c0_i32 = arith.constant 0 : i32
    %0 = arith.cmpi eq, %arg2, %c0_i32 : i32
    %1 = arith.extui %0 : i1 to i32
    %c0_i32_0 = arith.constant 0 : i32
    %2 = arith.cmpi ne, %1, %c0_i32_0 : i32
    scf.if %2 {
      %cst_22 = arith.constant 0.000000e+00 : f32
      %20 = vector.broadcast %cst_22 : f32 to vector<6x8xf32>
      %c0_23 = arith.constant 0 : index
      %c0_24 = arith.constant 0 : index
      %21 = vector.load %arg8[%c0_23, %c0_24] : memref<6x8xf32, #tpu.memory_space<vmem>>, vector<6x8xf32>
      tpu.vector_store %arg8[%c0_23, %c0_24], %20 {strides = array<i32>} : memref<6x8xf32, #tpu.memory_space<vmem>>, vector<6x8xf32>,
    } else {
    }
    %c0 = arith.constant 0 : index
    %c0_1 = arith.constant 0 : index
    %3 = vector.load %arg8[%c0, %c0_1] : memref<6x8xf32, #tpu.memory_space<vmem>>, vector<6x8xf32>
    %c0_2 = arith.constant 0 : index
    %c0_3 = arith.constant 0 : index
    %c0_4 = arith.constant 0 : index
    %c0_5 = arith.constant 0 : index
    %4 = vector.load %arg3[%c0_2, %c0_3, %c0_4, %c0_5] : memref<1x1x7x16xbf16, #tpu.memory_space<vmem>>, vector<1x1x6x16xbf16>
    %5 = vector.shape_cast %4 : vector<1x1x6x16xbf16> to vector<6x16xbf16>
    %c0_6 = arith.constant 0 : index
    %c0_7 = arith.constant 0 : index
    %c0_8 = arith.constant 0 : index
    %c0_9 = arith.constant 0 : index
    %6 = vector.load %arg4[%c0_6, %c0_7, %c0_8, %c0_9] : memref<1x2x16x8xbf16, #tpu.memory_space<vmem>>, vector<1x1x16x8xbf16>
    %7 = vector.shape_cast %6 : vector<1x1x16x8xbf16> to vector<16x8xbf16>
    %cst = arith.constant dense<0.000000e+00> : vector<6x8xf32>
    %8 = tpu.matmul %5, %7, %cst {dimension_numbers = #tpu.dot_dimension_numbers<[1], [0], [0], [1], [0, 0, 1, 1], [], []>} : vector<6x16xbf16>, vector<16x8xbf16>, vector<6x8xf32> -> vector<6x8xf32>
    %9 = arith.addf %3, %8 : vector<6x8xf32>
    %c0_10 = arith.constant 0 : index
    %c0_11 = arith.constant 0 : index
    %c1 = arith.constant 1 : index
    %c0_12 = arith.constant 0 : index
    %10 = vector.load %arg3[%c0_10, %c0_11, %c1, %c0_12] : memref<1x1x7x16xbf16, #tpu.memory_space<vmem>>, vector<1x1x6x16xbf16>
    %11 = vector.shape_cast %10 : vector<1x1x6x16xbf16> to vector<6x16xbf16>
    %c0_13 = arith.constant 0 : index
    %c1_14 = arith.constant 1 : index
    %c0_15 = arith.constant 0 : index
    %c0_16 = arith.constant 0 : index
    %12 = vector.load %arg4[%c0_13, %c1_14, %c0_15, %c0_16] : memref<1x2x16x8xbf16, #tpu.memory_space<vmem>>, vector<1x1x16x8xbf16>
    %13 = vector.shape_cast %12 : vector<1x1x16x8xbf16> to vector<16x8xbf16>
    %cst_17 = arith.constant dense<0.000000e+00> : vector<6x8xf32>
    %14 = tpu.matmul %11, %13, %cst_17 {dimension_numbers = #tpu.dot_dimension_numbers<[1], [0], [0], [1], [0, 0, 1, 1], [], []>} : vector<6x16xbf16>, vector<16x8xbf16>, vector<6x8xf32> -> vector<6x8xf32>
    %15 = arith.addf %9, %14 : vector<6x8xf32>
    %c0_18 = arith.constant 0 : index
    %c0_19 = arith.constant 0 : index
    %16 = vector.load %arg8[%c0_18, %c0_19] : memref<6x8xf32, #tpu.memory_space<vmem>>, vector<6x8xf32>
    tpu.vector_store %arg8[%c0_18, %c0_19], %15 {strides = array<i32>} : memref<6x8xf32, #tpu.memory_space<vmem>>, vector<6x8xf32>,
    %c0_i32_20 = arith.constant 0 : i32
    %17 = arith.cmpi eq, %arg2, %c0_i32_20 : i32
    %18 = arith.extui %17 : i1 to i32
    %c0_i32_21 = arith.constant 0 : i32
    %19 = arith.cmpi ne, %18, %c0_i32_21 : i32
    scf.if %19 {
      %c0_22 = arith.constant 0 : index
      %c0_23 = arith.constant 0 : index
      %20 = vector.load %arg5[%c0_22, %c0_23] : memref<1x8xf32, #tpu.memory_space<vmem>>, vector<1x8xf32>
      %21 = vector.broadcast %20 : vector<1x8xf32> to vector<6x8xf32>
      %22 = arith.addf %15, %21 : vector<6x8xf32>
      %c0_24 = arith.constant 0 : index
      %c0_25 = arith.constant 0 : index
      %c0_26 = arith.constant 0 : index
      %c0_27 = arith.constant 0 : index
      %23 = vector.load %arg6[%c0_24, %c0_25, %c0_26, %c0_27] : memref<1x1x6x8xbf16, #tpu.memory_space<vmem>>, vector<1x1x6x8xbf16>
      %24 = vector.shape_cast %23 : vector<1x1x6x8xbf16> to vector<6x8xbf16>
      %25 = arith.extf %24 : vector<6x8xbf16> to vector<6x8xf32>
      %26 = arith.addf %22, %25 : vector<6x8xf32>
      %cst_28 = arith.constant 0.000000e+00 : f32
      %27 = vector.broadcast %cst_28 : f32 to vector<6x8xf32>
      %28 = arith.maximumf %26, %27 : vector<6x8xf32>
      %29 = arith.truncf %28 : vector<6x8xf32> to vector<6x8xbf16>
      %c0_29 = arith.constant 0 : index
      %c0_30 = arith.constant 0 : index
      %c0_31 = arith.constant 0 : index
      %c0_32 = arith.constant 0 : index
      %30 = vector.load %arg7[%c0_29, %c0_30, %c0_31, %c0_32] : memref<1x1x6x8xbf16, #tpu.memory_space<vmem>>, vector<1x1x6x8xbf16>
      %31 = vector.shape_cast %30 : vector<1x1x6x8xbf16> to vector<6x8xbf16>
      %32 = vector.shape_cast %29 : vector<6x8xbf16> to vector<1x1x6x8xbf16>
      tpu.vector_store %arg7[%c0_29, %c0_30, %c0_31, %c0_32], %32 {strides = array<i32>} : memref<1x1x6x8xbf16, #tpu.memory_space<vmem>>, vector<1x1x6x8xbf16>,
    } else {
    }
    return
  }
  func.func @transform_0(%arg0: i32, %arg1: i32, %arg2: i32) -> (i32, i32, i32, i32) {
    %c1_i32 = arith.constant 1 : i32
    %0 = arith.muli %c1_i32, %arg1 : i32
    %1 = arith.addi %0, %arg2 : i32
    %c0_i32 = arith.constant 0 : i32
    %c0_i32_0 = arith.constant 0 : i32
    %c0_i32_1 = arith.constant 0 : i32
    return %arg0, %1, %c0_i32, %c0_i32_0 : i32, i32, i32, i32
  }
  func.func @transform_1(%arg0: i32, %arg1: i32, %arg2: i32) -> (i32, i32, i32, i32) {
    %c0_i32 = arith.constant 0 : i32
    %c0_i32_0 = arith.constant 0 : i32
    %c0_i32_1 = arith.constant 0 : i32
    %c0_i32_2 = arith.constant 0 : i32
    return %arg2, %c0_i32, %c0_i32_0, %c0_i32_1 : i32, i32, i32, i32
  }
  func.func @transform_2(%arg0: i32, %arg1: i32, %arg2: i32) -> (i32, i32) {
    %c0_i32 = arith.constant 0 : i32
    %c0_i32_0 = arith.constant 0 : i32
    %c0_i32_1 = arith.constant 0 : i32
    return %c0_i32, %c0_i32_0 : i32, i32
  }
  func.func @transform_3(%arg0: i32, %arg1: i32, %arg2: i32) -> (i32, i32, i32, i32) {
    %c0_i32 = arith.constant 0 : i32
    %c0_i32_0 = arith.constant 0 : i32
    %c0_i32_1 = arith.constant 0 : i32
    return %arg0, %arg1, %c0_i32, %c0_i32_0 : i32, i32, i32, i32
  }
  func.func @transform_4(%arg0: i32, %arg1: i32, %arg2: i32) -> (i32, i32, i32, i32) {
    %c0_i32 = arith.constant 0 : i32
    %c0_i32_0 = arith.constant 0 : i32
    %c0_i32_1 = arith.constant 0 : i32
    return %arg0, %arg1, %c0_i32, %c0_i32_0 : i32, i32, i32, i32
  }
}

module attributes {stable_mosaic.version = 11 : i64} {
  func.func @kernel(%arg0: i32, %arg1: i32, %arg2: i32, %arg3: memref<1x1x6x16xbf16, #tpu.memory_space<vmem>>, %arg4: memref<1x2x16x8xbf16, #tpu.memory_space<vmem>>, %arg5: memref<1x8xf32, #tpu.memory_space<vmem>>, %arg6: memref<1x1x4x8xbf16, #tpu.memory_space<vmem>>, %arg7: memref<1x1x4x8xbf16, #tpu.memory_space<vmem>>, %arg8: memref<4x8xf32, #tpu.memory_space<vmem>>) attributes {dimension_semantics = [#tpu.dimension_semantics<parallel>, #tpu.dimension_semantics<parallel>, #tpu.dimension_semantics<arbitrary>], iteration_bounds = array<i64: 2, 2, 1>, scalar_prefetch = 0 : i64, scratch_operands = 1 : i64, tpu.core_type = #tpu.core_type<tc>, window_params = [{transform_indices = @transform_0, window_bounds = array<i64: 1, 1, 6, 16>}, {transform_indices = @transform_1, window_bounds = array<i64: 1, 2, 16, 8>}, {pipeline_mode = #tpu.pipeline_mode<synchronous>, transform_indices = @transform_2, window_bounds = array<i64: 1, 8>}, {transform_indices = @transform_3, window_bounds = array<i64: 1, 1, 4, 8>}, {transform_indices = @transform_4, window_bounds = array<i64: 1, 1, 4, 8>}]} {
    %c0_i32 = arith.constant 0 : i32
    %0 = arith.cmpi eq, %arg2, %c0_i32 : i32
    %1 = arith.extui %0 : i1 to i32
    %c0_i32_0 = arith.constant 0 : i32
    %2 = arith.cmpi ne, %1, %c0_i32_0 : i32
    scf.if %2 {
      %cst_21 = arith.constant 0.000000e+00 : f32
      %20 = vector.broadcast %cst_21 : f32 to vector<4x8xf32>
      %c0_22 = arith.constant 0 : index
      %c0_23 = arith.constant 0 : index
      %21 = vector.load %arg8[%c0_22, %c0_23] : memref<4x8xf32, #tpu.memory_space<vmem>>, vector<4x8xf32>
      tpu.vector_store %arg8[%c0_22, %c0_23], %20 {strides = array<i32>} : memref<4x8xf32, #tpu.memory_space<vmem>>, vector<4x8xf32>,
    } else {
    }
    %c0 = arith.constant 0 : index
    %c0_1 = arith.constant 0 : index
    %3 = vector.load %arg8[%c0, %c0_1] : memref<4x8xf32, #tpu.memory_space<vmem>>, vector<4x8xf32>
    %c0_2 = arith.constant 0 : index
    %c0_3 = arith.constant 0 : index
    %c0_4 = arith.constant 0 : index
    %c0_5 = arith.constant 0 : index
    %4 = vector.load %arg3[%c0_2, %c0_3, %c0_4, %c0_5] : memref<1x1x6x16xbf16, #tpu.memory_space<vmem>>, vector<1x1x4x16xbf16>
    %5 = vector.shape_cast %4 : vector<1x1x4x16xbf16> to vector<4x16xbf16>
    %c0_6 = arith.constant 0 : index
    %c0_7 = arith.constant 0 : index
    %c0_8 = arith.constant 0 : index
    %c0_9 = arith.constant 0 : index
    %6 = vector.load %arg4[%c0_6, %c0_7, %c0_8, %c0_9] : memref<1x2x16x8xbf16, #tpu.memory_space<vmem>>, vector<1x1x16x8xbf16>
    %7 = vector.shape_cast %6 : vector<1x1x16x8xbf16> to vector<16x8xbf16>
    %cst = arith.constant dense<0.000000e+00> : vector<4x8xf32>
    %8 = tpu.matmul %5, %7, %cst {dimension_numbers = #tpu.dot_dimension_numbers<[1], [0], [0], [1], [0, 0, 1, 1], [], []>} : vector<4x16xbf16>, vector<16x8xbf16>, vector<4x8xf32> -> vector<4x8xf32>
    %9 = arith.addf %3, %8 : vector<4x8xf32>
    %c0_10 = arith.constant 0 : index
    %c0_11 = arith.constant 0 : index
    %c2 = arith.constant 2 : index
    %c0_12 = arith.constant 0 : index
    %10 = vector.load %arg3[%c0_10, %c0_11, %c2, %c0_12] : memref<1x1x6x16xbf16, #tpu.memory_space<vmem>>, vector<1x1x4x16xbf16>
    %11 = vector.shape_cast %10 : vector<1x1x4x16xbf16> to vector<4x16xbf16>
    %c0_13 = arith.constant 0 : index
    %c1 = arith.constant 1 : index
    %c0_14 = arith.constant 0 : index
    %c0_15 = arith.constant 0 : index
    %12 = vector.load %arg4[%c0_13, %c1, %c0_14, %c0_15] : memref<1x2x16x8xbf16, #tpu.memory_space<vmem>>, vector<1x1x16x8xbf16>
    %13 = vector.shape_cast %12 : vector<1x1x16x8xbf16> to vector<16x8xbf16>
    %cst_16 = arith.constant dense<0.000000e+00> : vector<4x8xf32>
    %14 = tpu.matmul %11, %13, %cst_16 {dimension_numbers = #tpu.dot_dimension_numbers<[1], [0], [0], [1], [0, 0, 1, 1], [], []>} : vector<4x16xbf16>, vector<16x8xbf16>, vector<4x8xf32> -> vector<4x8xf32>
    %15 = arith.addf %9, %14 : vector<4x8xf32>
    %c0_17 = arith.constant 0 : index
    %c0_18 = arith.constant 0 : index
    %16 = vector.load %arg8[%c0_17, %c0_18] : memref<4x8xf32, #tpu.memory_space<vmem>>, vector<4x8xf32>
    tpu.vector_store %arg8[%c0_17, %c0_18], %15 {strides = array<i32>} : memref<4x8xf32, #tpu.memory_space<vmem>>, vector<4x8xf32>,
    %c0_i32_19 = arith.constant 0 : i32
    %17 = arith.cmpi eq, %arg2, %c0_i32_19 : i32
    %18 = arith.extui %17 : i1 to i32
    %c0_i32_20 = arith.constant 0 : i32
    %19 = arith.cmpi ne, %18, %c0_i32_20 : i32
    scf.if %19 {
      %c0_21 = arith.constant 0 : index
      %c0_22 = arith.constant 0 : index
      %20 = vector.load %arg5[%c0_21, %c0_22] : memref<1x8xf32, #tpu.memory_space<vmem>>, vector<1x8xf32>
      %21 = vector.broadcast %20 : vector<1x8xf32> to vector<4x8xf32>
      %22 = arith.addf %15, %21 : vector<4x8xf32>
      %c0_23 = arith.constant 0 : index
      %c0_24 = arith.constant 0 : index
      %c0_25 = arith.constant 0 : index
      %c0_26 = arith.constant 0 : index
      %23 = vector.load %arg6[%c0_23, %c0_24, %c0_25, %c0_26] : memref<1x1x4x8xbf16, #tpu.memory_space<vmem>>, vector<1x1x4x8xbf16>
      %24 = vector.shape_cast %23 : vector<1x1x4x8xbf16> to vector<4x8xbf16>
      %25 = arith.extf %24 : vector<4x8xbf16> to vector<4x8xf32>
      %26 = arith.addf %22, %25 : vector<4x8xf32>
      %cst_27 = arith.constant 0.000000e+00 : f32
      %27 = vector.broadcast %cst_27 : f32 to vector<4x8xf32>
      %28 = arith.maximumf %26, %27 : vector<4x8xf32>
      %29 = arith.truncf %28 : vector<4x8xf32> to vector<4x8xbf16>
      %c0_28 = arith.constant 0 : index
      %c0_29 = arith.constant 0 : index
      %c0_30 = arith.constant 0 : index
      %c0_31 = arith.constant 0 : index
      %30 = vector.load %arg7[%c0_28, %c0_29, %c0_30, %c0_31] : memref<1x1x4x8xbf16, #tpu.memory_space<vmem>>, vector<1x1x4x8xbf16>
      %31 = vector.shape_cast %30 : vector<1x1x4x8xbf16> to vector<4x8xbf16>
      %32 = vector.shape_cast %29 : vector<4x8xbf16> to vector<1x1x4x8xbf16>
      tpu.vector_store %arg7[%c0_28, %c0_29, %c0_30, %c0_31], %32 {strides = array<i32>} : memref<1x1x4x8xbf16, #tpu.memory_space<vmem>>, vector<1x1x4x8xbf16>,
    } else {
    }
    return
  }
  func.func @transform_0(%arg0: i32, %arg1: i32, %arg2: i32) -> (i32, i32, i32, i32) {
    %c1_i32 = arith.constant 1 : i32
    %0 = arith.muli %c1_i32, %arg1 : i32
    %1 = arith.addi %0, %arg2 : i32
    %c0_i32 = arith.constant 0 : i32
    %c0_i32_0 = arith.constant 0 : i32
    %c0_i32_1 = arith.constant 0 : i32
    return %arg0, %1, %c0_i32, %c0_i32_0 : i32, i32, i32, i32
  }
  func.func @transform_1(%arg0: i32, %arg1: i32, %arg2: i32) -> (i32, i32, i32, i32) {
    %c0_i32 = arith.constant 0 : i32
    %c0_i32_0 = arith.constant 0 : i32
    %c0_i32_1 = arith.constant 0 : i32
    %c0_i32_2 = arith.constant 0 : i32
    return %arg2, %c0_i32, %c0_i32_0, %c0_i32_1 : i32, i32, i32, i32
  }
  func.func @transform_2(%arg0: i32, %arg1: i32, %arg2: i32) -> (i32, i32) {
    %c0_i32 = arith.constant 0 : i32
    %c0_i32_0 = arith.constant 0 : i32
    %c0_i32_1 = arith.constant 0 : i32
    return %c0_i32, %c0_i32_0 : i32, i32
  }
  func.func @transform_3(%arg0: i32, %arg1: i32, %arg2: i32) -> (i32, i32, i32, i32) {
    %c0_i32 = arith.constant 0 : i32
    %c0_i32_0 = arith.constant 0 : i32
    %c0_i32_1 = arith.constant 0 : i32
    return %arg0, %arg1, %c0_i32, %c0_i32_0 : i32, i32, i32, i32
  }
  func.func @transform_4(%arg0: i32, %arg1: i32, %arg2: i32) -> (i32, i32, i32, i32) {
    %c0_i32 = arith.constant 0 : i32
    %c0_i32_0 = arith.constant 0 : i32
    %c0_i32_1 = arith.constant 0 : i32
    return %arg0, %arg1, %c0_i32, %c0_i32_0 : i32, i32, i32, i32
  }
}

module attributes {stable_mosaic.version = 11 : i64} {
  func.func @kernel(%arg0: i32, %arg1: i32, %arg2: i32, %arg3: memref<1x1x10x16xbf16, #tpu.memory_space<vmem>>, %arg4: memref<1x4x16x8xbf16, #tpu.memory_space<vmem>>, %arg5: memref<1x8xf32, #tpu.memory_space<vmem>>, %arg6: memref<1x1x6x8xbf16, #tpu.memory_space<vmem>>, %arg7: memref<1x1x6x8xbf16, #tpu.memory_space<vmem>>, %arg8: memref<6x8xf32, #tpu.memory_space<vmem>>) attributes {dimension_semantics = [#tpu.dimension_semantics<parallel>, #tpu.dimension_semantics<parallel>, #tpu.dimension_semantics<arbitrary>], iteration_bounds = array<i64: 2, 2, 1>, scalar_prefetch = 0 : i64, scratch_operands = 1 : i64, tpu.core_type = #tpu.core_type<tc>, window_params = [{transform_indices = @transform_0, window_bounds = array<i64: 1, 1, 10, 16>}, {transform_indices = @transform_1, window_bounds = array<i64: 1, 4, 16, 8>}, {pipeline_mode = #tpu.pipeline_mode<synchronous>, transform_indices = @transform_2, window_bounds = array<i64: 1, 8>}, {transform_indices = @transform_3, window_bounds = array<i64: 1, 1, 6, 8>}, {transform_indices = @transform_4, window_bounds = array<i64: 1, 1, 6, 8>}]} {
    %c0_i32 = arith.constant 0 : i32
    %0 = arith.cmpi eq, %arg2, %c0_i32 : i32
    %1 = arith.extui %0 : i1 to i32
    %c0_i32_0 = arith.constant 0 : i32
    %2 = arith.cmpi ne, %1, %c0_i32_0 : i32
    scf.if %2 {
      %cst_37 = arith.constant 0.000000e+00 : f32
      %32 = vector.broadcast %cst_37 : f32 to vector<6x8xf32>
      %c0_38 = arith.constant 0 : index
      %c0_39 = arith.constant 0 : index
      %33 = vector.load %arg8[%c0_38, %c0_39] : memref<6x8xf32, #tpu.memory_space<vmem>>, vector<6x8xf32>
      tpu.vector_store %arg8[%c0_38, %c0_39], %32 {strides = array<i32>} : memref<6x8xf32, #tpu.memory_space<vmem>>, vector<6x8xf32>,
    } else {
    }
    %c0 = arith.constant 0 : index
    %c0_1 = arith.constant 0 : index
    %3 = vector.load %arg8[%c0, %c0_1] : memref<6x8xf32, #tpu.memory_space<vmem>>, vector<6x8xf32>
    %c0_2 = arith.constant 0 : index
    %c0_3 = arith.constant 0 : index
    %c0_4 = arith.constant 0 : index
    %c0_5 = arith.constant 0 : index
    %4 = vector.load %arg3[%c0_2, %c0_3, %c0_4, %c0_5] : memref<1x1x10x16xbf16, #tpu.memory_space<vmem>>, vector<1x1x6x16xbf16>
    %5 = vector.shape_cast %4 : vector<1x1x6x16xbf16> to vector<6x16xbf16>
    %c0_6 = arith.constant 0 : index
    %c0_7 = arith.constant 0 : index
    %c0_8 = arith.constant 0 : index
    %c0_9 = arith.constant 0 : index
    %6 = vector.load %arg4[%c0_6, %c0_7, %c0_8, %c0_9] : memref<1x4x16x8xbf16, #tpu.memory_space<vmem>>, vector<1x1x16x8xbf16>
    %7 = vector.shape_cast %6 : vector<1x1x16x8xbf16> to vector<16x8xbf16>
    %cst = arith.constant dense<0.000000e+00> : vector<6x8xf32>
    %8 = tpu.matmul %5, %7, %cst {dimension_numbers = #tpu.dot_dimension_numbers<[1], [0], [0], [1], [0, 0, 1, 1], [], []>} : vector<6x16xbf16>, vector<16x8xbf16>, vector<6x8xf32> -> vector<6x8xf32>
    %9 = arith.addf %3, %8 : vector<6x8xf32>
    %c0_10 = arith.constant 0 : index
    %c0_11 = arith.constant 0 : index
    %c1 = arith.constant 1 : index
    %c0_12 = arith.constant 0 : index
    %10 = vector.load %arg3[%c0_10, %c0_11, %c1, %c0_12] : memref<1x1x10x16xbf16, #tpu.memory_space<vmem>>, vector<1x1x6x16xbf16>
    %11 = vector.shape_cast %10 : vector<1x1x6x16xbf16> to vector<6x16xbf16>
    %c0_13 = arith.constant 0 : index
    %c1_14 = arith.constant 1 : index
    %c0_15 = arith.constant 0 : index
    %c0_16 = arith.constant 0 : index
    %12 = vector.load %arg4[%c0_13, %c1_14, %c0_15, %c0_16] : memref<1x4x16x8xbf16, #tpu.memory_space<vmem>>, vector<1x1x16x8xbf16>
    %13 = vector.shape_cast %12 : vector<1x1x16x8xbf16> to vector<16x8xbf16>
    %cst_17 = arith.constant dense<0.000000e+00> : vector<6x8xf32>
    %14 = tpu.matmul %11, %13, %cst_17 {dimension_numbers = #tpu.dot_dimension_numbers<[1], [0], [0], [1], [0, 0, 1, 1], [], []>} : vector<6x16xbf16>, vector<16x8xbf16>, vector<6x8xf32> -> vector<6x8xf32>
    %15 = arith.addf %9, %14 : vector<6x8xf32>
    %c0_18 = arith.constant 0 : index
    %c0_19 = arith.constant 0 : index
    %c3 = arith.constant 3 : index
    %c0_20 = arith.constant 0 : index
    %16 = vector.load %arg3[%c0_18, %c0_19, %c3, %c0_20] : memref<1x1x10x16xbf16, #tpu.memory_space<vmem>>, vector<1x1x6x16xbf16>
    %17 = vector.shape_cast %16 : vector<1x1x6x16xbf16> to vector<6x16xbf16>
    %c0_21 = arith.constant 0 : index
    %c2 = arith.constant 2 : index
    %c0_22 = arith.constant 0 : index
    %c0_23 = arith.constant 0 : index
    %18 = vector.load %arg4[%c0_21, %c2, %c0_22, %c0_23] : memref<1x4x16x8xbf16, #tpu.memory_space<vmem>>, vector<1x1x16x8xbf16>
    %19 = vector.shape_cast %18 : vector<1x1x16x8xbf16> to vector<16x8xbf16>
    %cst_24 = arith.constant dense<0.000000e+00> : vector<6x8xf32>
    %20 = tpu.matmul %17, %19, %cst_24 {dimension_numbers = #tpu.dot_dimension_numbers<[1], [0], [0], [1], [0, 0, 1, 1], [], []>} : vector<6x16xbf16>, vector<16x8xbf16>, vector<6x8xf32> -> vector<6x8xf32>
    %21 = arith.addf %15, %20 : vector<6x8xf32>
    %c0_25 = arith.constant 0 : index
    %c0_26 = arith.constant 0 : index
    %c4 = arith.constant 4 : index
    %c0_27 = arith.constant 0 : index
    %22 = vector.load %arg3[%c0_25, %c0_26, %c4, %c0_27] : memref<1x1x10x16xbf16, #tpu.memory_space<vmem>>, vector<1x1x6x16xbf16>
    %23 = vector.shape_cast %22 : vector<1x1x6x16xbf16> to vector<6x16xbf16>
    %c0_28 = arith.constant 0 : index
    %c3_29 = arith.constant 3 : index
    %c0_30 = arith.constant 0 : index
    %c0_31 = arith.constant 0 : index
    %24 = vector.load %arg4[%c0_28, %c3_29, %c0_30, %c0_31] : memref<1x4x16x8xbf16, #tpu.memory_space<vmem>>, vector<1x1x16x8xbf16>
    %25 = vector.shape_cast %24 : vector<1x1x16x8xbf16> to vector<16x8xbf16>
    %cst_32 = arith.constant dense<0.000000e+00> : vector<6x8xf32>
    %26 = tpu.matmul %23, %25, %cst_32 {dimension_numbers = #tpu.dot_dimension_numbers<[1], [0], [0], [1], [0, 0, 1, 1], [], []>} : vector<6x16xbf16>, vector<16x8xbf16>, vector<6x8xf32> -> vector<6x8xf32>
    %27 = arith.addf %21, %26 : vector<6x8xf32>
    %c0_33 = arith.constant 0 : index
    %c0_34 = arith.constant 0 : index
    %28 = vector.load %arg8[%c0_33, %c0_34] : memref<6x8xf32, #tpu.memory_space<vmem>>, vector<6x8xf32>
    tpu.vector_store %arg8[%c0_33, %c0_34], %27 {strides = array<i32>} : memref<6x8xf32, #tpu.memory_space<vmem>>, vector<6x8xf32>,
    %c0_i32_35 = arith.constant 0 : i32
    %29 = arith.cmpi eq, %arg2, %c0_i32_35 : i32
    %30 = arith.extui %29 : i1 to i32
    %c0_i32_36 = arith.constant 0 : i32
    %31 = arith.cmpi ne, %30, %c0_i32_36 : i32
    scf.if %31 {
      %c0_37 = arith.constant 0 : index
      %c0_38 = arith.constant 0 : index
      %32 = vector.load %arg5[%c0_37, %c0_38] : memref<1x8xf32, #tpu.memory_space<vmem>>, vector<1x8xf32>
      %33 = vector.broadcast %32 : vector<1x8xf32> to vector<6x8xf32>
      %34 = arith.addf %27, %33 : vector<6x8xf32>
      %c0_39 = arith.constant 0 : index
      %c0_40 = arith.constant 0 : index
      %c0_41 = arith.constant 0 : index
      %c0_42 = arith.constant 0 : index
      %35 = vector.load %arg6[%c0_39, %c0_40, %c0_41, %c0_42] : memref<1x1x6x8xbf16, #tpu.memory_space<vmem>>, vector<1x1x6x8xbf16>
      %36 = vector.shape_cast %35 : vector<1x1x6x8xbf16> to vector<6x8xbf16>
      %37 = arith.extf %36 : vector<6x8xbf16> to vector<6x8xf32>
      %38 = arith.addf %34, %37 : vector<6x8xf32>
      %cst_43 = arith.constant 0.000000e+00 : f32
      %39 = vector.broadcast %cst_43 : f32 to vector<6x8xf32>
      %40 = arith.maximumf %38, %39 : vector<6x8xf32>
      %41 = arith.truncf %40 : vector<6x8xf32> to vector<6x8xbf16>
      %c0_44 = arith.constant 0 : index
      %c0_45 = arith.constant 0 : index
      %c0_46 = arith.constant 0 : index
      %c0_47 = arith.constant 0 : index
      %42 = vector.load %arg7[%c0_44, %c0_45, %c0_46, %c0_47] : memref<1x1x6x8xbf16, #tpu.memory_space<vmem>>, vector<1x1x6x8xbf16>
      %43 = vector.shape_cast %42 : vector<1x1x6x8xbf16> to vector<6x8xbf16>
      %44 = vector.shape_cast %41 : vector<6x8xbf16> to vector<1x1x6x8xbf16>
      tpu.vector_store %arg7[%c0_44, %c0_45, %c0_46, %c0_47], %44 {strides = array<i32>} : memref<1x1x6x8xbf16, #tpu.memory_space<vmem>>, vector<1x1x6x8xbf16>,
    } else {
    }
    return
  }
  func.func @transform_0(%arg0: i32, %arg1: i32, %arg2: i32) -> (i32, i32, i32, i32) {
    %c1_i32 = arith.constant 1 : i32
    %0 = arith.muli %c1_i32, %arg1 : i32
    %1 = arith.addi %0, %arg2 : i32
    %c0_i32 = arith.constant 0 : i32
    %c0_i32_0 = arith.constant 0 : i32
    %c0_i32_1 = arith.constant 0 : i32
    return %arg0, %1, %c0_i32, %c0_i32_0 : i32, i32, i32, i32
  }
  func.func @transform_1(%arg0: i32, %arg1: i32, %arg2: i32) -> (i32, i32, i32, i32) {
    %c0_i32 = arith.constant 0 : i32
    %c0_i32_0 = arith.constant 0 : i32
    %c0_i32_1 = arith.constant 0 : i32
    %c0_i32_2 = arith.constant 0 : i32
    return %arg2, %c0_i32, %c0_i32_0, %c0_i32_1 : i32, i32, i32, i32
  }
  func.func @transform_2(%arg0: i32, %arg1: i32, %arg2: i32) -> (i32, i32) {
    %c0_i32 = arith.constant 0 : i32
    %c0_i32_0 = arith.constant 0 : i32
    %c0_i32_1 = arith.constant 0 : i32
    return %c0_i32, %c0_i32_0 : i32, i32
  }
  func.func @transform_3(%arg0: i32, %arg1: i32, %arg2: i32) -> (i32, i32, i32, i32) {
    %c0_i32 = arith.constant 0 : i32
    %c0_i32_0 = arith.constant 0 : i32
    %c0_i32_1 = arith.constant 0 : i32
    return %arg0, %arg1, %c0_i32, %c0_i32_0 : i32, i32, i32, i32
  }
  func.func @transform_4(%arg0: i32, %arg1: i32, %arg2: i32) -> (i32, i32, i32, i32) {
    %c0_i32 = arith.constant 0 : i32
    %c0_i32_0 = arith.constant 0 : i32
    %c0_i32_1 = arith.constant 0 : i32
    return %arg0, %arg1, %c0_i32, %c0_i32_0 : i32, i32, i32, i32
  }
}

module attributes {stable_mosaic.version = 11 : i64} {
  func.func @kernel(%arg0: i32, %arg1: i32, %arg2: i32, %arg3: memref<1x1x4x16xbf16, #tpu.memory_space<vmem>>, %arg4: memref<1x1x16x8xbf16, #tpu.memory_space<vmem>>, %arg5: memref<1x8xf32, #tpu.memory_space<vmem>>, %arg6: memref<1x1x4x8xbf16, #tpu.memory_space<vmem>>, %arg7: memref<1x1x4x8xbf16, #tpu.memory_space<vmem>>, %arg8: memref<4x8xf32, #tpu.memory_space<vmem>>) attributes {dimension_semantics = [#tpu.dimension_semantics<parallel>, #tpu.dimension_semantics<parallel>, #tpu.dimension_semantics<arbitrary>], iteration_bounds = array<i64: 2, 2, 2>, scalar_prefetch = 0 : i64, scratch_operands = 1 : i64, tpu.core_type = #tpu.core_type<tc>, window_params = [{transform_indices = @transform_0, window_bounds = array<i64: 1, 1, 4, 16>}, {transform_indices = @transform_1, window_bounds = array<i64: 1, 1, 16, 8>}, {pipeline_mode = #tpu.pipeline_mode<synchronous>, transform_indices = @transform_2, window_bounds = array<i64: 1, 8>}, {transform_indices = @transform_3, window_bounds = array<i64: 1, 1, 4, 8>}, {transform_indices = @transform_4, window_bounds = array<i64: 1, 1, 4, 8>}]} {
    %c0_i32 = arith.constant 0 : i32
    %0 = arith.cmpi eq, %arg2, %c0_i32 : i32
    %1 = arith.extui %0 : i1 to i32
    %c0_i32_0 = arith.constant 0 : i32
    %2 = arith.cmpi ne, %1, %c0_i32_0 : i32
    scf.if %2 {
      %cst_13 = arith.constant 0.000000e+00 : f32
      %14 = vector.broadcast %cst_13 : f32 to vector<4x8xf32>
      %c0_14 = arith.constant 0 : index
      %c0_15 = arith.constant 0 : index
      %15 = vector.load %arg8[%c0_14, %c0_15] : memref<4x8xf32, #tpu.memory_space<vmem>>, vector<4x8xf32>
      tpu.vector_store %arg8[%c0_14, %c0_15], %14 {strides = array<i32>} : memref<4x8xf32, #tpu.memory_space<vmem>>, vector<4x8xf32>,
    } else {
    }
    %c0 = arith.constant 0 : index
    %c0_1 = arith.constant 0 : index
    %3 = vector.load %arg8[%c0, %c0_1] : memref<4x8xf32, #tpu.memory_space<vmem>>, vector<4x8xf32>
    %c0_2 = arith.constant 0 : index
    %c0_3 = arith.constant 0 : index
    %c0_4 = arith.constant 0 : index
    %c0_5 = arith.constant 0 : index
    %4 = vector.load %arg3[%c0_2, %c0_3, %c0_4, %c0_5] : memref<1x1x4x16xbf16, #tpu.memory_space<vmem>>, vector<1x1x4x16xbf16>
    %5 = vector.shape_cast %4 : vector<1x1x4x16xbf16> to vector<4x16xbf16>
    %c0_6 = arith.constant 0 : index
    %c0_7 = arith.constant 0 : index
    %c0_8 = arith.constant 0 : index
    %c0_9 = arith.constant 0 : index
    %6 = vector.load %arg4[%c0_6, %c0_7, %c0_8, %c0_9] : memref<1x1x16x8xbf16, #tpu.memory_space<vmem>>, vector<1x1x16x8xbf16>
    %7 = vector.shape_cast %6 : vector<1x1x16x8xbf16> to vector<16x8xbf16>
    %cst = arith.constant dense<0.000000e+00> : vector<4x8xf32>
    %8 = tpu.matmul %5, %7, %cst {dimension_numbers = #tpu.dot_dimension_numbers<[1], [0], [0], [1], [0, 0, 1, 1], [], []>} : vector<4x16xbf16>, vector<16x8xbf16>, vector<4x8xf32> -> vector<4x8xf32>
    %9 = arith.addf %3, %8 : vector<4x8xf32>
    %c0_10 = arith.constant 0 : index
    %c0_11 = arith.constant 0 : index
    %10 = vector.load %arg8[%c0_10, %c0_11] : memref<4x8xf32, #tpu.memory_space<vmem>>, vector<4x8xf32>
    tpu.vector_store %arg8[%c0_10, %c0_11], %9 {strides = array<i32>} : memref<4x8xf32, #tpu.memory_space<vmem>>, vector<4x8xf32>,
    %c1_i32 = arith.constant 1 : i32
    %11 = arith.cmpi eq, %arg2, %c1_i32 : i32
    %12 = arith.extui %11 : i1 to i32
    %c0_i32_12 = arith.constant 0 : i32
    %13 = arith.cmpi ne, %12, %c0_i32_12 : i32
    scf.if %13 {
      %c0_13 = arith.constant 0 : index
      %c0_14 = arith.constant 0 : index
      %14 = vector.load %arg5[%c0_13, %c0_14] : memref<1x8xf32, #tpu.memory_space<vmem>>, vector<1x8xf32>
      %15 = vector.broadcast %14 : vector<1x8xf32> to vector<4x8xf32>
      %16 = arith.addf %9, %15 : vector<4x8xf32>
      %c0_15 = arith.constant 0 : index
      %c0_16 = arith.constant 0 : index
      %c0_17 = arith.constant 0 : index
      %c0_18 = arith.constant 0 : index
      %17 = vector.load %arg6[%c0_15, %c0_16, %c0_17, %c0_18] : memref<1x1x4x8xbf16, #tpu.memory_space<vmem>>, vector<1x1x4x8xbf16>
      %18 = vector.shape_cast %17 : vector<1x1x4x8xbf16> to vector<4x8xbf16>
      %19 = arith.extf %18 : vector<4x8xbf16> to vector<4x8xf32>
      %20 = arith.addf %16, %19 : vector<4x8xf32>
      %cst_19 = arith.constant 0.000000e+00 : f32
      %21 = vector.broadcast %cst_19 : f32 to vector<4x8xf32>
      %22 = arith.maximumf %20, %21 : vector<4x8xf32>
      %23 = arith.truncf %22 : vector<4x8xf32> to vector<4x8xbf16>
      %c0_20 = arith.constant 0 : index
      %c0_21 = arith.constant 0 : index
      %c0_22 = arith.constant 0 : index
      %c0_23 = arith.constant 0 : index
      %24 = vector.load %arg7[%c0_20, %c0_21, %c0_22, %c0_23] : memref<1x1x4x8xbf16, #tpu.memory_space<vmem>>, vector<1x1x4x8xbf16>
      %25 = vector.shape_cast %24 : vector<1x1x4x8xbf16> to vector<4x8xbf16>
      %26 = vector.shape_cast %23 : vector<4x8xbf16> to vector<1x1x4x8xbf16>
      tpu.vector_store %arg7[%c0_20, %c0_21, %c0_22, %c0_23], %26 {strides = array<i32>} : memref<1x1x4x8xbf16, #tpu.memory_space<vmem>>, vector<1x1x4x8xbf16>,
    } else {
    }
    return
  }
  func.func @transform_0(%arg0: i32, %arg1: i32, %arg2: i32) -> (i32, i32, i32, i32) {
    %c1_i32 = arith.constant 1 : i32
    %0 = arith.muli %c1_i32, %arg1 : i32
    %1 = arith.addi %0, %arg2 : i32
    %c0_i32 = arith.constant 0 : i32
    %c0_i32_0 = arith.constant 0 : i32
    %c0_i32_1 = arith.constant 0 : i32
    return %arg0, %1, %c0_i32, %c0_i32_0 : i32, i32, i32, i32
  }
  func.func @transform_1(%arg0: i32, %arg1: i32, %arg2: i32) -> (i32, i32, i32, i32) {
    %c0_i32 = arith.constant 0 : i32
    %c0_i32_0 = arith.constant 0 : i32
    %c0_i32_1 = arith.constant 0 : i32
    %c0_i32_2 = arith.constant 0 : i32
    return %arg2, %c0_i32, %c0_i32_0, %c0_i32_1 : i32, i32, i32, i32
  }
  func.func @transform_2(%arg0: i32, %arg1: i32, %arg2: i32) -> (i32, i32) {
    %c0_i32 = arith.constant 0 : i32
    %c0_i32_0 = arith.constant 0 : i32
    %c0_i32_1 = arith.constant 0 : i32
    return %c0_i32, %c0_i32_0 : i32, i32
  }
  func.func @transform_3(%arg0: i32, %arg1: i32, %arg2: i32) -> (i32, i32, i32, i32) {
    %c0_i32 = arith.constant 0 : i32
    %c0_i32_0 = arith.constant 0 : i32
    %c0_i32_1 = arith.constant 0 : i32
    return %arg0, %arg1, %c0_i32, %c0_i32_0 : i32, i32, i32, i32
  }
  func.func @transform_4(%arg0: i32, %arg1: i32, %arg2: i32) -> (i32, i32, i32, i32) {
    %c0_i32 = arith.constant 0 : i32
    %c0_i32_0 = arith.constant 0 : i32
    %c0_i32_1 = arith.constant 0 : i32
    return %arg0, %arg1, %c0_i32, %c0_i32_0 : i32, i32, i32, i32
  }
}

module attributes {stable_mosaic.version = 11 : i64} {
  func.func @kernel(%arg0: i32, %arg1: i32, %arg2: i32, %arg3: memref<1x1x7x16xbf16, #tpu.memory_space<vmem>>, %arg4: memref<1x2x16x8xbf16, #tpu.memory_space<vmem>>, %arg5: memref<1x8xf32, #tpu.memory_space<vmem>>, %arg6: memref<1x1x6x8xbf16, #tpu.memory_space<vmem>>, %arg7: memref<1x1x6x8xbf16, #tpu.memory_space<vmem>>, %arg8: memref<6x8xf32, #tpu.memory_space<vmem>>) attributes {dimension_semantics = [#tpu.dimension_semantics<parallel>, #tpu.dimension_semantics<parallel>, #tpu.dimension_semantics<arbitrary>], iteration_bounds = array<i64: 2, 2, 2>, scalar_prefetch = 0 : i64, scratch_operands = 1 : i64, tpu.core_type = #tpu.core_type<tc>, window_params = [{transform_indices = @transform_0, window_bounds = array<i64: 1, 1, 7, 16>}, {transform_indices = @transform_1, window_bounds = array<i64: 1, 2, 16, 8>}, {pipeline_mode = #tpu.pipeline_mode<synchronous>, transform_indices = @transform_2, window_bounds = array<i64: 1, 8>}, {transform_indices = @transform_3, window_bounds = array<i64: 1, 1, 6, 8>}, {transform_indices = @transform_4, window_bounds = array<i64: 1, 1, 6, 8>}]} {
    %c0_i32 = arith.constant 0 : i32
    %0 = arith.cmpi eq, %arg2, %c0_i32 : i32
    %1 = arith.extui %0 : i1 to i32
    %c0_i32_0 = arith.constant 0 : i32
    %2 = arith.cmpi ne, %1, %c0_i32_0 : i32
    scf.if %2 {
      %cst_21 = arith.constant 0.000000e+00 : f32
      %20 = vector.broadcast %cst_21 : f32 to vector<6x8xf32>
      %c0_22 = arith.constant 0 : index
      %c0_23 = arith.constant 0 : index
      %21 = vector.load %arg8[%c0_22, %c0_23] : memref<6x8xf32, #tpu.memory_space<vmem>>, vector<6x8xf32>
      tpu.vector_store %arg8[%c0_22, %c0_23], %20 {strides = array<i32>} : memref<6x8xf32, #tpu.memory_space<vmem>>, vector<6x8xf32>,
    } else {
    }
    %c0 = arith.constant 0 : index
    %c0_1 = arith.constant 0 : index
    %3 = vector.load %arg8[%c0, %c0_1] : memref<6x8xf32, #tpu.memory_space<vmem>>, vector<6x8xf32>
    %c0_2 = arith.constant 0 : index
    %c0_3 = arith.constant 0 : index
    %c0_4 = arith.constant 0 : index
    %c0_5 = arith.constant 0 : index
    %4 = vector.load %arg3[%c0_2, %c0_3, %c0_4, %c0_5] : memref<1x1x7x16xbf16, #tpu.memory_space<vmem>>, vector<1x1x6x16xbf16>
    %5 = vector.shape_cast %4 : vector<1x1x6x16xbf16> to vector<6x16xbf16>
    %c0_6 = arith.constant 0 : index
    %c0_7 = arith.constant 0 : index
    %c0_8 = arith.constant 0 : index
    %c0_9 = arith.constant 0 : index
    %6 = vector.load %arg4[%c0_6, %c0_7, %c0_8, %c0_9] : memref<1x2x16x8xbf16, #tpu.memory_space<vmem>>, vector<1x1x16x8xbf16>
    %7 = vector.shape_cast %6 : vector<1x1x16x8xbf16> to vector<16x8xbf16>
    %cst = arith.constant dense<0.000000e+00> : vector<6x8xf32>
    %8 = tpu.matmul %5, %7, %cst {dimension_numbers = #tpu.dot_dimension_numbers<[1], [0], [0], [1], [0, 0, 1, 1], [], []>} : vector<6x16xbf16>, vector<16x8xbf16>, vector<6x8xf32> -> vector<6x8xf32>
    %9 = arith.addf %3, %8 : vector<6x8xf32>
    %c0_10 = arith.constant 0 : index
    %c0_11 = arith.constant 0 : index
    %c1 = arith.constant 1 : index
    %c0_12 = arith.constant 0 : index
    %10 = vector.load %arg3[%c0_10, %c0_11, %c1, %c0_12] : memref<1x1x7x16xbf16, #tpu.memory_space<vmem>>, vector<1x1x6x16xbf16>
    %11 = vector.shape_cast %10 : vector<1x1x6x16xbf16> to vector<6x16xbf16>
    %c0_13 = arith.constant 0 : index
    %c1_14 = arith.constant 1 : index
    %c0_15 = arith.constant 0 : index
    %c0_16 = arith.constant 0 : index
    %12 = vector.load %arg4[%c0_13, %c1_14, %c0_15, %c0_16] : memref<1x2x16x8xbf16, #tpu.memory_space<vmem>>, vector<1x1x16x8xbf16>
    %13 = vector.shape_cast %12 : vector<1x1x16x8xbf16> to vector<16x8xbf16>
    %cst_17 = arith.constant dense<0.000000e+00> : vector<6x8xf32>
    %14 = tpu.matmul %11, %13, %cst_17 {dimension_numbers = #tpu.dot_dimension_numbers<[1], [0], [0], [1], [0, 0, 1, 1], [], []>} : vector<6x16xbf16>, vector<16x8xbf16>, vector<6x8xf32> -> vector<6x8xf32>
    %15 = arith.addf %9, %14 : vector<6x8xf32>
    %c0_18 = arith.constant 0 : index
    %c0_19 = arith.constant 0 : index
    %16 = vector.load %arg8[%c0_18, %c0_19] : memref<6x8xf32, #tpu.memory_space<vmem>>, vector<6x8xf32>
    tpu.vector_store %arg8[%c0_18, %c0_19], %15 {strides = array<i32>} : memref<6x8xf32, #tpu.memory_space<vmem>>, vector<6x8xf32>,
    %c1_i32 = arith.constant 1 : i32
    %17 = arith.cmpi eq, %arg2, %c1_i32 : i32
    %18 = arith.extui %17 : i1 to i32
    %c0_i32_20 = arith.constant 0 : i32
    %19 = arith.cmpi ne, %18, %c0_i32_20 : i32
    scf.if %19 {
      %c0_21 = arith.constant 0 : index
      %c0_22 = arith.constant 0 : index
      %20 = vector.load %arg5[%c0_21, %c0_22] : memref<1x8xf32, #tpu.memory_space<vmem>>, vector<1x8xf32>
      %21 = vector.broadcast %20 : vector<1x8xf32> to vector<6x8xf32>
      %22 = arith.addf %15, %21 : vector<6x8xf32>
      %c0_23 = arith.constant 0 : index
      %c0_24 = arith.constant 0 : index
      %c0_25 = arith.constant 0 : index
      %c0_26 = arith.constant 0 : index
      %23 = vector.load %arg6[%c0_23, %c0_24, %c0_25, %c0_26] : memref<1x1x6x8xbf16, #tpu.memory_space<vmem>>, vector<1x1x6x8xbf16>
      %24 = vector.shape_cast %23 : vector<1x1x6x8xbf16> to vector<6x8xbf16>
      %25 = arith.extf %24 : vector<6x8xbf16> to vector<6x8xf32>
      %26 = arith.addf %22, %25 : vector<6x8xf32>
      %cst_27 = arith.constant 0.000000e+00 : f32
      %27 = vector.broadcast %cst_27 : f32 to vector<6x8xf32>
      %28 = arith.maximumf %26, %27 : vector<6x8xf32>
      %29 = arith.truncf %28 : vector<6x8xf32> to vector<6x8xbf16>
      %c0_28 = arith.constant 0 : index
      %c0_29 = arith.constant 0 : index
      %c0_30 = arith.constant 0 : index
      %c0_31 = arith.constant 0 : index
      %30 = vector.load %arg7[%c0_28, %c0_29, %c0_30, %c0_31] : memref<1x1x6x8xbf16, #tpu.memory_space<vmem>>, vector<1x1x6x8xbf16>
      %31 = vector.shape_cast %30 : vector<1x1x6x8xbf16> to vector<6x8xbf16>
      %32 = vector.shape_cast %29 : vector<6x8xbf16> to vector<1x1x6x8xbf16>
      tpu.vector_store %arg7[%c0_28, %c0_29, %c0_30, %c0_31], %32 {strides = array<i32>} : memref<1x1x6x8xbf16, #tpu.memory_space<vmem>>, vector<1x1x6x8xbf16>,
    } else {
    }
    return
  }
  func.func @transform_0(%arg0: i32, %arg1: i32, %arg2: i32) -> (i32, i32, i32, i32) {
    %c1_i32 = arith.constant 1 : i32
    %0 = arith.muli %c1_i32, %arg1 : i32
    %1 = arith.addi %0, %arg2 : i32
    %c0_i32 = arith.constant 0 : i32
    %c0_i32_0 = arith.constant 0 : i32
    %c0_i32_1 = arith.constant 0 : i32
    return %arg0, %1, %c0_i32, %c0_i32_0 : i32, i32, i32, i32
  }
  func.func @transform_1(%arg0: i32, %arg1: i32, %arg2: i32) -> (i32, i32, i32, i32) {
    %c0_i32 = arith.constant 0 : i32
    %c0_i32_0 = arith.constant 0 : i32
    %c0_i32_1 = arith.constant 0 : i32
    %c0_i32_2 = arith.constant 0 : i32
    return %arg2, %c0_i32, %c0_i32_0, %c0_i32_1 : i32, i32, i32, i32
  }
  func.func @transform_2(%arg0: i32, %arg1: i32, %arg2: i32) -> (i32, i32) {
    %c0_i32 = arith.constant 0 : i32
    %c0_i32_0 = arith.constant 0 : i32
    %c0_i32_1 = arith.constant 0 : i32
    return %c0_i32, %c0_i32_0 : i32, i32
  }
  func.func @transform_3(%arg0: i32, %arg1: i32, %arg2: i32) -> (i32, i32, i32, i32) {
    %c0_i32 = arith.constant 0 : i32
    %c0_i32_0 = arith.constant 0 : i32
    %c0_i32_1 = arith.constant 0 : i32
    return %arg0, %arg1, %c0_i32, %c0_i32_0 : i32, i32, i32, i32
  }
  func.func @transform_4(%arg0: i32, %arg1: i32, %arg2: i32) -> (i32, i32, i32, i32) {
    %c0_i32 = arith.constant 0 : i32
    %c0_i32_0 = arith.constant 0 : i32
    %c0_i32_1 = arith.constant 0 : i32
    return %arg0, %arg1, %c0_i32, %c0_i32_0 : i32, i32, i32, i32
  }
}

module attributes {stable_mosaic.version = 11 : i64} {
  func.func @kernel(%arg0: i32, %arg1: i32, %arg2: i32, %arg3: memref<1x1x6x16xbf16, #tpu.memory_space<vmem>>, %arg4: memref<1x2x16x8xbf16, #tpu.memory_space<vmem>>, %arg5: memref<1x8xf32, #tpu.memory_space<vmem>>, %arg6: memref<1x1x4x8xbf16, #tpu.memory_space<vmem>>, %arg7: memref<1x1x4x8xbf16, #tpu.memory_space<vmem>>, %arg8: memref<4x8xf32, #tpu.memory_space<vmem>>) attributes {dimension_semantics = [#tpu.dimension_semantics<parallel>, #tpu.dimension_semantics<parallel>, #tpu.dimension_semantics<arbitrary>], iteration_bounds = array<i64: 2, 2, 2>, scalar_prefetch = 0 : i64, scratch_operands = 1 : i64, tpu.core_type = #tpu.core_type<tc>, window_params = [{transform_indices = @transform_0, window_bounds = array<i64: 1, 1, 6, 16>}, {transform_indices = @transform_1, window_bounds = array<i64: 1, 2, 16, 8>}, {pipeline_mode = #tpu.pipeline_mode<synchronous>, transform_indices = @transform_2, window_bounds = array<i64: 1, 8>}, {transform_indices = @transform_3, window_bounds = array<i64: 1, 1, 4, 8>}, {transform_indices = @transform_4, window_bounds = array<i64: 1, 1, 4, 8>}]} {
    %c0_i32 = arith.constant 0 : i32
    %0 = arith.cmpi eq, %arg2, %c0_i32 : i32
    %1 = arith.extui %0 : i1 to i32
    %c0_i32_0 = arith.constant 0 : i32
    %2 = arith.cmpi ne, %1, %c0_i32_0 : i32
    scf.if %2 {
      %cst_20 = arith.constant 0.000000e+00 : f32
      %20 = vector.broadcast %cst_20 : f32 to vector<4x8xf32>
      %c0_21 = arith.constant 0 : index
      %c0_22 = arith.constant 0 : index
      %21 = vector.load %arg8[%c0_21, %c0_22] : memref<4x8xf32, #tpu.memory_space<vmem>>, vector<4x8xf32>
      tpu.vector_store %arg8[%c0_21, %c0_22], %20 {strides = array<i32>} : memref<4x8xf32, #tpu.memory_space<vmem>>, vector<4x8xf32>,
    } else {
    }
    %c0 = arith.constant 0 : index
    %c0_1 = arith.constant 0 : index
    %3 = vector.load %arg8[%c0, %c0_1] : memref<4x8xf32, #tpu.memory_space<vmem>>, vector<4x8xf32>
    %c0_2 = arith.constant 0 : index
    %c0_3 = arith.constant 0 : index
    %c0_4 = arith.constant 0 : index
    %c0_5 = arith.constant 0 : index
    %4 = vector.load %arg3[%c0_2, %c0_3, %c0_4, %c0_5] : memref<1x1x6x16xbf16, #tpu.memory_space<vmem>>, vector<1x1x4x16xbf16>
    %5 = vector.shape_cast %4 : vector<1x1x4x16xbf16> to vector<4x16xbf16>
    %c0_6 = arith.constant 0 : index
    %c0_7 = arith.constant 0 : index
    %c0_8 = arith.constant 0 : index
    %c0_9 = arith.constant 0 : index
    %6 = vector.load %arg4[%c0_6, %c0_7, %c0_8, %c0_9] : memref<1x2x16x8xbf16, #tpu.memory_space<vmem>>, vector<1x1x16x8xbf16>
    %7 = vector.shape_cast %6 : vector<1x1x16x8xbf16> to vector<16x8xbf16>
    %cst = arith.constant dense<0.000000e+00> : vector<4x8xf32>
    %8 = tpu.matmul %5, %7, %cst {dimension_numbers = #tpu.dot_dimension_numbers<[1], [0], [0], [1], [0, 0, 1, 1], [], []>} : vector<4x16xbf16>, vector<16x8xbf16>, vector<4x8xf32> -> vector<4x8xf32>
    %9 = arith.addf %3, %8 : vector<4x8xf32>
    %c0_10 = arith.constant 0 : index
    %c0_11 = arith.constant 0 : index
    %c2 = arith.constant 2 : index
    %c0_12 = arith.constant 0 : index
    %10 = vector.load %arg3[%c0_10, %c0_11, %c2, %c0_12] : memref<1x1x6x16xbf16, #tpu.memory_space<vmem>>, vector<1x1x4x16xbf16>
    %11 = vector.shape_cast %10 : vector<1x1x4x16xbf16> to vector<4x16xbf16>
    %c0_13 = arith.constant 0 : index
    %c1 = arith.constant 1 : index
    %c0_14 = arith.constant 0 : index
    %c0_15 = arith.constant 0 : index
    %12 = vector.load %arg4[%c0_13, %c1, %c0_14, %c0_15] : memref<1x2x16x8xbf16, #tpu.memory_space<vmem>>, vector<1x1x16x8xbf16>
    %13 = vector.shape_cast %12 : vector<1x1x16x8xbf16> to vector<16x8xbf16>
    %cst_16 = arith.constant dense<0.000000e+00> : vector<4x8xf32>
    %14 = tpu.matmul %11, %13, %cst_16 {dimension_numbers = #tpu.dot_dimension_numbers<[1], [0], [0], [1], [0, 0, 1, 1], [], []>} : vector<4x16xbf16>, vector<16x8xbf16>, vector<4x8xf32> -> vector<4x8xf32>
    %15 = arith.addf %9, %14 : vector<4x8xf32>
    %c0_17 = arith.constant 0 : index
    %c0_18 = arith.constant 0 : index
    %16 = vector.load %arg8[%c0_17, %c0_18] : memref<4x8xf32, #tpu.memory_space<vmem>>, vector<4x8xf32>
    tpu.vector_store %arg8[%c0_17, %c0_18], %15 {strides = array<i32>} : memref<4x8xf32, #tpu.memory_space<vmem>>, vector<4x8xf32>,
    %c1_i32 = arith.constant 1 : i32
    %17 = arith.cmpi eq, %arg2, %c1_i32 : i32
    %18 = arith.extui %17 : i1 to i32
    %c0_i32_19 = arith.constant 0 : i32
    %19 = arith.cmpi ne, %18, %c0_i32_19 : i32
    scf.if %19 {
      %c0_20 = arith.constant 0 : index
      %c0_21 = arith.constant 0 : index
      %20 = vector.load %arg5[%c0_20, %c0_21] : memref<1x8xf32, #tpu.memory_space<vmem>>, vector<1x8xf32>
      %21 = vector.broadcast %20 : vector<1x8xf32> to vector<4x8xf32>
      %22 = arith.addf %15, %21 : vector<4x8xf32>
      %c0_22 = arith.constant 0 : index
      %c0_23 = arith.constant 0 : index
      %c0_24 = arith.constant 0 : index
      %c0_25 = arith.constant 0 : index
      %23 = vector.load %arg6[%c0_22, %c0_23, %c0_24, %c0_25] : memref<1x1x4x8xbf16, #tpu.memory_space<vmem>>, vector<1x1x4x8xbf16>
      %24 = vector.shape_cast %23 : vector<1x1x4x8xbf16> to vector<4x8xbf16>
      %25 = arith.extf %24 : vector<4x8xbf16> to vector<4x8xf32>
      %26 = arith.addf %22, %25 : vector<4x8xf32>
      %cst_26 = arith.constant 0.000000e+00 : f32
      %27 = vector.broadcast %cst_26 : f32 to vector<4x8xf32>
      %28 = arith.maximumf %26, %27 : vector<4x8xf32>
      %29 = arith.truncf %28 : vector<4x8xf32> to vector<4x8xbf16>
      %c0_27 = arith.constant 0 : index
      %c0_28 = arith.constant 0 : index
      %c0_29 = arith.constant 0 : index
      %c0_30 = arith.constant 0 : index
      %30 = vector.load %arg7[%c0_27, %c0_28, %c0_29, %c0_30] : memref<1x1x4x8xbf16, #tpu.memory_space<vmem>>, vector<1x1x4x8xbf16>
      %31 = vector.shape_cast %30 : vector<1x1x4x8xbf16> to vector<4x8xbf16>
      %32 = vector.shape_cast %29 : vector<4x8xbf16> to vector<1x1x4x8xbf16>
      tpu.vector_store %arg7[%c0_27, %c0_28, %c0_29, %c0_30], %32 {strides = array<i32>} : memref<1x1x4x8xbf16, #tpu.memory_space<vmem>>, vector<1x1x4x8xbf16>,
    } else {
    }
    return
  }
  func.func @transform_0(%arg0: i32, %arg1: i32, %arg2: i32) -> (i32, i32, i32, i32) {
    %c1_i32 = arith.constant 1 : i32
    %0 = arith.muli %c1_i32, %arg1 : i32
    %1 = arith.addi %0, %arg2 : i32
    %c0_i32 = arith.constant 0 : i32
    %c0_i32_0 = arith.constant 0 : i32
    %c0_i32_1 = arith.constant 0 : i32
    return %arg0, %1, %c0_i32, %c0_i32_0 : i32, i32, i32, i32
  }
  func.func @transform_1(%arg0: i32, %arg1: i32, %arg2: i32) -> (i32, i32, i32, i32) {
    %c0_i32 = arith.constant 0 : i32
    %c0_i32_0 = arith.constant 0 : i32
    %c0_i32_1 = arith.constant 0 : i32
    %c0_i32_2 = arith.constant 0 : i32
    return %arg2, %c0_i32, %c0_i32_0, %c0_i32_1 : i32, i32, i32, i32
  }
  func.func @transform_2(%arg0: i32, %arg1: i32, %arg2: i32) -> (i32, i32) {
    %c0_i32 = arith.constant 0 : i32
    %c0_i32_0 = arith.constant 0 : i32
    %c0_i32_1 = arith.constant 0 : i32
    return %c0_i32, %c0_i32_0 : i32, i32
  }
  func.func @transform_3(%arg0: i32, %arg1: i32, %arg2: i32) -> (i32, i32, i32, i32) {
    %c0_i32 = arith.constant 0 : i32
    %c0_i32_0 = arith.constant 0 : i32
    %c0_i32_1 = arith.constant 0 : i32
    return %arg0, %arg1, %c0_i32, %c0_i32_0 : i32, i32, i32, i32
  }
  func.func @transform_4(%arg0: i32, %arg1: i32, %arg2: i32) -> (i32, i32, i32, i32) {
    %c0_i32 = arith.constant 0 : i32
    %c0_i32_0 = arith.constant 0 : i32
    %c0_i32_1 = arith.constant 0 : i32
    return %arg0, %arg1, %c0_i32, %c0_i32_0 : i32, i32, i32, i32
  }
}

module attributes {stable_mosaic.version = 11 : i64} {
  func.func @kernel(%arg0: i32, %arg1: i32, %arg2: i32, %arg3: memref<1x1x10x16xbf16, #tpu.memory_space<vmem>>, %arg4: memref<1x4x16x8xbf16, #tpu.memory_space<vmem>>, %arg5: memref<1x8xf32, #tpu.memory_space<vmem>>, %arg6: memref<1x1x6x8xbf16, #tpu.memory_space<vmem>>, %arg7: memref<1x1x6x8xbf16, #tpu.memory_space<vmem>>, %arg8: memref<6x8xf32, #tpu.memory_space<vmem>>) attributes {dimension_semantics = [#tpu.dimension_semantics<parallel>, #tpu.dimension_semantics<parallel>, #tpu.dimension_semantics<arbitrary>], iteration_bounds = array<i64: 2, 2, 2>, scalar_prefetch = 0 : i64, scratch_operands = 1 : i64, tpu.core_type = #tpu.core_type<tc>, window_params = [{transform_indices = @transform_0, window_bounds = array<i64: 1, 1, 10, 16>}, {transform_indices = @transform_1, window_bounds = array<i64: 1, 4, 16, 8>}, {pipeline_mode = #tpu.pipeline_mode<synchronous>, transform_indices = @transform_2, window_bounds = array<i64: 1, 8>}, {transform_indices = @transform_3, window_bounds = array<i64: 1, 1, 6, 8>}, {transform_indices = @transform_4, window_bounds = array<i64: 1, 1, 6, 8>}]} {
    %c0_i32 = arith.constant 0 : i32
    %0 = arith.cmpi eq, %arg2, %c0_i32 : i32
    %1 = arith.extui %0 : i1 to i32
    %c0_i32_0 = arith.constant 0 : i32
    %2 = arith.cmpi ne, %1, %c0_i32_0 : i32
    scf.if %2 {
      %cst_36 = arith.constant 0.000000e+00 : f32
      %32 = vector.broadcast %cst_36 : f32 to vector<6x8xf32>
      %c0_37 = arith.constant 0 : index
      %c0_38 = arith.constant 0 : index
      %33 = vector.load %arg8[%c0_37, %c0_38] : memref<6x8xf32, #tpu.memory_space<vmem>>, vector<6x8xf32>
      tpu.vector_store %arg8[%c0_37, %c0_38], %32 {strides = array<i32>} : memref<6x8xf32, #tpu.memory_space<vmem>>, vector<6x8xf32>,
    } else {
    }
    %c0 = arith.constant 0 : index
    %c0_1 = arith.constant 0 : index
    %3 = vector.load %arg8[%c0, %c0_1] : memref<6x8xf32, #tpu.memory_space<vmem>>, vector<6x8xf32>
    %c0_2 = arith.constant 0 : index
    %c0_3 = arith.constant 0 : index
    %c0_4 = arith.constant 0 : index
    %c0_5 = arith.constant 0 : index
    %4 = vector.load %arg3[%c0_2, %c0_3, %c0_4, %c0_5] : memref<1x1x10x16xbf16, #tpu.memory_space<vmem>>, vector<1x1x6x16xbf16>
    %5 = vector.shape_cast %4 : vector<1x1x6x16xbf16> to vector<6x16xbf16>
    %c0_6 = arith.constant 0 : index
    %c0_7 = arith.constant 0 : index
    %c0_8 = arith.constant 0 : index
    %c0_9 = arith.constant 0 : index
    %6 = vector.load %arg4[%c0_6, %c0_7, %c0_8, %c0_9] : memref<1x4x16x8xbf16, #tpu.memory_space<vmem>>, vector<1x1x16x8xbf16>
    %7 = vector.shape_cast %6 : vector<1x1x16x8xbf16> to vector<16x8xbf16>
    %cst = arith.constant dense<0.000000e+00> : vector<6x8xf32>
    %8 = tpu.matmul %5, %7, %cst {dimension_numbers = #tpu.dot_dimension_numbers<[1], [0], [0], [1], [0, 0, 1, 1], [], []>} : vector<6x16xbf16>, vector<16x8xbf16>, vector<6x8xf32> -> vector<6x8xf32>
    %9 = arith.addf %3, %8 : vector<6x8xf32>
    %c0_10 = arith.constant 0 : index
    %c0_11 = arith.constant 0 : index
    %c1 = arith.constant 1 : index
    %c0_12 = arith.constant 0 : index
    %10 = vector.load %arg3[%c0_10, %c0_11, %c1, %c0_12] : memref<1x1x10x16xbf16, #tpu.memory_space<vmem>>, vector<1x1x6x16xbf16>
    %11 = vector.shape_cast %10 : vector<1x1x6x16xbf16> to vector<6x16xbf16>
    %c0_13 = arith.constant 0 : index
    %c1_14 = arith.constant 1 : index
    %c0_15 = arith.constant 0 : index
    %c0_16 = arith.constant 0 : index
    %12 = vector.load %arg4[%c0_13, %c1_14, %c0_15, %c0_16] : memref<1x4x16x8xbf16, #tpu.memory_space<vmem>>, vector<1x1x16x8xbf16>
    %13 = vector.shape_cast %12 : vector<1x1x16x8xbf16> to vector<16x8xbf16>
    %cst_17 = arith.constant dense<0.000000e+00> : vector<6x8xf32>
    %14 = tpu.matmul %11, %13, %cst_17 {dimension_numbers = #tpu.dot_dimension_numbers<[1], [0], [0], [1], [0, 0, 1, 1], [], []>} : vector<6x16xbf16>, vector<16x8xbf16>, vector<6x8xf32> -> vector<6x8xf32>
    %15 = arith.addf %9, %14 : vector<6x8xf32>
    %c0_18 = arith.constant 0 : index
    %c0_19 = arith.constant 0 : index
    %c3 = arith.constant 3 : index
    %c0_20 = arith.constant 0 : index
    %16 = vector.load %arg3[%c0_18, %c0_19, %c3, %c0_20] : memref<1x1x10x16xbf16, #tpu.memory_space<vmem>>, vector<1x1x6x16xbf16>
    %17 = vector.shape_cast %16 : vector<1x1x6x16xbf16> to vector<6x16xbf16>
    %c0_21 = arith.constant 0 : index
    %c2 = arith.constant 2 : index
    %c0_22 = arith.constant 0 : index
    %c0_23 = arith.constant 0 : index
    %18 = vector.load %arg4[%c0_21, %c2, %c0_22, %c0_23] : memref<1x4x16x8xbf16, #tpu.memory_space<vmem>>, vector<1x1x16x8xbf16>
    %19 = vector.shape_cast %18 : vector<1x1x16x8xbf16> to vector<16x8xbf16>
    %cst_24 = arith.constant dense<0.000000e+00> : vector<6x8xf32>
    %20 = tpu.matmul %17, %19, %cst_24 {dimension_numbers = #tpu.dot_dimension_numbers<[1], [0], [0], [1], [0, 0, 1, 1], [], []>} : vector<6x16xbf16>, vector<16x8xbf16>, vector<6x8xf32> -> vector<6x8xf32>
    %21 = arith.addf %15, %20 : vector<6x8xf32>
    %c0_25 = arith.constant 0 : index
    %c0_26 = arith.constant 0 : index
    %c4 = arith.constant 4 : index
    %c0_27 = arith.constant 0 : index
    %22 = vector.load %arg3[%c0_25, %c0_26, %c4, %c0_27] : memref<1x1x10x16xbf16, #tpu.memory_space<vmem>>, vector<1x1x6x16xbf16>
    %23 = vector.shape_cast %22 : vector<1x1x6x16xbf16> to vector<6x16xbf16>
    %c0_28 = arith.constant 0 : index
    %c3_29 = arith.constant 3 : index
    %c0_30 = arith.constant 0 : index
    %c0_31 = arith.constant 0 : index
    %24 = vector.load %arg4[%c0_28, %c3_29, %c0_30, %c0_31] : memref<1x4x16x8xbf16, #tpu.memory_space<vmem>>, vector<1x1x16x8xbf16>
    %25 = vector.shape_cast %24 : vector<1x1x16x8xbf16> to vector<16x8xbf16>
    %cst_32 = arith.constant dense<0.000000e+00> : vector<6x8xf32>
    %26 = tpu.matmul %23, %25, %cst_32 {dimension_numbers = #tpu.dot_dimension_numbers<[1], [0], [0], [1], [0, 0, 1, 1], [], []>} : vector<6x16xbf16>, vector<16x8xbf16>, vector<6x8xf32> -> vector<6x8xf32>
    %27 = arith.addf %21, %26 : vector<6x8xf32>
    %c0_33 = arith.constant 0 : index
    %c0_34 = arith.constant 0 : index
    %28 = vector.load %arg8[%c0_33, %c0_34] : memref<6x8xf32, #tpu.memory_space<vmem>>, vector<6x8xf32>
    tpu.vector_store %arg8[%c0_33, %c0_34], %27 {strides = array<i32>} : memref<6x8xf32, #tpu.memory_space<vmem>>, vector<6x8xf32>,
    %c1_i32 = arith.constant 1 : i32
    %29 = arith.cmpi eq, %arg2, %c1_i32 : i32
    %30 = arith.extui %29 : i1 to i32
    %c0_i32_35 = arith.constant 0 : i32
    %31 = arith.cmpi ne, %30, %c0_i32_35 : i32
    scf.if %31 {
      %c0_36 = arith.constant 0 : index
      %c0_37 = arith.constant 0 : index
      %32 = vector.load %arg5[%c0_36, %c0_37] : memref<1x8xf32, #tpu.memory_space<vmem>>, vector<1x8xf32>
      %33 = vector.broadcast %32 : vector<1x8xf32> to vector<6x8xf32>
      %34 = arith.addf %27, %33 : vector<6x8xf32>
      %c0_38 = arith.constant 0 : index
      %c0_39 = arith.constant 0 : index
      %c0_40 = arith.constant 0 : index
      %c0_41 = arith.constant 0 : index
      %35 = vector.load %arg6[%c0_38, %c0_39, %c0_40, %c0_41] : memref<1x1x6x8xbf16, #tpu.memory_space<vmem>>, vector<1x1x6x8xbf16>
      %36 = vector.shape_cast %35 : vector<1x1x6x8xbf16> to vector<6x8xbf16>
      %37 = arith.extf %36 : vector<6x8xbf16> to vector<6x8xf32>
      %38 = arith.addf %34, %37 : vector<6x8xf32>
      %cst_42 = arith.constant 0.000000e+00 : f32
      %39 = vector.broadcast %cst_42 : f32 to vector<6x8xf32>
      %40 = arith.maximumf %38, %39 : vector<6x8xf32>
      %41 = arith.truncf %40 : vector<6x8xf32> to vector<6x8xbf16>
      %c0_43 = arith.constant 0 : index
      %c0_44 = arith.constant 0 : index
      %c0_45 = arith.constant 0 : index
      %c0_46 = arith.constant 0 : index
      %42 = vector.load %arg7[%c0_43, %c0_44, %c0_45, %c0_46] : memref<1x1x6x8xbf16, #tpu.memory_space<vmem>>, vector<1x1x6x8xbf16>
      %43 = vector.shape_cast %42 : vector<1x1x6x8xbf16> to vector<6x8xbf16>
      %44 = vector.shape_cast %41 : vector<6x8xbf16> to vector<1x1x6x8xbf16>
      tpu.vector_store %arg7[%c0_43, %c0_44, %c0_45, %c0_46], %44 {strides = array<i32>} : memref<1x1x6x8xbf16, #tpu.memory_space<vmem>>, vector<1x1x6x8xbf16>,
    } else {
    }
    return
  }
  func.func @transform_0(%arg0: i32, %arg1: i32, %arg2: i32) -> (i32, i32, i32, i32) {
    %c1_i32 = arith.constant 1 : i32
    %0 = arith.muli %c1_i32, %arg1 : i32
    %1 = arith.addi %0, %arg2 : i32
    %c0_i32 = arith.constant 0 : i32
    %c0_i32_0 = arith.constant 0 : i32
    %c0_i32_1 = arith.constant 0 : i32
    return %arg0, %1, %c0_i32, %c0_i32_0 : i32, i32, i32, i32
  }
  func.func @transform_1(%arg0: i32, %arg1: i32, %arg2: i32) -> (i32, i32, i32, i32) {
    %c0_i32 = arith.constant 0 : i32
    %c0_i32_0 = arith.constant 0 : i32
    %c0_i32_1 = arith.constant 0 : i32
    %c0_i32_2 = arith.constant 0 : i32
    return %arg2, %c0_i32, %c0_i32_0, %c0_i32_1 : i32, i32, i32, i32
  }
  func.func @transform_2(%arg0: i32, %arg1: i32, %arg2: i32) -> (i32, i32) {
    %c0_i32 = arith.constant 0 : i32
    %c0_i32_0 = arith.constant 0 : i32
    %c0_i32_1 = arith.constant 0 : i32
    return %c0_i32, %c0_i32_0 : i32, i32
  }
  func.func @transform_3(%arg0: i32, %arg1: i32, %arg2: i32) -> (i32, i32, i32, i32) {
    %c0_i32 = arith.constant 0 : i32
    %c0_i32_0 = arith.constant 0 : i32
    %c0_i32_1 = arith.constant 0 : i32
    return %arg0, %arg1, %c0_i32, %c0_i32_0 : i32, i32, i32, i32
  }
  func.func @transform_4(%arg0: i32, %arg1: i32, %arg2: i32) -> (i32, i32, i32, i32) {
    %c0_i32 = arith.constant 0 : i32
    %c0_i32_0 = arith.constant 0 : i32
    %c0_i32_1 = arith.constant 0 : i32
    return %arg0, %arg1, %c0_i32, %c0_i32_0 : i32, i32, i32, i32
  }
}

module attributes {stable_mosaic.version = 11 : i64} {
  func.func @kernel(%arg0: i32, %arg1: i32, %arg2: i32, %arg3: memref<1x1x64x4xbf16, #tpu.memory_space<vmem>>, %arg4: memref<1x1x4x4xbf16, #tpu.memory_space<vmem>>, %arg5: memref<1x4xf32, #tpu.memory_space<vmem>>, %arg6: memref<1x1x64x4xbf16, #tpu.memory_space<vmem>>, %arg7: memref<64x4xf32, #tpu.memory_space<vmem>>) attributes {dimension_semantics = [#tpu.dimension_semantics<parallel>, #tpu.dimension_semantics<parallel>, #tpu.dimension_semantics<arbitrary>], iteration_bounds = array<i64: 2, 8, 1>, scalar_prefetch = 0 : i64, scratch_operands = 1 : i64, tpu.core_type = #tpu.core_type<tc>, window_params = [{transform_indices = @transform_0, window_bounds = array<i64: 1, 1, 64, 4>}, {transform_indices = @transform_1, window_bounds = array<i64: 1, 1, 4, 4>}, {pipeline_mode = #tpu.pipeline_mode<synchronous>, transform_indices = @transform_2, window_bounds = array<i64: 1, 4>}, {transform_indices = @transform_3, window_bounds = array<i64: 1, 1, 64, 4>}]} {
    %c0_i32 = arith.constant 0 : i32
    %0 = arith.cmpi eq, %arg2, %c0_i32 : i32
    %1 = arith.extui %0 : i1 to i32
    %c0_i32_0 = arith.constant 0 : i32
    %2 = arith.cmpi ne, %1, %c0_i32_0 : i32
    scf.if %2 {
      %cst_14 = arith.constant 0.000000e+00 : f32
      %14 = vector.broadcast %cst_14 : f32 to vector<64x4xf32>
      %c0_15 = arith.constant 0 : index
      %c0_16 = arith.constant 0 : index
      %15 = vector.load %arg7[%c0_15, %c0_16] : memref<64x4xf32, #tpu.memory_space<vmem>>, vector<64x4xf32>
      tpu.vector_store %arg7[%c0_15, %c0_16], %14 {strides = array<i32>} : memref<64x4xf32, #tpu.memory_space<vmem>>, vector<64x4xf32>,
    } else {
    }
    %c0 = arith.constant 0 : index
    %c0_1 = arith.constant 0 : index
    %3 = vector.load %arg7[%c0, %c0_1] : memref<64x4xf32, #tpu.memory_space<vmem>>, vector<64x4xf32>
    %c0_2 = arith.constant 0 : index
    %c0_3 = arith.constant 0 : index
    %c0_4 = arith.constant 0 : index
    %c0_5 = arith.constant 0 : index
    %4 = vector.load %arg3[%c0_2, %c0_3, %c0_4, %c0_5] : memref<1x1x64x4xbf16, #tpu.memory_space<vmem>>, vector<1x1x64x4xbf16>
    %5 = vector.shape_cast %4 : vector<1x1x64x4xbf16> to vector<64x4xbf16>
    %c0_6 = arith.constant 0 : index
    %c0_7 = arith.constant 0 : index
    %c0_8 = arith.constant 0 : index
    %c0_9 = arith.constant 0 : index
    %6 = vector.load %arg4[%c0_6, %c0_7, %c0_8, %c0_9] : memref<1x1x4x4xbf16, #tpu.memory_space<vmem>>, vector<1x1x4x4xbf16>
    %7 = vector.shape_cast %6 : vector<1x1x4x4xbf16> to vector<4x4xbf16>
    %cst = arith.constant dense<0.000000e+00> : vector<64x4xf32>
    %8 = tpu.matmul %5, %7, %cst {dimension_numbers = #tpu.dot_dimension_numbers<[1], [0], [0], [1], [0, 0, 1, 1], [], []>} : vector<64x4xbf16>, vector<4x4xbf16>, vector<64x4xf32> -> vector<64x4xf32>
    %9 = arith.addf %3, %8 : vector<64x4xf32>
    %c0_10 = arith.constant 0 : index
    %c0_11 = arith.constant 0 : index
    %10 = vector.load %arg7[%c0_10, %c0_11] : memref<64x4xf32, #tpu.memory_space<vmem>>, vector<64x4xf32>
    tpu.vector_store %arg7[%c0_10, %c0_11], %9 {strides = array<i32>} : memref<64x4xf32, #tpu.memory_space<vmem>>, vector<64x4xf32>,
    %c0_i32_12 = arith.constant 0 : i32
    %11 = arith.cmpi eq, %arg2, %c0_i32_12 : i32
    %12 = arith.extui %11 : i1 to i32
    %c0_i32_13 = arith.constant 0 : i32
    %13 = arith.cmpi ne, %12, %c0_i32_13 : i32
    scf.if %13 {
      %c0_14 = arith.constant 0 : index
      %c0_15 = arith.constant 0 : index
      %14 = vector.load %arg5[%c0_14, %c0_15] : memref<1x4xf32, #tpu.memory_space<vmem>>, vector<1x4xf32>
      %15 = vector.broadcast %14 : vector<1x4xf32> to vector<64x4xf32>
      %16 = arith.addf %9, %15 : vector<64x4xf32>
      %17 = arith.truncf %16 : vector<64x4xf32> to vector<64x4xbf16>
      %c0_16 = arith.constant 0 : index
      %c0_17 = arith.constant 0 : index
      %c0_18 = arith.constant 0 : index
      %c0_19 = arith.constant 0 : index
      %18 = vector.load %arg6[%c0_16, %c0_17, %c0_18, %c0_19] : memref<1x1x64x4xbf16, #tpu.memory_space<vmem>>, vector<1x1x64x4xbf16>
      %19 = vector.shape_cast %18 : vector<1x1x64x4xbf16> to vector<64x4xbf16>
      %20 = vector.shape_cast %17 : vector<64x4xbf16> to vector<1x1x64x4xbf16>
      tpu.vector_store %arg6[%c0_16, %c0_17, %c0_18, %c0_19], %20 {strides = array<i32>} : memref<1x1x64x4xbf16, #tpu.memory_space<vmem>>, vector<1x1x64x4xbf16>,
    } else {
    }
    return
  }
  func.func @transform_0(%arg0: i32, %arg1: i32, %arg2: i32) -> (i32, i32, i32, i32) {
    %c1_i32 = arith.constant 1 : i32
    %0 = arith.muli %c1_i32, %arg1 : i32
    %1 = arith.addi %0, %arg2 : i32
    %c0_i32 = arith.constant 0 : i32
    %c0_i32_0 = arith.constant 0 : i32
    %c0_i32_1 = arith.constant 0 : i32
    return %arg0, %1, %c0_i32, %c0_i32_0 : i32, i32, i32, i32
  }
  func.func @transform_1(%arg0: i32, %arg1: i32, %arg2: i32) -> (i32, i32, i32, i32) {
    %c0_i32 = arith.constant 0 : i32
    %c0_i32_0 = arith.constant 0 : i32
    %c0_i32_1 = arith.constant 0 : i32
    %c0_i32_2 = arith.constant 0 : i32
    return %arg2, %c0_i32, %c0_i32_0, %c0_i32_1 : i32, i32, i32, i32
  }
  func.func @transform_2(%arg0: i32, %arg1: i32, %arg2: i32) -> (i32, i32) {
    %c0_i32 = arith.constant 0 : i32
    %c0_i32_0 = arith.constant 0 : i32
    %c0_i32_1 = arith.constant 0 : i32
    return %c0_i32, %c0_i32_0 : i32, i32
  }
  func.func @transform_3(%arg0: i32, %arg1: i32, %arg2: i32) -> (i32, i32, i32, i32) {
    %c0_i32 = arith.constant 0 : i32
    %c0_i32_0 = arith.constant 0 : i32
    %c0_i32_1 = arith.constant 0 : i32
    return %arg0, %arg1, %c0_i32, %c0_i32_0 : i32, i32, i32, i32
  }
}

module attributes {stable_mosaic.version = 11 : i64} {
  func.func @kernel(%arg0: i32, %arg1: i32, %arg2: i32, %arg3: memref<1x1x16x8xbf16, #tpu.memory_space<vmem>>, %arg4: memref<1x1x8x4xbf16, #tpu.memory_space<vmem>>, %arg5: memref<1x4xf32, #tpu.memory_space<vmem>>, %arg6: memref<1x1x16x4xbf16, #tpu.memory_space<vmem>>, %arg7: memref<1x1x16x4xbf16, #tpu.memory_space<vmem>>, %arg8: memref<16x4xf32, #tpu.memory_space<vmem>>) attributes {dimension_semantics = [#tpu.dimension_semantics<parallel>, #tpu.dimension_semantics<parallel>, #tpu.dimension_semantics<arbitrary>], iteration_bounds = array<i64: 2, 4, 1>, scalar_prefetch = 0 : i64, scratch_operands = 1 : i64, tpu.core_type = #tpu.core_type<tc>, window_params = [{transform_indices = @transform_0, window_bounds = array<i64: 1, 1, 16, 8>}, {transform_indices = @transform_1, window_bounds = array<i64: 1, 1, 8, 4>}, {pipeline_mode = #tpu.pipeline_mode<synchronous>, transform_indices = @transform_2, window_bounds = array<i64: 1, 4>}, {transform_indices = @transform_3, window_bounds = array<i64: 1, 1, 16, 4>}, {transform_indices = @transform_4, window_bounds = array<i64: 1, 1, 16, 4>}]} {
    %c0_i32 = arith.constant 0 : i32
    %0 = arith.cmpi eq, %arg2, %c0_i32 : i32
    %1 = arith.extui %0 : i1 to i32
    %c0_i32_0 = arith.constant 0 : i32
    %2 = arith.cmpi ne, %1, %c0_i32_0 : i32
    scf.if %2 {
      %cst_14 = arith.constant 0.000000e+00 : f32
      %14 = vector.broadcast %cst_14 : f32 to vector<16x4xf32>
      %c0_15 = arith.constant 0 : index
      %c0_16 = arith.constant 0 : index
      %15 = vector.load %arg8[%c0_15, %c0_16] : memref<16x4xf32, #tpu.memory_space<vmem>>, vector<16x4xf32>
      tpu.vector_store %arg8[%c0_15, %c0_16], %14 {strides = array<i32>} : memref<16x4xf32, #tpu.memory_space<vmem>>, vector<16x4xf32>,
    } else {
    }
    %c0 = arith.constant 0 : index
    %c0_1 = arith.constant 0 : index
    %3 = vector.load %arg8[%c0, %c0_1] : memref<16x4xf32, #tpu.memory_space<vmem>>, vector<16x4xf32>
    %c0_2 = arith.constant 0 : index
    %c0_3 = arith.constant 0 : index
    %c0_4 = arith.constant 0 : index
    %c0_5 = arith.constant 0 : index
    %4 = vector.load %arg3[%c0_2, %c0_3, %c0_4, %c0_5] : memref<1x1x16x8xbf16, #tpu.memory_space<vmem>>, vector<1x1x16x8xbf16>
    %5 = vector.shape_cast %4 : vector<1x1x16x8xbf16> to vector<16x8xbf16>
    %c0_6 = arith.constant 0 : index
    %c0_7 = arith.constant 0 : index
    %c0_8 = arith.constant 0 : index
    %c0_9 = arith.constant 0 : index
    %6 = vector.load %arg4[%c0_6, %c0_7, %c0_8, %c0_9] : memref<1x1x8x4xbf16, #tpu.memory_space<vmem>>, vector<1x1x8x4xbf16>
    %7 = vector.shape_cast %6 : vector<1x1x8x4xbf16> to vector<8x4xbf16>
    %cst = arith.constant dense<0.000000e+00> : vector<16x4xf32>
    %8 = tpu.matmul %5, %7, %cst {dimension_numbers = #tpu.dot_dimension_numbers<[1], [0], [0], [1], [0, 0, 1, 1], [], []>} : vector<16x8xbf16>, vector<8x4xbf16>, vector<16x4xf32> -> vector<16x4xf32>
    %9 = arith.addf %3, %8 : vector<16x4xf32>
    %c0_10 = arith.constant 0 : index
    %c0_11 = arith.constant 0 : index
    %10 = vector.load %arg8[%c0_10, %c0_11] : memref<16x4xf32, #tpu.memory_space<vmem>>, vector<16x4xf32>
    tpu.vector_store %arg8[%c0_10, %c0_11], %9 {strides = array<i32>} : memref<16x4xf32, #tpu.memory_space<vmem>>, vector<16x4xf32>,
    %c0_i32_12 = arith.constant 0 : i32
    %11 = arith.cmpi eq, %arg2, %c0_i32_12 : i32
    %12 = arith.extui %11 : i1 to i32
    %c0_i32_13 = arith.constant 0 : i32
    %13 = arith.cmpi ne, %12, %c0_i32_13 : i32
    scf.if %13 {
      %c0_14 = arith.constant 0 : index
      %c0_15 = arith.constant 0 : index
      %14 = vector.load %arg5[%c0_14, %c0_15] : memref<1x4xf32, #tpu.memory_space<vmem>>, vector<1x4xf32>
      %15 = vector.broadcast %14 : vector<1x4xf32> to vector<16x4xf32>
      %16 = arith.addf %9, %15 : vector<16x4xf32>
      %c0_16 = arith.constant 0 : index
      %c0_17 = arith.constant 0 : index
      %c0_18 = arith.constant 0 : index
      %c0_19 = arith.constant 0 : index
      %17 = vector.load %arg6[%c0_16, %c0_17, %c0_18, %c0_19] : memref<1x1x16x4xbf16, #tpu.memory_space<vmem>>, vector<1x1x16x4xbf16>
      %18 = vector.shape_cast %17 : vector<1x1x16x4xbf16> to vector<16x4xbf16>
      %19 = arith.extf %18 : vector<16x4xbf16> to vector<16x4xf32>
      %20 = arith.addf %16, %19 : vector<16x4xf32>
      %cst_20 = arith.constant 0.000000e+00 : f32
      %21 = vector.broadcast %cst_20 : f32 to vector<16x4xf32>
      %22 = arith.maximumf %20, %21 : vector<16x4xf32>
      %23 = arith.truncf %22 : vector<16x4xf32> to vector<16x4xbf16>
      %c0_21 = arith.constant 0 : index
      %c0_22 = arith.constant 0 : index
      %c0_23 = arith.constant 0 : index
      %c0_24 = arith.constant 0 : index
      %24 = vector.load %arg7[%c0_21, %c0_22, %c0_23, %c0_24] : memref<1x1x16x4xbf16, #tpu.memory_space<vmem>>, vector<1x1x16x4xbf16>
      %25 = vector.shape_cast %24 : vector<1x1x16x4xbf16> to vector<16x4xbf16>
      %26 = vector.shape_cast %23 : vector<16x4xbf16> to vector<1x1x16x4xbf16>
      tpu.vector_store %arg7[%c0_21, %c0_22, %c0_23, %c0_24], %26 {strides = array<i32>} : memref<1x1x16x4xbf16, #tpu.memory_space<vmem>>, vector<1x1x16x4xbf16>,
    } else {
    }
    return
  }
  func.func @transform_0(%arg0: i32, %arg1: i32, %arg2: i32) -> (i32, i32, i32, i32) {
    %c1_i32 = arith.constant 1 : i32
    %0 = arith.muli %c1_i32, %arg1 : i32
    %1 = arith.addi %0, %arg2 : i32
    %c0_i32 = arith.constant 0 : i32
    %c0_i32_0 = arith.constant 0 : i32
    %c0_i32_1 = arith.constant 0 : i32
    return %arg0, %1, %c0_i32, %c0_i32_0 : i32, i32, i32, i32
  }
  func.func @transform_1(%arg0: i32, %arg1: i32, %arg2: i32) -> (i32, i32, i32, i32) {
    %c0_i32 = arith.constant 0 : i32
    %c0_i32_0 = arith.constant 0 : i32
    %c0_i32_1 = arith.constant 0 : i32
    %c0_i32_2 = arith.constant 0 : i32
    return %arg2, %c0_i32, %c0_i32_0, %c0_i32_1 : i32, i32, i32, i32
  }
  func.func @transform_2(%arg0: i32, %arg1: i32, %arg2: i32) -> (i32, i32) {
    %c0_i32 = arith.constant 0 : i32
    %c0_i32_0 = arith.constant 0 : i32
    %c0_i32_1 = arith.constant 0 : i32
    return %c0_i32, %c0_i32_0 : i32, i32
  }
  func.func @transform_3(%arg0: i32, %arg1: i32, %arg2: i32) -> (i32, i32, i32, i32) {
    %c0_i32 = arith.constant 0 : i32
    %c0_i32_0 = arith.constant 0 : i32
    %c0_i32_1 = arith.constant 0 : i32
    return %arg0, %arg1, %c0_i32, %c0_i32_0 : i32, i32, i32, i32
  }
  func.func @transform_4(%arg0: i32, %arg1: i32, %arg2: i32) -> (i32, i32, i32, i32) {
    %c0_i32 = arith.constant 0 : i32
    %c0_i32_0 = arith.constant 0 : i32
    %c0_i32_1 = arith.constant 0 : i32
    return %arg0, %arg1, %c0_i32, %c0_i32_0 : i32, i32, i32, i32
  }
}

module attributes {stable_mosaic.version = 11 : i64} {
  func.func @kernel(%arg0: i32, %arg1: i32, %arg2: i32, %arg3: memref<1x1x21x8xbf16, #tpu.memory_space<vmem>>, %arg4: memref<1x2x8x4xbf16, #tpu.memory_space<vmem>>, %arg5: memref<1x4xf32, #tpu.memory_space<vmem>>, %arg6: memref<1x1x20x4xbf16, #tpu.memory_space<vmem>>, %arg7: memref<1x1x20x4xbf16, #tpu.memory_space<vmem>>, %arg8: memref<20x4xf32, #tpu.memory_space<vmem>>) attributes {dimension_semantics = [#tpu.dimension_semantics<parallel>, #tpu.dimension_semantics<parallel>, #tpu.dimension_semantics<arbitrary>], iteration_bounds = array<i64: 2, 4, 1>, scalar_prefetch = 0 : i64, scratch_operands = 1 : i64, tpu.core_type = #tpu.core_type<tc>, window_params = [{transform_indices = @transform_0, window_bounds = array<i64: 1, 1, 21, 8>}, {transform_indices = @transform_1, window_bounds = array<i64: 1, 2, 8, 4>}, {pipeline_mode = #tpu.pipeline_mode<synchronous>, transform_indices = @transform_2, window_bounds = array<i64: 1, 4>}, {transform_indices = @transform_3, window_bounds = array<i64: 1, 1, 20, 4>}, {transform_indices = @transform_4, window_bounds = array<i64: 1, 1, 20, 4>}]} {
    %c0_i32 = arith.constant 0 : i32
    %0 = arith.cmpi eq, %arg2, %c0_i32 : i32
    %1 = arith.extui %0 : i1 to i32
    %c0_i32_0 = arith.constant 0 : i32
    %2 = arith.cmpi ne, %1, %c0_i32_0 : i32
    scf.if %2 {
      %cst_22 = arith.constant 0.000000e+00 : f32
      %20 = vector.broadcast %cst_22 : f32 to vector<20x4xf32>
      %c0_23 = arith.constant 0 : index
      %c0_24 = arith.constant 0 : index
      %21 = vector.load %arg8[%c0_23, %c0_24] : memref<20x4xf32, #tpu.memory_space<vmem>>, vector<20x4xf32>
      tpu.vector_store %arg8[%c0_23, %c0_24], %20 {strides = array<i32>} : memref<20x4xf32, #tpu.memory_space<vmem>>, vector<20x4xf32>,
    } else {
    }
    %c0 = arith.constant 0 : index
    %c0_1 = arith.constant 0 : index
    %3 = vector.load %arg8[%c0, %c0_1] : memref<20x4xf32, #tpu.memory_space<vmem>>, vector<20x4xf32>
    %c0_2 = arith.constant 0 : index
    %c0_3 = arith.constant 0 : index
    %c0_4 = arith.constant 0 : index
    %c0_5 = arith.constant 0 : index
    %4 = vector.load %arg3[%c0_2, %c0_3, %c0_4, %c0_5] : memref<1x1x21x8xbf16, #tpu.memory_space<vmem>>, vector<1x1x20x8xbf16>
    %5 = vector.shape_cast %4 : vector<1x1x20x8xbf16> to vector<20x8xbf16>
    %c0_6 = arith.constant 0 : index
    %c0_7 = arith.constant 0 : index
    %c0_8 = arith.constant 0 : index
    %c0_9 = arith.constant 0 : index
    %6 = vector.load %arg4[%c0_6, %c0_7, %c0_8, %c0_9] : memref<1x2x8x4xbf16, #tpu.memory_space<vmem>>, vector<1x1x8x4xbf16>
    %7 = vector.shape_cast %6 : vector<1x1x8x4xbf16> to vector<8x4xbf16>
    %cst = arith.constant dense<0.000000e+00> : vector<20x4xf32>
    %8 = tpu.matmul %5, %7, %cst {dimension_numbers = #tpu.dot_dimension_numbers<[1], [0], [0], [1], [0, 0, 1, 1], [], []>} : vector<20x8xbf16>, vector<8x4xbf16>, vector<20x4xf32> -> vector<20x4xf32>
    %9 = arith.addf %3, %8 : vector<20x4xf32>
    %c0_10 = arith.constant 0 : index
    %c0_11 = arith.constant 0 : index
    %c1 = arith.constant 1 : index
    %c0_12 = arith.constant 0 : index
    %10 = vector.load %arg3[%c0_10, %c0_11, %c1, %c0_12] : memref<1x1x21x8xbf16, #tpu.memory_space<vmem>>, vector<1x1x20x8xbf16>
    %11 = vector.shape_cast %10 : vector<1x1x20x8xbf16> to vector<20x8xbf16>
    %c0_13 = arith.constant 0 : index
    %c1_14 = arith.constant 1 : index
    %c0_15 = arith.constant 0 : index
    %c0_16 = arith.constant 0 : index
    %12 = vector.load %arg4[%c0_13, %c1_14, %c0_15, %c0_16] : memref<1x2x8x4xbf16, #tpu.memory_space<vmem>>, vector<1x1x8x4xbf16>
    %13 = vector.shape_cast %12 : vector<1x1x8x4xbf16> to vector<8x4xbf16>
    %cst_17 = arith.constant dense<0.000000e+00> : vector<20x4xf32>
    %14 = tpu.matmul %11, %13, %cst_17 {dimension_numbers = #tpu.dot_dimension_numbers<[1], [0], [0], [1], [0, 0, 1, 1], [], []>} : vector<20x8xbf16>, vector<8x4xbf16>, vector<20x4xf32> -> vector<20x4xf32>
    %15 = arith.addf %9, %14 : vector<20x4xf32>
    %c0_18 = arith.constant 0 : index
    %c0_19 = arith.constant 0 : index
    %16 = vector.load %arg8[%c0_18, %c0_19] : memref<20x4xf32, #tpu.memory_space<vmem>>, vector<20x4xf32>
    tpu.vector_store %arg8[%c0_18, %c0_19], %15 {strides = array<i32>} : memref<20x4xf32, #tpu.memory_space<vmem>>, vector<20x4xf32>,
    %c0_i32_20 = arith.constant 0 : i32
    %17 = arith.cmpi eq, %arg2, %c0_i32_20 : i32
    %18 = arith.extui %17 : i1 to i32
    %c0_i32_21 = arith.constant 0 : i32
    %19 = arith.cmpi ne, %18, %c0_i32_21 : i32
    scf.if %19 {
      %c0_22 = arith.constant 0 : index
      %c0_23 = arith.constant 0 : index
      %20 = vector.load %arg5[%c0_22, %c0_23] : memref<1x4xf32, #tpu.memory_space<vmem>>, vector<1x4xf32>
      %21 = vector.broadcast %20 : vector<1x4xf32> to vector<20x4xf32>
      %22 = arith.addf %15, %21 : vector<20x4xf32>
      %c0_24 = arith.constant 0 : index
      %c0_25 = arith.constant 0 : index
      %c0_26 = arith.constant 0 : index
      %c0_27 = arith.constant 0 : index
      %23 = vector.load %arg6[%c0_24, %c0_25, %c0_26, %c0_27] : memref<1x1x20x4xbf16, #tpu.memory_space<vmem>>, vector<1x1x20x4xbf16>
      %24 = vector.shape_cast %23 : vector<1x1x20x4xbf16> to vector<20x4xbf16>
      %25 = arith.extf %24 : vector<20x4xbf16> to vector<20x4xf32>
      %26 = arith.addf %22, %25 : vector<20x4xf32>
      %cst_28 = arith.constant 0.000000e+00 : f32
      %27 = vector.broadcast %cst_28 : f32 to vector<20x4xf32>
      %28 = arith.maximumf %26, %27 : vector<20x4xf32>
      %29 = arith.truncf %28 : vector<20x4xf32> to vector<20x4xbf16>
      %c0_29 = arith.constant 0 : index
      %c0_30 = arith.constant 0 : index
      %c0_31 = arith.constant 0 : index
      %c0_32 = arith.constant 0 : index
      %30 = vector.load %arg7[%c0_29, %c0_30, %c0_31, %c0_32] : memref<1x1x20x4xbf16, #tpu.memory_space<vmem>>, vector<1x1x20x4xbf16>
      %31 = vector.shape_cast %30 : vector<1x1x20x4xbf16> to vector<20x4xbf16>
      %32 = vector.shape_cast %29 : vector<20x4xbf16> to vector<1x1x20x4xbf16>
      tpu.vector_store %arg7[%c0_29, %c0_30, %c0_31, %c0_32], %32 {strides = array<i32>} : memref<1x1x20x4xbf16, #tpu.memory_space<vmem>>, vector<1x1x20x4xbf16>,
    } else {
    }
    return
  }
  func.func @transform_0(%arg0: i32, %arg1: i32, %arg2: i32) -> (i32, i32, i32, i32) {
    %c1_i32 = arith.constant 1 : i32
    %0 = arith.muli %c1_i32, %arg1 : i32
    %1 = arith.addi %0, %arg2 : i32
    %c0_i32 = arith.constant 0 : i32
    %c0_i32_0 = arith.constant 0 : i32
    %c0_i32_1 = arith.constant 0 : i32
    return %arg0, %1, %c0_i32, %c0_i32_0 : i32, i32, i32, i32
  }
  func.func @transform_1(%arg0: i32, %arg1: i32, %arg2: i32) -> (i32, i32, i32, i32) {
    %c0_i32 = arith.constant 0 : i32
    %c0_i32_0 = arith.constant 0 : i32
    %c0_i32_1 = arith.constant 0 : i32
    %c0_i32_2 = arith.constant 0 : i32
    return %arg2, %c0_i32, %c0_i32_0, %c0_i32_1 : i32, i32, i32, i32
  }
  func.func @transform_2(%arg0: i32, %arg1: i32, %arg2: i32) -> (i32, i32) {
    %c0_i32 = arith.constant 0 : i32
    %c0_i32_0 = arith.constant 0 : i32
    %c0_i32_1 = arith.constant 0 : i32
    return %c0_i32, %c0_i32_0 : i32, i32
  }
  func.func @transform_3(%arg0: i32, %arg1: i32, %arg2: i32) -> (i32, i32, i32, i32) {
    %c0_i32 = arith.constant 0 : i32
    %c0_i32_0 = arith.constant 0 : i32
    %c0_i32_1 = arith.constant 0 : i32
    return %arg0, %arg1, %c0_i32, %c0_i32_0 : i32, i32, i32, i32
  }
  func.func @transform_4(%arg0: i32, %arg1: i32, %arg2: i32) -> (i32, i32, i32, i32) {
    %c0_i32 = arith.constant 0 : i32
    %c0_i32_0 = arith.constant 0 : i32
    %c0_i32_1 = arith.constant 0 : i32
    return %arg0, %arg1, %c0_i32, %c0_i32_0 : i32, i32, i32, i32
  }
}

module attributes {stable_mosaic.version = 11 : i64} {
  func.func @kernel(%arg0: i32, %arg1: i32, %arg2: i32, %arg3: memref<1x1x20x8xbf16, #tpu.memory_space<vmem>>, %arg4: memref<1x2x8x4xbf16, #tpu.memory_space<vmem>>, %arg5: memref<1x4xf32, #tpu.memory_space<vmem>>, %arg6: memref<1x1x16x4xbf16, #tpu.memory_space<vmem>>, %arg7: memref<1x1x16x4xbf16, #tpu.memory_space<vmem>>, %arg8: memref<16x4xf32, #tpu.memory_space<vmem>>) attributes {dimension_semantics = [#tpu.dimension_semantics<parallel>, #tpu.dimension_semantics<parallel>, #tpu.dimension_semantics<arbitrary>], iteration_bounds = array<i64: 2, 4, 1>, scalar_prefetch = 0 : i64, scratch_operands = 1 : i64, tpu.core_type = #tpu.core_type<tc>, window_params = [{transform_indices = @transform_0, window_bounds = array<i64: 1, 1, 20, 8>}, {transform_indices = @transform_1, window_bounds = array<i64: 1, 2, 8, 4>}, {pipeline_mode = #tpu.pipeline_mode<synchronous>, transform_indices = @transform_2, window_bounds = array<i64: 1, 4>}, {transform_indices = @transform_3, window_bounds = array<i64: 1, 1, 16, 4>}, {transform_indices = @transform_4, window_bounds = array<i64: 1, 1, 16, 4>}]} {
    %c0_i32 = arith.constant 0 : i32
    %0 = arith.cmpi eq, %arg2, %c0_i32 : i32
    %1 = arith.extui %0 : i1 to i32
    %c0_i32_0 = arith.constant 0 : i32
    %2 = arith.cmpi ne, %1, %c0_i32_0 : i32
    scf.if %2 {
      %cst_21 = arith.constant 0.000000e+00 : f32
      %20 = vector.broadcast %cst_21 : f32 to vector<16x4xf32>
      %c0_22 = arith.constant 0 : index
      %c0_23 = arith.constant 0 : index
      %21 = vector.load %arg8[%c0_22, %c0_23] : memref<16x4xf32, #tpu.memory_space<vmem>>, vector<16x4xf32>
      tpu.vector_store %arg8[%c0_22, %c0_23], %20 {strides = array<i32>} : memref<16x4xf32, #tpu.memory_space<vmem>>, vector<16x4xf32>,
    } else {
    }
    %c0 = arith.constant 0 : index
    %c0_1 = arith.constant 0 : index
    %3 = vector.load %arg8[%c0, %c0_1] : memref<16x4xf32, #tpu.memory_space<vmem>>, vector<16x4xf32>
    %c0_2 = arith.constant 0 : index
    %c0_3 = arith.constant 0 : index
    %c0_4 = arith.constant 0 : index
    %c0_5 = arith.constant 0 : index
    %4 = vector.load %arg3[%c0_2, %c0_3, %c0_4, %c0_5] : memref<1x1x20x8xbf16, #tpu.memory_space<vmem>>, vector<1x1x16x8xbf16>
    %5 = vector.shape_cast %4 : vector<1x1x16x8xbf16> to vector<16x8xbf16>
    %c0_6 = arith.constant 0 : index
    %c0_7 = arith.constant 0 : index
    %c0_8 = arith.constant 0 : index
    %c0_9 = arith.constant 0 : index
    %6 = vector.load %arg4[%c0_6, %c0_7, %c0_8, %c0_9] : memref<1x2x8x4xbf16, #tpu.memory_space<vmem>>, vector<1x1x8x4xbf16>
    %7 = vector.shape_cast %6 : vector<1x1x8x4xbf16> to vector<8x4xbf16>
    %cst = arith.constant dense<0.000000e+00> : vector<16x4xf32>
    %8 = tpu.matmul %5, %7, %cst {dimension_numbers = #tpu.dot_dimension_numbers<[1], [0], [0], [1], [0, 0, 1, 1], [], []>} : vector<16x8xbf16>, vector<8x4xbf16>, vector<16x4xf32> -> vector<16x4xf32>
    %9 = arith.addf %3, %8 : vector<16x4xf32>
    %c0_10 = arith.constant 0 : index
    %c0_11 = arith.constant 0 : index
    %c4 = arith.constant 4 : index
    %c0_12 = arith.constant 0 : index
    %10 = vector.load %arg3[%c0_10, %c0_11, %c4, %c0_12] : memref<1x1x20x8xbf16, #tpu.memory_space<vmem>>, vector<1x1x16x8xbf16>
    %11 = vector.shape_cast %10 : vector<1x1x16x8xbf16> to vector<16x8xbf16>
    %c0_13 = arith.constant 0 : index
    %c1 = arith.constant 1 : index
    %c0_14 = arith.constant 0 : index
    %c0_15 = arith.constant 0 : index
    %12 = vector.load %arg4[%c0_13, %c1, %c0_14, %c0_15] : memref<1x2x8x4xbf16, #tpu.memory_space<vmem>>, vector<1x1x8x4xbf16>
    %13 = vector.shape_cast %12 : vector<1x1x8x4xbf16> to vector<8x4xbf16>
    %cst_16 = arith.constant dense<0.000000e+00> : vector<16x4xf32>
    %14 = tpu.matmul %11, %13, %cst_16 {dimension_numbers = #tpu.dot_dimension_numbers<[1], [0], [0], [1], [0, 0, 1, 1], [], []>} : vector<16x8xbf16>, vector<8x4xbf16>, vector<16x4xf32> -> vector<16x4xf32>
    %15 = arith.addf %9, %14 : vector<16x4xf32>
    %c0_17 = arith.constant 0 : index
    %c0_18 = arith.constant 0 : index
    %16 = vector.load %arg8[%c0_17, %c0_18] : memref<16x4xf32, #tpu.memory_space<vmem>>, vector<16x4xf32>
    tpu.vector_store %arg8[%c0_17, %c0_18], %15 {strides = array<i32>} : memref<16x4xf32, #tpu.memory_space<vmem>>, vector<16x4xf32>,
    %c0_i32_19 = arith.constant 0 : i32
    %17 = arith.cmpi eq, %arg2, %c0_i32_19 : i32
    %18 = arith.extui %17 : i1 to i32
    %c0_i32_20 = arith.constant 0 : i32
    %19 = arith.cmpi ne, %18, %c0_i32_20 : i32
    scf.if %19 {
      %c0_21 = arith.constant 0 : index
      %c0_22 = arith.constant 0 : index
      %20 = vector.load %arg5[%c0_21, %c0_22] : memref<1x4xf32, #tpu.memory_space<vmem>>, vector<1x4xf32>
      %21 = vector.broadcast %20 : vector<1x4xf32> to vector<16x4xf32>
      %22 = arith.addf %15, %21 : vector<16x4xf32>
      %c0_23 = arith.constant 0 : index
      %c0_24 = arith.constant 0 : index
      %c0_25 = arith.constant 0 : index
      %c0_26 = arith.constant 0 : index
      %23 = vector.load %arg6[%c0_23, %c0_24, %c0_25, %c0_26] : memref<1x1x16x4xbf16, #tpu.memory_space<vmem>>, vector<1x1x16x4xbf16>
      %24 = vector.shape_cast %23 : vector<1x1x16x4xbf16> to vector<16x4xbf16>
      %25 = arith.extf %24 : vector<16x4xbf16> to vector<16x4xf32>
      %26 = arith.addf %22, %25 : vector<16x4xf32>
      %cst_27 = arith.constant 0.000000e+00 : f32
      %27 = vector.broadcast %cst_27 : f32 to vector<16x4xf32>
      %28 = arith.maximumf %26, %27 : vector<16x4xf32>
      %29 = arith.truncf %28 : vector<16x4xf32> to vector<16x4xbf16>
      %c0_28 = arith.constant 0 : index
      %c0_29 = arith.constant 0 : index
      %c0_30 = arith.constant 0 : index
      %c0_31 = arith.constant 0 : index
      %30 = vector.load %arg7[%c0_28, %c0_29, %c0_30, %c0_31] : memref<1x1x16x4xbf16, #tpu.memory_space<vmem>>, vector<1x1x16x4xbf16>
      %31 = vector.shape_cast %30 : vector<1x1x16x4xbf16> to vector<16x4xbf16>
      %32 = vector.shape_cast %29 : vector<16x4xbf16> to vector<1x1x16x4xbf16>
      tpu.vector_store %arg7[%c0_28, %c0_29, %c0_30, %c0_31], %32 {strides = array<i32>} : memref<1x1x16x4xbf16, #tpu.memory_space<vmem>>, vector<1x1x16x4xbf16>,
    } else {
    }
    return
  }
  func.func @transform_0(%arg0: i32, %arg1: i32, %arg2: i32) -> (i32, i32, i32, i32) {
    %c1_i32 = arith.constant 1 : i32
    %0 = arith.muli %c1_i32, %arg1 : i32
    %1 = arith.addi %0, %arg2 : i32
    %c0_i32 = arith.constant 0 : i32
    %c0_i32_0 = arith.constant 0 : i32
    %c0_i32_1 = arith.constant 0 : i32
    return %arg0, %1, %c0_i32, %c0_i32_0 : i32, i32, i32, i32
  }
  func.func @transform_1(%arg0: i32, %arg1: i32, %arg2: i32) -> (i32, i32, i32, i32) {
    %c0_i32 = arith.constant 0 : i32
    %c0_i32_0 = arith.constant 0 : i32
    %c0_i32_1 = arith.constant 0 : i32
    %c0_i32_2 = arith.constant 0 : i32
    return %arg2, %c0_i32, %c0_i32_0, %c0_i32_1 : i32, i32, i32, i32
  }
  func.func @transform_2(%arg0: i32, %arg1: i32, %arg2: i32) -> (i32, i32) {
    %c0_i32 = arith.constant 0 : i32
    %c0_i32_0 = arith.constant 0 : i32
    %c0_i32_1 = arith.constant 0 : i32
    return %c0_i32, %c0_i32_0 : i32, i32
  }
  func.func @transform_3(%arg0: i32, %arg1: i32, %arg2: i32) -> (i32, i32, i32, i32) {
    %c0_i32 = arith.constant 0 : i32
    %c0_i32_0 = arith.constant 0 : i32
    %c0_i32_1 = arith.constant 0 : i32
    return %arg0, %arg1, %c0_i32, %c0_i32_0 : i32, i32, i32, i32
  }
  func.func @transform_4(%arg0: i32, %arg1: i32, %arg2: i32) -> (i32, i32, i32, i32) {
    %c0_i32 = arith.constant 0 : i32
    %c0_i32_0 = arith.constant 0 : i32
    %c0_i32_1 = arith.constant 0 : i32
    return %arg0, %arg1, %c0_i32, %c0_i32_0 : i32, i32, i32, i32
  }
}

module attributes {stable_mosaic.version = 11 : i64} {
  func.func @kernel(%arg0: i32, %arg1: i32, %arg2: i32, %arg3: memref<1x1x26x8xbf16, #tpu.memory_space<vmem>>, %arg4: memref<1x4x8x4xbf16, #tpu.memory_space<vmem>>, %arg5: memref<1x4xf32, #tpu.memory_space<vmem>>, %arg6: memref<1x1x20x4xbf16, #tpu.memory_space<vmem>>, %arg7: memref<1x1x20x4xbf16, #tpu.memory_space<vmem>>, %arg8: memref<20x4xf32, #tpu.memory_space<vmem>>) attributes {dimension_semantics = [#tpu.dimension_semantics<parallel>, #tpu.dimension_semantics<parallel>, #tpu.dimension_semantics<arbitrary>], iteration_bounds = array<i64: 2, 4, 1>, scalar_prefetch = 0 : i64, scratch_operands = 1 : i64, tpu.core_type = #tpu.core_type<tc>, window_params = [{transform_indices = @transform_0, window_bounds = array<i64: 1, 1, 26, 8>}, {transform_indices = @transform_1, window_bounds = array<i64: 1, 4, 8, 4>}, {pipeline_mode = #tpu.pipeline_mode<synchronous>, transform_indices = @transform_2, window_bounds = array<i64: 1, 4>}, {transform_indices = @transform_3, window_bounds = array<i64: 1, 1, 20, 4>}, {transform_indices = @transform_4, window_bounds = array<i64: 1, 1, 20, 4>}]} {
    %c0_i32 = arith.constant 0 : i32
    %0 = arith.cmpi eq, %arg2, %c0_i32 : i32
    %1 = arith.extui %0 : i1 to i32
    %c0_i32_0 = arith.constant 0 : i32
    %2 = arith.cmpi ne, %1, %c0_i32_0 : i32
    scf.if %2 {
      %cst_36 = arith.constant 0.000000e+00 : f32
      %32 = vector.broadcast %cst_36 : f32 to vector<20x4xf32>
      %c0_37 = arith.constant 0 : index
      %c0_38 = arith.constant 0 : index
      %33 = vector.load %arg8[%c0_37, %c0_38] : memref<20x4xf32, #tpu.memory_space<vmem>>, vector<20x4xf32>
      tpu.vector_store %arg8[%c0_37, %c0_38], %32 {strides = array<i32>} : memref<20x4xf32, #tpu.memory_space<vmem>>, vector<20x4xf32>,
    } else {
    }
    %c0 = arith.constant 0 : index
    %c0_1 = arith.constant 0 : index
    %3 = vector.load %arg8[%c0, %c0_1] : memref<20x4xf32, #tpu.memory_space<vmem>>, vector<20x4xf32>
    %c0_2 = arith.constant 0 : index
    %c0_3 = arith.constant 0 : index
    %c0_4 = arith.constant 0 : index
    %c0_5 = arith.constant 0 : index
    %4 = vector.load %arg3[%c0_2, %c0_3, %c0_4, %c0_5] : memref<1x1x26x8xbf16, #tpu.memory_space<vmem>>, vector<1x1x20x8xbf16>
    %5 = vector.shape_cast %4 : vector<1x1x20x8xbf16> to vector<20x8xbf16>
    %c0_6 = arith.constant 0 : index
    %c0_7 = arith.constant 0 : index
    %c0_8 = arith.constant 0 : index
    %c0_9 = arith.constant 0 : index
    %6 = vector.load %arg4[%c0_6, %c0_7, %c0_8, %c0_9] : memref<1x4x8x4xbf16, #tpu.memory_space<vmem>>, vector<1x1x8x4xbf16>
    %7 = vector.shape_cast %6 : vector<1x1x8x4xbf16> to vector<8x4xbf16>
    %cst = arith.constant dense<0.000000e+00> : vector<20x4xf32>
    %8 = tpu.matmul %5, %7, %cst {dimension_numbers = #tpu.dot_dimension_numbers<[1], [0], [0], [1], [0, 0, 1, 1], [], []>} : vector<20x8xbf16>, vector<8x4xbf16>, vector<20x4xf32> -> vector<20x4xf32>
    %9 = arith.addf %3, %8 : vector<20x4xf32>
    %c0_10 = arith.constant 0 : index
    %c0_11 = arith.constant 0 : index
    %c1 = arith.constant 1 : index
    %c0_12 = arith.constant 0 : index
    %10 = vector.load %arg3[%c0_10, %c0_11, %c1, %c0_12] : memref<1x1x26x8xbf16, #tpu.memory_space<vmem>>, vector<1x1x20x8xbf16>
    %11 = vector.shape_cast %10 : vector<1x1x20x8xbf16> to vector<20x8xbf16>
    %c0_13 = arith.constant 0 : index
    %c1_14 = arith.constant 1 : index
    %c0_15 = arith.constant 0 : index
    %c0_16 = arith.constant 0 : index
    %12 = vector.load %arg4[%c0_13, %c1_14, %c0_15, %c0_16] : memref<1x4x8x4xbf16, #tpu.memory_space<vmem>>, vector<1x1x8x4xbf16>
    %13 = vector.shape_cast %12 : vector<1x1x8x4xbf16> to vector<8x4xbf16>
    %cst_17 = arith.constant dense<0.000000e+00> : vector<20x4xf32>
    %14 = tpu.matmul %11, %13, %cst_17 {dimension_numbers = #tpu.dot_dimension_numbers<[1], [0], [0], [1], [0, 0, 1, 1], [], []>} : vector<20x8xbf16>, vector<8x4xbf16>, vector<20x4xf32> -> vector<20x4xf32>
    %15 = arith.addf %9, %14 : vector<20x4xf32>
    %c0_18 = arith.constant 0 : index
    %c0_19 = arith.constant 0 : index
    %c5 = arith.constant 5 : index
    %c0_20 = arith.constant 0 : index
    %16 = vector.load %arg3[%c0_18, %c0_19, %c5, %c0_20] : memref<1x1x26x8xbf16, #tpu.memory_space<vmem>>, vector<1x1x20x8xbf16>
    %17 = vector.shape_cast %16 : vector<1x1x20x8xbf16> to vector<20x8xbf16>
    %c0_21 = arith.constant 0 : index
    %c2 = arith.constant 2 : index
    %c0_22 = arith.constant 0 : index
    %c0_23 = arith.constant 0 : index
    %18 = vector.load %arg4[%c0_21, %c2, %c0_22, %c0_23] : memref<1x4x8x4xbf16, #tpu.memory_space<vmem>>, vector<1x1x8x4xbf16>
    %19 = vector.shape_cast %18 : vector<1x1x8x4xbf16> to vector<8x4xbf16>
    %cst_24 = arith.constant dense<0.000000e+00> : vector<20x4xf32>
    %20 = tpu.matmul %17, %19, %cst_24 {dimension_numbers = #tpu.dot_dimension_numbers<[1], [0], [0], [1], [0, 0, 1, 1], [], []>} : vector<20x8xbf16>, vector<8x4xbf16>, vector<20x4xf32> -> vector<20x4xf32>
    %21 = arith.addf %15, %20 : vector<20x4xf32>
    %c0_25 = arith.constant 0 : index
    %c0_26 = arith.constant 0 : index
    %c6 = arith.constant 6 : index
    %c0_27 = arith.constant 0 : index
    %22 = vector.load %arg3[%c0_25, %c0_26, %c6, %c0_27] : memref<1x1x26x8xbf16, #tpu.memory_space<vmem>>, vector<1x1x20x8xbf16>
    %23 = vector.shape_cast %22 : vector<1x1x20x8xbf16> to vector<20x8xbf16>
    %c0_28 = arith.constant 0 : index
    %c3 = arith.constant 3 : index
    %c0_29 = arith.constant 0 : index
    %c0_30 = arith.constant 0 : index
    %24 = vector.load %arg4[%c0_28, %c3, %c0_29, %c0_30] : memref<1x4x8x4xbf16, #tpu.memory_space<vmem>>, vector<1x1x8x4xbf16>
    %25 = vector.shape_cast %24 : vector<1x1x8x4xbf16> to vector<8x4xbf16>
    %cst_31 = arith.constant dense<0.000000e+00> : vector<20x4xf32>
    %26 = tpu.matmul %23, %25, %cst_31 {dimension_numbers = #tpu.dot_dimension_numbers<[1], [0], [0], [1], [0, 0, 1, 1], [], []>} : vector<20x8xbf16>, vector<8x4xbf16>, vector<20x4xf32> -> vector<20x4xf32>
    %27 = arith.addf %21, %26 : vector<20x4xf32>
    %c0_32 = arith.constant 0 : index
    %c0_33 = arith.constant 0 : index
    %28 = vector.load %arg8[%c0_32, %c0_33] : memref<20x4xf32, #tpu.memory_space<vmem>>, vector<20x4xf32>
    tpu.vector_store %arg8[%c0_32, %c0_33], %27 {strides = array<i32>} : memref<20x4xf32, #tpu.memory_space<vmem>>, vector<20x4xf32>,
    %c0_i32_34 = arith.constant 0 : i32
    %29 = arith.cmpi eq, %arg2, %c0_i32_34 : i32
    %30 = arith.extui %29 : i1 to i32
    %c0_i32_35 = arith.constant 0 : i32
    %31 = arith.cmpi ne, %30, %c0_i32_35 : i32
    scf.if %31 {
      %c0_36 = arith.constant 0 : index
      %c0_37 = arith.constant 0 : index
      %32 = vector.load %arg5[%c0_36, %c0_37] : memref<1x4xf32, #tpu.memory_space<vmem>>, vector<1x4xf32>
      %33 = vector.broadcast %32 : vector<1x4xf32> to vector<20x4xf32>
      %34 = arith.addf %27, %33 : vector<20x4xf32>
      %c0_38 = arith.constant 0 : index
      %c0_39 = arith.constant 0 : index
      %c0_40 = arith.constant 0 : index
      %c0_41 = arith.constant 0 : index
      %35 = vector.load %arg6[%c0_38, %c0_39, %c0_40, %c0_41] : memref<1x1x20x4xbf16, #tpu.memory_space<vmem>>, vector<1x1x20x4xbf16>
      %36 = vector.shape_cast %35 : vector<1x1x20x4xbf16> to vector<20x4xbf16>
      %37 = arith.extf %36 : vector<20x4xbf16> to vector<20x4xf32>
      %38 = arith.addf %34, %37 : vector<20x4xf32>
      %cst_42 = arith.constant 0.000000e+00 : f32
      %39 = vector.broadcast %cst_42 : f32 to vector<20x4xf32>
      %40 = arith.maximumf %38, %39 : vector<20x4xf32>
      %41 = arith.truncf %40 : vector<20x4xf32> to vector<20x4xbf16>
      %c0_43 = arith.constant 0 : index
      %c0_44 = arith.constant 0 : index
      %c0_45 = arith.constant 0 : index
      %c0_46 = arith.constant 0 : index
      %42 = vector.load %arg7[%c0_43, %c0_44, %c0_45, %c0_46] : memref<1x1x20x4xbf16, #tpu.memory_space<vmem>>, vector<1x1x20x4xbf16>
      %43 = vector.shape_cast %42 : vector<1x1x20x4xbf16> to vector<20x4xbf16>
      %44 = vector.shape_cast %41 : vector<20x4xbf16> to vector<1x1x20x4xbf16>
      tpu.vector_store %arg7[%c0_43, %c0_44, %c0_45, %c0_46], %44 {strides = array<i32>} : memref<1x1x20x4xbf16, #tpu.memory_space<vmem>>, vector<1x1x20x4xbf16>,
    } else {
    }
    return
  }
  func.func @transform_0(%arg0: i32, %arg1: i32, %arg2: i32) -> (i32, i32, i32, i32) {
    %c1_i32 = arith.constant 1 : i32
    %0 = arith.muli %c1_i32, %arg1 : i32
    %1 = arith.addi %0, %arg2 : i32
    %c0_i32 = arith.constant 0 : i32
    %c0_i32_0 = arith.constant 0 : i32
    %c0_i32_1 = arith.constant 0 : i32
    return %arg0, %1, %c0_i32, %c0_i32_0 : i32, i32, i32, i32
  }
  func.func @transform_1(%arg0: i32, %arg1: i32, %arg2: i32) -> (i32, i32, i32, i32) {
    %c0_i32 = arith.constant 0 : i32
    %c0_i32_0 = arith.constant 0 : i32
    %c0_i32_1 = arith.constant 0 : i32
    %c0_i32_2 = arith.constant 0 : i32
    return %arg2, %c0_i32, %c0_i32_0, %c0_i32_1 : i32, i32, i32, i32
  }
  func.func @transform_2(%arg0: i32, %arg1: i32, %arg2: i32) -> (i32, i32) {
    %c0_i32 = arith.constant 0 : i32
    %c0_i32_0 = arith.constant 0 : i32
    %c0_i32_1 = arith.constant 0 : i32
    return %c0_i32, %c0_i32_0 : i32, i32
  }
  func.func @transform_3(%arg0: i32, %arg1: i32, %arg2: i32) -> (i32, i32, i32, i32) {
    %c0_i32 = arith.constant 0 : i32
    %c0_i32_0 = arith.constant 0 : i32
    %c0_i32_1 = arith.constant 0 : i32
    return %arg0, %arg1, %c0_i32, %c0_i32_0 : i32, i32, i32, i32
  }
  func.func @transform_4(%arg0: i32, %arg1: i32, %arg2: i32) -> (i32, i32, i32, i32) {
    %c0_i32 = arith.constant 0 : i32
    %c0_i32_0 = arith.constant 0 : i32
    %c0_i32_1 = arith.constant 0 : i32
    return %arg0, %arg1, %c0_i32, %c0_i32_0 : i32, i32, i32, i32
  }
}

module attributes {stable_mosaic.version = 11 : i64} {
  func.func @kernel(%arg0: i32, %arg1: i32, %arg2: i32, %arg3: memref<1x1x16x8xbf16, #tpu.memory_space<vmem>>, %arg4: memref<1x1x8x4xbf16, #tpu.memory_space<vmem>>, %arg5: memref<1x4xf32, #tpu.memory_space<vmem>>, %arg6: memref<1x1x16x4xbf16, #tpu.memory_space<vmem>>, %arg7: memref<1x1x16x4xbf16, #tpu.memory_space<vmem>>, %arg8: memref<16x4xf32, #tpu.memory_space<vmem>>) attributes {dimension_semantics = [#tpu.dimension_semantics<parallel>, #tpu.dimension_semantics<parallel>, #tpu.dimension_semantics<arbitrary>], iteration_bounds = array<i64: 2, 4, 2>, scalar_prefetch = 0 : i64, scratch_operands = 1 : i64, tpu.core_type = #tpu.core_type<tc>, window_params = [{transform_indices = @transform_0, window_bounds = array<i64: 1, 1, 16, 8>}, {transform_indices = @transform_1, window_bounds = array<i64: 1, 1, 8, 4>}, {pipeline_mode = #tpu.pipeline_mode<synchronous>, transform_indices = @transform_2, window_bounds = array<i64: 1, 4>}, {transform_indices = @transform_3, window_bounds = array<i64: 1, 1, 16, 4>}, {transform_indices = @transform_4, window_bounds = array<i64: 1, 1, 16, 4>}]} {
    %c0_i32 = arith.constant 0 : i32
    %0 = arith.cmpi eq, %arg2, %c0_i32 : i32
    %1 = arith.extui %0 : i1 to i32
    %c0_i32_0 = arith.constant 0 : i32
    %2 = arith.cmpi ne, %1, %c0_i32_0 : i32
    scf.if %2 {
      %cst_13 = arith.constant 0.000000e+00 : f32
      %14 = vector.broadcast %cst_13 : f32 to vector<16x4xf32>
      %c0_14 = arith.constant 0 : index
      %c0_15 = arith.constant 0 : index
      %15 = vector.load %arg8[%c0_14, %c0_15] : memref<16x4xf32, #tpu.memory_space<vmem>>, vector<16x4xf32>
      tpu.vector_store %arg8[%c0_14, %c0_15], %14 {strides = array<i32>} : memref<16x4xf32, #tpu.memory_space<vmem>>, vector<16x4xf32>,
    } else {
    }
    %c0 = arith.constant 0 : index
    %c0_1 = arith.constant 0 : index
    %3 = vector.load %arg8[%c0, %c0_1] : memref<16x4xf32, #tpu.memory_space<vmem>>, vector<16x4xf32>
    %c0_2 = arith.constant 0 : index
    %c0_3 = arith.constant 0 : index
    %c0_4 = arith.constant 0 : index
    %c0_5 = arith.constant 0 : index
    %4 = vector.load %arg3[%c0_2, %c0_3, %c0_4, %c0_5] : memref<1x1x16x8xbf16, #tpu.memory_space<vmem>>, vector<1x1x16x8xbf16>
    %5 = vector.shape_cast %4 : vector<1x1x16x8xbf16> to vector<16x8xbf16>
    %c0_6 = arith.constant 0 : index
    %c0_7 = arith.constant 0 : index
    %c0_8 = arith.constant 0 : index
    %c0_9 = arith.constant 0 : index
    %6 = vector.load %arg4[%c0_6, %c0_7, %c0_8, %c0_9] : memref<1x1x8x4xbf16, #tpu.memory_space<vmem>>, vector<1x1x8x4xbf16>
    %7 = vector.shape_cast %6 : vector<1x1x8x4xbf16> to vector<8x4xbf16>
    %cst = arith.constant dense<0.000000e+00> : vector<16x4xf32>
    %8 = tpu.matmul %5, %7, %cst {dimension_numbers = #tpu.dot_dimension_numbers<[1], [0], [0], [1], [0, 0, 1, 1], [], []>} : vector<16x8xbf16>, vector<8x4xbf16>, vector<16x4xf32> -> vector<16x4xf32>
    %9 = arith.addf %3, %8 : vector<16x4xf32>
    %c0_10 = arith.constant 0 : index
    %c0_11 = arith.constant 0 : index
    %10 = vector.load %arg8[%c0_10, %c0_11] : memref<16x4xf32, #tpu.memory_space<vmem>>, vector<16x4xf32>
    tpu.vector_store %arg8[%c0_10, %c0_11], %9 {strides = array<i32>} : memref<16x4xf32, #tpu.memory_space<vmem>>, vector<16x4xf32>,
    %c1_i32 = arith.constant 1 : i32
    %11 = arith.cmpi eq, %arg2, %c1_i32 : i32
    %12 = arith.extui %11 : i1 to i32
    %c0_i32_12 = arith.constant 0 : i32
    %13 = arith.cmpi ne, %12, %c0_i32_12 : i32
    scf.if %13 {
      %c0_13 = arith.constant 0 : index
      %c0_14 = arith.constant 0 : index
      %14 = vector.load %arg5[%c0_13, %c0_14] : memref<1x4xf32, #tpu.memory_space<vmem>>, vector<1x4xf32>
      %15 = vector.broadcast %14 : vector<1x4xf32> to vector<16x4xf32>
      %16 = arith.addf %9, %15 : vector<16x4xf32>
      %c0_15 = arith.constant 0 : index
      %c0_16 = arith.constant 0 : index
      %c0_17 = arith.constant 0 : index
      %c0_18 = arith.constant 0 : index
      %17 = vector.load %arg6[%c0_15, %c0_16, %c0_17, %c0_18] : memref<1x1x16x4xbf16, #tpu.memory_space<vmem>>, vector<1x1x16x4xbf16>
      %18 = vector.shape_cast %17 : vector<1x1x16x4xbf16> to vector<16x4xbf16>
      %19 = arith.extf %18 : vector<16x4xbf16> to vector<16x4xf32>
      %20 = arith.addf %16, %19 : vector<16x4xf32>
      %cst_19 = arith.constant 0.000000e+00 : f32
      %21 = vector.broadcast %cst_19 : f32 to vector<16x4xf32>
      %22 = arith.maximumf %20, %21 : vector<16x4xf32>
      %23 = arith.truncf %22 : vector<16x4xf32> to vector<16x4xbf16>
      %c0_20 = arith.constant 0 : index
      %c0_21 = arith.constant 0 : index
      %c0_22 = arith.constant 0 : index
      %c0_23 = arith.constant 0 : index
      %24 = vector.load %arg7[%c0_20, %c0_21, %c0_22, %c0_23] : memref<1x1x16x4xbf16, #tpu.memory_space<vmem>>, vector<1x1x16x4xbf16>
      %25 = vector.shape_cast %24 : vector<1x1x16x4xbf16> to vector<16x4xbf16>
      %26 = vector.shape_cast %23 : vector<16x4xbf16> to vector<1x1x16x4xbf16>
      tpu.vector_store %arg7[%c0_20, %c0_21, %c0_22, %c0_23], %26 {strides = array<i32>} : memref<1x1x16x4xbf16, #tpu.memory_space<vmem>>, vector<1x1x16x4xbf16>,
    } else {
    }
    return
  }
  func.func @transform_0(%arg0: i32, %arg1: i32, %arg2: i32) -> (i32, i32, i32, i32) {
    %c1_i32 = arith.constant 1 : i32
    %0 = arith.muli %c1_i32, %arg1 : i32
    %1 = arith.addi %0, %arg2 : i32
    %c0_i32 = arith.constant 0 : i32
    %c0_i32_0 = arith.constant 0 : i32
    %c0_i32_1 = arith.constant 0 : i32
    return %arg0, %1, %c0_i32, %c0_i32_0 : i32, i32, i32, i32
  }
  func.func @transform_1(%arg0: i32, %arg1: i32, %arg2: i32) -> (i32, i32, i32, i32) {
    %c0_i32 = arith.constant 0 : i32
    %c0_i32_0 = arith.constant 0 : i32
    %c0_i32_1 = arith.constant 0 : i32
    %c0_i32_2 = arith.constant 0 : i32
    return %arg2, %c0_i32, %c0_i32_0, %c0_i32_1 : i32, i32, i32, i32
  }
  func.func @transform_2(%arg0: i32, %arg1: i32, %arg2: i32) -> (i32, i32) {
    %c0_i32 = arith.constant 0 : i32
    %c0_i32_0 = arith.constant 0 : i32
    %c0_i32_1 = arith.constant 0 : i32
    return %c0_i32, %c0_i32_0 : i32, i32
  }
  func.func @transform_3(%arg0: i32, %arg1: i32, %arg2: i32) -> (i32, i32, i32, i32) {
    %c0_i32 = arith.constant 0 : i32
    %c0_i32_0 = arith.constant 0 : i32
    %c0_i32_1 = arith.constant 0 : i32
    return %arg0, %arg1, %c0_i32, %c0_i32_0 : i32, i32, i32, i32
  }
  func.func @transform_4(%arg0: i32, %arg1: i32, %arg2: i32) -> (i32, i32, i32, i32) {
    %c0_i32 = arith.constant 0 : i32
    %c0_i32_0 = arith.constant 0 : i32
    %c0_i32_1 = arith.constant 0 : i32
    return %arg0, %arg1, %c0_i32, %c0_i32_0 : i32, i32, i32, i32
  }
}

module attributes {stable_mosaic.version = 11 : i64} {
  func.func @kernel(%arg0: i32, %arg1: i32, %arg2: i32, %arg3: memref<1x1x21x8xbf16, #tpu.memory_space<vmem>>, %arg4: memref<1x2x8x4xbf16, #tpu.memory_space<vmem>>, %arg5: memref<1x4xf32, #tpu.memory_space<vmem>>, %arg6: memref<1x1x20x4xbf16, #tpu.memory_space<vmem>>, %arg7: memref<1x1x20x4xbf16, #tpu.memory_space<vmem>>, %arg8: memref<20x4xf32, #tpu.memory_space<vmem>>) attributes {dimension_semantics = [#tpu.dimension_semantics<parallel>, #tpu.dimension_semantics<parallel>, #tpu.dimension_semantics<arbitrary>], iteration_bounds = array<i64: 2, 4, 2>, scalar_prefetch = 0 : i64, scratch_operands = 1 : i64, tpu.core_type = #tpu.core_type<tc>, window_params = [{transform_indices = @transform_0, window_bounds = array<i64: 1, 1, 21, 8>}, {transform_indices = @transform_1, window_bounds = array<i64: 1, 2, 8, 4>}, {pipeline_mode = #tpu.pipeline_mode<synchronous>, transform_indices = @transform_2, window_bounds = array<i64: 1, 4>}, {transform_indices = @transform_3, window_bounds = array<i64: 1, 1, 20, 4>}, {transform_indices = @transform_4, window_bounds = array<i64: 1, 1, 20, 4>}]} {
    %c0_i32 = arith.constant 0 : i32
    %0 = arith.cmpi eq, %arg2, %c0_i32 : i32
    %1 = arith.extui %0 : i1 to i32
    %c0_i32_0 = arith.constant 0 : i32
    %2 = arith.cmpi ne, %1, %c0_i32_0 : i32
    scf.if %2 {
      %cst_21 = arith.constant 0.000000e+00 : f32
      %20 = vector.broadcast %cst_21 : f32 to vector<20x4xf32>
      %c0_22 = arith.constant 0 : index
      %c0_23 = arith.constant 0 : index
      %21 = vector.load %arg8[%c0_22, %c0_23] : memref<20x4xf32, #tpu.memory_space<vmem>>, vector<20x4xf32>
      tpu.vector_store %arg8[%c0_22, %c0_23], %20 {strides = array<i32>} : memref<20x4xf32, #tpu.memory_space<vmem>>, vector<20x4xf32>,
    } else {
    }
    %c0 = arith.constant 0 : index
    %c0_1 = arith.constant 0 : index
    %3 = vector.load %arg8[%c0, %c0_1] : memref<20x4xf32, #tpu.memory_space<vmem>>, vector<20x4xf32>
    %c0_2 = arith.constant 0 : index
    %c0_3 = arith.constant 0 : index
    %c0_4 = arith.constant 0 : index
    %c0_5 = arith.constant 0 : index
    %4 = vector.load %arg3[%c0_2, %c0_3, %c0_4, %c0_5] : memref<1x1x21x8xbf16, #tpu.memory_space<vmem>>, vector<1x1x20x8xbf16>
    %5 = vector.shape_cast %4 : vector<1x1x20x8xbf16> to vector<20x8xbf16>
    %c0_6 = arith.constant 0 : index
    %c0_7 = arith.constant 0 : index
    %c0_8 = arith.constant 0 : index
    %c0_9 = arith.constant 0 : index
    %6 = vector.load %arg4[%c0_6, %c0_7, %c0_8, %c0_9] : memref<1x2x8x4xbf16, #tpu.memory_space<vmem>>, vector<1x1x8x4xbf16>
    %7 = vector.shape_cast %6 : vector<1x1x8x4xbf16> to vector<8x4xbf16>
    %cst = arith.constant dense<0.000000e+00> : vector<20x4xf32>
    %8 = tpu.matmul %5, %7, %cst {dimension_numbers = #tpu.dot_dimension_numbers<[1], [0], [0], [1], [0, 0, 1, 1], [], []>} : vector<20x8xbf16>, vector<8x4xbf16>, vector<20x4xf32> -> vector<20x4xf32>
    %9 = arith.addf %3, %8 : vector<20x4xf32>
    %c0_10 = arith.constant 0 : index
    %c0_11 = arith.constant 0 : index
    %c1 = arith.constant 1 : index
    %c0_12 = arith.constant 0 : index
    %10 = vector.load %arg3[%c0_10, %c0_11, %c1, %c0_12] : memref<1x1x21x8xbf16, #tpu.memory_space<vmem>>, vector<1x1x20x8xbf16>
    %11 = vector.shape_cast %10 : vector<1x1x20x8xbf16> to vector<20x8xbf16>
    %c0_13 = arith.constant 0 : index
    %c1_14 = arith.constant 1 : index
    %c0_15 = arith.constant 0 : index
    %c0_16 = arith.constant 0 : index
    %12 = vector.load %arg4[%c0_13, %c1_14, %c0_15, %c0_16] : memref<1x2x8x4xbf16, #tpu.memory_space<vmem>>, vector<1x1x8x4xbf16>
    %13 = vector.shape_cast %12 : vector<1x1x8x4xbf16> to vector<8x4xbf16>
    %cst_17 = arith.constant dense<0.000000e+00> : vector<20x4xf32>
    %14 = tpu.matmul %11, %13, %cst_17 {dimension_numbers = #tpu.dot_dimension_numbers<[1], [0], [0], [1], [0, 0, 1, 1], [], []>} : vector<20x8xbf16>, vector<8x4xbf16>, vector<20x4xf32> -> vector<20x4xf32>
    %15 = arith.addf %9, %14 : vector<20x4xf32>
    %c0_18 = arith.constant 0 : index
    %c0_19 = arith.constant 0 : index
    %16 = vector.load %arg8[%c0_18, %c0_19] : memref<20x4xf32, #tpu.memory_space<vmem>>, vector<20x4xf32>
    tpu.vector_store %arg8[%c0_18, %c0_19], %15 {strides = array<i32>} : memref<20x4xf32, #tpu.memory_space<vmem>>, vector<20x4xf32>,
    %c1_i32 = arith.constant 1 : i32
    %17 = arith.cmpi eq, %arg2, %c1_i32 : i32
    %18 = arith.extui %17 : i1 to i32
    %c0_i32_20 = arith.constant 0 : i32
    %19 = arith.cmpi ne, %18, %c0_i32_20 : i32
    scf.if %19 {
      %c0_21 = arith.constant 0 : index
      %c0_22 = arith.constant 0 : index
      %20 = vector.load %arg5[%c0_21, %c0_22] : memref<1x4xf32, #tpu.memory_space<vmem>>, vector<1x4xf32>
      %21 = vector.broadcast %20 : vector<1x4xf32> to vector<20x4xf32>
      %22 = arith.addf %15, %21 : vector<20x4xf32>
      %c0_23 = arith.constant 0 : index
      %c0_24 = arith.constant 0 : index
      %c0_25 = arith.constant 0 : index
      %c0_26 = arith.constant 0 : index
      %23 = vector.load %arg6[%c0_23, %c0_24, %c0_25, %c0_26] : memref<1x1x20x4xbf16, #tpu.memory_space<vmem>>, vector<1x1x20x4xbf16>
      %24 = vector.shape_cast %23 : vector<1x1x20x4xbf16> to vector<20x4xbf16>
      %25 = arith.extf %24 : vector<20x4xbf16> to vector<20x4xf32>
      %26 = arith.addf %22, %25 : vector<20x4xf32>
      %cst_27 = arith.constant 0.000000e+00 : f32
      %27 = vector.broadcast %cst_27 : f32 to vector<20x4xf32>
      %28 = arith.maximumf %26, %27 : vector<20x4xf32>
      %29 = arith.truncf %28 : vector<20x4xf32> to vector<20x4xbf16>
      %c0_28 = arith.constant 0 : index
      %c0_29 = arith.constant 0 : index
      %c0_30 = arith.constant 0 : index
      %c0_31 = arith.constant 0 : index
      %30 = vector.load %arg7[%c0_28, %c0_29, %c0_30, %c0_31] : memref<1x1x20x4xbf16, #tpu.memory_space<vmem>>, vector<1x1x20x4xbf16>
      %31 = vector.shape_cast %30 : vector<1x1x20x4xbf16> to vector<20x4xbf16>
      %32 = vector.shape_cast %29 : vector<20x4xbf16> to vector<1x1x20x4xbf16>
      tpu.vector_store %arg7[%c0_28, %c0_29, %c0_30, %c0_31], %32 {strides = array<i32>} : memref<1x1x20x4xbf16, #tpu.memory_space<vmem>>, vector<1x1x20x4xbf16>,
    } else {
    }
    return
  }
  func.func @transform_0(%arg0: i32, %arg1: i32, %arg2: i32) -> (i32, i32, i32, i32) {
    %c1_i32 = arith.constant 1 : i32
    %0 = arith.muli %c1_i32, %arg1 : i32
    %1 = arith.addi %0, %arg2 : i32
    %c0_i32 = arith.constant 0 : i32
    %c0_i32_0 = arith.constant 0 : i32
    %c0_i32_1 = arith.constant 0 : i32
    return %arg0, %1, %c0_i32, %c0_i32_0 : i32, i32, i32, i32
  }
  func.func @transform_1(%arg0: i32, %arg1: i32, %arg2: i32) -> (i32, i32, i32, i32) {
    %c0_i32 = arith.constant 0 : i32
    %c0_i32_0 = arith.constant 0 : i32
    %c0_i32_1 = arith.constant 0 : i32
    %c0_i32_2 = arith.constant 0 : i32
    return %arg2, %c0_i32, %c0_i32_0, %c0_i32_1 : i32, i32, i32, i32
  }
  func.func @transform_2(%arg0: i32, %arg1: i32, %arg2: i32) -> (i32, i32) {
    %c0_i32 = arith.constant 0 : i32
    %c0_i32_0 = arith.constant 0 : i32
    %c0_i32_1 = arith.constant 0 : i32
    return %c0_i32, %c0_i32_0 : i32, i32
  }
  func.func @transform_3(%arg0: i32, %arg1: i32, %arg2: i32) -> (i32, i32, i32, i32) {
    %c0_i32 = arith.constant 0 : i32
    %c0_i32_0 = arith.constant 0 : i32
    %c0_i32_1 = arith.constant 0 : i32
    return %arg0, %arg1, %c0_i32, %c0_i32_0 : i32, i32, i32, i32
  }
  func.func @transform_4(%arg0: i32, %arg1: i32, %arg2: i32) -> (i32, i32, i32, i32) {
    %c0_i32 = arith.constant 0 : i32
    %c0_i32_0 = arith.constant 0 : i32
    %c0_i32_1 = arith.constant 0 : i32
    return %arg0, %arg1, %c0_i32, %c0_i32_0 : i32, i32, i32, i32
  }
}

module attributes {stable_mosaic.version = 11 : i64} {
  func.func @kernel(%arg0: i32, %arg1: i32, %arg2: i32, %arg3: memref<1x1x20x8xbf16, #tpu.memory_space<vmem>>, %arg4: memref<1x2x8x4xbf16, #tpu.memory_space<vmem>>, %arg5: memref<1x4xf32, #tpu.memory_space<vmem>>, %arg6: memref<1x1x16x4xbf16, #tpu.memory_space<vmem>>, %arg7: memref<1x1x16x4xbf16, #tpu.memory_space<vmem>>, %arg8: memref<16x4xf32, #tpu.memory_space<vmem>>) attributes {dimension_semantics = [#tpu.dimension_semantics<parallel>, #tpu.dimension_semantics<parallel>, #tpu.dimension_semantics<arbitrary>], iteration_bounds = array<i64: 2, 4, 2>, scalar_prefetch = 0 : i64, scratch_operands = 1 : i64, tpu.core_type = #tpu.core_type<tc>, window_params = [{transform_indices = @transform_0, window_bounds = array<i64: 1, 1, 20, 8>}, {transform_indices = @transform_1, window_bounds = array<i64: 1, 2, 8, 4>}, {pipeline_mode = #tpu.pipeline_mode<synchronous>, transform_indices = @transform_2, window_bounds = array<i64: 1, 4>}, {transform_indices = @transform_3, window_bounds = array<i64: 1, 1, 16, 4>}, {transform_indices = @transform_4, window_bounds = array<i64: 1, 1, 16, 4>}]} {
    %c0_i32 = arith.constant 0 : i32
    %0 = arith.cmpi eq, %arg2, %c0_i32 : i32
    %1 = arith.extui %0 : i1 to i32
    %c0_i32_0 = arith.constant 0 : i32
    %2 = arith.cmpi ne, %1, %c0_i32_0 : i32
    scf.if %2 {
      %cst_20 = arith.constant 0.000000e+00 : f32
      %20 = vector.broadcast %cst_20 : f32 to vector<16x4xf32>
      %c0_21 = arith.constant 0 : index
      %c0_22 = arith.constant 0 : index
      %21 = vector.load %arg8[%c0_21, %c0_22] : memref<16x4xf32, #tpu.memory_space<vmem>>, vector<16x4xf32>
      tpu.vector_store %arg8[%c0_21, %c0_22], %20 {strides = array<i32>} : memref<16x4xf32, #tpu.memory_space<vmem>>, vector<16x4xf32>,
    } else {
    }
    %c0 = arith.constant 0 : index
    %c0_1 = arith.constant 0 : index
    %3 = vector.load %arg8[%c0, %c0_1] : memref<16x4xf32, #tpu.memory_space<vmem>>, vector<16x4xf32>
    %c0_2 = arith.constant 0 : index
    %c0_3 = arith.constant 0 : index
    %c0_4 = arith.constant 0 : index
    %c0_5 = arith.constant 0 : index
    %4 = vector.load %arg3[%c0_2, %c0_3, %c0_4, %c0_5] : memref<1x1x20x8xbf16, #tpu.memory_space<vmem>>, vector<1x1x16x8xbf16>
    %5 = vector.shape_cast %4 : vector<1x1x16x8xbf16> to vector<16x8xbf16>
    %c0_6 = arith.constant 0 : index
    %c0_7 = arith.constant 0 : index
    %c0_8 = arith.constant 0 : index
    %c0_9 = arith.constant 0 : index
    %6 = vector.load %arg4[%c0_6, %c0_7, %c0_8, %c0_9] : memref<1x2x8x4xbf16, #tpu.memory_space<vmem>>, vector<1x1x8x4xbf16>
    %7 = vector.shape_cast %6 : vector<1x1x8x4xbf16> to vector<8x4xbf16>
    %cst = arith.constant dense<0.000000e+00> : vector<16x4xf32>
    %8 = tpu.matmul %5, %7, %cst {dimension_numbers = #tpu.dot_dimension_numbers<[1], [0], [0], [1], [0, 0, 1, 1], [], []>} : vector<16x8xbf16>, vector<8x4xbf16>, vector<16x4xf32> -> vector<16x4xf32>
    %9 = arith.addf %3, %8 : vector<16x4xf32>
    %c0_10 = arith.constant 0 : index
    %c0_11 = arith.constant 0 : index
    %c4 = arith.constant 4 : index
    %c0_12 = arith.constant 0 : index
    %10 = vector.load %arg3[%c0_10, %c0_11, %c4, %c0_12] : memref<1x1x20x8xbf16, #tpu.memory_space<vmem>>, vector<1x1x16x8xbf16>
    %11 = vector.shape_cast %10 : vector<1x1x16x8xbf16> to vector<16x8xbf16>
    %c0_13 = arith.constant 0 : index
    %c1 = arith.constant 1 : index
    %c0_14 = arith.constant 0 : index
    %c0_15 = arith.constant 0 : index
    %12 = vector.load %arg4[%c0_13, %c1, %c0_14, %c0_15] : memref<1x2x8x4xbf16, #tpu.memory_space<vmem>>, vector<1x1x8x4xbf16>
    %13 = vector.shape_cast %12 : vector<1x1x8x4xbf16> to vector<8x4xbf16>
    %cst_16 = arith.constant dense<0.000000e+00> : vector<16x4xf32>
    %14 = tpu.matmul %11, %13, %cst_16 {dimension_numbers = #tpu.dot_dimension_numbers<[1], [0], [0], [1], [0, 0, 1, 1], [], []>} : vector<16x8xbf16>, vector<8x4xbf16>, vector<16x4xf32> -> vector<16x4xf32>
    %15 = arith.addf %9, %14 : vector<16x4xf32>
    %c0_17 = arith.constant 0 : index
    %c0_18 = arith.constant 0 : index
    %16 = vector.load %arg8[%c0_17, %c0_18] : memref<16x4xf32, #tpu.memory_space<vmem>>, vector<16x4xf32>
    tpu.vector_store %arg8[%c0_17, %c0_18], %15 {strides = array<i32>} : memref<16x4xf32, #tpu.memory_space<vmem>>, vector<16x4xf32>,
    %c1_i32 = arith.constant 1 : i32
    %17 = arith.cmpi eq, %arg2, %c1_i32 : i32
    %18 = arith.extui %17 : i1 to i32
    %c0_i32_19 = arith.constant 0 : i32
    %19 = arith.cmpi ne, %18, %c0_i32_19 : i32
    scf.if %19 {
      %c0_20 = arith.constant 0 : index
      %c0_21 = arith.constant 0 : index
      %20 = vector.load %arg5[%c0_20, %c0_21] : memref<1x4xf32, #tpu.memory_space<vmem>>, vector<1x4xf32>
      %21 = vector.broadcast %20 : vector<1x4xf32> to vector<16x4xf32>
      %22 = arith.addf %15, %21 : vector<16x4xf32>
      %c0_22 = arith.constant 0 : index
      %c0_23 = arith.constant 0 : index
      %c0_24 = arith.constant 0 : index
      %c0_25 = arith.constant 0 : index
      %23 = vector.load %arg6[%c0_22, %c0_23, %c0_24, %c0_25] : memref<1x1x16x4xbf16, #tpu.memory_space<vmem>>, vector<1x1x16x4xbf16>
      %24 = vector.shape_cast %23 : vector<1x1x16x4xbf16> to vector<16x4xbf16>
      %25 = arith.extf %24 : vector<16x4xbf16> to vector<16x4xf32>
      %26 = arith.addf %22, %25 : vector<16x4xf32>
      %cst_26 = arith.constant 0.000000e+00 : f32
      %27 = vector.broadcast %cst_26 : f32 to vector<16x4xf32>
      %28 = arith.maximumf %26, %27 : vector<16x4xf32>
      %29 = arith.truncf %28 : vector<16x4xf32> to vector<16x4xbf16>
      %c0_27 = arith.constant 0 : index
      %c0_28 = arith.constant 0 : index
      %c0_29 = arith.constant 0 : index
      %c0_30 = arith.constant 0 : index
      %30 = vector.load %arg7[%c0_27, %c0_28, %c0_29, %c0_30] : memref<1x1x16x4xbf16, #tpu.memory_space<vmem>>, vector<1x1x16x4xbf16>
      %31 = vector.shape_cast %30 : vector<1x1x16x4xbf16> to vector<16x4xbf16>
      %32 = vector.shape_cast %29 : vector<16x4xbf16> to vector<1x1x16x4xbf16>
      tpu.vector_store %arg7[%c0_27, %c0_28, %c0_29, %c0_30], %32 {strides = array<i32>} : memref<1x1x16x4xbf16, #tpu.memory_space<vmem>>, vector<1x1x16x4xbf16>,
    } else {
    }
    return
  }
  func.func @transform_0(%arg0: i32, %arg1: i32, %arg2: i32) -> (i32, i32, i32, i32) {
    %c1_i32 = arith.constant 1 : i32
    %0 = arith.muli %c1_i32, %arg1 : i32
    %1 = arith.addi %0, %arg2 : i32
    %c0_i32 = arith.constant 0 : i32
    %c0_i32_0 = arith.constant 0 : i32
    %c0_i32_1 = arith.constant 0 : i32
    return %arg0, %1, %c0_i32, %c0_i32_0 : i32, i32, i32, i32
  }
  func.func @transform_1(%arg0: i32, %arg1: i32, %arg2: i32) -> (i32, i32, i32, i32) {
    %c0_i32 = arith.constant 0 : i32
    %c0_i32_0 = arith.constant 0 : i32
    %c0_i32_1 = arith.constant 0 : i32
    %c0_i32_2 = arith.constant 0 : i32
    return %arg2, %c0_i32, %c0_i32_0, %c0_i32_1 : i32, i32, i32, i32
  }
  func.func @transform_2(%arg0: i32, %arg1: i32, %arg2: i32) -> (i32, i32) {
    %c0_i32 = arith.constant 0 : i32
    %c0_i32_0 = arith.constant 0 : i32
    %c0_i32_1 = arith.constant 0 : i32
    return %c0_i32, %c0_i32_0 : i32, i32
  }
  func.func @transform_3(%arg0: i32, %arg1: i32, %arg2: i32) -> (i32, i32, i32, i32) {
    %c0_i32 = arith.constant 0 : i32
    %c0_i32_0 = arith.constant 0 : i32
    %c0_i32_1 = arith.constant 0 : i32
    return %arg0, %arg1, %c0_i32, %c0_i32_0 : i32, i32, i32, i32
  }
  func.func @transform_4(%arg0: i32, %arg1: i32, %arg2: i32) -> (i32, i32, i32, i32) {
    %c0_i32 = arith.constant 0 : i32
    %c0_i32_0 = arith.constant 0 : i32
    %c0_i32_1 = arith.constant 0 : i32
    return %arg0, %arg1, %c0_i32, %c0_i32_0 : i32, i32, i32, i32
  }
}

module attributes {stable_mosaic.version = 11 : i64} {
  func.func @kernel(%arg0: i32, %arg1: i32, %arg2: i32, %arg3: memref<1x1x26x8xbf16, #tpu.memory_space<vmem>>, %arg4: memref<1x4x8x4xbf16, #tpu.memory_space<vmem>>, %arg5: memref<1x4xf32, #tpu.memory_space<vmem>>, %arg6: memref<1x1x20x4xbf16, #tpu.memory_space<vmem>>, %arg7: memref<1x1x20x4xbf16, #tpu.memory_space<vmem>>, %arg8: memref<20x4xf32, #tpu.memory_space<vmem>>) attributes {dimension_semantics = [#tpu.dimension_semantics<parallel>, #tpu.dimension_semantics<parallel>, #tpu.dimension_semantics<arbitrary>], iteration_bounds = array<i64: 2, 4, 2>, scalar_prefetch = 0 : i64, scratch_operands = 1 : i64, tpu.core_type = #tpu.core_type<tc>, window_params = [{transform_indices = @transform_0, window_bounds = array<i64: 1, 1, 26, 8>}, {transform_indices = @transform_1, window_bounds = array<i64: 1, 4, 8, 4>}, {pipeline_mode = #tpu.pipeline_mode<synchronous>, transform_indices = @transform_2, window_bounds = array<i64: 1, 4>}, {transform_indices = @transform_3, window_bounds = array<i64: 1, 1, 20, 4>}, {transform_indices = @transform_4, window_bounds = array<i64: 1, 1, 20, 4>}]} {
    %c0_i32 = arith.constant 0 : i32
    %0 = arith.cmpi eq, %arg2, %c0_i32 : i32
    %1 = arith.extui %0 : i1 to i32
    %c0_i32_0 = arith.constant 0 : i32
    %2 = arith.cmpi ne, %1, %c0_i32_0 : i32
    scf.if %2 {
      %cst_35 = arith.constant 0.000000e+00 : f32
      %32 = vector.broadcast %cst_35 : f32 to vector<20x4xf32>
      %c0_36 = arith.constant 0 : index
      %c0_37 = arith.constant 0 : index
      %33 = vector.load %arg8[%c0_36, %c0_37] : memref<20x4xf32, #tpu.memory_space<vmem>>, vector<20x4xf32>
      tpu.vector_store %arg8[%c0_36, %c0_37], %32 {strides = array<i32>} : memref<20x4xf32, #tpu.memory_space<vmem>>, vector<20x4xf32>,
    } else {
    }
    %c0 = arith.constant 0 : index
    %c0_1 = arith.constant 0 : index
    %3 = vector.load %arg8[%c0, %c0_1] : memref<20x4xf32, #tpu.memory_space<vmem>>, vector<20x4xf32>
    %c0_2 = arith.constant 0 : index
    %c0_3 = arith.constant 0 : index
    %c0_4 = arith.constant 0 : index
    %c0_5 = arith.constant 0 : index
    %4 = vector.load %arg3[%c0_2, %c0_3, %c0_4, %c0_5] : memref<1x1x26x8xbf16, #tpu.memory_space<vmem>>, vector<1x1x20x8xbf16>
    %5 = vector.shape_cast %4 : vector<1x1x20x8xbf16> to vector<20x8xbf16>
    %c0_6 = arith.constant 0 : index
    %c0_7 = arith.constant 0 : index
    %c0_8 = arith.constant 0 : index
    %c0_9 = arith.constant 0 : index
    %6 = vector.load %arg4[%c0_6, %c0_7, %c0_8, %c0_9] : memref<1x4x8x4xbf16, #tpu.memory_space<vmem>>, vector<1x1x8x4xbf16>
    %7 = vector.shape_cast %6 : vector<1x1x8x4xbf16> to vector<8x4xbf16>
    %cst = arith.constant dense<0.000000e+00> : vector<20x4xf32>
    %8 = tpu.matmul %5, %7, %cst {dimension_numbers = #tpu.dot_dimension_numbers<[1], [0], [0], [1], [0, 0, 1, 1], [], []>} : vector<20x8xbf16>, vector<8x4xbf16>, vector<20x4xf32> -> vector<20x4xf32>
    %9 = arith.addf %3, %8 : vector<20x4xf32>
    %c0_10 = arith.constant 0 : index
    %c0_11 = arith.constant 0 : index
    %c1 = arith.constant 1 : index
    %c0_12 = arith.constant 0 : index
    %10 = vector.load %arg3[%c0_10, %c0_11, %c1, %c0_12] : memref<1x1x26x8xbf16, #tpu.memory_space<vmem>>, vector<1x1x20x8xbf16>
    %11 = vector.shape_cast %10 : vector<1x1x20x8xbf16> to vector<20x8xbf16>
    %c0_13 = arith.constant 0 : index
    %c1_14 = arith.constant 1 : index
    %c0_15 = arith.constant 0 : index
    %c0_16 = arith.constant 0 : index
    %12 = vector.load %arg4[%c0_13, %c1_14, %c0_15, %c0_16] : memref<1x4x8x4xbf16, #tpu.memory_space<vmem>>, vector<1x1x8x4xbf16>
    %13 = vector.shape_cast %12 : vector<1x1x8x4xbf16> to vector<8x4xbf16>
    %cst_17 = arith.constant dense<0.000000e+00> : vector<20x4xf32>
    %14 = tpu.matmul %11, %13, %cst_17 {dimension_numbers = #tpu.dot_dimension_numbers<[1], [0], [0], [1], [0, 0, 1, 1], [], []>} : vector<20x8xbf16>, vector<8x4xbf16>, vector<20x4xf32> -> vector<20x4xf32>
    %15 = arith.addf %9, %14 : vector<20x4xf32>
    %c0_18 = arith.constant 0 : index
    %c0_19 = arith.constant 0 : index
    %c5 = arith.constant 5 : index
    %c0_20 = arith.constant 0 : index
    %16 = vector.load %arg3[%c0_18, %c0_19, %c5, %c0_20] : memref<1x1x26x8xbf16, #tpu.memory_space<vmem>>, vector<1x1x20x8xbf16>
    %17 = vector.shape_cast %16 : vector<1x1x20x8xbf16> to vector<20x8xbf16>
    %c0_21 = arith.constant 0 : index
    %c2 = arith.constant 2 : index
    %c0_22 = arith.constant 0 : index
    %c0_23 = arith.constant 0 : index
    %18 = vector.load %arg4[%c0_21, %c2, %c0_22, %c0_23] : memref<1x4x8x4xbf16, #tpu.memory_space<vmem>>, vector<1x1x8x4xbf16>
    %19 = vector.shape_cast %18 : vector<1x1x8x4xbf16> to vector<8x4xbf16>
    %cst_24 = arith.constant dense<0.000000e+00> : vector<20x4xf32>
    %20 = tpu.matmul %17, %19, %cst_24 {dimension_numbers = #tpu.dot_dimension_numbers<[1], [0], [0], [1], [0, 0, 1, 1], [], []>} : vector<20x8xbf16>, vector<8x4xbf16>, vector<20x4xf32> -> vector<20x4xf32>
    %21 = arith.addf %15, %20 : vector<20x4xf32>
    %c0_25 = arith.constant 0 : index
    %c0_26 = arith.constant 0 : index
    %c6 = arith.constant 6 : index
    %c0_27 = arith.constant 0 : index
    %22 = vector.load %arg3[%c0_25, %c0_26, %c6, %c0_27] : memref<1x1x26x8xbf16, #tpu.memory_space<vmem>>, vector<1x1x20x8xbf16>
    %23 = vector.shape_cast %22 : vector<1x1x20x8xbf16> to vector<20x8xbf16>
    %c0_28 = arith.constant 0 : index
    %c3 = arith.constant 3 : index
    %c0_29 = arith.constant 0 : index
    %c0_30 = arith.constant 0 : index
    %24 = vector.load %arg4[%c0_28, %c3, %c0_29, %c0_30] : memref<1x4x8x4xbf16, #tpu.memory_space<vmem>>, vector<1x1x8x4xbf16>
    %25 = vector.shape_cast %24 : vector<1x1x8x4xbf16> to vector<8x4xbf16>
    %cst_31 = arith.constant dense<0.000000e+00> : vector<20x4xf32>
    %26 = tpu.matmul %23, %25, %cst_31 {dimension_numbers = #tpu.dot_dimension_numbers<[1], [0], [0], [1], [0, 0, 1, 1], [], []>} : vector<20x8xbf16>, vector<8x4xbf16>, vector<20x4xf32> -> vector<20x4xf32>
    %27 = arith.addf %21, %26 : vector<20x4xf32>
    %c0_32 = arith.constant 0 : index
    %c0_33 = arith.constant 0 : index
    %28 = vector.load %arg8[%c0_32, %c0_33] : memref<20x4xf32, #tpu.memory_space<vmem>>, vector<20x4xf32>
    tpu.vector_store %arg8[%c0_32, %c0_33], %27 {strides = array<i32>} : memref<20x4xf32, #tpu.memory_space<vmem>>, vector<20x4xf32>,
    %c1_i32 = arith.constant 1 : i32
    %29 = arith.cmpi eq, %arg2, %c1_i32 : i32
    %30 = arith.extui %29 : i1 to i32
    %c0_i32_34 = arith.constant 0 : i32
    %31 = arith.cmpi ne, %30, %c0_i32_34 : i32
    scf.if %31 {
      %c0_35 = arith.constant 0 : index
      %c0_36 = arith.constant 0 : index
      %32 = vector.load %arg5[%c0_35, %c0_36] : memref<1x4xf32, #tpu.memory_space<vmem>>, vector<1x4xf32>
      %33 = vector.broadcast %32 : vector<1x4xf32> to vector<20x4xf32>
      %34 = arith.addf %27, %33 : vector<20x4xf32>
      %c0_37 = arith.constant 0 : index
      %c0_38 = arith.constant 0 : index
      %c0_39 = arith.constant 0 : index
      %c0_40 = arith.constant 0 : index
      %35 = vector.load %arg6[%c0_37, %c0_38, %c0_39, %c0_40] : memref<1x1x20x4xbf16, #tpu.memory_space<vmem>>, vector<1x1x20x4xbf16>
      %36 = vector.shape_cast %35 : vector<1x1x20x4xbf16> to vector<20x4xbf16>
      %37 = arith.extf %36 : vector<20x4xbf16> to vector<20x4xf32>
      %38 = arith.addf %34, %37 : vector<20x4xf32>
      %cst_41 = arith.constant 0.000000e+00 : f32
      %39 = vector.broadcast %cst_41 : f32 to vector<20x4xf32>
      %40 = arith.maximumf %38, %39 : vector<20x4xf32>
      %41 = arith.truncf %40 : vector<20x4xf32> to vector<20x4xbf16>
      %c0_42 = arith.constant 0 : index
      %c0_43 = arith.constant 0 : index
      %c0_44 = arith.constant 0 : index
      %c0_45 = arith.constant 0 : index
      %42 = vector.load %arg7[%c0_42, %c0_43, %c0_44, %c0_45] : memref<1x1x20x4xbf16, #tpu.memory_space<vmem>>, vector<1x1x20x4xbf16>
      %43 = vector.shape_cast %42 : vector<1x1x20x4xbf16> to vector<20x4xbf16>
      %44 = vector.shape_cast %41 : vector<20x4xbf16> to vector<1x1x20x4xbf16>
      tpu.vector_store %arg7[%c0_42, %c0_43, %c0_44, %c0_45], %44 {strides = array<i32>} : memref<1x1x20x4xbf16, #tpu.memory_space<vmem>>, vector<1x1x20x4xbf16>,
    } else {
    }
    return
  }
  func.func @transform_0(%arg0: i32, %arg1: i32, %arg2: i32) -> (i32, i32, i32, i32) {
    %c1_i32 = arith.constant 1 : i32
    %0 = arith.muli %c1_i32, %arg1 : i32
    %1 = arith.addi %0, %arg2 : i32
    %c0_i32 = arith.constant 0 : i32
    %c0_i32_0 = arith.constant 0 : i32
    %c0_i32_1 = arith.constant 0 : i32
    return %arg0, %1, %c0_i32, %c0_i32_0 : i32, i32, i32, i32
  }
  func.func @transform_1(%arg0: i32, %arg1: i32, %arg2: i32) -> (i32, i32, i32, i32) {
    %c0_i32 = arith.constant 0 : i32
    %c0_i32_0 = arith.constant 0 : i32
    %c0_i32_1 = arith.constant 0 : i32
    %c0_i32_2 = arith.constant 0 : i32
    return %arg2, %c0_i32, %c0_i32_0, %c0_i32_1 : i32, i32, i32, i32
  }
  func.func @transform_2(%arg0: i32, %arg1: i32, %arg2: i32) -> (i32, i32) {
    %c0_i32 = arith.constant 0 : i32
    %c0_i32_0 = arith.constant 0 : i32
    %c0_i32_1 = arith.constant 0 : i32
    return %c0_i32, %c0_i32_0 : i32, i32
  }
  func.func @transform_3(%arg0: i32, %arg1: i32, %arg2: i32) -> (i32, i32, i32, i32) {
    %c0_i32 = arith.constant 0 : i32
    %c0_i32_0 = arith.constant 0 : i32
    %c0_i32_1 = arith.constant 0 : i32
    return %arg0, %arg1, %c0_i32, %c0_i32_0 : i32, i32, i32, i32
  }
  func.func @transform_4(%arg0: i32, %arg1: i32, %arg2: i32) -> (i32, i32, i32, i32) {
    %c0_i32 = arith.constant 0 : i32
    %c0_i32_0 = arith.constant 0 : i32
    %c0_i32_1 = arith.constant 0 : i32
    return %arg0, %arg1, %c0_i32, %c0_i32_0 : i32, i32, i32, i32
  }
}

</mosaic_0001>

<bundles_post_ra>
// kernel: hourglass_forward.22
= control target key start
LH: loop header
LB: loop body
LE: loop exit
PB: predicated region body
PF: predicated region fallthrough
CT: control target
= control target key end

     0   :  { %s1409_s15 = smov 0   ;;  %s1411_s16 = smov 0   ;;  %s1643_s0 = inlined_call_operand.vmem [shape: bf16[2,10,51,4], index: 0, kind: input, shape index: {}]   ;;  %s1644_s1 = inlined_call_operand.vmem [shape: bf16[2,10,50,4], index: 1, kind: input, shape index: {}]   ;;  %s1645_s2 = inlined_call_operand.vmem [shape: bf16[3,9,4,8], index: 2, kind: input, shape index: {}]   ;;  %s1646_s3 = inlined_call_operand.vmem [shape: f32[1,8], index: 3, kind: input, shape index: {}]   ;;  %s1647_s4 = inlined_call_operand.vmem [shape: bf16[2,4,40,8], index: 4, kind: output, shape index: {}]  }
   0x1   :  { %s1413_s17 = smov 0   ;;  %s1415_s18 = smov 0  }
   0x2   :  { %s1417_s19 = smov 0   ;;  %s1419_s20 = smov 0  }
   0x3   :  { %s1421_s21 = smov 0  }
   0x4 LB: > { %s26_s22 = sadd.s32 1, %s1369_s18  ;;  %s29_s23 = sadd.s32 1, %s1373_s19  ;;  %s1381_s21 = sphi %s1421_s21, %s14_s21   ;;  %s1377_s20 = sphi %s1419_s20, %s1655_s20   ;;  %s1373_s19 = sphi %s1417_s19, %s1654_s19   ;;  %s1369_s18 = sphi %s1415_s18, %s1653_s18   ;;  %s1365_s17 = sphi %s1413_s17, %s1652_s17   ;;  %s1361_s16 = sphi %s1411_s16, %s1651_s16   ;;  %s1357_s15 = sphi %s1409_s15, %s1650_s15  }
   0x5   : > { %p27_p0 = scmp.ge.s32.totalorder %s26_s22, 3  ;;  %p1147_p1 = scmp.ge.s32.totalorder %s1381_s21, 1 }
   0x6   : > { %p231_p2 = scmp.lt.s32.totalorder %s1381_s21, 25  ;;  %s33_s24 = sadd.s32 1, %s1377_s20 }
   0x7   : > { %s1657_s22 = smov (%p27_p0, %s26_s22), 0  ;;  %s1659_s23 = smov (!%p27_p0, %s29_s23), %s1373_s19 }
   0x8   : > { %p232_p3 = pnand %p1147_p1, %p231_p2  ;;  %p31_p4 = scmp.ge.s32.totalorder %s1659_s23, 4 }
   0x9   : > { %s1148_s25 = sshll.u32 (!%p232_p3), %s1361_s16, 1  ;;  %p285_p6 = scmp.lt.s32.totalorder (!%p232_p3), %s1365_s17, 1 }
   0xa   : > { %s1661_s23 = smov (%p31_p4, %s1659_s23), 0  ;;  %s1663_s24 = smov (!%p31_p4, %s33_s24), %s1377_s20 }
   0xb   : > { %p35_p5 = scmp.ge.s32.totalorder %s1663_s24, 2  ;;  %235 = sbr.rel (%p232_p3) target bundleno = 290 (0x122), region = 36 }
   0xc   : > { %s284_s26 = sadd.s32 (!%p232_p3), %s1357_s15, %s1148_s25  ;;  %p309_p7 = scmp.lt.s32.totalorder (!%p232_p3), %s1357_s15, 2 }
   0xd   : > { %s1665_s24 = smov (%p35_p5, %s1663_s24), 0  ;;  %p287_p8 = scmp.lt.s32.totalorder (!%p232_p3), %s284_s26, 9 }
   0xe   : > { %1648 = sst [smem:[#allocation3_spill]] %s1665_s24  ;;  %p316_p9 = scmp.lt.s32.totalorder (!%p232_p3), %s1361_s16, 3 }
   0xf   : > { %p1154_p10 = scmp.ne.s32.totalorder (!%p232_p3), %s1357_s15, 0 }
  0x10   : > { %s1667_s17 = smov (!%p285_p6, %s1365_s17), 1  ;;  %s1669_s26 = smov (!%p287_p8, %s284_s26), 9 }
  0x11   : > { %s1265_s27 = smul.u32 70, %s1667_s17  ;;  %s1671_s16 = smov (!%p316_p9, %s1361_s16), 3 }
  0x12   : > { %s310_s28 = scalar_select %p309_p7, %s1357_s15, 2 }
  0x13   : > { %s1264_s29 = smul.u32 7, %s1669_s26 }
  0x14   : > { %s1266_s30 = smul.u32 18, %s310_s28 }
  0x15   : > { %s291_s5 = sadd.s32 %s1265_s27, %s1264_s29  ;;  %s1268_s6 = smul.u32 20, %s1667_s17 }
  0x16   : > { %s1149_s7 = sshll.u32 %s291_s5, 2  ;;  %s1463_s10 = scalar_lea.vmem %s1645_s2, %s1266_s30 }
  0x17   : > { %s1468_s13 = scalar_lea.vmem %s1643_s0, %s1149_s7  ;;  %s1473_s24 = scalar_lea.vmem %s1644_s1, %s1149_s7 }
  0x18   : > { %s1267_s26 = smul.u32 5, %s1671_s16 }
  0x19   : > { %327 = sbr.rel (%p1154_p10) target bundleno = 36 (0x24), region = 40 }
  0x1a   : > { %s320_s27 = sadd.s32 %s1268_s6, %s1267_s26 }
  0x1b   : > { %s1153_s17 = sshll.u32 %s320_s27, 2 }
  0x1c   : > { %s1479_s5 = scalar_lea.vmem %s1647_s4, %s1153_s17 }
  0x1e   : > { %vm328_vm0 = vcmask 64512   ;;  %v1383_v0 = vmov 0.0  }
  0x1f   : > { %329 = vst.msk [vmem:[#allocation2] sm:$0xff] %vm328_vm0, %v1383_v0 }
  0x20   : > { %330 = vst.msk [vmem:[#allocation2 + $0x8] sm:$0xff] %vm328_vm0, %v1383_v0 }
  0x21   : > { %331 = vst.msk [vmem:[#allocation2 + $0x10] sm:$0xff] %vm328_vm0, %v1383_v0 }
  0x22   : > { %332 = vst.msk [vmem:[#allocation2 + $0x18] sm:$0xff] %vm328_vm0, %v1383_v0 }
  0x23   : > { %333 = vst.msk [vmem:[#allocation2 + $0x20] sm:$0xff] %vm328_vm0, %v1383_v0 }
  0x24 PF: > { %v344_v1 = vld [vmem:[%s1463_s10] sm:$0x3]  ;;  %vm368_vm1 = vcmask 1041408   ;;  %vm358_vm2 = vcmask 31744   ;;  %v1246_v3 = vld [vmem:[%s1468_s13 + $0x8] sm:$0xff]  ;;  %v1487_v5 = vld [vmem:[%s1468_s13 + $0x10] sm:$0xff]  }
  0x25   : > { %v1245_v2 = vld [vmem:[%s1468_s13] sm:$0xff]  ;;  %v370_v4 = vsel %vm368_vm1, %v344_v1, 0  ;;  %v354_v8 = vunpack.c.l.b16 %v1487_v5  ;;  %v1190_v12 = vld [vmem:[%s1463_s10 + $0x8] sm:$0x3]  ;;  %vm557_vm3 = vsmask.f32 5376 }
  0x26   : > { %v1178_v6 = vld [vmem:[%s1463_s10 + $0x4] sm:$0x3]  ;;  %v1166_v7 = vld [vmem:[%s1463_s10 + $0x2] sm:$0x3]  ;;  %379 = vmatpush.bf16.msra.mxu0 %v370_v4  ;;  %1262 = vmatpush.bf16.msra.mxu1 %v370_v4  ;;  %v1186_v11 = vld [vmem:[%s1463_s10 + $0x6] sm:$0x3] }
  0x27   : > { %v517_v9 = vsel %vm368_vm1, %v1178_v6, 0  ;;  %v430_v10 = vsel %vm368_vm1, %v1166_v7, 0  ;;  %1263 = vmatpush.bf16.msra.mxu2 %v370_v4  ;;  %v589_v13 = vsel %vm368_vm1, %v1186_v11, 0  ;;  %v678_v14 = vsel %vm368_vm1, %v1190_v12, 0  ;;  %v1499_v15 = vld [vmem:[%s1468_s13] sm:$0xff]   ;;  %v1502_v16 = vld [vmem:[%s1468_s13 + $0x8] sm:$0xff] }
  0x28   : > { %v547_v17 = vld [vmem:[%s1468_s13] sm:$0xc]  ;;  %v357_v18 = vpack.c.b16 %v354_v8, %v354_v8  ;;  %598 = vmatpush.bf16.msra.mxu3 %v589_v13  ;;  %v1261_v19 = vunpack.c.h.b16 %v1499_v15  ;;  %v1251_v22 = vld [vmem:[%s1473_s24 + $0x8] sm:$0xff]  ;;  %v492_v23 = vshll.u32 %v1502_v16, 16  ;;  %v496_v24 = vshrl.u32 %v1502_v16, 16  ;;  %p1242_p11 = scmp.ne.s32.totalorder %s1357_s15, 2 }
  0x29   : > { %v553_v20 = vunpack.c.l.b16 %v547_v17  ;;  %v1193_v21 = vld [vmem:[%s1473_s24] sm:$0xc]  ;;  %1163 = vmatmul.msk.bf16.vlgmr.msra.gmra.mxu0 %vm358_vm2, %v1245_v2  ;;  %1164 = vmatmul.msk.bf16.vlgmr.msra.gmra.mxu1 %vm358_vm2, %v1246_v3  ;;  %v1250_v26 = vld [vmem:[%s1473_s24] sm:$0xf0]  ;;  %v651_v27 = vshrl.u32 %v1251_v22, 16  ;;  %v654_v28 = vshll.u32 %v1251_v22, 16 }
  0x2a   : > { %439 = vmatpush.bf16.msrb.mxu1 %v430_v10  ;;  %1165 = vmatmul.msk.bf16.vlgmr.msra.gmra.mxu2 %vm358_vm2, %v357_v18  ;;  %v566_v29 = vrot.slane %v496_v24, 2  ;;  %v567_v30 = vrot.slane %v492_v23, 3  ;;  %v487_v31 = vshll.u32 %v1499_v15, 16  ;;  %v1194_v32 = vor.u32 %v1250_v26, %v1193_v21  ;;  %v1210_v33 = vld [vmem:[%s1463_s10 + $0xc] sm:$0x3]  ;;  %v1247_v4 = vld [vmem:[%s1473_s24] sm:$0xff] }
  0x2b   : > { %526 = vmatpush.bf16.msrb.mxu2 %v517_v9  ;;  %687 = vmatpush.bf16.msrb.mxu0 %v678_v14  ;;  %v555_v25 = vpack.c.b16 %v1261_v19, %v553_v20  ;;  %v485_v36 = vshrl.u32 %v1499_v15, 16  ;;  %v1222_v37 = vld [vmem:[%s1463_s10 + $0xe] sm:$0x3]  ;;  %v653_v41 = vrot.slane %v651_v27, 2  ;;  %v1206_v42 = vld [vmem:[%s1463_s10 + $0xa] sm:$0x3] }
  0x2c   : > { %v568_v38 = vor.u32 %v567_v30, %v566_v29  ;;  %v643_v39 = vshrl.u32 %v1194_v32, 16  ;;  %v646_v40 = vshll.u32 %v1194_v32, 16  ;;  %v656_v45 = vrot.slane %v654_v28, 3  ;;  %v1238_v47 = vld [vmem:[%s1463_s10 + $0x10] sm:$0x3]  ;;  %v1248_v29 = vld [vmem:[%s1473_s24 + $0x8] sm:$0xff] }
  0x2d   : > { %v559_v34 = vshrl.u32 %v555_v25, 16  ;;  %v562_v35 = vshll.u32 %v555_v25, 16  ;;  %v799_v46 = vsel %vm368_vm1, %v1210_v33, 0  ;;  %v489_v48 = vrot.slane %v487_v31, 1  ;;  %v464_v52 = vld [vmem:[%s1468_s13 + $0x10] sm:$0xf] }
  0x2e   : > { %v645_v49 = vrot.slane %v643_v39, 2  ;;  %v648_v50 = vrot.slane %v646_v40, 3  ;;  %v867_v51 = vsel %vm368_vm1, %v1222_v37, 0  ;;  %v730_v54 = vsel %vm368_vm1, %v1206_v42, 0  ;;  %v548_v56 = vld [vmem:[%s1468_s13 + $0x14] sm:$0x7] }
  0x2f   : > { %v561_v43 = vrot.slane %v559_v34, 2  ;;  %v564_v44 = vrot.slane %v562_v35, 3  ;;  %808 = vmatpush.bf16.msra.mxu2 %v799_v46  ;;  %876 = vmatpush.bf16.msrb.mxu3 %v867_v51  ;;  %v940_v55 = vsel %vm368_vm1, %v1238_v47, 0  ;;  %v478_v57 = vunpack.c.l.b16 %v464_v52  ;;  %v1201_v1 = vld [vmem:[%s1473_s24 + $0x10] sm:$0xf] }
  0x30   : > { %739 = vmatpush.bf16.msra.mxu1 %v730_v54  ;;  %949 = vmatpush.bf16.msra.mxu0 %v940_v55  ;;  %v554_v58 = vunpack.c.l.b16 %v548_v56  ;;  %v649_v60 = vor.u32 %v648_v50, %v645_v49  ;;  %v657_v61 = vor.u32 %v656_v45, %v653_v41  ;;  %v490_v62 = vor.u32 %v489_v48, %v485_v36  ;;  %v1252_v2 = vld [vmem:[%s1473_s24 + $0x10] sm:$0x70]  ;;  %v404_v32 = vld [vmem:[%s1473_s24 + $0x10] sm:$0xf]  ;;  %v1253_v35 = vld [vmem:[%s1468_s13 + $0x4] sm:$0xf0] }
  0x31   : > { %v565_v53 = vor.u32 %v564_v44, %v561_v43  ;;  %v494_v63 = vrot.slane %v492_v23, 1  ;;  %vm483_vm4 = vsmask.f32 7424  ;;  %v465_v3 = vld [vmem:[%s1468_s13 + $0x14] sm:$0x1]  ;;  %v1202_v9 = vor.u32 %v1252_v2, %v1201_v1  ;;  %v1254_v41 = vld [vmem:[%s1468_s13 + $0xc] sm:$0xff] }
  0x32   : > { %v1532_v0 = vpack.c.b16 %v554_v58, %v478_v57  ;;  %v658_v8 = vsel %vm557_vm3, %v649_v60, %v657_v61  ;;  %v479_v11 = vunpack.c.l.b16 %v465_v3  ;;  %v416_v33 = vunpack.c.l.b16 %v404_v32  ;;  %v1225_v37 = vld [vmem:[%s1473_s24 + $0x4] sm:$0xe]  ;;  %v708_v40 = vld [vmem:[%s1468_s13] sm:$0x8]  ;;  %v1256_v43 = vld [vmem:[%s1473_s24 + $0xc] sm:$0xff] }
  0x33   : > { %v569_v59 = vsel %vm557_vm3, %v565_v53, %v568_v38  ;;  %v495_v10 = vsel %vm483_vm4, %v490_v62, %v494_v63  ;;  %v660_v14 = vshrl.u32 %v1202_v9, 16  ;;  %v663_v17 = vshll.u32 %v1202_v9, 16  ;;  %v1233_v2 = vld [vmem:[%s1473_s24 + $0x14] sm:$0xf]  ;;  %v1257_v3 = vld [vmem:[%s1473_s24 + $0x14] sm:$0x10] }
  0x34   : > { %1187 = vmatmul.msk.bf16.vlgmr.msra.gmra.mxu3 %vm358_vm2, %v569_v59  ;;  %v571_v6 = vshrl.u32 %v1532_v0, 16  ;;  %v574_v7 = vshll.u32 %v1532_v0, 16  ;;  %v482_v18 = vpack.c.b16 %v479_v11, %v478_v57  ;;  %v498_v27 = vor.u32 %v496_v24, %v494_v63  ;;  %v1213_v24 = vld [vmem:[%s1468_s13 + $0x4] sm:$0xe]  ;;  %v897_v57 = vld [vmem:[%s1468_s13 + $0x18] sm:$0x3] }
  0x35   : > { %v662_v21 = vrot.slane %v660_v14, 2  ;;  %v665_v22 = vrot.slane %v663_v17, 3  ;;  %v419_v36 = vpack.c.b16 %v416_v33, %v416_v33  ;;  %v1214_v42 = vor.u32 %v1253_v35, %v1213_v24  ;;  %v765_v9 = vld [vmem:[%s1468_s13 + $0x18] sm:$0x1] }
  0x36   : > { %v573_v12 = vrot.slane %v571_v6, 2  ;;  %v576_v13 = vrot.slane %v574_v7, 3  ;;  %v500_v23 = vshll.u32 %v482_v18, 16  ;;  %v504_v34 = vshrl.u32 %v482_v18, 16 }
  0x37   : > { %v666_v26 = vor.u32 %v665_v22, %v662_v21  ;;  %v712_v45 = vunpack.c.l.b16 %v708_v40  ;;  %v905_v46 = vshrl.u32 %v1214_v42, 16  ;;  %v908_v47 = vshll.u32 %v1214_v42, 16 }
  0x38   : > { %v577_v20 = vor.u32 %v576_v13, %v573_v12  ;;  %v502_v28 = vrot.slane %v500_v23, 1  ;;  %v913_v48 = vshrl.u32 %v1254_v41, 16  ;;  %v916_v49 = vshll.u32 %v1254_v41, 16 }
  0x39   : > { %1175 = vmatmul.msk.bf16.vlgmr.msrb.gmra.mxu1 %vm358_vm2, %v1247_v4  ;;  %1203 = vmatmul.msk.bf16.vlgmr.msrb.gmra.mxu0 %vm358_vm2, %v658_v8  ;;  %v667_v30 = vsel %vm557_vm3, %v657_v61, %v666_v26  ;;  %v853_v51 = vrot.slane %v1256_v43, 1  ;;  %vm783_vm5 = vcmask 1046528   ;;  %v713_v52 = vpack.c.b16 %v1261_v19, %v712_v45 }
  0x3a   : > { %1183 = vmatmul.msk.bf16.vlgmr.msrb.gmra.mxu2 %vm358_vm2, %v495_v10  ;;  %v578_v25 = vsel %vm557_vm3, %v568_v38, %v577_v20  ;;  %v503_v31 = vsel %vm483_vm4, %v498_v27, %v502_v28  ;;  %v1255_v38 = vld [vmem:[%s1473_s24 + $0x4] sm:$0xf0]  ;;  %v506_v39 = vor.u32 %v504_v34, %v502_v28  ;;  %v907_v53 = vrot.slane %v905_v46, 1 }
  0x3b   : > { %v1226_v44 = vor.u32 %v1255_v38, %v1225_v37  ;;  %v910_v54 = vrot.slane %v908_v47, 2  ;;  %v915_v55 = vrot.slane %v913_v48, 1  ;;  %v918_v56 = vrot.slane %v916_v49, 2 }
  0x3c   : > { %v715_v59 = vrot.slane %v713_v52, 3  ;;  %v716_v60 = vrot.slane %v1502_v16, 3  ;;  %v778_v63 = vunpack.c.h.b16 %v1487_v5  ;;  %v901_v1 = vunpack.c.l.b16 %v897_v57 }
  0x3d   : > { %v852_v50 = vrot.slane %v1226_v44, 1  ;;  %v911_v61 = vor.u32 %v910_v54, %v907_v53  ;;  %v919_v62 = vor.u32 %v918_v56, %v915_v55  ;;  %vm714_vm6 = vcmask 1044480  }
  0x3e   : > { %v784_v15 = vrot.slane %v1214_v42, 1  ;;  %v785_v19 = vrot.slane %v1254_v41, 1  ;;  %vm903_vm7 = vsmask.f32 6400  ;;  %v717_v4 = vsel %vm714_vm6, %v715_v59, %v716_v60 }
  0x3f   : > { %v854_v58 = vsel %vm783_vm5, %v852_v50, %v853_v51  ;;  %v920_v6 = vsel %vm903_vm7, %v911_v61, %v919_v62  ;;  %v902_v7 = vpack.c.b16 %v901_v1, %v778_v63  ;;  %v1234_v8 = vor.u32 %v1257_v3, %v1233_v2  ;;  %v334_v50 = vld [vmem:[#allocation2] sm:$0xff]  ;;  %v336_v3 = vld [vmem:[#allocation2 + $0x10] sm:$0xff] }
  0x40   : > { %v786_v16 = vsel %vm783_vm5, %v784_v15, %v785_v19  ;;  %v779_v11 = vunpack.c.l.b16 %v765_v9  ;;  %vm970_vm8 = vcmask 64512  }
  0x41   : > { %v922_v5 = vshrl.u32 %v902_v7, 16  ;;  %v925_v10 = vshll.u32 %v902_v7, 16  ;;  %v855_v12 = vrot.slane %v1234_v8, 1 }
  0x42   : > { %v782_v17 = vpack.c.b16 %v779_v11, %v778_v63 }
  0x43   : > { %v924_v13 = vrot.slane %v922_v5, 1  ;;  %v927_v14 = vrot.slane %v925_v10, 2  ;;  %v856_v18 = vsel %vm783_vm5, %v853_v51, %v855_v12 }
  0x44   : > { %1188 = vmatmul.msk.bf16.gmra.mxu3 %vm358_vm2, %v578_v25  ;;  %v787_v22 = vrot.slane %v782_v17, 1 }
  0x45   : > { %v928_v21 = vor.u32 %v927_v14, %v924_v13 }
  0x47   : > { %v929_v25 = vsel %vm903_vm7, %v919_v62, %v928_v21 }
  0x49   : > { %1176 = vmatmul.msk.bf16.gmra.mxu1 %vm358_vm2, %v1248_v29  ;;  %1204 = vmatmul.msk.bf16.gmra.mxu0 %vm358_vm2, %v667_v30 }
  0x4a   : > { %1184 = vmatmul.msk.bf16.gmra.mxu2 %vm358_vm2, %v503_v31 }
  0x54   : > { %1189 = vmatmul.msk.bf16.gmra.mxu3 %vm358_vm2, %v577_v20  ;;  %v718_v20 = vrot.slane %v1532_v0, 3 }
  0x56   : > { %v719_v23 = vsel %vm714_vm6, %v716_v60, %v718_v20 }
  0x59   : > { %1177 = vmatmul.msk.bf16.gmra.mxu1 %vm358_vm2, %v419_v36  ;;  %1205 = vmatmul.msk.bf16.gmra.mxu0 %vm358_vm2, %v666_v26  ;;  %v788_v26 = vsel %vm783_vm5, %v785_v19, %v787_v22 }
  0x5a   : > { %1185 = vmatmul.msk.bf16.gmra.mxu2 %vm358_vm2, %v506_v39 }
  0x64   : > { %1235 = vmatmul.msk.bf16.vlgmr.msrb.gmra.mxu3 %vm358_vm2, %v854_v58  ;;  %v335_v58 = vld [vmem:[#allocation2 + $0x8] sm:$0xff] }
  0x69   : > { %1207 = vmatmul.msk.bf16.vlgmr.msra.gmra.mxu1 %vm358_vm2, %v717_v4  ;;  %1239 = vmatmul.msk.bf16.vlgmr.msra.gmra.mxu0 %vm358_vm2, %v920_v6 }
  0x6a   : > { %1219 = vmatmul.msk.bf16.vlgmr.msra.gmra.mxu2 %vm358_vm2, %v786_v16 }
  0x74   : > { %1236 = vmatmul.msk.bf16.gmra.mxu3 %vm358_vm2, %v856_v18  ;;  %v337_v18 = vld [vmem:[#allocation2 + $0x18] sm:$0xff] }
  0x79   : > { %1208 = vmatmul.msk.bf16.gmra.mxu1 %vm358_vm2, %v719_v23  ;;  %1240 = vmatmul.msk.bf16.gmra.mxu0 %vm358_vm2, %v929_v25 }
  0x7a   : > { %1220 = vmatmul.msk.bf16.gmra.mxu2 %vm358_vm2, %v788_v26 }
  0x84   : > { %1237 = vmatmul.msk.bf16.gmra.mxu3 %vm358_vm2, %v855_v12 }
  0x89   : > { %1209 = vmatmul.msk.bf16.gmra.mxu1 %vm358_vm2, %v718_v20  ;;  %1241 = vmatmul.msk.bf16.gmra.mxu0 %vm358_vm2, %v928_v21 }
  0x8a   : > { %1221 = vmatmul.msk.bf16.gmra.mxu2 %vm358_vm2, %v787_v22 }
  0xa6   : > { %v381_v0 = vpop.f32.mrf.mxu0  ;;  %v386_v27 = vpop.f32.mrf.mxu1 }
  0xa7   : > { %v395_v52 = vadd.f32 %v381_v0, %v334_v50  ;;  %v397_v7 = vadd.f32 %v386_v27, %v336_v3 }
  0xad   : > { %v1596_v28 = vpop.f32.mrf.mxu2 }
  0xae   : > { %v383_v29 = vpop.f32.mrf.mxu0  ;;  %v388_v30 = vpop.f32.mrf.mxu1 }
  0xaf   : > { %v396_v60 = vadd.f32 %v383_v29, %v335_v58  ;;  %v398_v22 = vadd.f32 %v388_v30, %v337_v18 }
  0xb5   : > { %v393_v31 = vpop.f32.mrf.mxu2 }
  0xb6   : > { %v441_v33 = vpop.f32.mrf.mxu1  ;;  %v689_v34 = vpop.f32.mrf.mxu0 }
  0xb7   : > { %v600_v32 = vpop.f32.mrf.mxu3  ;;  %v455_v56 = vadd.f32 %v441_v33, %v395_v52 }
  0xbd   : > { %v528_v24 = vpop.f32.mrf.mxu2 }
  0xbe   : > { %v443_v36 = vpop.f32.mrf.mxu1  ;;  %v691_v37 = vpop.f32.mrf.mxu0  ;;  %v542_v57 = vadd.f32 %v528_v24, %v455_v56  ;;  %v338_v24 = vld [vmem:[#allocation2 + $0x20] sm:$0xff] }
  0xbf   : > { %v602_v35 = vpop.f32.mrf.mxu3  ;;  %v456_v15 = vadd.f32 %v443_v36, %v396_v60 }
  0xc0   : > { %v614_v61 = vadd.f32 %v600_v32, %v542_v57 }
  0xc2   : > { %v703_v2 = vadd.f32 %v689_v34, %v614_v61 }
  0xc5   : > { %v530_v38 = vpop.f32.mrf.mxu2 }
  0xc6   : > { %v446_v40 = vpop.f32.mrf.mxu1  ;;  %v694_v41 = vpop.f32.mrf.mxu0  ;;  %v543_v19 = vadd.f32 %v530_v38, %v456_v15 }
  0xc7   : > { %v605_v39 = vpop.f32.mrf.mxu3  ;;  %v457_v11 = vadd.f32 %v446_v40, %v397_v7 }
  0xc8   : > { %v615_v16 = vadd.f32 %v602_v35, %v543_v19 }
  0xca   : > { %v704_v17 = vadd.f32 %v691_v37, %v615_v16  ;;  %v399_v37 = vadd.f32 %v1596_v28, %v338_v24 }
  0xcd   : > { %v533_v42 = vpop.f32.mrf.mxu2 }
  0xce   : > { %v448_v44 = vpop.f32.mrf.mxu1  ;;  %v1598_v45 = vpop.f32.mrf.mxu0  ;;  %v544_v13 = vadd.f32 %v533_v42, %v457_v11 }
  0xcf   : > { %v607_v43 = vpop.f32.mrf.mxu3  ;;  %v458_v29 = vadd.f32 %v448_v44, %v398_v22 }
  0xd0   : > { %v616_v23 = vadd.f32 %v605_v39, %v544_v13 }
  0xd2   : > { %v705_v34 = vadd.f32 %v694_v41, %v616_v23 }
  0xd5   : > { %v535_v46 = vpop.f32.mrf.mxu2 }
  0xd6   : > { %v451_v48 = vpop.f32.mrf.mxu1  ;;  %v1602_v49 = vpop.f32.mrf.mxu0  ;;  %v545_v32 = vadd.f32 %v535_v46, %v458_v29 }
  0xd7   : > { %v1600_v47 = vpop.f32.mrf.mxu3  ;;  %v459_v50 = vadd.f32 %v451_v48, %v399_v37 }
  0xd8   : > { %v617_v38 = vadd.f32 %v607_v43, %v545_v32 }
  0xda   : > { %v706_v46 = vadd.f32 %v1598_v45, %v617_v38 }
  0xdd   : > { %v538_v51 = vpop.f32.mrf.mxu2 }
  0xde   : > { %v453_v54 = vpop.f32.mrf.mxu1  ;;  %v701_v55 = vpop.f32.mrf.mxu0 }
  0xdf   : > { %v612_v53 = vpop.f32.mrf.mxu3 }
  0xe0   : > { %v546_v53 = vadd.f32 %v538_v51, %v459_v50 }
  0xe2   : > { %v618_v55 = vadd.f32 %v1600_v47, %v546_v53 }
  0xe4   : > { %v707_v60 = vadd.f32 %v1602_v49, %v618_v55 }
  0xe5   : > { %v540_v59 = vpop.f32.mrf.mxu2 }
  0xe6   : > { %v741_v63 = vpop.f32.mrf.mxu1  ;;  %v951_v1 = vpop.f32.mrf.mxu0 }
  0xe7   : > { %v878_v62 = vpop.f32.mrf.mxu3  ;;  %v755_v4 = vadd.f32 %v741_v63, %v703_v2 }
  0xed   : > { %v810_v6 = vpop.f32.mrf.mxu2 }
  0xee   : > { %v824_v8 = vadd.f32 %v810_v6, %v755_v4  ;;  %v743_v5 = vpop.f32.mrf.mxu1  ;;  %v953_v10 = vpop.f32.mrf.mxu0 }
  0xef   : > { %v880_v9 = vpop.f32.mrf.mxu3  ;;  %v756_v20 = vadd.f32 %v743_v5, %v704_v17 }
  0xf0   : > { %v892_v12 = vadd.f32 %v878_v62, %v824_v8 }
  0xf2   : > { %v965_v14 = vadd.f32 %v951_v1, %v892_v12 }
  0xf4   : > { %971 = vst.msk [vmem:[#allocation2] sm:$0xff] %vm970_vm8, %v965_v14 }
  0xf5   : > { %v812_v21 = vpop.f32.mrf.mxu2 }
  0xf6   : > { %v825_v25 = vadd.f32 %v812_v21, %v756_v20  ;;  %v746_v0 = vpop.f32.mrf.mxu1  ;;  %v956_v27 = vpop.f32.mrf.mxu0 }
  0xf7   : > { %v883_v26 = vpop.f32.mrf.mxu3  ;;  %v757_v35 = vadd.f32 %v746_v0, %v705_v34 }
  0xf8   : > { %v893_v31 = vadd.f32 %v880_v9, %v825_v25 }
  0xfa   : > { %v966_v33 = vadd.f32 %v953_v10, %v893_v31 }
  0xfc   : > { %972 = vst.msk [vmem:[#allocation2 + $0x8] sm:$0xff] %vm970_vm8, %v966_v33 }
  0xfd   : > { %v815_v36 = vpop.f32.mrf.mxu2 }
  0xfe   : > { %v826_v40 = vadd.f32 %v815_v36, %v757_v35  ;;  %v748_v39 = vpop.f32.mrf.mxu1  ;;  %v958_v42 = vpop.f32.mrf.mxu0 }
  0xff   : > { %v885_v30 = vpop.f32.mrf.mxu3  ;;  %v758_v41 = vadd.f32 %v748_v39, %v706_v46 }
 0x100   : > { %v894_v52 = vadd.f32 %v883_v26, %v826_v40 }
 0x102   : > { %v967_v44 = vadd.f32 %v956_v27, %v894_v52 }
 0x104   : > { %973 = vst.msk [vmem:[#allocation2 + $0x10] sm:$0xff] %vm970_vm8, %v967_v44 }
 0x105   : > { %v817_v54 = vpop.f32.mrf.mxu2 }
 0x106   : > { %v827_v56 = vadd.f32 %v817_v54, %v758_v41  ;;  %v751_v28 = vpop.f32.mrf.mxu1  ;;  %v961_v43 = vpop.f32.mrf.mxu0 }
 0x107   : > { %v888_v57 = vpop.f32.mrf.mxu3  ;;  %v759_v48 = vadd.f32 %v751_v28, %v707_v60 }
 0x108   : > { %v895_v58 = vadd.f32 %v885_v30, %v827_v56 }
 0x10a   : > { %v968_v59 = vadd.f32 %v958_v42, %v895_v58 }
 0x10c   : > { %974 = vst.msk [vmem:[#allocation2 + $0x18] sm:$0xff] %vm970_vm8, %v968_v59 }
 0x10d   : > { %v820_v51 = vpop.f32.mrf.mxu2 }
 0x10e   : > { %v828_v61 = vadd.f32 %v820_v51, %v759_v48  ;;  %v753_v62 = vpop.f32.mrf.mxu1  ;;  %v963_v63 = vpop.f32.mrf.mxu0 }
 0x10f   : > { %v890_v45 = vpop.f32.mrf.mxu3 }
 0x110   : > { %v896_v1 = vadd.f32 %v888_v57, %v828_v61 }
 0x111   : > { %979 = sbr.rel (%p1242_p11) target bundleno = 290 (0x122), region = 44 }
 0x112   : > { %v969_v15 = vadd.f32 %v961_v43, %v896_v1 }
 0x114   : > { %975 = vst.msk [vmem:[#allocation2 + $0x20] sm:$0xff] %vm970_vm8, %v969_v15 }
 0x115   : > { %v822_v47 = vpop.f32.mrf.mxu2 }
 0x116   : > { %v1326_v49 = vld [vmem:[%s1646_s3] ss:$0 sm:$0xff]  ;;  %vm999_vm9 = vcmask 60416  }
 0x117   : > { %v984_v19 = vadd.f32 %v1326_v49, %v965_v14  ;;  %v985_v2 = vadd.f32 %v1326_v49, %v966_v33  ;;  %v986_v3 = vadd.f32 %v1326_v49, %v967_v44  ;;  %v987_v4 = vadd.f32 %v1326_v49, %v968_v59 }
 0x118   : > { %v988_v6 = vadd.f32 %v1326_v49, %v969_v15 }
 0x119   : > { %v989_v7 = vmax.f32 %v984_v19, 0.0  ;;  %v990_v16 = vmax.f32 %v985_v2, 0.0  ;;  %v991_v8 = vmax.f32 %v986_v3, 0.0  ;;  %v992_v9 = vmax.f32 %v987_v4, 0.0 }
 0x11a   : > { %v993_v5 = vmax.f32 %v988_v6, 0.0 }
 0x11b   : > { %v994_v10 = vpack.c.bf16 %v989_v7, %v989_v7  ;;  %v995_v11 = vpack.c.bf16 %v990_v16, %v990_v16  ;;  %v996_v12 = vpack.c.bf16 %v991_v8, %v991_v8  ;;  %v997_v13 = vpack.c.bf16 %v992_v9, %v992_v9 }
 0x11c   : > { %v998_v14 = vpack.c.bf16 %v993_v5, %v993_v5 }
 0x11d   : > { %1000 = vst.msk [vmem:[%s1479_s5] sm:$0xf] %vm999_vm9, %v994_v10 }
 0x11e   : > { %1001 = vst.msk [vmem:[%s1479_s5 + $0x4] sm:$0xf] %vm999_vm9, %v995_v11 }
 0x11f   : > { %1002 = vst.msk [vmem:[%s1479_s5 + $0x8] sm:$0xf] %vm999_vm9, %v996_v12 }
 0x120   : > { %1003 = vst.msk [vmem:[%s1479_s5 + $0xc] sm:$0xf] %vm999_vm9, %v997_v13 }
 0x121   : > { %1004 = vst.msk [vmem:[%s1479_s5 + $0x10] sm:$0xf] %vm999_vm9, %v998_v14 }
 0x122 PF: > { %s14_s21 = sadd.s32 1, %s1381_s21   ;;  %s1649_s30 = sld [smem:[#allocation3_spill]] }
 0x123   : > { %p11_p12 = scmp.ge.s32.totalorder %s14_s21, 26   ;;  %s1650_s15 = smov %s1369_s18 }
 0x124   : > { %s1651_s16 = smov %s1373_s19  ;;  %s1652_s17 = smov %s1377_s20 }
 0x125   : > { %s1653_s18 = smov %s1657_s22  ;;  %s1654_s19 = smov %s1661_s23 }
 0x126   :  { %13 = sbr.rel (!%p11_p12) target bundleno = 4 (0x4), region = 88 }
 0x128   : > { %s1655_s20 = smov %s1649_s30 }

// kernel: hourglass_forward.23
= control target key start
LH: loop header
LB: loop body
LE: loop exit
PB: predicated region body
PF: predicated region fallthrough
CT: control target
= control target key end

     0   :  { %s1004_s12 = smov 0   ;;  %s1006_s13 = smov 0   ;;  %s1181_s0 = inlined_call_operand.vmem [shape: bf16[2,6,38,8], index: 0, kind: input, shape index: {}]   ;;  %s1182_s1 = inlined_call_operand.vmem [shape: bf16[3,9,8,8], index: 1, kind: input, shape index: {}]   ;;  %s1183_s2 = inlined_call_operand.vmem [shape: f32[1,8], index: 2, kind: input, shape index: {}]   ;;  %s1184_s3 = inlined_call_operand.vmem [shape: bf16[2,4,24,8], index: 3, kind: output, shape index: {}]  }
   0x1   :  { %s1008_s14 = smov 0   ;;  %s1010_s15 = smov 0  }
   0x2   :  { %s1012_s16 = smov 0   ;;  %s1014_s17 = smov 0  }
   0x3   :  { %s1016_s18 = smov 0  }
   0x4 LB: > { %s25_s19 = sadd.s32 1, %s969_s15  ;;  %s28_s20 = sadd.s32 1, %s973_s16  ;;  %s981_s18 = sphi %s1016_s18, %s13_s18   ;;  %s977_s17 = sphi %s1014_s17, %s1190_s17   ;;  %s973_s16 = sphi %s1012_s16, %s1189_s16   ;;  %s969_s15 = sphi %s1010_s15, %s1188_s15   ;;  %s965_s14 = sphi %s1008_s14, %s1187_s14   ;;  %s961_s13 = sphi %s1006_s13, %s1186_s13   ;;  %s957_s12 = sphi %s1004_s12, %s1185_s12  }
   0x5   : > { %p26_p0 = scmp.ge.s32.totalorder %s25_s19, 3  ;;  %p815_p1 = scmp.ge.s32.totalorder %s981_s18, 1 }
   0x6   : > { %p178_p2 = scmp.lt.s32.totalorder %s981_s18, 25  ;;  %s32_s21 = sadd.s32 1, %s977_s17 }
   0x7   : > { %s1192_s19 = smov (%p26_p0, %s25_s19), 0  ;;  %s1194_s20 = smov (!%p26_p0, %s28_s20), %s973_s16 }
   0x8   : > { %p179_p3 = pnand %p815_p1, %p178_p2  ;;  %p30_p4 = scmp.ge.s32.totalorder %s1194_s20, 4 }
   0x9   : > { %s216_s22 = sadd.s32 (!%p179_p3), %s957_s12, %s961_s13  ;;  %p217_p6 = scmp.lt.s32.totalorder (!%p179_p3), %s965_s14, 1 }
   0xa   : > { %s1196_s20 = smov (%p30_p4, %s1194_s20), 0  ;;  %s1198_s21 = smov (!%p30_p4, %s32_s21), %s977_s17 }
   0xb   : > { %p34_p5 = scmp.ge.s32.totalorder %s1198_s21, 2  ;;  %182 = sbr.rel (%p179_p3) target bundleno = 246 (0xf6), region = 32 }
   0xc   : > { %p219_p7 = scmp.lt.s32.totalorder (!%p179_p3), %s216_s22, 5  ;;  %p227_p8 = scmp.lt.s32.totalorder (!%p179_p3), %s957_s12, 2 }
   0xd   : > { %s1200_s21 = smov (%p34_p5, %s1198_s21), 0  ;;  %p234_p9 = scmp.lt.s32.totalorder (!%p179_p3), %s961_s13, 3 }
   0xe   : > { %p819_p10 = scmp.ne.s32.totalorder (!%p179_p3), %s957_s12, 0 }
  0x10   : > { %s1202_s14 = smov (!%p217_p6, %s965_s14), 1  ;;  %s1204_s22 = smov (!%p219_p7, %s216_s22), 5 }
  0x11   : > { %s865_s23 = smul.u32 30, %s1202_s14  ;;  %s1206_s13 = smov (!%p234_p9, %s961_s13), 3 }
  0x12   : > { %s864_s24 = smul.u32 5, %s1204_s22 }
  0x13   : > { %s228_s25 = scalar_select %p227_p8, %s957_s12, 2 }
  0x14   : > { %s223_s26 = sadd.s32 %s865_s23, %s864_s24  ;;  %s868_s8 = smul.u32 12, %s1202_s14 }
  0x15   : > { %s816_s27 = sshll.u32 %s223_s26, 2  ;;  %s866_s28 = smul.u32 36, %s228_s25 }
  0x16   : > { %s1058_s4 = scalar_lea.vmem %s1181_s0, %s816_s27  ;;  %s867_s9 = smul.u32 3, %s1206_s13 }
  0x17   : > { %s1063_s7 = scalar_lea.vmem %s1182_s1, %s866_s28  ;;  %245 = sbr.rel (%p819_p10) target bundleno = 32 (0x20), region = 36 }
  0x18   : > { %s238_s10 = sadd.s32 %s868_s8, %s867_s9 }
  0x19   : > { %s818_s11 = sshll.u32 %s238_s10, 2 }
  0x1a   : > { %s1069_s24 = scalar_lea.vmem %s1184_s3, %s818_s11 }
  0x1c   : > { %vm246_vm0 = vcmask 64512   ;;  %v983_v0 = vmov 0.0  }
  0x1d   : > { %247 = vst.msk [vmem:[#allocation2] sm:$0xff] %vm246_vm0, %v983_v0 }
  0x1e   : > { %248 = vst.msk [vmem:[#allocation2 + $0x8] sm:$0xff] %vm246_vm0, %v983_v0 }
  0x1f   : > { %249 = vst.msk [vmem:[#allocation2 + $0x10] sm:$0xff] %vm246_vm0, %v983_v0 }
  0x20 PF: > { %v256_v1 = vld [vmem:[%s1063_s7] sm:$0xf]  ;;  %vm272_vm1 = vcmask 1043456   ;;  %vm265_vm2 = vcmask 64512   ;;  %v255_v3 = vld [vmem:[%s1058_s4 + $0x8] sm:$0xff]   ;;  %vm365_vm3 = vcmask 1046528  }
  0x21   : > { %v853_v2 = vld [vmem:[%s1058_s4] sm:$0xff]  ;;  %v274_v4 = vsel %vm272_vm1, %v256_v1, 0  ;;  %v262_v5 = vunpack.c.l.b16 %v255_v3  ;;  %v829_v7 = vld [vmem:[%s1063_s7 + $0x8] sm:$0xf]  ;;  %v832_v11 = vld [vmem:[%s1063_s7 + $0xc] sm:$0xf]  ;;  %v1101_v28 = vunpack.c.h.b16 %v255_v3 }
  0x22   : > { %v826_v6 = vld [vmem:[%s1063_s7 + $0x4] sm:$0xf]  ;;  %283 = vmatpush.bf16.msra.mxu0 %v274_v4  ;;  %863 = vmatpush.bf16.msra.mxu1 %v274_v4  ;;  %v376_v10 = vsel %vm272_vm1, %v829_v7, 0  ;;  %v835_v12 = vld [vmem:[%s1063_s7 + $0x10] sm:$0xf]  ;;  %v420_v14 = vsel %vm272_vm1, %v832_v11, 0 }
  0x23   : > { %v1079_v8 = vld [vmem:[%s1058_s4] sm:$0xff]   ;;  %v336_v9 = vsel %vm272_vm1, %v826_v6, 0  ;;  %v264_v13 = vpack.c.b16 %v262_v5, %v262_v5  ;;  %385 = vmatpush.bf16.msra.mxu2 %v376_v10  ;;  %v474_v15 = vsel %vm272_vm1, %v835_v12, 0  ;;  %v299_v17 = vld [vmem:[%s1058_s4 + $0x8] sm:$0xf]  ;;  %429 = vmatpush.bf16.msra.mxu3 %v420_v14  ;;  %vm409_vm4 = vcmask 1044480  }
  0x24   : > { %v1088_v16 = vunpack.c.h.b16 %v1079_v8  ;;  %v300_v18 = vld [vmem:[%s1058_s4 + $0xc] sm:$0x1]  ;;  %v1092_v19 = vunpack.c.l.b16 %v299_v17  ;;  %v359_v21 = vld [vmem:[%s1058_s4] sm:$0xe]  ;;  %v841_v26 = vld [vmem:[%s1063_s7 + $0x18] sm:$0xf] }
  0x25   : > { %v310_v20 = vunpack.c.l.b16 %v300_v18  ;;  %v399_v22 = vld [vmem:[%s1058_s4] sm:$0x8]  ;;  %824 = vmatmul.msk.bf16.vlgmr.msra.gmra.mxu0 %vm265_vm2, %v853_v2  ;;  %825 = vmatmul.msk.bf16.vlgmr.msra.gmra.mxu1 %vm265_vm2, %v264_v13  ;;  %v363_v23 = vunpack.c.l.b16 %v359_v21  ;;  %v400_v24 = vld [vmem:[%s1058_s4 + $0xc] sm:$0x7]  ;;  %v844_v27 = vld [vmem:[%s1063_s7 + $0x1c] sm:$0xf] }
  0x26   : > { %345 = vmatpush.bf16.msrb.mxu1 %v336_v9  ;;  %483 = vmatpush.bf16.msrb.mxu0 %v474_v15  ;;  %v405_v25 = vunpack.c.l.b16 %v399_v22  ;;  %v406_v30 = vunpack.c.l.b16 %v400_v24  ;;  %v558_v31 = vsel %vm272_vm1, %v841_v26, 0  ;;  %v612_v32 = vsel %vm272_vm1, %v844_v27, 0  ;;  %v838_v42 = vld [vmem:[%s1063_s7 + $0x14] sm:$0xf]  ;;  %v847_v47 = vld [vmem:[%s1063_s7 + $0x20] sm:$0xf] }
  0x27   : > { %v1104_v29 = vpack.c.b16 %v310_v20, %v1092_v19  ;;  %v364_v33 = vpack.c.b16 %v1088_v16, %v363_v23  ;;  %567 = vmatpush.bf16.msrb.mxu2 %v558_v31  ;;  %621 = vmatpush.bf16.msrb.mxu3 %v612_v32  ;;  %v317_v37 = vshll.u32 %v1079_v8, 16  ;;  %v315_v40 = vshrl.u32 %v1079_v8, 16  ;;  %v531_v1 = vld [vmem:[%s1058_s4 + $0x4] sm:$0xc]  ;;  %v862_v2 = vld [vmem:[%s1058_s4 + $0x8] sm:$0xff]   ;;  %p850_p11 = scmp.ne.s32.totalorder %s957_s12, 2 }
  0x28   : > { %v407_v34 = vpack.c.b16 %v1088_v16, %v405_v25  ;;  %v408_v36 = vpack.c.b16 %v406_v30, %v1092_v19  ;;  %v448_v41 = vpack.c.b16 %v1101_v28, %v1092_v19  ;;  %v508_v54 = vsel %vm272_vm1, %v838_v42, 0  ;;  %v581_v3 = vld [vmem:[%s1058_s4 + $0x10] sm:$0x7]  ;;  %v635_v25 = vld [vmem:[%s1058_s4 + $0x4] sm:$0x8] }
  0x29   : > { %v367_v35 = vrot.slane %v1104_v29, 1  ;;  %v366_v38 = vrot.slane %v364_v33, 1  ;;  %v319_v44 = vrot.slane %v317_v37, 1  ;;  %v322_v45 = vshll.u32 %v1104_v29, 16  ;;  %v534_v8 = vld [vmem:[%s1058_s4 + $0x10] sm:$0x3] }
  0x2a   : > { %v410_v39 = vrot.slane %v407_v34, 3  ;;  %v411_v43 = vrot.slane %v408_v36, 3  ;;  %v451_v46 = vshrl.u32 %v407_v34, 16  ;;  %v454_v49 = vshll.u32 %v407_v34, 16  ;;  %517 = vmatpush.bf16.msra.mxu1 %v508_v54 }
  0x2b   : > { %v368_v48 = vsel %vm365_vm3, %v366_v38, %v367_v35  ;;  %v459_v50 = vshrl.u32 %v448_v41, 16  ;;  %v462_v51 = vshll.u32 %v448_v41, 16  ;;  %v651_v58 = vsel %vm272_vm1, %v847_v47, 0 }
  0x2c   : > { %830 = vmatmul.msk.bf16.vlgmr.msra.gmra.mxu2 %vm265_vm2, %v368_v48  ;;  %v412_v52 = vsel %vm409_vm4, %v410_v39, %v411_v43  ;;  %v453_v53 = vrot.slane %v451_v46, 3  ;;  %v456_v55 = vrot.slane %v454_v49, 4  ;;  %v320_v59 = vor.u32 %v319_v44, %v315_v40  ;;  %660 = vmatpush.bf16.msra.mxu0 %v651_v58 }
  0x2d   : > { %833 = vmatmul.msk.bf16.vlgmr.msra.gmra.mxu3 %vm265_vm2, %v412_v52  ;;  %v461_v56 = vrot.slane %v459_v50, 3  ;;  %v464_v57 = vrot.slane %v462_v51, 4  ;;  %v324_v60 = vrot.slane %v322_v45, 1  ;;  %vm313_vm5 = vsmask.f32 7424  ;;  %v250_v51 = vld [vmem:[#allocation2] sm:$0xff] }
  0x2e   : > { %vm449_vm6 = vsmask.f32 4352  ;;  %v457_v61 = vor.u32 %v456_v55, %v453_v53  ;;  %v860_v4 = vunpack.c.l.b16 %v862_v2  ;;  %v861_v5 = vunpack.c.h.b16 %v862_v2  ;;  %v252_v2 = vld [vmem:[#allocation2 + $0x10] sm:$0xff] }
  0x2f   : > { %v465_v62 = vor.u32 %v464_v57, %v461_v56  ;;  %v325_v63 = vsel %vm313_vm5, %v320_v59, %v324_v60  ;;  %v541_v6 = vunpack.c.l.b16 %v531_v1  ;;  %v585_v7 = vunpack.c.l.b16 %v581_v3  ;;  %v251_v57 = vld [vmem:[#allocation2 + $0x8] sm:$0xff] }
  0x30   : > { %v326_v11 = vshrl.u32 %v1104_v29, 16  ;;  %v544_v12 = vunpack.c.l.b16 %v534_v8  ;;  %vm547_vm7 = vcmask 1045504   ;;  %v639_v31 = vunpack.c.l.b16 %v635_v25 }
  0x31   : > { %v466_v0 = vsel %vm449_vm6, %v457_v61, %v465_v62  ;;  %v545_v9 = vpack.c.b16 %v860_v4, %v541_v6  ;;  %v586_v10 = vpack.c.b16 %v585_v7, %v861_v5  ;;  %vm587_vm8 = vsmask.f32 5376 }
  0x32   : > { %v328_v18 = vor.u32 %v326_v11, %v324_v60  ;;  %v546_v20 = vpack.c.b16 %v544_v12, %v861_v5  ;;  %v640_v34 = vpack.c.b16 %v860_v4, %v639_v31  ;;  %v499_v37 = vpack.c.b16 %v1092_v19, %v1088_v16 }
  0x33   : > { %v589_v13 = vshrl.u32 %v545_v9, 16  ;;  %v592_v14 = vshll.u32 %v545_v9, 16  ;;  %v597_v15 = vshrl.u32 %v586_v10, 16  ;;  %v600_v17 = vshll.u32 %v586_v10, 16 }
  0x34   : > { %v548_v26 = vrot.slane %v545_v9, 2  ;;  %v549_v27 = vrot.slane %v546_v20, 2  ;;  %v642_v36 = vrot.slane %v586_v10, 3  ;;  %v500_v39 = vpack.c.b16 %v1101_v28, %v1101_v28 }
  0x35   : > { %827 = vmatmul.msk.bf16.vlgmr.msrb.gmra.mxu1 %vm265_vm2, %v325_v63  ;;  %836 = vmatmul.msk.bf16.vlgmr.msrb.gmra.mxu0 %vm265_vm2, %v466_v0  ;;  %v591_v21 = vrot.slane %v589_v13, 2  ;;  %v594_v22 = vrot.slane %v592_v14, 3  ;;  %v599_v23 = vrot.slane %v597_v15, 2  ;;  %v602_v24 = vrot.slane %v600_v17, 3 }
  0x36   : > { %v550_v32 = vsel %vm547_vm7, %v548_v26, %v549_v27 }
  0x37   : > { %v595_v29 = vor.u32 %v594_v22, %v591_v21  ;;  %v603_v30 = vor.u32 %v602_v24, %v599_v23 }
  0x39   : > { %v604_v33 = vsel %vm587_vm8, %v595_v29, %v603_v30 }
  0x3c   : > { %831 = vmatmul.msk.bf16.gmra.mxu2 %vm265_vm2, %v367_v35  ;;  %v641_v35 = vrot.slane %v640_v34, 3 }
  0x3d   : > { %834 = vmatmul.msk.bf16.gmra.mxu3 %vm265_vm2, %v411_v43 }
  0x3e   : > { %v643_v38 = vsel %vm409_vm4, %v641_v35, %v642_v36 }
  0x45   : > { %828 = vmatmul.msk.bf16.gmra.mxu1 %vm265_vm2, %v328_v18  ;;  %837 = vmatmul.msk.bf16.gmra.mxu0 %vm265_vm2, %v465_v62 }
  0x4c   : > { %842 = vmatmul.msk.bf16.vlgmr.msrb.gmra.mxu2 %vm265_vm2, %v550_v32 }
  0x4d   : > { %845 = vmatmul.msk.bf16.vlgmr.msrb.gmra.mxu3 %vm265_vm2, %v604_v33 }
  0x55   : > { %839 = vmatmul.msk.bf16.vlgmr.msra.gmra.mxu1 %vm265_vm2, %v499_v37  ;;  %848 = vmatmul.msk.bf16.vlgmr.msra.gmra.mxu0 %vm265_vm2, %v643_v38 }
  0x5c   : > { %843 = vmatmul.msk.bf16.gmra.mxu2 %vm265_vm2, %v549_v27 }
  0x5d   : > { %846 = vmatmul.msk.bf16.gmra.mxu3 %vm265_vm2, %v603_v30 }
  0x65   : > { %840 = vmatmul.msk.bf16.gmra.mxu1 %vm265_vm2, %v500_v39  ;;  %849 = vmatmul.msk.bf16.gmra.mxu0 %vm265_vm2, %v642_v36 }
  0xa2   : > { %v285_v40 = vpop.f32.mrf.mxu0  ;;  %v290_v41 = vpop.f32.mrf.mxu1 }
  0xa3   : > { %v294_v54 = vadd.f32 %v285_v40, %v250_v51  ;;  %v296_v8 = vadd.f32 %v290_v41, %v252_v2 }
  0xaa   : > { %v287_v16 = vpop.f32.mrf.mxu0  ;;  %v292_v19 = vpop.f32.mrf.mxu1 }
  0xab   : > { %v295_v62 = vadd.f32 %v287_v16, %v251_v57 }
  0xaf   : > { %v387_v42 = vpop.f32.mrf.mxu2 }
  0xb0   : > { %v431_v43 = vpop.f32.mrf.mxu3 }
  0xb2   : > { %v347_v44 = vpop.f32.mrf.mxu1  ;;  %v485_v45 = vpop.f32.mrf.mxu0 }
  0xb3   : > { %v356_v55 = vadd.f32 %v347_v44, %v294_v54 }
  0xb5   : > { %v396_v59 = vadd.f32 %v387_v42, %v356_v55 }
  0xb7   : > { %v389_v46 = vpop.f32.mrf.mxu2  ;;  %v440_v63 = vadd.f32 %v431_v43, %v396_v59 }
  0xb8   : > { %v433_v47 = vpop.f32.mrf.mxu3 }
  0xb9   : > { %v494_v4 = vadd.f32 %v485_v45, %v440_v63 }
  0xba   : > { %v349_v48 = vpop.f32.mrf.mxu1  ;;  %v487_v49 = vpop.f32.mrf.mxu0 }
  0xbb   : > { %v357_v0 = vadd.f32 %v349_v48, %v295_v62 }
  0xbd   : > { %v397_v5 = vadd.f32 %v389_v46, %v357_v0 }
  0xbf   : > { %v392_v50 = vpop.f32.mrf.mxu2  ;;  %v441_v10 = vadd.f32 %v433_v47, %v397_v5 }
  0xc0   : > { %v436_v52 = vpop.f32.mrf.mxu3 }
  0xc1   : > { %v495_v17 = vadd.f32 %v487_v49, %v441_v10 }
  0xc2   : > { %v352_v28 = vpop.f32.mrf.mxu1  ;;  %v490_v53 = vpop.f32.mrf.mxu0 }
  0xc3   : > { %v358_v11 = vadd.f32 %v352_v28, %v296_v8 }
  0xc5   : > { %v398_v18 = vadd.f32 %v392_v50, %v358_v11 }
  0xc7   : > { %v394_v56 = vpop.f32.mrf.mxu2  ;;  %v442_v24 = vadd.f32 %v436_v52, %v398_v18 }
  0xc8   : > { %v438_v58 = vpop.f32.mrf.mxu3 }
  0xc9   : > { %v496_v30 = vadd.f32 %v490_v53, %v442_v24 }
  0xca   : > { %v354_v60 = vpop.f32.mrf.mxu1  ;;  %v492_v61 = vpop.f32.mrf.mxu0 }
  0xcf   : > { %v569_v1 = vpop.f32.mrf.mxu2 }
  0xd0   : > { %v623_v3 = vpop.f32.mrf.mxu3 }
  0xd2   : > { %v519_v6 = vpop.f32.mrf.mxu1  ;;  %v662_v7 = vpop.f32.mrf.mxu0 }
  0xd3   : > { %v528_v9 = vadd.f32 %v519_v6, %v494_v4 }
  0xd5   : > { %v578_v12 = vadd.f32 %v569_v1, %v528_v9 }
  0xd7   : > { %v632_v13 = vadd.f32 %v623_v3, %v578_v12  ;;  %v571_v14 = vpop.f32.mrf.mxu2 }
  0xd8   : > { %v625_v15 = vpop.f32.mrf.mxu3 }
  0xd9   : > { %v671_v20 = vadd.f32 %v662_v7, %v632_v13 }
  0xda   : > { %v521_v21 = vpop.f32.mrf.mxu1  ;;  %v664_v22 = vpop.f32.mrf.mxu0 }
  0xdb   : > { %674 = vst.msk [vmem:[#allocation2] sm:$0xff] %vm265_vm2, %v671_v20  ;;  %v529_v23 = vadd.f32 %v521_v21, %v495_v17 }
  0xdd   : > { %v579_v25 = vadd.f32 %v571_v14, %v529_v23 }
  0xdf   : > { %v633_v26 = vadd.f32 %v625_v15, %v579_v25  ;;  %v574_v27 = vpop.f32.mrf.mxu2 }
  0xe0   : > { %v628_v29 = vpop.f32.mrf.mxu3 }
  0xe1   : > { %v672_v31 = vadd.f32 %v664_v22, %v633_v26 }
  0xe2   : > { %v524_v32 = vpop.f32.mrf.mxu1  ;;  %v667_v33 = vpop.f32.mrf.mxu0 }
  0xe3   : > { %675 = vst.msk [vmem:[#allocation2 + $0x8] sm:$0xff] %vm265_vm2, %v672_v31  ;;  %v530_v34 = vadd.f32 %v524_v32, %v496_v30 }
  0xe5   : > { %v580_v35 = vadd.f32 %v574_v27, %v530_v34 }
  0xe7   : > { %v634_v36 = vadd.f32 %v628_v29, %v580_v35  ;;  %v576_v37 = vpop.f32.mrf.mxu2  ;;  %680 = sbr.rel (%p850_p11) target bundleno = 246 (0xf6), region = 40 }
  0xe8   : > { %v630_v38 = vpop.f32.mrf.mxu3 }
  0xe9   : > { %v673_v39 = vadd.f32 %v667_v33, %v634_v36 }
  0xea   : > { %v526_v40 = vpop.f32.mrf.mxu1  ;;  %v669_v41 = vpop.f32.mrf.mxu0 }
  0xeb   : > { %676 = vst.msk [vmem:[#allocation2 + $0x10] sm:$0xff] %vm265_vm2, %v673_v39 }
  0xec   : > { %v926_v16 = vld [vmem:[%s1183_s2] ss:$0 sm:$0xff]  ;;  %vm694_vm9 = vcmask 60416  }
  0xed   : > { %v685_v19 = vadd.f32 %v926_v16, %v671_v20  ;;  %v686_v42 = vadd.f32 %v926_v16, %v672_v31  ;;  %v687_v43 = vadd.f32 %v926_v16, %v673_v39 }
  0xef   : > { %v688_v44 = vmax.f32 %v685_v19, 0.0  ;;  %v689_v45 = vmax.f32 %v686_v42, 0.0  ;;  %v690_v46 = vmax.f32 %v687_v43, 0.0 }
  0xf1   : > { %v691_v47 = vpack.c.bf16 %v688_v44, %v688_v44  ;;  %v692_v48 = vpack.c.bf16 %v689_v45, %v689_v45  ;;  %v693_v49 = vpack.c.bf16 %v690_v46, %v690_v46 }
  0xf3   : > { %695 = vst.msk [vmem:[%s1069_s24] sm:$0xf] %vm694_vm9, %v691_v47 }
  0xf4   : > { %696 = vst.msk [vmem:[%s1069_s24 + $0x4] sm:$0xf] %vm694_vm9, %v692_v48 }
  0xf5   : > { %697 = vst.msk [vmem:[%s1069_s24 + $0x8] sm:$0xf] %vm694_vm9, %v693_v49 }
  0xf6 PF: > { %s13_s18 = sadd.s32 1, %s981_s18   ;;  %s1185_s12 = smov %s969_s15 }
  0xf7   : > { %p10_p12 = scmp.ge.s32.totalorder %s13_s18, 26   ;;  %s1186_s13 = smov %s973_s16 }
  0xf8   : > { %s1187_s14 = smov %s977_s17  ;;  %s1188_s15 = smov %s1192_s19 }
  0xf9   : > { %s1189_s16 = smov %s1196_s20  ;;  %s1190_s17 = smov %s1200_s21 }
  0xfa   :  { %12 = sbr.rel (!%p10_p12) target bundleno = 4 (0x4), region = 81 }

// kernel: hourglass_forward.24
= control target key start
LH: loop header
LB: loop body
LE: loop exit
PB: predicated region body
PF: predicated region fallthrough
CT: control target
= control target key end

     0   :  { %s1018_s15 = smov 0   ;;  %s1020_s16 = smov 0   ;;  %s1161_s0 = inlined_call_operand.vmem [shape: bf16[2,6,19,8], index: 0, kind: input, shape index: {}]   ;;  %s1162_s1 = inlined_call_operand.vmem [shape: bf16[2,6,18,8], index: 1, kind: input, shape index: {}]   ;;  %s1163_s2 = inlined_call_operand.vmem [shape: bf16[3,9,8,16], index: 2, kind: input, shape index: {}]   ;;  %s1164_s3 = inlined_call_operand.vmem [shape: f32[1,16], index: 3, kind: input, shape index: {}]   ;;  %s1165_s4 = inlined_call_operand.vmem [shape: bf16[2,2,12,16], index: 4, kind: output, shape index: {}]  }
   0x1   :  { %s1022_s17 = smov 0   ;;  %s1024_s18 = smov 0  }
   0x2   :  { %s1026_s19 = smov 0   ;;  %s1028_s20 = smov 0  }
   0x3   :  { %s1030_s21 = smov 0  }
   0x4 LB: > { %s26_s22 = sadd.s32 1, %s978_s18  ;;  %s29_s23 = sadd.s32 1, %s982_s19  ;;  %s990_s21 = sphi %s1030_s21, %s14_s21   ;;  %s986_s20 = sphi %s1028_s20, %s1173_s20   ;;  %s982_s19 = sphi %s1026_s19, %s1172_s19   ;;  %s978_s18 = sphi %s1024_s18, %s1171_s18   ;;  %s974_s17 = sphi %s1022_s17, %s1170_s17   ;;  %s970_s16 = sphi %s1020_s16, %s1169_s16   ;;  %s966_s15 = sphi %s1018_s15, %s1168_s15  }
   0x5   : > { %p27_p0 = scmp.ge.s32.totalorder %s26_s22, 3  ;;  %p825_p1 = scmp.ge.s32.totalorder %s990_s21, 1 }
   0x6   : > { %p231_p2 = scmp.lt.s32.totalorder %s990_s21, 13  ;;  %s33_s24 = sadd.s32 1, %s986_s20 }
   0x7   : > { %s1175_s22 = smov (%p27_p0, %s26_s22), 0  ;;  %s1177_s23 = smov (!%p27_p0, %s29_s23), %s982_s19 }
   0x8   : > { %p232_p3 = pnand %p825_p1, %p231_p2  ;;  %p31_p4 = scmp.ge.s32.totalorder %s1177_s23, 2 }
   0x9   : > { %s826_s25 = sshll.u32 (!%p232_p3), %s970_s16, 1  ;;  %p285_p6 = scmp.lt.s32.totalorder (!%p232_p3), %s974_s17, 1 }
   0xa   : > { %s1179_s23 = smov (%p31_p4, %s1177_s23), 0  ;;  %s1181_s24 = smov (!%p31_p4, %s33_s24), %s986_s20 }
   0xb   : > { %p35_p5 = scmp.ge.s32.totalorder %s1181_s24, 2  ;;  %235 = sbr.rel (%p232_p3) target bundleno = 219 (0xdb), region = 36 }
   0xc   : > { %s284_s26 = sadd.s32 (!%p232_p3), %s966_s15, %s826_s25  ;;  %p309_p7 = scmp.lt.s32.totalorder (!%p232_p3), %s966_s15, 2 }
   0xd   : > { %s1183_s24 = smov (%p35_p5, %s1181_s24), 0  ;;  %p287_p8 = scmp.lt.s32.totalorder (!%p232_p3), %s284_s26, 5 }
   0xe   : > { %1166 = sst [smem:[#allocation3_spill]] %s1183_s24  ;;  %p316_p9 = scmp.lt.s32.totalorder (!%p232_p3), %s970_s16, 1 }
   0xf   : > { %p834_p10 = scmp.ne.s32.totalorder (!%p232_p3), %s966_s15, 0 }
  0x10   : > { %s1185_s17 = smov (!%p285_p6, %s974_s17), 1  ;;  %s1187_s26 = smov (!%p287_p8, %s284_s26), 5 }
  0x11   : > { %s876_s27 = smul.u32 18, %s1185_s17  ;;  %s832_s6 = sshll.u32 %s1185_s17, 2 }
  0x12   : > { %s310_s28 = scalar_select %p309_p7, %s966_s15, 2 }
  0x13   : > { %s875_s29 = smul.u32 3, %s1187_s26  ;;  %s1189_s16 = smov (!%p316_p9, %s970_s16), 1 }
  0x14   : > { %s877_s30 = smul.u32 36, %s310_s28  ;;  %s831_s26 = sshll.u32 %s1189_s16, 1 }
  0x15   : > { %s291_s5 = sadd.s32 %s876_s27, %s875_s29  ;;  %s320_s27 = sadd.s32 %s832_s6, %s831_s26 }
  0x16   : > { %s827_s7 = sshll.u32 %s291_s5, 2  ;;  %s1072_s10 = scalar_lea.vmem %s1163_s2, %s877_s30 }
  0x17   : > { %s1077_s13 = scalar_lea.vmem %s1161_s0, %s827_s7  ;;  %s1082_s24 = scalar_lea.vmem %s1162_s1, %s827_s7 }
  0x18   : > { %s833_s17 = sshll.u32 %s320_s27, 2  ;;  %327 = sbr.rel (%p834_p10) target bundleno = 32 (0x20), region = 40 }
  0x19   : > { %s1088_s5 = scalar_lea.vmem %s1165_s4, %s833_s17 }
  0x1d   : > { %vm328_vm0 = vcmask 130048   ;;  %vm330_vm1 = vcmask 125952   ;;  %v992_v0 = vmov 0.0  }
  0x1e   : > { %329 = vst.msk [vmem:[#allocation2] sm:$0xff] %vm328_vm0, %v992_v0 }
  0x1f   : > { %331 = vst.msk [vmem:[#allocation2 + $0x8] sm:$0xf] %vm330_vm1, %v992_v0 }
  0x20 PF: > { %v336_v1 = vld [vmem:[%s1072_s10] sm:$0xf]  ;;  %vm346_vm2 = vcmask 1043456   ;;  %v836_v2 = vld [vmem:[%s1072_s10 + $0x4] sm:$0xf]  ;;  %vm342_vm3 = vcmask 64512  }
  0x21   : > { %v334_v3 = vld [vmem:[%s1077_s13] sm:$0xff]   ;;  %v348_v4 = vsel %vm346_vm2, %v336_v1, 0  ;;  %v379_v5 = vsel %vm346_vm2, %v836_v2, 0  ;;  %v846_v9 = vld [vmem:[%s1072_s10 + $0x10] sm:$0xf]  ;;  %vm552_vm4 = vcmask 1044480  }
  0x22   : > { %v335_v6 = vld [vmem:[%s1077_s13 + $0x4] sm:$0x3]  ;;  %v339_v7 = vunpack.c.l.b16 %v334_v3  ;;  %357 = vmatpush.bf16.msra.mxu0 %v348_v4  ;;  %388 = vmatpush.bf16.msra.mxu1 %v379_v5  ;;  %v839_v10 = vld [vmem:[%s1082_s24] sm:$0xf]  ;;  %v492_v12 = vsel %vm346_vm2, %v846_v9, 0  ;;  %v439_v16 = vunpack.c.h.b16 %v334_v3  ;;  %vm662_vm6 = vcmask 130048  }
  0x23   : > { %v340_v8 = vunpack.c.l.b16 %v335_v6  ;;  %v871_v11 = vld [vmem:[%s1082_s24] sm:$0x30]  ;;  %v842_v14 = vld [vmem:[%s1072_s10 + $0x8] sm:$0xf]  ;;  %v844_v15 = vld [vmem:[%s1072_s10 + $0xc] sm:$0xf] }
  0x24   : > { %v840_v13 = vor.u32 %v871_v11, %v839_v10  ;;  %v414_v18 = vsel %vm346_vm2, %v842_v14, 0  ;;  %v453_v19 = vsel %vm346_vm2, %v844_v15, 0  ;;  %v397_v20 = vld [vmem:[%s1077_s13 + $0x4] sm:$0x7]  ;;  %v432_v21 = vld [vmem:[%s1077_s13] sm:$0xe] }
  0x25   : > { %v341_v17 = vpack.c.b16 %v340_v8, %v339_v7  ;;  %423 = vmatpush.bf16.msra.mxu2 %v414_v18  ;;  %v401_v22 = vunpack.c.l.b16 %v397_v20  ;;  %v438_v23 = vunpack.c.l.b16 %v432_v21  ;;  %v854_v24 = vld [vmem:[%s1072_s10 + $0x18] sm:$0xf]  ;;  %v860_v25 = vld [vmem:[%s1072_s10 + $0x1c] sm:$0xf]  ;;  %v852_v26 = vld [vmem:[%s1072_s10 + $0x14] sm:$0xf]  ;;  %462 = vmatpush.bf16.msra.mxu3 %v453_v19 }
  0x26   : > { %501 = vmatpush.bf16.msrb.mxu0 %v492_v12  ;;  %841 = vmatmul.msk.bf16.vlgmr.msra.gmra.mxu1 %vm342_vm3, %v840_v13  ;;  %v560_v27 = vsel %vm346_vm2, %v854_v24, 0  ;;  %v598_v28 = vsel %vm346_vm2, %v860_v25, 0  ;;  %v521_v29 = vsel %vm346_vm2, %v852_v26, 0  ;;  %v849_v30 = vld [vmem:[%s1082_s24] sm:$0xe]  ;;  %vm664_vm7 = vcmask 125952  }
  0x27   : > { %835 = vmatmul.msk.bf16.vlgmr.msra.gmra.mxu0 %vm342_vm3, %v341_v17  ;;  %v402_v31 = vpack.c.b16 %v401_v22, %v339_v7  ;;  %v440_v32 = vpack.c.b16 %v439_v16, %v438_v23  ;;  %v872_v33 = vld [vmem:[%s1082_s24] sm:$0xf0]  ;;  %v866_v34 = vld [vmem:[%s1072_s10 + $0x20] sm:$0xf]  ;;  %530 = vmatpush.bf16.msrb.mxu1 %v521_v29  ;;  %v616_v48 = vld [vmem:[%s1077_s13 + $0x8] sm:$0x3] }
  0x28   : > { %v510_v35 = vld [vmem:[%s1077_s13] sm:$0xc]  ;;  %v850_v36 = vor.u32 %v872_v33, %v849_v30  ;;  %v644_v37 = vsel %vm346_vm2, %v866_v34, 0  ;;  %v541_v52 = vld [vmem:[%s1077_s13 + $0x8] sm:$0x1]  ;;  %v620_v56 = vunpack.c.l.b16 %v616_v48  ;;  %p868_p11 = scmp.ne.s32.totalorder %s966_s15, 2 }
  0x29   : > { %569 = vmatpush.bf16.msrb.mxu2 %v560_v27  ;;  %607 = vmatpush.bf16.msrb.mxu3 %v598_v28  ;;  %v514_v38 = vunpack.c.l.b16 %v510_v35  ;;  %v404_v39 = vshrl.u32 %v402_v31, 16  ;;  %v406_v40 = vshll.u32 %v402_v31, 16  ;;  %v442_v41 = vshrl.u32 %v440_v32, 16  ;;  %v580_v53 = vld [vmem:[%s1082_s24 + $0x8] sm:$0x1]  ;;  %v332_v26 = vld [vmem:[#allocation2] sm:$0xff] }
  0x2a   : > { %v445_v42 = vshll.u32 %v440_v32, 16  ;;  %653 = vmatpush.bf16.msra.mxu0 %v644_v37  ;;  %v481_v43 = vshrl.u32 %v850_v36, 16  ;;  %v484_v44 = vshll.u32 %v850_v36, 16  ;;  %v857_v57 = vld [vmem:[%s1077_s13] sm:$0x8]  ;;  %v549_v59 = vunpack.c.l.b16 %v541_v52 }
  0x2b   : > { %v408_v45 = vrot.slane %v406_v40, 1  ;;  %v444_v46 = vrot.slane %v442_v41, 1  ;;  %v515_v51 = vpack.c.b16 %v439_v16, %v514_v38  ;;  %v873_v58 = vld [vmem:[%s1077_s13] sm:$0xf0]  ;;  %v588_v60 = vunpack.c.l.b16 %v580_v53  ;;  %v863_v62 = vld [vmem:[%s1082_s24] sm:$0x8] }
  0x2c   : > { %v447_v47 = vrot.slane %v445_v42, 2  ;;  %v483_v54 = vrot.slane %v481_v43, 1  ;;  %v486_v55 = vrot.slane %v484_v44, 2  ;;  %v874_v63 = vld [vmem:[%s1082_s24] sm:$0xf0]  ;;  %v621_v1 = vpack.c.b16 %v620_v56, %v620_v56 }
  0x2d   : > { %v409_v49 = vor.u32 %v408_v45, %v404_v39  ;;  %v516_v61 = vrot.slane %v515_v51, 2  ;;  %v858_v2 = vor.u32 %v873_v58, %v857_v57  ;;  %v551_v3 = vpack.c.b16 %v549_v59, %v549_v59  ;;  %v333_v33 = vld [vmem:[#allocation2 + $0x8] sm:$0xf] }
  0x2e   : > { %v448_v50 = vor.u32 %v447_v47, %v444_v46  ;;  %v487_v0 = vor.u32 %v486_v55, %v483_v54  ;;  %v864_v4 = vor.u32 %v874_v63, %v863_v62  ;;  %v590_v5 = vpack.c.b16 %v588_v60, %v588_v60 }
  0x2f   : > { %843 = vmatmul.msk.bf16.vlgmr.msra.gmra.mxu2 %vm342_vm3, %v409_v49  ;;  %v624_v6 = vshrl.u32 %v858_v2, 16  ;;  %v627_v7 = vshll.u32 %v858_v2, 16  ;;  %v632_v8 = vshrl.u32 %v621_v1, 16  ;;  %v635_v9 = vshll.u32 %v621_v1, 16 }
  0x30   : > { %845 = vmatmul.msk.bf16.vlgmr.msra.gmra.mxu3 %vm342_vm3, %v448_v50  ;;  %v553_v10 = vrot.slane %v858_v2, 3  ;;  %v554_v11 = vrot.slane %v551_v3, 3  ;;  %v591_v12 = vrot.slane %v864_v4, 3  ;;  %v592_v13 = vrot.slane %v590_v5, 3 }
  0x31   : > { %v626_v14 = vrot.slane %v624_v6, 3  ;;  %v629_v15 = vrot.slane %v627_v7, 4  ;;  %v634_v16 = vrot.slane %v632_v8, 3  ;;  %v637_v17 = vrot.slane %v635_v9, 4 }
  0x32   : > { %v555_v18 = vsel %vm552_vm4, %v553_v10, %v554_v11  ;;  %v593_v19 = vsel %vm552_vm4, %v591_v12, %v592_v13  ;;  %vm622_vm5 = vsmask.f32 4352 }
  0x33   : > { %v630_v20 = vor.u32 %v629_v15, %v626_v14  ;;  %v638_v21 = vor.u32 %v637_v17, %v634_v16 }
  0x35   : > { %v639_v22 = vsel %vm622_vm5, %v630_v20, %v638_v21 }
  0x36   : > { %853 = vmatmul.msk.bf16.vlgmr.msrb.gmra.mxu1 %vm342_vm3, %v516_v61 }
  0x37   : > { %851 = vmatmul.msk.bf16.vlgmr.msrb.gmra.mxu0 %vm342_vm3, %v487_v0 }
  0x3f   : > { %859 = vmatmul.msk.bf16.vlgmr.msrb.gmra.mxu2 %vm342_vm3, %v555_v18 }
  0x40   : > { %865 = vmatmul.msk.bf16.vlgmr.msrb.gmra.mxu3 %vm342_vm3, %v593_v19 }
  0x47   : > { %867 = vmatmul.msk.bf16.vlgmr.msra.gmra.mxu0 %vm342_vm3, %v639_v22 }
  0xa3   : > { %v390_v24 = vpop.f32.mrf.mxu1 }
  0xa4   : > { %v359_v23 = vpop.f32.mrf.mxu0 }
  0xa5   : > { %v364_v27 = vadd.f32 %v359_v23, %v332_v26 }
  0xa7   : > { %v395_v31 = vadd.f32 %v390_v24, %v364_v27 }
  0xab   : > { %v392_v28 = vpop.f32.mrf.mxu1 }
  0xac   : > { %v361_v25 = vpop.f32.mrf.mxu0 }
  0xad   : > { %v365_v35 = vadd.f32 %v361_v25, %v333_v33 }
  0xaf   : > { %v396_v39 = vadd.f32 %v392_v28, %v365_v35 }
  0xb2   : > { %v425_v29 = vpop.f32.mrf.mxu2 }
  0xb3   : > { %v464_v30 = vpop.f32.mrf.mxu3  ;;  %v430_v34 = vadd.f32 %v425_v29, %v395_v31  ;;  %v532_v41 = vpop.f32.mrf.mxu1 }
  0xb4   : > { %v503_v32 = vpop.f32.mrf.mxu0 }
  0xb5   : > { %v469_v36 = vadd.f32 %v464_v30, %v430_v34 }
  0xb7   : > { %v508_v42 = vadd.f32 %v503_v32, %v469_v36 }
  0xb9   : > { %v537_v44 = vadd.f32 %v532_v41, %v508_v42 }
  0xba   : > { %v427_v37 = vpop.f32.mrf.mxu2 }
  0xbb   : > { %v466_v38 = vpop.f32.mrf.mxu3  ;;  %v431_v43 = vadd.f32 %v427_v37, %v396_v39  ;;  %v534_v52 = vpop.f32.mrf.mxu1 }
  0xbc   : > { %v505_v40 = vpop.f32.mrf.mxu0 }
  0xbd   : > { %v470_v45 = vadd.f32 %v466_v38, %v431_v43 }
  0xbf   : > { %v509_v50 = vadd.f32 %v505_v40, %v470_v45 }
  0xc1   : > { %v538_v54 = vadd.f32 %v534_v52, %v509_v50 }
  0xc2   : > { %v571_v46 = vpop.f32.mrf.mxu2 }
  0xc3   : > { %v609_v47 = vpop.f32.mrf.mxu3  ;;  %v576_v48 = vadd.f32 %v571_v46, %v537_v44 }
  0xc4   : > { %v655_v49 = vpop.f32.mrf.mxu0 }
  0xc5   : > { %v614_v51 = vadd.f32 %v609_v47, %v576_v48 }
  0xc7   : > { %v660_v53 = vadd.f32 %v655_v49, %v614_v51 }
  0xc9   : > { %663 = vst.msk [vmem:[#allocation2] sm:$0xff] %vm662_vm6, %v660_v53 }
  0xca   : > { %v573_v55 = vpop.f32.mrf.mxu2 }
  0xcb   : > { %v577_v56 = vadd.f32 %v573_v55, %v538_v54  ;;  %v611_v57 = vpop.f32.mrf.mxu3 }
  0xcc   : > { %v657_v58 = vpop.f32.mrf.mxu0 }
  0xcd   : > { %v615_v59 = vadd.f32 %v611_v57, %v577_v56  ;;  %669 = sbr.rel (%p868_p11) target bundleno = 219 (0xdb), region = 44 }
  0xcf   : > { %v661_v60 = vadd.f32 %v657_v58, %v615_v59 }
  0xd1   : > { %665 = vst.msk [vmem:[#allocation2 + $0x8] sm:$0xf] %vm664_vm7, %v661_v60 }
  0xd2   : > { %v935_v61 = vld [vmem:[%s1164_s3] ss:$0 sm:$0xff]  ;;  %vm681_vm8 = vcmask 123904  }
  0xd3   : > { %v674_v62 = vadd.f32 %v935_v61, %v660_v53  ;;  %v675_v63 = vadd.f32 %v935_v61, %v661_v60 }
  0xd5   : > { %v676_v0 = vmax.f32 %v674_v62, 0.0  ;;  %v677_v1 = vmax.f32 %v675_v63, 0.0 }
  0xd7   : > { %v678_v2 = vpack.c.bf16 %v676_v0, %v676_v0  ;;  %v679_v3 = vpack.c.bf16 %v677_v1, %v677_v1 }
  0xd9   : > { %680 = vst.msk [vmem:[%s1088_s5] sm:$0xf] %vm664_vm7, %v678_v2 }
  0xda   : > { %682 = vst.msk [vmem:[%s1088_s5 + $0x4] sm:$0x3] %vm681_vm8, %v679_v3 }
  0xdb PF: > { %s14_s21 = sadd.s32 1, %s990_s21   ;;  %s1167_s30 = sld [smem:[#allocation3_spill]] }
  0xdc   : > { %p11_p12 = scmp.ge.s32.totalorder %s14_s21, 14   ;;  %s1168_s15 = smov %s978_s18 }
  0xdd   : > { %s1169_s16 = smov %s982_s19  ;;  %s1170_s17 = smov %s986_s20 }
  0xde   : > { %s1171_s18 = smov %s1175_s22  ;;  %s1172_s19 = smov %s1179_s23 }
  0xdf   :  { %13 = sbr.rel (!%p11_p12) target bundleno = 4 (0x4), region = 88 }
  0xe1   : > { %s1173_s20 = smov %s1167_s30 }

// kernel: hourglass_forward.26
= control target key start
LH: loop header
LB: loop body
LE: loop exit
PB: predicated region body
PF: predicated region fallthrough
CT: control target
= control target key end

     0   :  { %s533_s12 = smov 0   ;;  %s535_s13 = smov 0   ;;  %s595_s0 = inlined_call_operand.vmem [shape: bf16[2,4,16,8], index: 0, kind: input, shape index: {}]   ;;  %s596_s1 = inlined_call_operand.vmem [shape: bf16[1,1,8,8], index: 1, kind: input, shape index: {}]   ;;  %s597_s2 = inlined_call_operand.vmem [shape: f32[1,8], index: 2, kind: input, shape index: {}]   ;;  %s598_s3 = inlined_call_operand.vmem [shape: bf16[2,4,16,8], index: 3, kind: output, shape index: {}]  }
   0x1   :  { %s537_s14 = smov 0   ;;  %s539_s15 = smov 0  }
   0x2   :  { %s541_s16 = smov 0  }
   0x3 LB: > { %s28_s17 = sadd.s32 1, %s502_s14  ;;  %s32_s18 = sadd.s32 1, %s506_s15  ;;  %s510_s16 = sphi %s541_s16, %s13_s16   ;;  %s506_s15 = sphi %s539_s15, %s602_s15   ;;  %s502_s14 = sphi %s537_s14, %s601_s14   ;;  %s498_s13 = sphi %s535_s13, %s600_s13   ;;  %s494_s12 = sphi %s533_s12, %s599_s12  }
   0x4   : > { %p30_p0 = scmp.ge.s32.totalorder %s28_s17, 4  ;;  %p415_p1 = scmp.ge.s32.totalorder %s510_s16, 1 }
   0x5   : > { %p177_p2 = scmp.lt.s32.totalorder %s510_s16, 9 }
   0x6   : > { %s604_s17 = smov (%p30_p0, %s28_s17), 0  ;;  %s606_s18 = smov (!%p30_p0, %s32_s18), %s506_s15 }
   0x7   : > { %p178_p3 = pnand %p415_p1, %p177_p2  ;;  %p34_p4 = scmp.ge.s32.totalorder %s606_s18, 2 }
   0x8   : > { %p215_p5 = scmp.lt.s32.totalorder (!%p178_p3), %s498_s13, 1  ;;  %p217_p6 = scmp.lt.s32.totalorder (!%p178_p3), %s494_s12, 3 }
   0x9   : > { %s608_s18 = smov (%p34_p4, %s606_s18), 0  ;;  %181 = sbr.rel (%p178_p3) target bundleno = 162 (0xa2), region = 32 }
   0xe   : > { %v250_v0 = vld [vmem:[%s596_s1] sm:$0xf]  ;;  %vm260_vm0 = vcmask 1043456   ;;  %vm243_vm1 = vcmask 64512   ;;  %s610_s13 = smov (!%p215_p5, %s498_s13), 1  ;;  %v512_v2 = vmov 0.0  }
   0xf   : > { %v262_v1 = vsel %vm260_vm0, %v250_v0, 0  ;;  %244 = vst.msk [vmem:[#allocation2] sm:$0xff] %vm243_vm1, %v512_v2  ;;  %s612_s12 = smov (!%p217_p6, %s494_s12), 3  ;;  %s417_s21 = sshll.u32 %s610_s13, 3  ;;  %v471_v5 = vld [vmem:[%s597_s2] ss:$0 sm:$0xff] }
  0x10   : > { %271 = vmatpush.bf16.msra.mxu0 %v262_v1  ;;  %245 = vst.msk [vmem:[#allocation2 + $0x8] sm:$0xff] %vm243_vm1, %v512_v2  ;;  %s416_s22 = sshll.u32 %s612_s12, 1  ;;  %vm293_vm2 = vcmask 60416  }
  0x11   : > { %s221_s23 = sadd.s32 %s417_s21, %s416_s22 }
  0x12   : > { %s418_s24 = sshll.u32 %s221_s23, 2 }
  0x13   : > { %s223_s27 = scalar_lea.vmem %s595_s0, %s418_s24  ;;  %s237_s5 = scalar_lea.vmem %s598_s3, %s418_s24 }
  0x14   : > { %v429_v3 = vld [vmem:[%s223_s27] sm:$0xff] }
  0x15   : > { %426 = vmatmul.msk.bf16.vlgmr.msra.gmra.mxu0 %vm243_vm1, %v429_v3 }
  0x16   : > { %v246_v4 = vld [vmem:[#allocation2] sm:$0xff] }
  0x17   : > { %v247_v10 = vld [vmem:[#allocation2 + $0x8] sm:$0xff] }
  0x92   : > { %v273_v6 = vpop.f32.mrf.mxu0 }
  0x93   : > { %v278_v7 = vadd.f32 %v273_v6, %v246_v4 }
  0x95   : > { %280 = vst.msk [vmem:[#allocation2] sm:$0xff] %vm243_vm1, %v278_v7  ;;  %v289_v8 = vadd.f32 %v471_v5, %v278_v7 }
  0x97   : > { %v291_v9 = vpack.c.bf16 %v289_v8, %v289_v8 }
  0x99   : > { %294 = vst.msk [vmem:[%s237_s5] sm:$0xf] %vm293_vm2, %v291_v9 }
  0x9a   : > { %v275_v11 = vpop.f32.mrf.mxu0 }
  0x9b   : > { %v279_v12 = vadd.f32 %v275_v11, %v247_v10 }
  0x9d   : > { %281 = vst.msk [vmem:[#allocation2 + $0x8] sm:$0xff] %vm243_vm1, %v279_v12  ;;  %v290_v13 = vadd.f32 %v471_v5, %v279_v12 }
  0x9f   : > { %v292_v14 = vpack.c.bf16 %v290_v13, %v290_v13 }
  0xa1   : > { %295 = vst.msk [vmem:[%s237_s5 + $0x4] sm:$0xf] %vm293_vm2, %v292_v14 }
  0xa2 PF: > { %s13_s16 = sadd.s32 1, %s510_s16   ;;  %s599_s12 = smov %s502_s14 }
  0xa3   : > { %p10_p7 = scmp.ge.s32.totalorder %s13_s16, 10   ;;  %s600_s13 = smov %s506_s15 }
  0xa4   : > { %s601_s14 = smov %s604_s17  ;;  %s602_s15 = smov %s608_s18 }
  0xa5   :  { %12 = sbr.rel (!%p10_p7) target bundleno = 3 (0x3), region = 73 }

// kernel: hourglass_forward.25
= control target key start
LH: loop header
LB: loop body
LE: loop exit
PB: predicated region body
PF: predicated region fallthrough
CT: control target
= control target key end

     0   :  { %s888_s12 = smov 0   ;;  %s890_s13 = smov 0   ;;  %s1012_s0 = inlined_call_operand.vmem [shape: bf16[2,4,18,16], index: 0, kind: input, shape index: {}]   ;;  %s1013_s1 = inlined_call_operand.vmem [shape: bf16[3,9,16,16], index: 1, kind: input, shape index: {}]   ;;  %s1014_s2 = inlined_call_operand.vmem [shape: f32[1,16], index: 2, kind: input, shape index: {}]   ;;  %s1015_s3 = inlined_call_operand.vmem [shape: bf16[2,2,8,16], index: 3, kind: output, shape index: {}]  }
   0x1   :  { %s892_s14 = smov 0   ;;  %s894_s15 = smov 0  }
   0x2   :  { %s896_s16 = smov 0   ;;  %s898_s17 = smov 0  }
   0x3   :  { %s900_s18 = smov 0  }
   0x4 LB: > { %s25_s19 = sadd.s32 1, %s853_s15  ;;  %s28_s20 = sadd.s32 1, %s857_s16  ;;  %s865_s18 = sphi %s900_s18, %s13_s18   ;;  %s861_s17 = sphi %s898_s17, %s1021_s17   ;;  %s857_s16 = sphi %s896_s16, %s1020_s16   ;;  %s853_s15 = sphi %s894_s15, %s1019_s15   ;;  %s849_s14 = sphi %s892_s14, %s1018_s14   ;;  %s845_s13 = sphi %s890_s13, %s1017_s13   ;;  %s841_s12 = sphi %s888_s12, %s1016_s12  }
   0x5   : > { %p26_p0 = scmp.ge.s32.totalorder %s25_s19, 3  ;;  %p671_p1 = scmp.ge.s32.totalorder %s865_s18, 1 }
   0x6   : > { %p178_p2 = scmp.lt.s32.totalorder %s865_s18, 13  ;;  %s32_s21 = sadd.s32 1, %s861_s17 }
   0x7   : > { %s1023_s19 = smov (%p26_p0, %s25_s19), 0  ;;  %s1025_s20 = smov (!%p26_p0, %s28_s20), %s857_s16 }
   0x8   : > { %p179_p3 = pnand %p671_p1, %p178_p2  ;;  %p30_p4 = scmp.ge.s32.totalorder %s1025_s20, 2 }
   0x9   : > { %s215_s22 = sadd.s32 (!%p179_p3), %s841_s12, %s845_s13  ;;  %p216_p6 = scmp.lt.s32.totalorder (!%p179_p3), %s849_s14, 1 }
   0xa   : > { %s1027_s20 = smov (%p30_p4, %s1025_s20), 0  ;;  %s1029_s21 = smov (!%p30_p4, %s32_s21), %s861_s17 }
   0xb   : > { %p34_p5 = scmp.ge.s32.totalorder %s1029_s21, 2  ;;  %182 = sbr.rel (%p179_p3) target bundleno = 209 (0xd1), region = 32 }
   0xc   : > { %p218_p7 = scmp.lt.s32.totalorder (!%p179_p3), %s215_s22, 3  ;;  %p226_p8 = scmp.lt.s32.totalorder (!%p179_p3), %s841_s12, 2 }
   0xd   : > { %s1031_s21 = smov (%p34_p5, %s1029_s21), 0  ;;  %p233_p9 = scmp.lt.s32.totalorder (!%p179_p3), %s845_s13, 1 }
   0xe   : > { %p676_p10 = scmp.ne.s32.totalorder (!%p179_p3), %s841_s12, 0 }
  0x10   : > { %s1033_s14 = smov (!%p216_p6, %s849_s14), 1  ;;  %s1035_s22 = smov (!%p218_p7, %s215_s22), 3 }
  0x11   : > { %s751_s23 = smul.u32 12, %s1033_s14  ;;  %s674_s8 = sshll.u32 %s1033_s14, 1 }
  0x12   : > { %s750_s24 = smul.u32 3, %s1035_s22  ;;  %s1037_s13 = smov (!%p233_p9, %s845_s13), 1 }
  0x13   : > { %s227_s25 = scalar_select %p226_p8, %s841_s12, 2 }
  0x14   : > { %s222_s26 = sadd.s32 %s751_s23, %s750_s24  ;;  %s236_s9 = sadd.s32 %s674_s8, %s1037_s13 }
  0x15   : > { %s672_s27 = sshll.u32 %s222_s26, 2  ;;  %s752_s28 = smul.u32 72, %s227_s25 }
  0x16   : > { %s942_s4 = scalar_lea.vmem %s1012_s0, %s672_s27  ;;  %s675_s10 = sshll.u32 %s236_s9, 2 }
  0x17   : > { %s947_s7 = scalar_lea.vmem %s1013_s1, %s752_s28  ;;  %s953_s23 = scalar_lea.vmem %s1015_s3, %s675_s10 }
  0x18   : > { %243 = sbr.rel (%p676_p10) target bundleno = 31 (0x1f), region = 36 }
  0x1d   : > { %vm244_vm0 = vcmask 130048   ;;  %v867_v0 = vmov 0.0  }
  0x1e   : > { %245 = vst.msk [vmem:[#allocation2] sm:$0xff] %vm244_vm0, %v867_v0 }
  0x1f PF: > { %v741_v1 = vld [vmem:[%s947_s7] sm:$0xff]  ;;  %v743_v2 = vld [vmem:[%s947_s7 + $0x10] sm:$0xff]  ;;  %v744_v3 = vld [vmem:[%s947_s7 + $0x18] sm:$0xff]  ;;  %vm256_vm1 = vcmask 130048   ;;  %p738_p11 = scmp.ne.s32.totalorder %s841_s12, 2 }
  0x20   : > { %v247_v4 = vld [vmem:[%s942_s4] sm:$0xf]  ;;  %v275_v6 = vld [vmem:[%s942_s4 + $0x4] sm:$0x1]  ;;  %267 = vmatpush.bf16.msra.mxu0 %v741_v1  ;;  %338 = vmatpush.bf16.msra.mxu2 %v743_v2  ;;  %v742_v9 = vld [vmem:[%s947_s7 + $0x8] sm:$0xff] }
  0x21   : > { %v745_v5 = vld [vmem:[%s947_s7 + $0x20] sm:$0xff]  ;;  %v282_v7 = vunpack.c.l.b16 %v275_v6  ;;  %372 = vmatpush.bf16.msra.mxu3 %v744_v3  ;;  %307 = vmatpush.bf16.msra.mxu1 %v742_v9  ;;  %v747_v19 = vld [vmem:[%s947_s7 + $0x30] sm:$0xff]  ;;  %v748_v20 = vld [vmem:[%s947_s7 + $0x38] sm:$0xff] }
  0x22   : > { %v314_v8 = vld [vmem:[%s942_s4] sm:$0xe]  ;;  %v346_v12 = vld [vmem:[%s942_s4 + $0x4] sm:$0x3]  ;;  %v746_v21 = vld [vmem:[%s947_s7 + $0x28] sm:$0xff] }
  0x23   : > { %v345_v10 = vld [vmem:[%s942_s4] sm:$0xc]  ;;  %v319_v11 = vunpack.c.l.b16 %v314_v8  ;;  %v379_v14 = vld [vmem:[%s942_s4 + $0x4] sm:$0x7]  ;;  %v353_v16 = vunpack.c.l.b16 %v346_v12  ;;  %681 = vmatmul.msk.bf16.vlgmr.msra.gmra.mxu0 %vm256_vm1, %v247_v4  ;;  %v476_v24 = vld [vmem:[%s942_s4 + $0x8] sm:$0x1] }
  0x24   : > { %410 = vmatpush.bf16.msrb.mxu0 %v745_v5  ;;  %v352_v13 = vunpack.c.l.b16 %v345_v10  ;;  %v274_v15 = vld [vmem:[%s942_s4] sm:$0xff]   ;;  %v384_v17 = vunpack.c.l.b16 %v379_v14  ;;  %468 = vmatpush.bf16.msrb.mxu2 %v747_v19  ;;  %v483_v29 = vunpack.c.l.b16 %v476_v24 }
  0x25   : > { %v281_v18 = vunpack.c.l.b16 %v274_v15  ;;  %v320_v22 = vpack.c.b16 %v282_v7, %v319_v11  ;;  %v749_v23 = vld [vmem:[%s947_s7 + $0x40] sm:$0xff]  ;;  %v482_v25 = vunpack.c.h.b16 %v274_v15  ;;  %508 = vmatpush.bf16.msrb.mxu3 %v748_v20  ;;  %441 = vmatpush.bf16.msrb.mxu1 %v746_v21 }
  0x26   : > { %v354_v26 = vpack.c.b16 %v353_v16, %v352_v13  ;;  %v385_v27 = vpack.c.b16 %v384_v17, %v352_v13  ;;  %v417_v42 = vld [vmem:[%s942_s4] sm:$0x8]  ;;  %v448_v47 = vld [vmem:[%s942_s4 + $0x4] sm:$0xf] }
  0x27   : > { %v283_v28 = vpack.c.b16 %v282_v7, %v281_v18  ;;  %v321_v30 = vrot.slane %v320_v22, 1  ;;  %v484_v37 = vpack.c.b16 %v483_v29, %v482_v25  ;;  %v422_v46 = vunpack.c.l.b16 %v417_v42  ;;  %v515_v50 = vld [vmem:[%s942_s4 + $0x4] sm:$0xe] }
  0x28   : > { %539 = vmatpush.bf16.msra.mxu0 %v749_v23  ;;  %v355_v31 = vrot.slane %v354_v26, 2  ;;  %v387_v34 = vshrl.u32 %v385_v27, 16  ;;  %v390_v35 = vshll.u32 %v385_v27, 16  ;;  %v520_v51 = vunpack.c.l.b16 %v515_v50  ;;  %v246_v57 = vld [vmem:[#allocation2] sm:$0xff] }
  0x29   : > { %v285_v32 = vshrl.u32 %v283_v28, 16  ;;  %v287_v33 = vshll.u32 %v283_v28, 16  ;;  %695 = vmatmul.msk.bf16.vlgmr.msra.gmra.mxu2 %vm256_vm1, %v321_v30  ;;  %v488_v41 = vshll.u32 %v484_v37, 16  ;;  %v486_v44 = vshrl.u32 %v484_v37, 16 }
  0x2a   : > { %702 = vmatmul.msk.bf16.vlgmr.msra.gmra.mxu3 %vm256_vm1, %v355_v31  ;;  %v389_v39 = vrot.slane %v387_v34, 2  ;;  %v392_v40 = vrot.slane %v390_v35, 3  ;;  %v423_v49 = vpack.c.b16 %v384_v17, %v422_v46  ;;  %v521_v53 = vpack.c.b16 %v483_v29, %v520_v51 }
  0x2b   : > { %v289_v36 = vrot.slane %v287_v33, 1  ;;  %v490_v45 = vrot.slane %v488_v41, 1 }
  0x2c   : > { %v393_v43 = vor.u32 %v392_v40, %v389_v39  ;;  %v424_v52 = vrot.slane %v423_v49, 3  ;;  %v522_v54 = vrot.slane %v521_v53, 1 }
  0x2d   : > { %v290_v38 = vor.u32 %v289_v36, %v285_v32  ;;  %v491_v48 = vor.u32 %v490_v45, %v486_v44 }
  0x2f   : > { %688 = vmatmul.msk.bf16.vlgmr.msra.gmra.mxu1 %vm256_vm1, %v290_v38 }
  0x33   : > { %709 = vmatmul.msk.bf16.vlgmr.msrb.gmra.mxu0 %vm256_vm1, %v393_v43 }
  0x39   : > { %723 = vmatmul.msk.bf16.vlgmr.msrb.gmra.mxu2 %vm256_vm1, %v448_v47 }
  0x3a   : > { %730 = vmatmul.msk.bf16.vlgmr.msrb.gmra.mxu3 %vm256_vm1, %v491_v48 }
  0x3f   : > { %716 = vmatmul.msk.bf16.vlgmr.msrb.gmra.mxu1 %vm256_vm1, %v424_v52 }
  0x43   : > { %737 = vmatmul.msk.bf16.vlgmr.msra.gmra.mxu0 %vm256_vm1, %v522_v54 }
  0xa0   : > { %v269_v55 = vpop.f32.mrf.mxu0 }
  0xa1   : > { %v273_v61 = vadd.f32 %v269_v55, %v246_v57 }
  0xa8   : > { %v271_v56 = vpop.f32.mrf.mxu0 }
  0xac   : > { %v309_v58 = vpop.f32.mrf.mxu1  ;;  %v340_v59 = vpop.f32.mrf.mxu2 }
  0xad   : > { %v374_v60 = vpop.f32.mrf.mxu3  ;;  %v313_v62 = vadd.f32 %v309_v58, %v273_v61 }
  0xaf   : > { %v344_v1 = vadd.f32 %v340_v59, %v313_v62 }
  0xb0   : > { %v412_v63 = vpop.f32.mrf.mxu0 }
  0xb1   : > { %v378_v4 = vadd.f32 %v374_v60, %v344_v1 }
  0xb3   : > { %v416_v5 = vadd.f32 %v412_v63, %v378_v4 }
  0xb4   : > { %v311_v0 = vpop.f32.mrf.mxu1  ;;  %v342_v2 = vpop.f32.mrf.mxu2 }
  0xb5   : > { %v376_v3 = vpop.f32.mrf.mxu3 }
  0xb8   : > { %v414_v6 = vpop.f32.mrf.mxu0 }
  0xbc   : > { %v443_v7 = vpop.f32.mrf.mxu1  ;;  %v470_v9 = vpop.f32.mrf.mxu2 }
  0xbd   : > { %v447_v8 = vadd.f32 %v443_v7, %v416_v5  ;;  %v510_v10 = vpop.f32.mrf.mxu3 }
  0xbf   : > { %v474_v11 = vadd.f32 %v470_v9, %v447_v8 }
  0xc0   : > { %v541_v13 = vpop.f32.mrf.mxu0 }
  0xc1   : > { %v514_v12 = vadd.f32 %v510_v10, %v474_v11 }
  0xc3   : > { %v545_v15 = vadd.f32 %v541_v13, %v514_v12 }
  0xc4   : > { %v445_v14 = vpop.f32.mrf.mxu1  ;;  %v472_v16 = vpop.f32.mrf.mxu2  ;;  %550 = sbr.rel (%p738_p11) target bundleno = 209 (0xd1), region = 40 }
  0xc5   : > { %v512_v17 = vpop.f32.mrf.mxu3  ;;  %546 = vst.msk [vmem:[#allocation2] sm:$0xff] %vm256_vm1, %v545_v15 }
  0xc8   : > { %v543_v18 = vpop.f32.mrf.mxu0 }
  0xc9   : > { %v810_v19 = vld [vmem:[%s1014_s2] ss:$0 sm:$0xff]  ;;  %vm558_vm2 = vcmask 125952  }
  0xca   : > { %v555_v20 = vadd.f32 %v810_v19, %v545_v15 }
  0xcc   : > { %v556_v21 = vmax.f32 %v555_v20, 0.0 }
  0xce   : > { %v557_v22 = vpack.c.bf16 %v556_v21, %v556_v21 }
  0xd0   : > { %559 = vst.msk [vmem:[%s953_s23] sm:$0xf] %vm558_vm2, %v557_v22 }
  0xd1 PF: > { %s13_s18 = sadd.s32 1, %s865_s18   ;;  %s1016_s12 = smov %s853_s15 }
  0xd2   : > { %p10_p12 = scmp.ge.s32.totalorder %s13_s18, 14   ;;  %s1017_s13 = smov %s857_s16 }
  0xd3   : > { %s1018_s14 = smov %s861_s17  ;;  %s1019_s15 = smov %s1023_s19 }
  0xd4   : > { %s1020_s16 = smov %s1027_s20  ;;  %s1021_s17 = smov %s1031_s21 }
  0xd5   :  { %12 = sbr.rel (!%p10_p12) target bundleno = 4 (0x4), region = 81 }

// kernel: hourglass_forward.27
= control target key start
LH: loop header
LB: loop body
LE: loop exit
PB: predicated region body
PF: predicated region fallthrough
CT: control target
= control target key end

     0   :  { %s597_s15 = smov 0   ;;  %s599_s16 = smov 0   ;;  %s659_s0 = inlined_call_operand.vmem [shape: bf16[2,2,4,16], index: 0, kind: input, shape index: {}]   ;;  %s660_s1 = inlined_call_operand.vmem [shape: bf16[1,1,16,8], index: 1, kind: input, shape index: {}]   ;;  %s661_s2 = inlined_call_operand.vmem [shape: f32[1,8], index: 2, kind: input, shape index: {}]   ;;  %s662_s3 = inlined_call_operand.vmem [shape: bf16[2,2,4,8], index: 3, kind: input, shape index: {}]   ;;  %s663_s4 = inlined_call_operand.vmem [shape: bf16[2,2,4,8], index: 4, kind: output, shape index: {}]  }
   0x1   :  { %s601_s17 = smov 0   ;;  %s603_s18 = smov 0  }
   0x2   :  { %s605_s19 = smov 0  }
   0x3 LB: > { %s29_s20 = sadd.s32 1, %s561_s17  ;;  %s33_s21 = sadd.s32 1, %s565_s18  ;;  %s569_s19 = sphi %s605_s19, %s14_s19   ;;  %s565_s18 = sphi %s603_s18, %s667_s18   ;;  %s561_s17 = sphi %s601_s17, %s666_s17   ;;  %s557_s16 = sphi %s599_s16, %s665_s16   ;;  %s553_s15 = sphi %s597_s15, %s664_s15  }
   0x4   : > { %p31_p0 = scmp.ge.s32.totalorder %s29_s20, 2  ;;  %p474_p1 = scmp.ge.s32.totalorder %s569_s19, 1 }
   0x5   : > { %p217_p2 = scmp.lt.s32.totalorder %s569_s19, 5 }
   0x6   : > { %s669_s20 = smov (%p31_p0, %s29_s20), 0  ;;  %s671_s21 = smov (!%p31_p0, %s33_s21), %s565_s18 }
   0x7   : > { %p218_p3 = pnand %p474_p1, %p217_p2  ;;  %p35_p4 = scmp.ge.s32.totalorder %s671_s21, 2 }
   0x8   : > { %p264_p5 = scmp.lt.s32.totalorder (!%p218_p3), %s557_s16, 1  ;;  %p266_p6 = scmp.lt.s32.totalorder (!%p218_p3), %s553_s15, 1 }
   0x9   : > { %s673_s21 = smov (%p35_p4, %s671_s21), 0  ;;  %221 = sbr.rel (%p218_p3) target bundleno = 157 (0x9d), region = 36 }
   0xe   : > { %v488_v0 = vld [vmem:[%s660_s1] sm:$0xff]  ;;  %vm299_vm0 = vcmask 60416   ;;  %v571_v1 = vmov 0.0   ;;  %s675_s16 = smov (!%p264_p5, %s557_s16), 1  ;;  %s677_s15 = smov (!%p266_p6, %s553_s15), 1  ;;  %vm311_vm1 = vcmask 130048  }
   0xf   : > { %300 = vst.msk [vmem:[#allocation2] sm:$0xf] %vm299_vm0, %v571_v1  ;;  %322 = vmatpush.bf16.msra.mxu0 %v488_v0  ;;  %s475_s24 = sshll.u32 %s675_s16, 1  ;;  %v530_v5 = vld [vmem:[%s661_s2] ss:$0 sm:$0xff]  ;;  %vm344_vm2 = vcmask 58368  }
  0x10   : > { %s269_s25 = sadd.s32 %s475_s24, %s677_s15 }
  0x11   : > { %s476_s26 = sshll.u32 %s269_s25, 1 }
  0x12   : > { %s271_s29 = scalar_lea.vmem %s659_s0, %s476_s26  ;;  %s285_s6 = scalar_lea.vmem %s662_s3, %s476_s26 }
  0x13   : > { %v302_v2 = vld [vmem:[%s271_s29] sm:$0x3]  ;;  %s293_s11 = scalar_lea.vmem %s663_s4, %s476_s26 }
  0x14   : > { %485 = vmatmul.msk.bf16.vlgmr.msra.gmra.mxu0 %vm311_vm1, %v302_v2  ;;  %v339_v4 = vld [vmem:[%s285_s6] sm:$0x3] }
  0x15   : > { %v340_v8 = vunpack.c.l.bf16 %v339_v4 }
  0x16   : > { %v301_v3 = vld [vmem:[#allocation2] sm:$0xf] }
  0x91   : > { %v324_v6 = vpop.f32.mrf.mxu0 }
  0x92   : > { %v328_v7 = vadd.f32 %v324_v6, %v301_v3 }
  0x94   : > { %330 = vst.msk [vmem:[#allocation2] sm:$0xf] %vm299_vm0, %v328_v7  ;;  %v338_v9 = vadd.f32 %v530_v5, %v328_v7 }
  0x96   : > { %v341_v10 = vadd.f32 %v340_v8, %v338_v9 }
  0x98   : > { %v342_v11 = vmax.f32 %v341_v10, 0.0 }
  0x99   : > { %v326_v12 = vpop.f32.mrf.mxu0 }
  0x9a   : > { %v343_v13 = vpack.c.bf16 %v342_v11, %v342_v11 }
  0x9c   : > { %345 = vst.msk [vmem:[%s293_s11] sm:$0x3] %vm344_vm2, %v343_v13 }
  0x9d PF: > { %s14_s19 = sadd.s32 1, %s569_s19   ;;  %s664_s15 = smov %s561_s17 }
  0x9e   : > { %p11_p7 = scmp.ge.s32.totalorder %s14_s19, 6   ;;  %s665_s16 = smov %s565_s18 }
  0x9f   : > { %s666_s17 = smov %s669_s20  ;;  %s667_s18 = smov %s673_s21 }
  0xa0   :  { %13 = sbr.rel (!%p11_p7) target bundleno = 3 (0x3), region = 80 }

// kernel: hourglass_forward.28
= control target key start
LH: loop header
LB: loop body
LE: loop exit
PB: predicated region body
PF: predicated region fallthrough
CT: control target
= control target key end

     0   :  { %s642_s15 = smov 0   ;;  %s644_s16 = smov 0   ;;  %s712_s0 = inlined_call_operand.vmem [shape: bf16[2,2,7,16], index: 0, kind: input, shape index: {}]   ;;  %s713_s1 = inlined_call_operand.vmem [shape: bf16[1,2,16,8], index: 1, kind: input, shape index: {}]   ;;  %s714_s2 = inlined_call_operand.vmem [shape: f32[1,8], index: 2, kind: input, shape index: {}]   ;;  %s715_s3 = inlined_call_operand.vmem [shape: bf16[2,2,6,8], index: 3, kind: input, shape index: {}]   ;;  %s716_s4 = inlined_call_operand.vmem [shape: bf16[2,2,6,8], index: 4, kind: output, shape index: {}]  }
   0x1   :  { %s646_s17 = smov 0   ;;  %s648_s18 = smov 0  }
   0x2   :  { %s650_s19 = smov 0  }
   0x3 LB: > { %s29_s20 = sadd.s32 1, %s606_s17  ;;  %s33_s21 = sadd.s32 1, %s610_s18  ;;  %s614_s19 = sphi %s650_s19, %s14_s19   ;;  %s610_s18 = sphi %s648_s18, %s720_s18   ;;  %s606_s17 = sphi %s646_s17, %s719_s17   ;;  %s602_s16 = sphi %s644_s16, %s718_s16   ;;  %s598_s15 = sphi %s642_s15, %s717_s15  }
   0x4   : > { %p31_p0 = scmp.ge.s32.totalorder %s29_s20, 2  ;;  %p511_p1 = scmp.ge.s32.totalorder %s614_s19, 1 }
   0x5   : > { %p217_p2 = scmp.lt.s32.totalorder %s614_s19, 5 }
   0x6   : > { %s722_s20 = smov (%p31_p0, %s29_s20), 0  ;;  %s724_s21 = smov (!%p31_p0, %s33_s21), %s610_s18 }
   0x7   : > { %p218_p3 = pnand %p511_p1, %p217_p2  ;;  %p35_p4 = scmp.ge.s32.totalorder %s724_s21, 2 }
   0x8   : > { %p264_p5 = scmp.lt.s32.totalorder (!%p218_p3), %s602_s16, 1  ;;  %p266_p6 = scmp.lt.s32.totalorder (!%p218_p3), %s598_s15, 1 }
   0x9   : > { %s726_s21 = smov (%p35_p4, %s724_s21), 0  ;;  %221 = sbr.rel (%p218_p3) target bundleno = 168 (0xa8), region = 36 }
   0xe   : > { %v532_v0 = vld [vmem:[%s713_s1] sm:$0xff]  ;;  %v533_v1 = vld [vmem:[%s713_s1 + $0x8] sm:$0xff]  ;;  %vm299_vm0 = vcmask 62464   ;;  %s728_s16 = smov (!%p264_p5, %s602_s16), 1  ;;  %v616_v2 = vmov 0.0   ;;  %s730_s15 = smov (!%p266_p6, %s598_s15), 1 }
   0xf   : > { %322 = vmatpush.bf16.msra.mxu0 %v532_v0  ;;  %359 = vmatpush.bf16.msra.mxu1 %v533_v1  ;;  %300 = vst.msk [vmem:[#allocation2] sm:$0x3f] %vm299_vm0, %v616_v2  ;;  %s512_s26 = sshll.u32 %s728_s16, 1  ;;  %vm311_vm1 = vcmask 130048   ;;  %v575_v16 = vld [vmem:[%s714_s2] ss:$0 sm:$0xff] }
  0x10   : > { %s269_s27 = sadd.s32 %s512_s26, %s730_s15  ;;  %vm381_vm2 = vcmask 59392  }
  0x11   : > { %s679_s28 = sshll.u32 %s269_s27, 2 }
  0x12   : > { %s271_s5 = scalar_lea.vmem %s712_s0, %s679_s28  ;;  %s285_s8 = scalar_lea.vmem %s715_s3, %s679_s28 }
  0x13   : > { %v302_v3 = vld [vmem:[%s271_s5] sm:$0x7]  ;;  %s293_s13 = scalar_lea.vmem %s716_s4, %s679_s28 }
  0x14   : > { %v329_v4 = vld [vmem:[%s271_s5] sm:$0xf]  ;;  %522 = vmatmul.msk.bf16.vlgmr.msra.gmra.mxu0 %vm311_vm1, %v302_v3 }
  0x15   : > { %v334_v5 = vunpack.c.l.b16 %v329_v4  ;;  %v376_v15 = vld [vmem:[%s285_s8] sm:$0x7] }
  0x16   : > { %v301_v12 = vld [vmem:[#allocation2] sm:$0x3f]  ;;  %v377_v19 = vunpack.c.l.bf16 %v376_v15 }
  0x17   : > { %v335_v6 = vpack.c.b16 %v334_v5, %v334_v5 }
  0x19   : > { %v337_v7 = vshrl.u32 %v335_v6, 16  ;;  %v339_v8 = vshll.u32 %v335_v6, 16 }
  0x1b   : > { %v341_v9 = vrot.slane %v339_v8, 1 }
  0x1d   : > { %v342_v10 = vor.u32 %v341_v9, %v337_v7 }
  0x1f   : > { %529 = vmatmul.msk.bf16.vlgmr.msra.gmra.mxu1 %vm311_vm1, %v342_v10 }
  0x91   : > { %v324_v11 = vpop.f32.mrf.mxu0 }
  0x92   : > { %v328_v13 = vadd.f32 %v324_v11, %v301_v12 }
  0x99   : > { %v326_v14 = vpop.f32.mrf.mxu0 }
  0x9c   : > { %v361_v17 = vpop.f32.mrf.mxu1 }
  0x9d   : > { %v365_v18 = vadd.f32 %v361_v17, %v328_v13 }
  0x9f   : > { %367 = vst.msk [vmem:[#allocation2] sm:$0x3f] %vm299_vm0, %v365_v18  ;;  %v375_v20 = vadd.f32 %v575_v16, %v365_v18 }
  0xa1   : > { %v378_v21 = vadd.f32 %v377_v19, %v375_v20 }
  0xa3   : > { %v379_v22 = vmax.f32 %v378_v21, 0.0 }
  0xa4   : > { %v363_v23 = vpop.f32.mrf.mxu1 }
  0xa5   : > { %v380_v24 = vpack.c.bf16 %v379_v22, %v379_v22 }
  0xa7   : > { %382 = vst.msk [vmem:[%s293_s13] sm:$0x7] %vm381_vm2, %v380_v24 }
  0xa8 PF: > { %s14_s19 = sadd.s32 1, %s614_s19   ;;  %s717_s15 = smov %s606_s17 }
  0xa9   : > { %p11_p7 = scmp.ge.s32.totalorder %s14_s19, 6   ;;  %s718_s16 = smov %s610_s18 }
  0xaa   : > { %s719_s17 = smov %s722_s20  ;;  %s720_s18 = smov %s726_s21 }
  0xab   :  { %13 = sbr.rel (!%p11_p7) target bundleno = 3 (0x3), region = 81 }

// kernel: hourglass_forward.29
= control target key start
LH: loop header
LB: loop body
LE: loop exit
PB: predicated region body
PF: predicated region fallthrough
CT: control target
= control target key end

     0   :  { %s636_s15 = smov 0   ;;  %s638_s16 = smov 0   ;;  %s701_s0 = inlined_call_operand.vmem [shape: bf16[2,2,6,16], index: 0, kind: input, shape index: {}]   ;;  %s702_s1 = inlined_call_operand.vmem [shape: bf16[1,2,16,8], index: 1, kind: input, shape index: {}]   ;;  %s703_s2 = inlined_call_operand.vmem [shape: f32[1,8], index: 2, kind: input, shape index: {}]   ;;  %s704_s3 = inlined_call_operand.vmem [shape: bf16[2,2,4,8], index: 3, kind: input, shape index: {}]   ;;  %s705_s4 = inlined_call_operand.vmem [shape: bf16[2,2,4,8], index: 4, kind: output, shape index: {}]  }
   0x1   :  { %s640_s17 = smov 0   ;;  %s642_s18 = smov 0  }
   0x2   :  { %s644_s19 = smov 0  }
   0x3 LB: > { %s29_s20 = sadd.s32 1, %s600_s17  ;;  %s33_s21 = sadd.s32 1, %s604_s18  ;;  %s608_s19 = sphi %s644_s19, %s14_s19   ;;  %s604_s18 = sphi %s642_s18, %s709_s18   ;;  %s600_s17 = sphi %s640_s17, %s708_s17   ;;  %s596_s16 = sphi %s638_s16, %s707_s16   ;;  %s592_s15 = sphi %s636_s15, %s706_s15  }
   0x4   : > { %p31_p0 = scmp.ge.s32.totalorder %s29_s20, 2  ;;  %p505_p1 = scmp.ge.s32.totalorder %s608_s19, 1 }
   0x5   : > { %p217_p2 = scmp.lt.s32.totalorder %s608_s19, 5 }
   0x6   : > { %s711_s20 = smov (%p31_p0, %s29_s20), 0  ;;  %s713_s21 = smov (!%p31_p0, %s33_s21), %s604_s18 }
   0x7   : > { %p218_p3 = pnand %p505_p1, %p217_p2  ;;  %p35_p4 = scmp.ge.s32.totalorder %s713_s21, 2 }
   0x8   : > { %p264_p5 = scmp.lt.s32.totalorder (!%p218_p3), %s596_s16, 1  ;;  %p266_p6 = scmp.lt.s32.totalorder (!%p218_p3), %s592_s15, 1 }
   0x9   : > { %s715_s21 = smov (%p35_p4, %s713_s21), 0  ;;  %221 = sbr.rel (%p218_p3) target bundleno = 164 (0xa4), region = 36 }
   0xe   : > { %v526_v0 = vld [vmem:[%s702_s1] sm:$0xff]  ;;  %v527_v1 = vld [vmem:[%s702_s1 + $0x8] sm:$0xff]  ;;  %vm299_vm0 = vcmask 60416   ;;  %s717_s16 = smov (!%p264_p5, %s596_s16), 1  ;;  %v610_v2 = vmov 0.0   ;;  %s719_s15 = smov (!%p266_p6, %s592_s15), 1 }
   0xf   : > { %322 = vmatpush.bf16.msra.mxu0 %v526_v0  ;;  %353 = vmatpush.bf16.msra.mxu1 %v527_v1  ;;  %300 = vst.msk [vmem:[#allocation2] sm:$0xf] %vm299_vm0, %v610_v2  ;;  %s506_s26 = sshll.u32 %s717_s16, 1  ;;  %vm311_vm1 = vcmask 130048   ;;  %v569_v12 = vld [vmem:[%s703_s2] ss:$0 sm:$0xff] }
  0x10   : > { %s269_s27 = sadd.s32 %s506_s26, %s719_s15  ;;  %vm375_vm2 = vcmask 58368  }
  0x11   : > { %s507_s28 = sshll.u32 %s269_s27, 2  ;;  %s509_s6 = sshll.u32 %s269_s27, 1 }
  0x12   : > { %s271_s5 = scalar_lea.vmem %s701_s0, %s507_s28  ;;  %s285_s9 = scalar_lea.vmem %s704_s3, %s509_s6 }
  0x13   : > { %v302_v3 = vld [vmem:[%s271_s5] sm:$0x3]  ;;  %s293_s14 = scalar_lea.vmem %s705_s4, %s509_s6 }
  0x14   : > { %v329_v4 = vld [vmem:[%s271_s5] sm:$0x6]  ;;  %516 = vmatmul.msk.bf16.vlgmr.msra.gmra.mxu0 %vm311_vm1, %v302_v3 }
  0x15   : > { %v334_v5 = vunpack.c.l.b16 %v329_v4  ;;  %v370_v11 = vld [vmem:[%s285_s9] sm:$0x3] }
  0x16   : > { %v301_v8 = vld [vmem:[#allocation2] sm:$0xf]  ;;  %v371_v15 = vunpack.c.l.bf16 %v370_v11 }
  0x17   : > { %v335_v6 = vpack.c.b16 %v334_v5, %v334_v5 }
  0x19   : > { %v336_v7 = vrot.slane %v335_v6, 1 }
  0x1b   : > { %523 = vmatmul.msk.bf16.vlgmr.msra.gmra.mxu1 %vm311_vm1, %v336_v7 }
  0x91   : > { %v324_v9 = vpop.f32.mrf.mxu0 }
  0x92   : > { %v328_v10 = vadd.f32 %v324_v9, %v301_v8 }
  0x98   : > { %v355_v13 = vpop.f32.mrf.mxu1 }
  0x99   : > { %v359_v14 = vadd.f32 %v355_v13, %v328_v10  ;;  %v326_v16 = vpop.f32.mrf.mxu0 }
  0x9b   : > { %361 = vst.msk [vmem:[#allocation2] sm:$0xf] %vm299_vm0, %v359_v14  ;;  %v369_v17 = vadd.f32 %v569_v12, %v359_v14 }
  0x9d   : > { %v372_v18 = vadd.f32 %v371_v15, %v369_v17 }
  0x9f   : > { %v373_v19 = vmax.f32 %v372_v18, 0.0 }
  0xa0   : > { %v357_v20 = vpop.f32.mrf.mxu1 }
  0xa1   : > { %v374_v21 = vpack.c.bf16 %v373_v19, %v373_v19 }
  0xa3   : > { %376 = vst.msk [vmem:[%s293_s14] sm:$0x3] %vm375_vm2, %v374_v21 }
  0xa4 PF: > { %s14_s19 = sadd.s32 1, %s608_s19   ;;  %s706_s15 = smov %s600_s17 }
  0xa5   : > { %p11_p7 = scmp.ge.s32.totalorder %s14_s19, 6   ;;  %s707_s16 = smov %s604_s18 }
  0xa6   : > { %s708_s17 = smov %s711_s20  ;;  %s709_s18 = smov %s715_s21 }
  0xa7   :  { %13 = sbr.rel (!%p11_p7) target bundleno = 3 (0x3), region = 81 }

// kernel: hourglass_forward.31
= control target key start
LH: loop header
LB: loop body
LE: loop exit
PB: predicated region body
PF: predicated region fallthrough
CT: control target
= control target key end

     0   :  { %s633_s15 = smov 0   ;;  %s635_s16 = smov 0   ;;  %s723_s0 = inlined_call_operand.vmem [shape: bf16[2,3,4,16], index: 0, kind: input, shape index: {}]   ;;  %s724_s1 = inlined_call_operand.vmem [shape: bf16[2,1,16,8], index: 1, kind: input, shape index: {}]   ;;  %s725_s2 = inlined_call_operand.vmem [shape: f32[1,8], index: 2, kind: input, shape index: {}]   ;;  %s726_s3 = inlined_call_operand.vmem [shape: bf16[2,2,4,8], index: 3, kind: input, shape index: {}]   ;;  %s727_s4 = inlined_call_operand.vmem [shape: bf16[2,2,4,8], index: 4, kind: output, shape index: {}]  }
   0x1   :  { %s637_s17 = smov 0   ;;  %s639_s18 = smov 0  }
   0x2   :  { %s641_s19 = smov 0   ;;  %s643_s20 = smov 0  }
   0x3   :  { %s645_s21 = smov 0  }
   0x4 LB: > { %s26_s22 = sadd.s32 1, %s593_s18  ;;  %s29_s23 = sadd.s32 1, %s597_s19  ;;  %s605_s21 = sphi %s645_s21, %s14_s21   ;;  %s601_s20 = sphi %s643_s20, %s739_s20   ;;  %s597_s19 = sphi %s641_s19, %s738_s19   ;;  %s593_s18 = sphi %s639_s18, %s737_s18   ;;  %s589_s17 = sphi %s637_s17, %s736_s17   ;;  %s585_s16 = sphi %s635_s16, %s735_s16   ;;  %s581_s15 = sphi %s633_s15, %s734_s15  }
   0x5   : > { %p27_p0 = scmp.ge.s32.totalorder %s26_s22, 2  ;;  %p473_p1 = scmp.ge.s32.totalorder %s605_s21, 1 }
   0x6   : > { %p217_p2 = scmp.lt.s32.totalorder %s605_s21, 9  ;;  %s33_s24 = sadd.s32 1, %s601_s20 }
   0x7   : > { %s741_s22 = smov (%p27_p0, %s26_s22), 0  ;;  %s743_s23 = smov (!%p27_p0, %s29_s23), %s597_s19 }
   0x8   : > { %728 = sst [smem:[#allocation3_spill]] %s741_s22  ;;  %p218_p3 = pnand %p473_p1, %p217_p2 }
   0x9   : > { %p31_p4 = scmp.ge.s32.totalorder %s743_s23, 2  ;;  %s263_s25 = sadd.s32 (!%p218_p3), %s581_s15, %s585_s16 }
   0xa   : > { %p264_p6 = scmp.lt.s32.totalorder (!%p218_p3), %s589_s17, 1  ;;  %p266_p7 = scmp.lt.s32.totalorder (!%p218_p3), %s263_s25, 2 }
   0xb   : > { %s745_s23 = smov (%p31_p4, %s743_s23), 0  ;;  %s747_s24 = smov (!%p31_p4, %s33_s24), %s601_s20 }
   0xc   : > { %729 = sst [smem:[#allocation4_spill]] %s745_s23  ;;  %p35_p5 = scmp.ge.s32.totalorder %s747_s24, 2 }
   0xd   : > { %221 = sbr.rel (%p218_p3) target bundleno = 180 (0xb4), region = 36  ;;  %p273_p8 = scmp.lt.s32.totalorder (!%p218_p3), %s581_s15, 1 }
   0xe   : > { %s749_s24 = smov (%p35_p5, %s747_s24), 0  ;;  %p280_p9 = scmp.lt.s32.totalorder (!%p218_p3), %s585_s16, 1 }
   0xf   : > { %730 = sst [smem:[#allocation5_spill]] %s749_s24  ;;  %p481_p10 = scmp.ne.s32.totalorder (!%p218_p3), %s581_s15, 0 }
  0x12   : > { %s751_s17 = smov (!%p264_p6, %s589_s17), 1  ;;  %s753_s25 = smov (!%p266_p7, %s263_s25), 2 }
  0x13   : > { %s492_s26 = smul.u32 3, %s751_s17  ;;  %s477_s29 = sshll.u32 %s751_s17, 1 }
  0x14   : > { %s274_s27 = scalar_select %p273_p8, %s581_s15, 1 }
  0x15   : > { %s269_s28 = sadd.s32 %s492_s26, %s753_s25  ;;  %s755_s16 = smov (!%p280_p9, %s585_s16), 1 }
  0x16   : > { %s474_s30 = sshll.u32 %s269_s28, 1  ;;  %s490_s5 = sshll.u32 %s274_s27, 3 }
  0x17   : > { %s271_s8 = scalar_lea.vmem %s723_s0, %s474_s30  ;;  %s277_s11 = scalar_lea.vmem %s724_s1, %s490_s5 }
  0x18   : > { %s283_s12 = sadd.s32 %s477_s29, %s755_s16  ;;  %298 = sbr.rel (%p481_p10) target bundleno = 31 (0x1f), region = 40 }
  0x19   : > { %s478_s13 = sshll.u32 %s283_s12, 1 }
  0x1a   : > { %s285_s23 = scalar_lea.vmem %s726_s3, %s478_s13  ;;  %s293_s17 = scalar_lea.vmem %s727_s4, %s478_s13 }
  0x1d   : > { %vm299_vm0 = vcmask 60416   ;;  %v607_v0 = vmov 0.0  }
  0x1e   : > { %300 = vst.msk [vmem:[#allocation2] sm:$0xf] %vm299_vm0, %v607_v0 }
  0x1f PF: > { %v491_v1 = vld [vmem:[%s277_s11] sm:$0xff]  ;;  %vm311_vm1 = vcmask 130048   ;;  %vm329_vm2 = vcmask 60416   ;;  %p487_p11 = scmp.ne.s32.totalorder %s581_s15, 1 }
  0x20   : > { %322 = vmatpush.bf16.msra.mxu0 %v491_v1  ;;  %v302_v2 = vld [vmem:[%s271_s8] sm:$0x3] }
  0x23   : > { %486 = vmatmul.msk.bf16.vlgmr.msra.gmra.mxu0 %vm311_vm1, %v302_v2 }
  0x25   : > { %v301_v3 = vld [vmem:[#allocation2] sm:$0xf] }
  0xa0   : > { %v324_v4 = vpop.f32.mrf.mxu0 }
  0xa1   : > { %v328_v5 = vadd.f32 %v324_v4, %v301_v3 }
  0xa3   : > { %330 = vst.msk [vmem:[#allocation2] sm:$0xf] %vm329_vm2, %v328_v5 }
  0xa4   : > { %334 = sbr.rel (%p487_p11) target bundleno = 180 (0xb4), region = 44 }
  0xa8   : > { %v326_v6 = vpop.f32.mrf.mxu0 }
  0xa9   : > { %v550_v7 = vld [vmem:[%s725_s2] ss:$0 sm:$0xff]  ;;  %vm345_vm3 = vcmask 58368  }
  0xaa   : > { %v340_v8 = vld [vmem:[%s285_s23] sm:$0x3]  ;;  %v339_v10 = vadd.f32 %v550_v7, %v328_v5 }
  0xab   : > { %v341_v9 = vunpack.c.l.bf16 %v340_v8 }
  0xad   : > { %v342_v11 = vadd.f32 %v341_v9, %v339_v10 }
  0xaf   : > { %v343_v12 = vmax.f32 %v342_v11, 0.0 }
  0xb1   : > { %v344_v13 = vpack.c.bf16 %v343_v12, %v343_v12 }
  0xb3   : > { %346 = vst.msk [vmem:[%s293_s17] sm:$0x3] %vm345_vm3, %v344_v13 }
  0xb4 PF: > { %s14_s21 = sadd.s32 1, %s605_s21   ;;  %s731_s24 = sld [smem:[#allocation3_spill]] }
  0xb5   : > { %p11_p12 = scmp.ge.s32.totalorder %s14_s21, 10   ;;  %s732_s26 = sld [smem:[#allocation4_spill]] }
  0xb6   : > { %s733_s27 = sld [smem:[#allocation5_spill]]  ;;  %s734_s15 = smov %s593_s18 }
  0xb7   : > { %s735_s16 = smov %s597_s19  ;;  %s736_s17 = smov %s601_s20 }
  0xb8   :  { %13 = sbr.rel (!%p11_p12) target bundleno = 4 (0x4), region = 80 }
  0xba   : > { %s737_s18 = smov %s731_s24 }
  0xbb   : > { %s738_s19 = smov %s732_s26 }
  0xbc   : > { %s739_s20 = smov %s733_s27 }

// kernel: hourglass_forward.30
= control target key start
LH: loop header
LB: loop body
LE: loop exit
PB: predicated region body
PF: predicated region fallthrough
CT: control target
= control target key end

     0   :  { %s737_s15 = smov 0   ;;  %s739_s16 = smov 0   ;;  %s820_s0 = inlined_call_operand.vmem [shape: bf16[2,2,10,16], index: 0, kind: input, shape index: {}]   ;;  %s821_s1 = inlined_call_operand.vmem [shape: bf16[1,4,16,8], index: 1, kind: input, shape index: {}]   ;;  %s822_s2 = inlined_call_operand.vmem [shape: f32[1,8], index: 2, kind: input, shape index: {}]   ;;  %s823_s3 = inlined_call_operand.vmem [shape: bf16[2,2,6,8], index: 3, kind: input, shape index: {}]   ;;  %s824_s4 = inlined_call_operand.vmem [shape: bf16[2,2,6,8], index: 4, kind: output, shape index: {}]  }
   0x1   :  { %s741_s17 = smov 0   ;;  %s743_s18 = smov 0  }
   0x2   :  { %s745_s19 = smov 0  }
   0x3 LB: > { %s29_s20 = sadd.s32 1, %s701_s17  ;;  %s33_s21 = sadd.s32 1, %s705_s18  ;;  %s709_s19 = sphi %s745_s19, %s14_s19   ;;  %s705_s18 = sphi %s743_s18, %s828_s18   ;;  %s701_s17 = sphi %s741_s17, %s827_s17   ;;  %s697_s16 = sphi %s739_s16, %s826_s16   ;;  %s693_s15 = sphi %s737_s15, %s825_s15  }
   0x4   : > { %p31_p0 = scmp.ge.s32.totalorder %s29_s20, 2  ;;  %p589_p1 = scmp.ge.s32.totalorder %s709_s19, 1 }
   0x5   : > { %p218_p2 = scmp.lt.s32.totalorder %s709_s19, 5 }
   0x6   : > { %s830_s20 = smov (%p31_p0, %s29_s20), 0  ;;  %s832_s21 = smov (!%p31_p0, %s33_s21), %s705_s18 }
   0x7   : > { %p219_p3 = pnand %p589_p1, %p218_p2  ;;  %p35_p4 = scmp.ge.s32.totalorder %s832_s21, 2 }
   0x8   : > { %p266_p5 = scmp.lt.s32.totalorder (!%p219_p3), %s697_s16, 1  ;;  %p268_p6 = scmp.lt.s32.totalorder (!%p219_p3), %s693_s15, 1 }
   0x9   : > { %s834_s21 = smov (%p35_p4, %s832_s21), 0  ;;  %222 = sbr.rel (%p219_p3) target bundleno = 179 (0xb3), region = 36 }
   0xe   : > { %v625_v0 = vld [vmem:[%s821_s1] sm:$0xff]  ;;  %v628_v1 = vld [vmem:[%s821_s1 + $0x18] sm:$0xff]  ;;  %v626_v2 = vld [vmem:[%s821_s1 + $0x8] sm:$0xff]  ;;  %vm302_vm0 = vcmask 62464   ;;  %s836_s16 = smov (!%p266_p5, %s697_s16), 1  ;;  %v711_v4 = vmov 0.0  }
   0xf   : > { %v627_v3 = vld [vmem:[%s821_s1 + $0x10] sm:$0xff]  ;;  %325 = vmatpush.bf16.msra.mxu0 %v625_v0  ;;  %434 = vmatpush.bf16.msra.mxu3 %v628_v1  ;;  %303 = vst.msk [vmem:[#allocation2] sm:$0x3f] %vm302_vm0, %v711_v4  ;;  %s838_s15 = smov (!%p268_p6, %s693_s15), 1  ;;  %s591_s30 = sshll.u32 %s836_s16, 2  ;;  %vm314_vm1 = vcmask 130048  }
  0x10   : > { %362 = vmatpush.bf16.msra.mxu1 %v626_v2  ;;  %403 = vmatpush.bf16.msra.mxu2 %v627_v3  ;;  %s590_s5 = sshll.u32 %s838_s15, 1  ;;  %s593_s11 = sshll.u32 %s836_s16, 1  ;;  %v670_v37 = vld [vmem:[%s822_s2] ss:$0 sm:$0xff]  ;;  %vm456_vm2 = vcmask 59392  }
  0x11   : > { %s272_s6 = sadd.s32 %s591_s30, %s590_s5  ;;  %s286_s12 = sadd.s32 %s593_s11, %s838_s15 }
  0x12   : > { %s592_s7 = sshll.u32 %s272_s6, 2  ;;  %s594_s13 = sshll.u32 %s286_s12, 2 }
  0x13   : > { %s274_s10 = scalar_lea.vmem %s820_s0, %s592_s7  ;;  %s288_s23 = scalar_lea.vmem %s823_s3, %s594_s13 }
  0x14   : > { %v305_v5 = vld [vmem:[%s274_s10] sm:$0x7]  ;;  %v370_v6 = vld [vmem:[%s274_s10 + $0x4] sm:$0x1]  ;;  %s296_s26 = scalar_lea.vmem %s824_s4, %s594_s13 }
  0x15   : > { %v410_v7 = vld [vmem:[%s274_s10] sm:$0xc]  ;;  %601 = vmatmul.msk.bf16.vlgmr.msra.gmra.mxu0 %vm314_vm1, %v305_v5  ;;  %v377_v8 = vunpack.c.l.b16 %v370_v6 }
  0x16   : > { %v415_v9 = vunpack.c.l.b16 %v410_v7  ;;  %v332_v10 = vld [vmem:[%s274_s10] sm:$0xf] }
  0x17   : > { %v369_v11 = vld [vmem:[%s274_s10] sm:$0xe]  ;;  %v337_v12 = vunpack.c.l.b16 %v332_v10 }
  0x18   : > { %v376_v13 = vunpack.c.l.b16 %v369_v11  ;;  %v416_v14 = vpack.c.b16 %v377_v8, %v415_v9  ;;  %v304_v28 = vld [vmem:[#allocation2] sm:$0x3f] }
  0x19   : > { %v338_v15 = vpack.c.b16 %v337_v12, %v337_v12  ;;  %v451_v35 = vld [vmem:[%s288_s23] sm:$0x7] }
  0x1a   : > { %v378_v16 = vpack.c.b16 %v377_v8, %v376_v13  ;;  %v417_v17 = vrot.slane %v416_v14, 2  ;;  %v452_v40 = vunpack.c.l.bf16 %v451_v35 }
  0x1b   : > { %v340_v18 = vshrl.u32 %v338_v15, 16  ;;  %v342_v19 = vshll.u32 %v338_v15, 16 }
  0x1c   : > { %v380_v20 = vshrl.u32 %v378_v16, 16  ;;  %v383_v21 = vshll.u32 %v378_v16, 16  ;;  %622 = vmatmul.msk.bf16.vlgmr.msra.gmra.mxu3 %vm314_vm1, %v417_v17 }
  0x1d   : > { %v344_v22 = vrot.slane %v342_v19, 1 }
  0x1e   : > { %v382_v23 = vrot.slane %v380_v20, 1  ;;  %v385_v24 = vrot.slane %v383_v21, 2 }
  0x1f   : > { %v345_v25 = vor.u32 %v344_v22, %v340_v18 }
  0x20   : > { %v386_v26 = vor.u32 %v385_v24, %v382_v23 }
  0x21   : > { %608 = vmatmul.msk.bf16.vlgmr.msra.gmra.mxu1 %vm314_vm1, %v345_v25 }
  0x22   : > { %615 = vmatmul.msk.bf16.vlgmr.msra.gmra.mxu2 %vm314_vm1, %v386_v26 }
  0x92   : > { %v327_v27 = vpop.f32.mrf.mxu0 }
  0x93   : > { %v331_v30 = vadd.f32 %v327_v27, %v304_v28 }
  0x9a   : > { %v329_v29 = vpop.f32.mrf.mxu0 }
  0x9e   : > { %v364_v31 = vpop.f32.mrf.mxu1 }
  0x9f   : > { %v436_v32 = vpop.f32.mrf.mxu3  ;;  %v368_v33 = vadd.f32 %v364_v31, %v331_v30 }
  0xa5   : > { %v405_v34 = vpop.f32.mrf.mxu2 }
  0xa6   : > { %v409_v36 = vadd.f32 %v405_v34, %v368_v33  ;;  %v366_v38 = vpop.f32.mrf.mxu1 }
  0xa7   : > { %v438_v41 = vpop.f32.mrf.mxu3 }
  0xa8   : > { %v440_v39 = vadd.f32 %v436_v32, %v409_v36 }
  0xaa   : > { %442 = vst.msk [vmem:[#allocation2] sm:$0x3f] %vm302_vm0, %v440_v39  ;;  %v450_v42 = vadd.f32 %v670_v37, %v440_v39 }
  0xac   : > { %v453_v43 = vadd.f32 %v452_v40, %v450_v42 }
  0xad   : > { %v407_v44 = vpop.f32.mrf.mxu2 }
  0xae   : > { %v454_v45 = vmax.f32 %v453_v43, 0.0 }
  0xb0   : > { %v455_v46 = vpack.c.bf16 %v454_v45, %v454_v45 }
  0xb2   : > { %457 = vst.msk [vmem:[%s296_s26] sm:$0x7] %vm456_vm2, %v455_v46 }
  0xb3 PF: > { %s14_s19 = sadd.s32 1, %s709_s19   ;;  %s825_s15 = smov %s701_s17 }
  0xb4   : > { %p11_p7 = scmp.ge.s32.totalorder %s14_s19, 6   ;;  %s826_s16 = smov %s705_s18 }
  0xb5   : > { %s827_s17 = smov %s830_s20  ;;  %s828_s18 = smov %s834_s21 }
  0xb6   :  { %13 = sbr.rel (!%p11_p7) target bundleno = 3 (0x3), region = 83 }

// kernel: hourglass_forward.32
= control target key start
LH: loop header
LB: loop body
LE: loop exit
PB: predicated region body
PF: predicated region fallthrough
CT: control target
= control target key end

     0   :  { %s678_s15 = smov 0   ;;  %s680_s16 = smov 0   ;;  %s774_s0 = inlined_call_operand.vmem [shape: bf16[2,3,7,16], index: 0, kind: input, shape index: {}]   ;;  %s775_s1 = inlined_call_operand.vmem [shape: bf16[2,2,16,8], index: 1, kind: input, shape index: {}]   ;;  %s776_s2 = inlined_call_operand.vmem [shape: f32[1,8], index: 2, kind: input, shape index: {}]   ;;  %s777_s3 = inlined_call_operand.vmem [shape: bf16[2,2,6,8], index: 3, kind: input, shape index: {}]   ;;  %s778_s4 = inlined_call_operand.vmem [shape: bf16[2,2,6,8], index: 4, kind: output, shape index: {}]  }
   0x1   :  { %s682_s17 = smov 0   ;;  %s684_s18 = smov 0  }
   0x2   :  { %s686_s19 = smov 0   ;;  %s688_s20 = smov 0  }
   0x3   :  { %s690_s21 = smov 0  }
   0x4 LB: > { %s26_s22 = sadd.s32 1, %s638_s18  ;;  %s29_s23 = sadd.s32 1, %s642_s19  ;;  %s650_s21 = sphi %s690_s21, %s14_s21   ;;  %s646_s20 = sphi %s688_s20, %s788_s20   ;;  %s642_s19 = sphi %s686_s19, %s787_s19   ;;  %s638_s18 = sphi %s684_s18, %s786_s18   ;;  %s634_s17 = sphi %s682_s17, %s785_s17   ;;  %s630_s16 = sphi %s680_s16, %s784_s16   ;;  %s626_s15 = sphi %s678_s15, %s783_s15  }
   0x5   : > { %p27_p0 = scmp.ge.s32.totalorder %s26_s22, 2  ;;  %p510_p1 = scmp.ge.s32.totalorder %s650_s21, 1 }
   0x6   : > { %p217_p2 = scmp.lt.s32.totalorder %s650_s21, 9  ;;  %s33_s24 = sadd.s32 1, %s646_s20 }
   0x7   : > { %s790_s22 = smov (%p27_p0, %s26_s22), 0  ;;  %s792_s23 = smov (!%p27_p0, %s29_s23), %s642_s19 }
   0x8   : > { %p218_p3 = pnand %p510_p1, %p217_p2  ;;  %p31_p4 = scmp.ge.s32.totalorder %s792_s23, 2 }
   0x9   : > { %s263_s25 = sadd.s32 (!%p218_p3), %s626_s15, %s630_s16  ;;  %p264_p6 = scmp.lt.s32.totalorder (!%p218_p3), %s634_s17, 1 }
   0xa   : > { %s794_s23 = smov (%p31_p4, %s792_s23), 0  ;;  %s796_s24 = smov (!%p31_p4, %s33_s24), %s646_s20 }
   0xb   : > { %779 = sst [smem:[#allocation3_spill]] %s794_s23  ;;  %p35_p5 = scmp.ge.s32.totalorder %s796_s24, 2 }
   0xc   : > { %221 = sbr.rel (%p218_p3) target bundleno = 187 (0xbb), region = 36  ;;  %p266_p7 = scmp.lt.s32.totalorder (!%p218_p3), %s263_s25, 2 }
   0xd   : > { %s798_s24 = smov (%p35_p5, %s796_s24), 0  ;;  %p273_p8 = scmp.lt.s32.totalorder (!%p218_p3), %s626_s15, 1 }
   0xe   : > { %780 = sst [smem:[#allocation4_spill]] %s798_s24  ;;  %p280_p9 = scmp.lt.s32.totalorder (!%p218_p3), %s630_s16, 1 }
   0xf   : > { %p518_p10 = scmp.ne.s32.totalorder (!%p218_p3), %s626_s15, 0 }
  0x11   : > { %s800_s17 = smov (!%p264_p6, %s634_s17), 1  ;;  %s802_s25 = smov (!%p266_p7, %s263_s25), 2 }
  0x12   : > { %s537_s26 = smul.u32 3, %s800_s17  ;;  %s514_s29 = sshll.u32 %s800_s17, 1 }
  0x13   : > { %s274_s27 = scalar_select %p273_p8, %s626_s15, 1 }
  0x14   : > { %s269_s28 = sadd.s32 %s537_s26, %s802_s25  ;;  %s804_s16 = smov (!%p280_p9, %s630_s16), 1 }
  0x15   : > { %s511_s30 = sshll.u32 %s269_s28, 2  ;;  %s534_s5 = sshll.u32 %s274_s27, 4 }
  0x16   : > { %s271_s8 = scalar_lea.vmem %s774_s0, %s511_s30  ;;  %s277_s11 = scalar_lea.vmem %s775_s1, %s534_s5 }
  0x17   : > { %s283_s12 = sadd.s32 %s514_s29, %s804_s16  ;;  %298 = sbr.rel (%p518_p10) target bundleno = 30 (0x1e), region = 40 }
  0x18   : > { %s515_s13 = sshll.u32 %s283_s12, 2 }
  0x19   : > { %s739_s23 = scalar_lea.vmem %s777_s3, %s515_s13  ;;  %s744_s26 = scalar_lea.vmem %s778_s4, %s515_s13 }
  0x1c   : > { %vm299_vm0 = vcmask 62464   ;;  %v652_v0 = vmov 0.0  }
  0x1d   : > { %300 = vst.msk [vmem:[#allocation2] sm:$0x3f] %vm299_vm0, %v652_v0 }
  0x1e PF: > { %v535_v1 = vld [vmem:[%s277_s11] sm:$0xff]  ;;  %v536_v2 = vld [vmem:[%s277_s11 + $0x8] sm:$0xff]  ;;  %vm311_vm1 = vcmask 130048   ;;  %vm366_vm2 = vcmask 62464   ;;  %p531_p11 = scmp.ne.s32.totalorder %s626_s15, 1 }
  0x1f   : > { %v329_v3 = vld [vmem:[%s271_s8] sm:$0xf]  ;;  %322 = vmatpush.bf16.msra.mxu0 %v535_v1  ;;  %359 = vmatpush.bf16.msra.mxu1 %v536_v2 }
  0x20   : > { %v302_v4 = vld [vmem:[%s271_s8] sm:$0x7]  ;;  %v334_v5 = vunpack.c.l.b16 %v329_v3 }
  0x22   : > { %v335_v6 = vpack.c.b16 %v334_v5, %v334_v5  ;;  %523 = vmatmul.msk.bf16.vlgmr.msra.gmra.mxu0 %vm311_vm1, %v302_v4 }
  0x24   : > { %v337_v7 = vshrl.u32 %v335_v6, 16  ;;  %v339_v8 = vshll.u32 %v335_v6, 16  ;;  %v301_v12 = vld [vmem:[#allocation2] sm:$0x3f] }
  0x26   : > { %v341_v9 = vrot.slane %v339_v8, 1 }
  0x28   : > { %v342_v10 = vor.u32 %v341_v9, %v337_v7 }
  0x2a   : > { %530 = vmatmul.msk.bf16.vlgmr.msra.gmra.mxu1 %vm311_vm1, %v342_v10 }
  0x9f   : > { %v324_v11 = vpop.f32.mrf.mxu0 }
  0xa0   : > { %v328_v13 = vadd.f32 %v324_v11, %v301_v12 }
  0xa7   : > { %v361_v14 = vpop.f32.mrf.mxu1  ;;  %v326_v16 = vpop.f32.mrf.mxu0 }
  0xa8   : > { %v365_v15 = vadd.f32 %v361_v14, %v328_v13 }
  0xaa   : > { %367 = vst.msk [vmem:[#allocation2] sm:$0x3f] %vm366_vm2, %v365_v15 }
  0xab   : > { %371 = sbr.rel (%p531_p11) target bundleno = 187 (0xbb), region = 44 }
  0xaf   : > { %v363_v17 = vpop.f32.mrf.mxu1 }
  0xb0   : > { %v595_v18 = vld [vmem:[%s776_s2] ss:$0 sm:$0xff]  ;;  %vm382_vm3 = vcmask 59392  }
  0xb1   : > { %v377_v19 = vld [vmem:[%s739_s23] sm:$0x7]  ;;  %v376_v21 = vadd.f32 %v595_v18, %v365_v15 }
  0xb2   : > { %v378_v20 = vunpack.c.l.bf16 %v377_v19 }
  0xb4   : > { %v379_v22 = vadd.f32 %v378_v20, %v376_v21 }
  0xb6   : > { %v380_v23 = vmax.f32 %v379_v22, 0.0 }
  0xb8   : > { %v381_v24 = vpack.c.bf16 %v380_v23, %v380_v23 }
  0xba   : > { %383 = vst.msk [vmem:[%s744_s26] sm:$0x7] %vm382_vm3, %v381_v24 }
  0xbb PF: > { %s14_s21 = sadd.s32 1, %s650_s21   ;;  %s781_s27 = sld [smem:[#allocation3_spill]] }
  0xbc   : > { %p11_p12 = scmp.ge.s32.totalorder %s14_s21, 10   ;;  %s782_s28 = sld [smem:[#allocation4_spill]] }
  0xbd   : > { %s783_s15 = smov %s638_s18  ;;  %s784_s16 = smov %s642_s19 }
  0xbe   : > { %s785_s17 = smov %s646_s20  ;;  %s786_s18 = smov %s790_s22 }
  0xbf   :  { %13 = sbr.rel (!%p11_p12) target bundleno = 4 (0x4), region = 81 }
  0xc1   : > { %s787_s19 = smov %s781_s27 }
  0xc2   : > { %s788_s20 = smov %s782_s28 }

// kernel: hourglass_forward.33
= control target key start
LH: loop header
LB: loop body
LE: loop exit
PB: predicated region body
PF: predicated region fallthrough
CT: control target
= control target key end

     0   :  { %s672_s15 = smov 0   ;;  %s674_s16 = smov 0   ;;  %s768_s0 = inlined_call_operand.vmem [shape: bf16[2,3,6,16], index: 0, kind: input, shape index: {}]   ;;  %s769_s1 = inlined_call_operand.vmem [shape: bf16[2,2,16,8], index: 1, kind: input, shape index: {}]   ;;  %s770_s2 = inlined_call_operand.vmem [shape: f32[1,8], index: 2, kind: input, shape index: {}]   ;;  %s771_s3 = inlined_call_operand.vmem [shape: bf16[2,2,4,8], index: 3, kind: input, shape index: {}]   ;;  %s772_s4 = inlined_call_operand.vmem [shape: bf16[2,2,4,8], index: 4, kind: output, shape index: {}]  }
   0x1   :  { %s676_s17 = smov 0   ;;  %s678_s18 = smov 0  }
   0x2   :  { %s680_s19 = smov 0   ;;  %s682_s20 = smov 0  }
   0x3   :  { %s684_s21 = smov 0  }
   0x4 LB: > { %s26_s22 = sadd.s32 1, %s632_s18  ;;  %s29_s23 = sadd.s32 1, %s636_s19  ;;  %s644_s21 = sphi %s684_s21, %s14_s21   ;;  %s640_s20 = sphi %s682_s20, %s782_s20   ;;  %s636_s19 = sphi %s680_s19, %s781_s19   ;;  %s632_s18 = sphi %s678_s18, %s780_s18   ;;  %s628_s17 = sphi %s676_s17, %s779_s17   ;;  %s624_s16 = sphi %s674_s16, %s778_s16   ;;  %s620_s15 = sphi %s672_s15, %s777_s15  }
   0x5   : > { %p27_p0 = scmp.ge.s32.totalorder %s26_s22, 2  ;;  %p504_p1 = scmp.ge.s32.totalorder %s644_s21, 1 }
   0x6   : > { %p217_p2 = scmp.lt.s32.totalorder %s644_s21, 9  ;;  %s33_s24 = sadd.s32 1, %s640_s20 }
   0x7   : > { %s784_s22 = smov (%p27_p0, %s26_s22), 0  ;;  %s786_s23 = smov (!%p27_p0, %s29_s23), %s636_s19 }
   0x8   : > { %p218_p3 = pnand %p504_p1, %p217_p2  ;;  %p31_p4 = scmp.ge.s32.totalorder %s786_s23, 2 }
   0x9   : > { %s263_s25 = sadd.s32 (!%p218_p3), %s620_s15, %s624_s16  ;;  %p264_p6 = scmp.lt.s32.totalorder (!%p218_p3), %s628_s17, 1 }
   0xa   : > { %s788_s23 = smov (%p31_p4, %s786_s23), 0  ;;  %s790_s24 = smov (!%p31_p4, %s33_s24), %s640_s20 }
   0xb   : > { %773 = sst [smem:[#allocation3_spill]] %s788_s23  ;;  %p35_p5 = scmp.ge.s32.totalorder %s790_s24, 2 }
   0xc   : > { %221 = sbr.rel (%p218_p3) target bundleno = 183 (0xb7), region = 36  ;;  %p266_p7 = scmp.lt.s32.totalorder (!%p218_p3), %s263_s25, 2 }
   0xd   : > { %s792_s24 = smov (%p35_p5, %s790_s24), 0  ;;  %p273_p8 = scmp.lt.s32.totalorder (!%p218_p3), %s620_s15, 1 }
   0xe   : > { %774 = sst [smem:[#allocation4_spill]] %s792_s24  ;;  %p280_p9 = scmp.lt.s32.totalorder (!%p218_p3), %s624_s16, 1 }
   0xf   : > { %p512_p10 = scmp.ne.s32.totalorder (!%p218_p3), %s620_s15, 0 }
  0x11   : > { %s794_s17 = smov (!%p264_p6, %s628_s17), 1  ;;  %s796_s25 = smov (!%p266_p7, %s263_s25), 2 }
  0x12   : > { %s531_s26 = smul.u32 3, %s794_s17  ;;  %s508_s29 = sshll.u32 %s794_s17, 1 }
  0x13   : > { %s274_s27 = scalar_select %p273_p8, %s620_s15, 1 }
  0x14   : > { %s269_s28 = sadd.s32 %s531_s26, %s796_s25  ;;  %s798_s16 = smov (!%p280_p9, %s624_s16), 1 }
  0x15   : > { %s505_s30 = sshll.u32 %s269_s28, 2  ;;  %s528_s5 = sshll.u32 %s274_s27, 4 }
  0x16   : > { %s271_s8 = scalar_lea.vmem %s768_s0, %s505_s30  ;;  %s277_s11 = scalar_lea.vmem %s769_s1, %s528_s5 }
  0x17   : > { %s283_s12 = sadd.s32 %s508_s29, %s798_s16  ;;  %298 = sbr.rel (%p512_p10) target bundleno = 30 (0x1e), region = 40 }
  0x18   : > { %s509_s13 = sshll.u32 %s283_s12, 1 }
  0x19   : > { %s733_s23 = scalar_lea.vmem %s771_s3, %s509_s13  ;;  %s738_s26 = scalar_lea.vmem %s772_s4, %s509_s13 }
  0x1c   : > { %vm299_vm0 = vcmask 60416   ;;  %v646_v0 = vmov 0.0  }
  0x1d   : > { %300 = vst.msk [vmem:[#allocation2] sm:$0xf] %vm299_vm0, %v646_v0 }
  0x1e PF: > { %v529_v1 = vld [vmem:[%s277_s11] sm:$0xff]  ;;  %v530_v2 = vld [vmem:[%s277_s11 + $0x8] sm:$0xff]  ;;  %vm311_vm1 = vcmask 130048   ;;  %vm360_vm2 = vcmask 60416   ;;  %p525_p11 = scmp.ne.s32.totalorder %s620_s15, 1 }
  0x1f   : > { %v329_v3 = vld [vmem:[%s271_s8] sm:$0x6]  ;;  %322 = vmatpush.bf16.msra.mxu0 %v529_v1  ;;  %353 = vmatpush.bf16.msra.mxu1 %v530_v2 }
  0x20   : > { %v302_v4 = vld [vmem:[%s271_s8] sm:$0x3]  ;;  %v334_v5 = vunpack.c.l.b16 %v329_v3 }
  0x22   : > { %v335_v6 = vpack.c.b16 %v334_v5, %v334_v5  ;;  %517 = vmatmul.msk.bf16.vlgmr.msra.gmra.mxu0 %vm311_vm1, %v302_v4 }
  0x24   : > { %v336_v7 = vrot.slane %v335_v6, 1  ;;  %v301_v8 = vld [vmem:[#allocation2] sm:$0xf] }
  0x26   : > { %524 = vmatmul.msk.bf16.vlgmr.msra.gmra.mxu1 %vm311_vm1, %v336_v7 }
  0x9f   : > { %v324_v9 = vpop.f32.mrf.mxu0 }
  0xa0   : > { %v328_v10 = vadd.f32 %v324_v9, %v301_v8 }
  0xa3   : > { %v355_v11 = vpop.f32.mrf.mxu1 }
  0xa4   : > { %v359_v12 = vadd.f32 %v355_v11, %v328_v10 }
  0xa6   : > { %361 = vst.msk [vmem:[#allocation2] sm:$0xf] %vm360_vm2, %v359_v12 }
  0xa7   : > { %v326_v13 = vpop.f32.mrf.mxu0  ;;  %365 = sbr.rel (%p525_p11) target bundleno = 183 (0xb7), region = 44 }
  0xab   : > { %v357_v14 = vpop.f32.mrf.mxu1 }
  0xac   : > { %v589_v15 = vld [vmem:[%s770_s2] ss:$0 sm:$0xff]  ;;  %vm376_vm3 = vcmask 58368  }
  0xad   : > { %v371_v16 = vld [vmem:[%s733_s23] sm:$0x3]  ;;  %v370_v18 = vadd.f32 %v589_v15, %v359_v12 }
  0xae   : > { %v372_v17 = vunpack.c.l.bf16 %v371_v16 }
  0xb0   : > { %v373_v19 = vadd.f32 %v372_v17, %v370_v18 }
  0xb2   : > { %v374_v20 = vmax.f32 %v373_v19, 0.0 }
  0xb4   : > { %v375_v21 = vpack.c.bf16 %v374_v20, %v374_v20 }
  0xb6   : > { %377 = vst.msk [vmem:[%s738_s26] sm:$0x3] %vm376_vm3, %v375_v21 }
  0xb7 PF: > { %s14_s21 = sadd.s32 1, %s644_s21   ;;  %s775_s27 = sld [smem:[#allocation3_spill]] }
  0xb8   : > { %p11_p12 = scmp.ge.s32.totalorder %s14_s21, 10   ;;  %s776_s28 = sld [smem:[#allocation4_spill]] }
  0xb9   : > { %s777_s15 = smov %s632_s18  ;;  %s778_s16 = smov %s636_s19 }
  0xba   : > { %s779_s17 = smov %s640_s20  ;;  %s780_s18 = smov %s784_s22 }
  0xbb   :  { %13 = sbr.rel (!%p11_p12) target bundleno = 4 (0x4), region = 81 }
  0xbd   : > { %s781_s19 = smov %s775_s27 }
  0xbe   : > { %s782_s20 = smov %s776_s28 }

// kernel: hourglass_forward.34
= control target key start
LH: loop header
LB: loop body
LE: loop exit
PB: predicated region body
PF: predicated region fallthrough
CT: control target
= control target key end

     0   :  { %s773_s15 = smov 0   ;;  %s775_s16 = smov 0   ;;  %s873_s0 = inlined_call_operand.vmem [shape: bf16[2,3,10,16], index: 0, kind: input, shape index: {}]   ;;  %s874_s1 = inlined_call_operand.vmem [shape: bf16[2,4,16,8], index: 1, kind: input, shape index: {}]   ;;  %s875_s2 = inlined_call_operand.vmem [shape: f32[1,8], index: 2, kind: input, shape index: {}]   ;;  %s876_s3 = inlined_call_operand.vmem [shape: bf16[2,2,6,8], index: 3, kind: input, shape index: {}]   ;;  %s877_s4 = inlined_call_operand.vmem [shape: bf16[2,2,6,8], index: 4, kind: output, shape index: {}]  }
   0x1   :  { %s777_s17 = smov 0   ;;  %s779_s18 = smov 0  }
   0x2   :  { %s781_s19 = smov 0   ;;  %s783_s20 = smov 0  }
   0x3   :  { %s785_s21 = smov 0  }
   0x4 LB: > { %s26_s22 = sadd.s32 1, %s733_s18  ;;  %s29_s23 = sadd.s32 1, %s737_s19  ;;  %s745_s21 = sphi %s785_s21, %s14_s21   ;;  %s741_s20 = sphi %s783_s20, %s885_s20   ;;  %s737_s19 = sphi %s781_s19, %s884_s19   ;;  %s733_s18 = sphi %s779_s18, %s883_s18   ;;  %s729_s17 = sphi %s777_s17, %s882_s17   ;;  %s725_s16 = sphi %s775_s16, %s881_s16   ;;  %s721_s15 = sphi %s773_s15, %s880_s15  }
   0x5   : > { %p27_p0 = scmp.ge.s32.totalorder %s26_s22, 2  ;;  %p588_p1 = scmp.ge.s32.totalorder %s745_s21, 1 }
   0x6   : > { %p218_p2 = scmp.lt.s32.totalorder %s745_s21, 9  ;;  %s33_s24 = sadd.s32 1, %s741_s20 }
   0x7   : > { %s887_s22 = smov (%p27_p0, %s26_s22), 0  ;;  %s889_s23 = smov (!%p27_p0, %s29_s23), %s737_s19 }
   0x8   : > { %p219_p3 = pnand %p588_p1, %p218_p2  ;;  %p31_p4 = scmp.ge.s32.totalorder %s889_s23, 2 }
   0x9   : > { %s265_s25 = sadd.s32 (!%p219_p3), %s721_s15, %s725_s16  ;;  %p266_p6 = scmp.lt.s32.totalorder (!%p219_p3), %s729_s17, 1 }
   0xa   : > { %s891_s23 = smov (%p31_p4, %s889_s23), 0  ;;  %s893_s24 = smov (!%p31_p4, %s33_s24), %s741_s20 }
   0xb   : > { %p35_p5 = scmp.ge.s32.totalorder %s893_s24, 2  ;;  %222 = sbr.rel (%p219_p3) target bundleno = 196 (0xc4), region = 36 }
   0xc   : > { %p268_p7 = scmp.lt.s32.totalorder (!%p219_p3), %s265_s25, 2  ;;  %p276_p8 = scmp.lt.s32.totalorder (!%p219_p3), %s721_s15, 1 }
   0xd   : > { %s895_s24 = smov (%p35_p5, %s893_s24), 0  ;;  %p283_p9 = scmp.lt.s32.totalorder (!%p219_p3), %s725_s16, 1 }
   0xe   : > { %878 = sst [smem:[#allocation3_spill]] %s895_s24  ;;  %p597_p10 = scmp.ne.s32.totalorder (!%p219_p3), %s721_s15, 0 }
  0x10   : > { %s897_s17 = smov (!%p266_p6, %s729_s17), 1  ;;  %s899_s25 = smov (!%p268_p7, %s265_s25), 2 }
  0x11   : > { %s632_s26 = smul.u32 6, %s897_s17  ;;  %s589_s27 = sshll.u32 %s899_s25, 1 }
  0x12   : > { %s593_s7 = sshll.u32 %s897_s17, 1  ;;  %s901_s16 = smov (!%p283_p9, %s725_s16), 1 }
  0x13   : > { %s272_s28 = sadd.s32 %s632_s26, %s589_s27  ;;  %s286_s13 = sadd.s32 %s593_s7, %s901_s16 }
  0x14   : > { %s590_s29 = sshll.u32 %s272_s28, 2  ;;  %s594_s14 = sshll.u32 %s286_s13, 2 }
  0x15   : > { %s274_s6 = scalar_lea.vmem %s873_s0, %s590_s29  ;;  %s834_s26 = scalar_lea.vmem %s876_s3, %s594_s14 }
  0x16   : > { %s277_s8 = scalar_select %p276_p8, %s721_s15, 1 }
  0x17   : > { %s839_s30 = scalar_lea.vmem %s877_s4, %s594_s14  ;;  %301 = sbr.rel (%p597_p10) target bundleno = 30 (0x1e), region = 40 }
  0x18   : > { %s627_s9 = sshll.u32 %s277_s8, 5 }
  0x19   : > { %s280_s12 = scalar_lea.vmem %s874_s1, %s627_s9 }
  0x1c   : > { %vm302_vm0 = vcmask 62464   ;;  %v747_v0 = vmov 0.0  }
  0x1d   : > { %303 = vst.msk [vmem:[#allocation2] sm:$0x3f] %vm302_vm0, %v747_v0 }
  0x1e PF: > { %v631_v1 = vld [vmem:[%s280_s12 + $0x18] sm:$0xff]  ;;  %v628_v2 = vld [vmem:[%s280_s12] sm:$0xff]  ;;  %v629_v7 = vld [vmem:[%s280_s12 + $0x8] sm:$0xff]  ;;  %vm314_vm1 = vcmask 130048   ;;  %vm441_vm2 = vcmask 62464   ;;  %p624_p11 = scmp.ne.s32.totalorder %s721_s15, 1 }
  0x1f   : > { %v370_v3 = vld [vmem:[%s274_s6 + $0x4] sm:$0x1]  ;;  %v410_v5 = vld [vmem:[%s274_s6] sm:$0xc]  ;;  %434 = vmatpush.bf16.msra.mxu3 %v631_v1  ;;  %325 = vmatpush.bf16.msra.mxu0 %v628_v2  ;;  %v630_v9 = vld [vmem:[%s280_s12 + $0x10] sm:$0xff] }
  0x20   : > { %v377_v4 = vunpack.c.l.b16 %v370_v3  ;;  %v305_v6 = vld [vmem:[%s274_s6] sm:$0x7]  ;;  %v415_v8 = vunpack.c.l.b16 %v410_v5  ;;  %362 = vmatpush.bf16.msra.mxu1 %v629_v7  ;;  %403 = vmatpush.bf16.msra.mxu2 %v630_v9 }
  0x21   : > { %v332_v10 = vld [vmem:[%s274_s6] sm:$0xf] }
  0x22   : > { %v369_v11 = vld [vmem:[%s274_s6] sm:$0xe]  ;;  %v337_v12 = vunpack.c.l.b16 %v332_v10  ;;  %v416_v14 = vpack.c.b16 %v377_v4, %v415_v8  ;;  %602 = vmatmul.msk.bf16.vlgmr.msra.gmra.mxu0 %vm314_vm1, %v305_v6 }
  0x23   : > { %v376_v13 = vunpack.c.l.b16 %v369_v11 }
  0x24   : > { %v338_v15 = vpack.c.b16 %v337_v12, %v337_v12  ;;  %v417_v17 = vrot.slane %v416_v14, 2  ;;  %v304_v28 = vld [vmem:[#allocation2] sm:$0x3f] }
  0x25   : > { %v378_v16 = vpack.c.b16 %v377_v4, %v376_v13 }
  0x26   : > { %v340_v18 = vshrl.u32 %v338_v15, 16  ;;  %v342_v19 = vshll.u32 %v338_v15, 16  ;;  %623 = vmatmul.msk.bf16.vlgmr.msra.gmra.mxu3 %vm314_vm1, %v417_v17 }
  0x27   : > { %v380_v20 = vshrl.u32 %v378_v16, 16  ;;  %v383_v21 = vshll.u32 %v378_v16, 16 }
  0x28   : > { %v344_v22 = vrot.slane %v342_v19, 1 }
  0x29   : > { %v382_v23 = vrot.slane %v380_v20, 1  ;;  %v385_v24 = vrot.slane %v383_v21, 2 }
  0x2a   : > { %v345_v25 = vor.u32 %v344_v22, %v340_v18 }
  0x2b   : > { %v386_v26 = vor.u32 %v385_v24, %v382_v23 }
  0x2c   : > { %609 = vmatmul.msk.bf16.vlgmr.msra.gmra.mxu1 %vm314_vm1, %v345_v25 }
  0x2d   : > { %616 = vmatmul.msk.bf16.vlgmr.msra.gmra.mxu2 %vm314_vm1, %v386_v26 }
  0x9f   : > { %v327_v27 = vpop.f32.mrf.mxu0 }
  0xa0   : > { %v331_v29 = vadd.f32 %v327_v27, %v304_v28 }
  0xa7   : > { %v329_v31 = vpop.f32.mrf.mxu0 }
  0xa9   : > { %v364_v30 = vpop.f32.mrf.mxu1  ;;  %v436_v32 = vpop.f32.mrf.mxu3 }
  0xaa   : > { %v368_v33 = vadd.f32 %v364_v30, %v331_v29 }
  0xb0   : > { %v405_v34 = vpop.f32.mrf.mxu2 }
  0xb1   : > { %v409_v35 = vadd.f32 %v405_v34, %v368_v33  ;;  %v366_v36 = vpop.f32.mrf.mxu1  ;;  %v438_v38 = vpop.f32.mrf.mxu3 }
  0xb3   : > { %v440_v37 = vadd.f32 %v436_v32, %v409_v35 }
  0xb4   : > { %446 = sbr.rel (%p624_p11) target bundleno = 196 (0xc4), region = 44 }
  0xb5   : > { %442 = vst.msk [vmem:[#allocation2] sm:$0x3f] %vm441_vm2, %v440_v37 }
  0xb8   : > { %v407_v39 = vpop.f32.mrf.mxu2 }
  0xb9   : > { %v690_v40 = vld [vmem:[%s875_s2] ss:$0 sm:$0xff]  ;;  %vm457_vm3 = vcmask 59392  }
  0xba   : > { %v452_v41 = vld [vmem:[%s834_s26] sm:$0x7]  ;;  %v451_v43 = vadd.f32 %v690_v40, %v440_v37 }
  0xbb   : > { %v453_v42 = vunpack.c.l.bf16 %v452_v41 }
  0xbd   : > { %v454_v44 = vadd.f32 %v453_v42, %v451_v43 }
  0xbf   : > { %v455_v45 = vmax.f32 %v454_v44, 0.0 }
  0xc1   : > { %v456_v46 = vpack.c.bf16 %v455_v45, %v455_v45 }
  0xc3   : > { %458 = vst.msk [vmem:[%s839_s30] sm:$0x7] %vm457_vm3, %v456_v46 }
  0xc4 PF: > { %s14_s21 = sadd.s32 1, %s745_s21   ;;  %s879_s24 = sld [smem:[#allocation3_spill]] }
  0xc5   : > { %p11_p12 = scmp.ge.s32.totalorder %s14_s21, 10   ;;  %s880_s15 = smov %s733_s18 }
  0xc6   : > { %s881_s16 = smov %s737_s19  ;;  %s882_s17 = smov %s741_s20 }
  0xc7   : > { %s883_s18 = smov %s887_s22  ;;  %s884_s19 = smov %s891_s23 }
  0xc8   :  { %13 = sbr.rel (!%p11_p12) target bundleno = 4 (0x4), region = 83 }
  0xca   : > { %s885_s20 = smov %s879_s24 }

// kernel: hourglass_forward.35
= control target key start
LH: loop header
LB: loop body
LE: loop exit
PB: predicated region body
PF: predicated region fallthrough
CT: control target
= control target key end

     0   :  { %s641_s12 = smov 0   ;;  %s643_s13 = smov 0   ;;  %s736_s0 = inlined_call_operand.vmem [shape: bf16[2,8,64,4], index: 0, kind: input, shape index: {}]   ;;  %s737_s1 = inlined_call_operand.vmem [shape: bf16[1,1,4,4], index: 1, kind: input, shape index: {}]   ;;  %s738_s2 = inlined_call_operand.vmem [shape: f32[1,4], index: 2, kind: input, shape index: {}]   ;;  %s739_s3 = inlined_call_operand.vmem [shape: bf16[2,8,64,4], index: 3, kind: output, shape index: {}]  }
   0x1   :  { %s645_s14 = smov 0   ;;  %s647_s15 = smov 0  }
   0x2   :  { %s649_s16 = smov 0  }
   0x3 LB: > { %s28_s17 = sadd.s32 1, %s610_s14  ;;  %s32_s18 = sadd.s32 1, %s614_s15  ;;  %s618_s16 = sphi %s649_s16, %s13_s16   ;;  %s614_s15 = sphi %s647_s15, %s743_s15   ;;  %s610_s14 = sphi %s645_s14, %s742_s14   ;;  %s606_s13 = sphi %s643_s13, %s741_s13   ;;  %s602_s12 = sphi %s641_s12, %s740_s12  }
   0x4   : > { %p30_p0 = scmp.ge.s32.totalorder %s28_s17, 8  ;;  %p502_p1 = scmp.ge.s32.totalorder %s618_s16, 1 }
   0x5   : > { %p177_p2 = scmp.lt.s32.totalorder %s618_s16, 17 }
   0x6   : > { %s745_s17 = smov (%p30_p0, %s28_s17), 0  ;;  %s747_s18 = smov (!%p30_p0, %s32_s18), %s614_s15 }
   0x7   : > { %p178_p3 = pnand %p502_p1, %p177_p2  ;;  %p34_p4 = scmp.ge.s32.totalorder %s747_s18, 2 }
   0x8   : > { %p215_p5 = scmp.lt.s32.totalorder (!%p178_p3), %s606_s13, 1  ;;  %p217_p6 = scmp.lt.s32.totalorder (!%p178_p3), %s602_s12, 7 }
   0x9   : > { %s749_s18 = smov (%p34_p4, %s747_s18), 0  ;;  %181 = sbr.rel (%p178_p3) target bundleno = 170 (0xaa), region = 32 }
   0xe   : > { %v268_v0 = vld [vmem:[%s737_s1] sm:$0x3]  ;;  %vm302_vm0 = vcmask 1041408   ;;  %vm243_vm1 = vcmask 31744   ;;  %s751_s13 = smov (!%p215_p5, %s606_s13), 1  ;;  %v620_v2 = vmov 0.0  }
   0xf   : > { %v304_v1 = vsel %vm302_vm0, %v268_v0, 0  ;;  %244 = vst.msk [vmem:[#allocation2] sm:$0xff] %vm243_vm1, %v620_v2  ;;  %s753_s12 = smov (!%p217_p6, %s602_s12), 7  ;;  %s504_s21 = sshll.u32 %s751_s13, 6  ;;  %v579_v9 = vld [vmem:[%s738_s2] ss:$0 sm:$0xff] }
  0x10   : > { %313 = vmatpush.bf16.msra.mxu0 %v304_v1  ;;  %535 = vmatpush.bf16.msra.mxu1 %v304_v1  ;;  %245 = vst.msk [vmem:[#allocation2 + $0x8] sm:$0xff] %vm243_vm1, %v620_v2  ;;  %s503_s22 = sshll.u32 %s753_s12, 3  ;;  %vm374_vm2 = vcmask 27648  }
  0x11   : > { %536 = vmatpush.bf16.msra.mxu2 %v304_v1  ;;  %537 = vmatpush.bf16.msra.mxu3 %v304_v1  ;;  %246 = vst.msk [vmem:[#allocation2 + $0x10] sm:$0xff] %vm243_vm1, %v620_v2  ;;  %s221_s23 = sadd.s32 %s504_s21, %s503_s22 }
  0x12   : > { %247 = vst.msk [vmem:[#allocation2 + $0x18] sm:$0xff] %vm243_vm1, %v620_v2  ;;  %s505_s24 = sshll.u32 %s221_s23, 2 }
  0x13   : > { %248 = vst.msk [vmem:[#allocation2 + $0x20] sm:$0xff] %vm243_vm1, %v620_v2  ;;  %s223_s27 = scalar_lea.vmem %s736_s0, %s505_s24  ;;  %s696_s5 = scalar_lea.vmem %s739_s3, %s505_s24 }
  0x14   : > { %249 = vst.msk [vmem:[#allocation2 + $0x28] sm:$0xff] %vm243_vm1, %v620_v2  ;;  %v531_v3 = vld [vmem:[%s223_s27] sm:$0xff]  ;;  %v532_v4 = vld [vmem:[%s223_s27 + $0x8] sm:$0xff]  ;;  %v533_v5 = vld [vmem:[%s223_s27 + $0x10] sm:$0xff] }
  0x15   : > { %250 = vst.msk [vmem:[#allocation2 + $0x30] sm:$0xff] %vm243_vm1, %v620_v2  ;;  %v534_v6 = vld [vmem:[%s223_s27 + $0x18] sm:$0xff]  ;;  %525 = vmatmul.msk.bf16.vlgmr.msra.gmra.mxu0 %vm243_vm1, %v531_v3  ;;  %526 = vmatmul.msk.bf16.vlgmr.msra.gmra.mxu1 %vm243_vm1, %v532_v4 }
  0x16   : > { %251 = vst.msk [vmem:[#allocation2 + $0x38] sm:$0xff] %vm243_vm1, %v620_v2  ;;  %527 = vmatmul.msk.bf16.vlgmr.msra.gmra.mxu2 %vm243_vm1, %v533_v5  ;;  %528 = vmatmul.msk.bf16.vlgmr.msra.gmra.mxu3 %vm243_vm1, %v534_v6  ;;  %v252_v7 = vld [vmem:[#allocation2] sm:$0xff] }
  0x17   : > { %v253_v20 = vld [vmem:[#allocation2 + $0x8] sm:$0xff] }
  0x18   : > { %v254_v8 = vld [vmem:[#allocation2 + $0x10] sm:$0xff] }
  0x19   : > { %v255_v21 = vld [vmem:[#allocation2 + $0x18] sm:$0xff] }
  0x1a   : > { %v256_v18 = vld [vmem:[#allocation2 + $0x20] sm:$0xff] }
  0x1b   : > { %v257_v38 = vld [vmem:[#allocation2 + $0x28] sm:$0xff] }
  0x1c   : > { %v258_v19 = vld [vmem:[#allocation2 + $0x30] sm:$0xff] }
  0x1d   : > { %v259_v39 = vld [vmem:[#allocation2 + $0x38] sm:$0xff] }
  0x92   : > { %v315_v10 = vpop.f32.mrf.mxu0  ;;  %v320_v11 = vpop.f32.mrf.mxu1 }
  0x93   : > { %v335_v12 = vadd.f32 %v315_v10, %v252_v7  ;;  %v337_v13 = vadd.f32 %v320_v11, %v254_v8 }
  0x95   : > { %343 = vst.msk [vmem:[#allocation2] sm:$0xff] %vm243_vm1, %v335_v12  ;;  %v358_v14 = vadd.f32 %v579_v9, %v335_v12  ;;  %v360_v15 = vadd.f32 %v579_v9, %v337_v13 }
  0x96   : > { %345 = vst.msk [vmem:[#allocation2 + $0x10] sm:$0xff] %vm243_vm1, %v337_v13 }
  0x97   : > { %v366_v16 = vpack.c.bf16 %v358_v14, %v358_v14  ;;  %v368_v17 = vpack.c.bf16 %v360_v15, %v360_v15 }
  0x99   : > { %375 = vst.msk [vmem:[%s696_s5] sm:$0xf] %vm374_vm2, %v366_v16  ;;  %v325_v22 = vpop.f32.mrf.mxu2  ;;  %v330_v23 = vpop.f32.mrf.mxu3 }
  0x9a   : > { %377 = vst.msk [vmem:[%s696_s5 + $0x8] sm:$0xf] %vm374_vm2, %v368_v17  ;;  %v339_v24 = vadd.f32 %v325_v22, %v256_v18  ;;  %v341_v25 = vadd.f32 %v330_v23, %v258_v19  ;;  %v317_v26 = vpop.f32.mrf.mxu0  ;;  %v322_v27 = vpop.f32.mrf.mxu1 }
  0x9b   : > { %v336_v28 = vadd.f32 %v317_v26, %v253_v20  ;;  %v338_v29 = vadd.f32 %v322_v27, %v255_v21 }
  0x9c   : > { %347 = vst.msk [vmem:[#allocation2 + $0x20] sm:$0xff] %vm243_vm1, %v339_v24  ;;  %v362_v30 = vadd.f32 %v579_v9, %v339_v24  ;;  %v364_v31 = vadd.f32 %v579_v9, %v341_v25 }
  0x9d   : > { %349 = vst.msk [vmem:[#allocation2 + $0x30] sm:$0xff] %vm243_vm1, %v341_v25  ;;  %v359_v32 = vadd.f32 %v579_v9, %v336_v28  ;;  %v361_v33 = vadd.f32 %v579_v9, %v338_v29 }
  0x9e   : > { %v370_v34 = vpack.c.bf16 %v362_v30, %v362_v30  ;;  %v372_v35 = vpack.c.bf16 %v364_v31, %v364_v31  ;;  %344 = vst.msk [vmem:[#allocation2 + $0x8] sm:$0xff] %vm243_vm1, %v336_v28 }
  0x9f   : > { %v367_v36 = vpack.c.bf16 %v359_v32, %v359_v32  ;;  %346 = vst.msk [vmem:[#allocation2 + $0x18] sm:$0xff] %vm243_vm1, %v338_v29  ;;  %v369_v37 = vpack.c.bf16 %v361_v33, %v361_v33 }
  0xa0   : > { %379 = vst.msk [vmem:[%s696_s5 + $0x10] sm:$0xf] %vm374_vm2, %v370_v34 }
  0xa1   : > { %381 = vst.msk [vmem:[%s696_s5 + $0x18] sm:$0xf] %vm374_vm2, %v372_v35  ;;  %v327_v40 = vpop.f32.mrf.mxu2  ;;  %v332_v41 = vpop.f32.mrf.mxu3 }
  0xa2   : > { %376 = vst.msk [vmem:[%s696_s5 + $0x4] sm:$0xf] %vm374_vm2, %v367_v36  ;;  %v340_v42 = vadd.f32 %v327_v40, %v257_v38  ;;  %v342_v43 = vadd.f32 %v332_v41, %v259_v39 }
  0xa3   : > { %378 = vst.msk [vmem:[%s696_s5 + $0xc] sm:$0xf] %vm374_vm2, %v369_v37 }
  0xa4   : > { %348 = vst.msk [vmem:[#allocation2 + $0x28] sm:$0xff] %vm243_vm1, %v340_v42  ;;  %v363_v44 = vadd.f32 %v579_v9, %v340_v42  ;;  %v365_v45 = vadd.f32 %v579_v9, %v342_v43 }
  0xa5   : > { %350 = vst.msk [vmem:[#allocation2 + $0x38] sm:$0xff] %vm243_vm1, %v342_v43 }
  0xa6   : > { %v371_v46 = vpack.c.bf16 %v363_v44, %v363_v44  ;;  %v373_v47 = vpack.c.bf16 %v365_v45, %v365_v45 }
  0xa8   : > { %380 = vst.msk [vmem:[%s696_s5 + $0x14] sm:$0xf] %vm374_vm2, %v371_v46 }
  0xa9   : > { %382 = vst.msk [vmem:[%s696_s5 + $0x1c] sm:$0xf] %vm374_vm2, %v373_v47 }
  0xaa PF: > { %s13_s16 = sadd.s32 1, %s618_s16   ;;  %s740_s12 = smov %s610_s14 }
  0xab   : > { %p10_p7 = scmp.ge.s32.totalorder %s13_s16, 18   ;;  %s741_s13 = smov %s614_s15 }
  0xac   : > { %s742_s14 = smov %s745_s17  ;;  %s743_s15 = smov %s749_s18 }
  0xad   :  { %12 = sbr.rel (!%p10_p7) target bundleno = 3 (0x3), region = 73 }

// kernel: hourglass_forward.36
= control target key start
LH: loop header
LB: loop body
LE: loop exit
PB: predicated region body
PF: predicated region fallthrough
CT: control target
= control target key end

     0   :  { %s636_s15 = smov 0   ;;  %s638_s16 = smov 0   ;;  %s700_s0 = inlined_call_operand.vmem [shape: bf16[2,4,16,8], index: 0, kind: input, shape index: {}]   ;;  %s701_s1 = inlined_call_operand.vmem [shape: bf16[1,1,8,4], index: 1, kind: input, shape index: {}]   ;;  %s702_s2 = inlined_call_operand.vmem [shape: f32[1,4], index: 2, kind: input, shape index: {}]   ;;  %s703_s3 = inlined_call_operand.vmem [shape: bf16[2,4,16,4], index: 3, kind: input, shape index: {}]   ;;  %s704_s4 = inlined_call_operand.vmem [shape: bf16[2,4,16,4], index: 4, kind: output, shape index: {}]  }
   0x1   :  { %s640_s17 = smov 0   ;;  %s642_s18 = smov 0  }
   0x2   :  { %s644_s19 = smov 0  }
   0x3 LB: > { %s29_s20 = sadd.s32 1, %s600_s17  ;;  %s33_s21 = sadd.s32 1, %s604_s18  ;;  %s608_s19 = sphi %s644_s19, %s14_s19   ;;  %s604_s18 = sphi %s642_s18, %s708_s18   ;;  %s600_s17 = sphi %s640_s17, %s707_s17   ;;  %s596_s16 = sphi %s638_s16, %s706_s16   ;;  %s592_s15 = sphi %s636_s15, %s705_s15  }
   0x4   : > { %p31_p0 = scmp.ge.s32.totalorder %s29_s20, 4  ;;  %p506_p1 = scmp.ge.s32.totalorder %s608_s19, 1 }
   0x5   : > { %p218_p2 = scmp.lt.s32.totalorder %s608_s19, 9 }
   0x6   : > { %s710_s20 = smov (%p31_p0, %s29_s20), 0  ;;  %s712_s21 = smov (!%p31_p0, %s33_s21), %s604_s18 }
   0x7   : > { %p219_p3 = pnand %p506_p1, %p218_p2  ;;  %p35_p4 = scmp.ge.s32.totalorder %s712_s21, 2 }
   0x8   : > { %p267_p5 = scmp.lt.s32.totalorder (!%p219_p3), %s596_s16, 1  ;;  %p269_p6 = scmp.lt.s32.totalorder (!%p219_p3), %s592_s15, 3 }
   0x9   : > { %s714_s21 = smov (%p35_p4, %s712_s21), 0  ;;  %222 = sbr.rel (%p219_p3) target bundleno = 166 (0xa6), region = 36 }
   0xe   : > { %v311_v0 = vld [vmem:[%s701_s1] sm:$0xf]  ;;  %vm321_vm0 = vcmask 1043456   ;;  %vm304_vm1 = vcmask 31744   ;;  %s716_s16 = smov (!%p267_p5, %s596_s16), 1  ;;  %v610_v2 = vmov 0.0  }
   0xf   : > { %v323_v1 = vsel %vm321_vm0, %v311_v0, 0  ;;  %305 = vst.msk [vmem:[#allocation2] sm:$0xff] %vm304_vm1, %v610_v2  ;;  %s718_s15 = smov (!%p269_p6, %s592_s15), 3  ;;  %s508_s24 = sshll.u32 %s716_s16, 3  ;;  %vm317_vm2 = vcmask 64512   ;;  %vm363_vm3 = vcmask 27648  }
  0x10   : > { %332 = vmatpush.bf16.msra.mxu0 %v323_v1  ;;  %306 = vst.msk [vmem:[#allocation2 + $0x8] sm:$0xff] %vm304_vm1, %v610_v2  ;;  %s507_s25 = sshll.u32 %s718_s15, 1  ;;  %v569_v6 = vld [vmem:[%s702_s2] ss:$0 sm:$0xff] }
  0x11   : > { %s273_s26 = sadd.s32 %s508_s24, %s507_s25 }
  0x12   : > { %s509_s27 = sshll.u32 %s273_s26, 2 }
  0x13   : > { %s275_s30 = scalar_lea.vmem %s700_s0, %s509_s27  ;;  %s289_s7 = scalar_lea.vmem %s703_s3, %s509_s27 }
  0x14   : > { %v523_v3 = vld [vmem:[%s275_s30] sm:$0xff]  ;;  %s298_s12 = scalar_lea.vmem %s704_s4, %s509_s27 }
  0x15   : > { %520 = vmatmul.msk.bf16.vlgmr.msra.gmra.mxu0 %vm317_vm2, %v523_v3  ;;  %v525_v5 = vld [vmem:[%s289_s7] sm:$0xff]  }
  0x16   : > { %v307_v4 = vld [vmem:[#allocation2] sm:$0xff]  ;;  %v526_v9 = vunpack.c.l.bf16 %v525_v5  ;;  %v527_v17 = vunpack.c.h.bf16 %v525_v5 }
  0x17   : > { %v308_v12 = vld [vmem:[#allocation2 + $0x8] sm:$0xff] }
  0x92   : > { %v334_v7 = vpop.f32.mrf.mxu0 }
  0x93   : > { %v339_v8 = vadd.f32 %v334_v7, %v307_v4 }
  0x95   : > { %342 = vst.msk [vmem:[#allocation2] sm:$0xff] %vm304_vm1, %v339_v8  ;;  %v351_v10 = vadd.f32 %v569_v6, %v339_v8 }
  0x97   : > { %v357_v11 = vadd.f32 %v526_v9, %v351_v10 }
  0x99   : > { %v359_v13 = vmax.f32 %v357_v11, 0.0 }
  0x9a   : > { %v336_v14 = vpop.f32.mrf.mxu0 }
  0x9b   : > { %v361_v15 = vpack.c.bf16 %v359_v13, %v359_v13  ;;  %v340_v16 = vadd.f32 %v336_v14, %v308_v12 }
  0x9d   : > { %364 = vst.msk [vmem:[%s298_s12] sm:$0xf] %vm363_vm3, %v361_v15  ;;  %v352_v18 = vadd.f32 %v569_v6, %v340_v16 }
  0x9e   : > { %343 = vst.msk [vmem:[#allocation2 + $0x8] sm:$0xff] %vm304_vm1, %v340_v16 }
  0x9f   : > { %v358_v19 = vadd.f32 %v527_v17, %v352_v18 }
  0xa1   : > { %v360_v20 = vmax.f32 %v358_v19, 0.0 }
  0xa3   : > { %v362_v21 = vpack.c.bf16 %v360_v20, %v360_v20 }
  0xa5   : > { %365 = vst.msk [vmem:[%s298_s12 + $0x4] sm:$0xf] %vm363_vm3, %v362_v21 }
  0xa6 PF: > { %s14_s19 = sadd.s32 1, %s608_s19   ;;  %s705_s15 = smov %s600_s17 }
  0xa7   : > { %p11_p7 = scmp.ge.s32.totalorder %s14_s19, 10   ;;  %s706_s16 = smov %s604_s18 }
  0xa8   : > { %s707_s17 = smov %s710_s20  ;;  %s708_s18 = smov %s714_s21 }
  0xa9   :  { %13 = sbr.rel (!%p11_p7) target bundleno = 3 (0x3), region = 80 }

// kernel: hourglass_forward.37
= control target key start
LH: loop header
LB: loop body
LE: loop exit
PB: predicated region body
PF: predicated region fallthrough
CT: control target
= control target key end

     0   :  { %s716_s15 = smov 0   ;;  %s718_s16 = smov 0   ;;  %s796_s0 = inlined_call_operand.vmem [shape: bf16[2,4,21,8], index: 0, kind: input, shape index: {}]   ;;  %s797_s1 = inlined_call_operand.vmem [shape: bf16[1,2,8,4], index: 1, kind: input, shape index: {}]   ;;  %s798_s2 = inlined_call_operand.vmem [shape: f32[1,4], index: 2, kind: input, shape index: {}]   ;;  %s799_s3 = inlined_call_operand.vmem [shape: bf16[2,4,20,4], index: 3, kind: input, shape index: {}]   ;;  %s800_s4 = inlined_call_operand.vmem [shape: bf16[2,4,20,4], index: 4, kind: output, shape index: {}]  }
   0x1   :  { %s720_s17 = smov 0   ;;  %s722_s18 = smov 0  }
   0x2   :  { %s724_s19 = smov 0  }
   0x3 LB: > { %s29_s20 = sadd.s32 1, %s680_s17  ;;  %s33_s21 = sadd.s32 1, %s684_s18  ;;  %s688_s19 = sphi %s724_s19, %s14_s19   ;;  %s684_s18 = sphi %s722_s18, %s804_s18   ;;  %s680_s17 = sphi %s720_s17, %s803_s17   ;;  %s676_s16 = sphi %s718_s16, %s802_s16   ;;  %s672_s15 = sphi %s716_s15, %s801_s15  }
   0x4   : > { %p31_p0 = scmp.ge.s32.totalorder %s29_s20, 4  ;;  %p584_p1 = scmp.ge.s32.totalorder %s688_s19, 1 }
   0x5   : > { %p219_p2 = scmp.lt.s32.totalorder %s688_s19, 9 }
   0x6   : > { %s806_s20 = smov (%p31_p0, %s29_s20), 0  ;;  %s808_s21 = smov (!%p31_p0, %s33_s21), %s684_s18 }
   0x7   : > { %p220_p3 = pnand %p584_p1, %p219_p2  ;;  %p35_p4 = scmp.ge.s32.totalorder %s808_s21, 2 }
   0x8   : > { %p269_p5 = scmp.lt.s32.totalorder (!%p220_p3), %s676_s16, 1  ;;  %p271_p6 = scmp.lt.s32.totalorder (!%p220_p3), %s672_s15, 3 }
   0x9   : > { %s810_s21 = smov (%p35_p4, %s808_s21), 0  ;;  %223 = sbr.rel (%p220_p3) target bundleno = 178 (0xb2), region = 36 }
   0xe   : > { %v318_v0 = vld [vmem:[%s797_s1] sm:$0xf]  ;;  %vm334_vm0 = vcmask 1043456   ;;  %v594_v2 = vld [vmem:[%s797_s1 + $0x4] sm:$0xf]  ;;  %vm307_vm1 = vcmask 31744  }
   0xf   : > { %v336_v1 = vsel %vm334_vm0, %v318_v0, 0  ;;  %s812_s16 = smov (!%p269_p5, %s676_s16), 1  ;;  %v387_v3 = vsel %vm334_vm0, %v594_v2, 0  ;;  %s814_s15 = smov (!%p271_p6, %s672_s15), 3  ;;  %v690_v4 = vmov 0.0   ;;  %vm327_vm2 = vcmask 64512  }
  0x10   : > { %345 = vmatpush.bf16.msra.mxu0 %v336_v1  ;;  %604 = vmatpush.bf16.msra.mxu2 %v336_v1  ;;  %308 = vst.msk [vmem:[#allocation2] sm:$0xff] %vm307_vm1, %v690_v4  ;;  %s607_s26 = smul.u32 12, %s812_s16  ;;  %vm365_vm3 = vsmask.f32 7424  ;;  %vm310_vm4 = vcmask 27648   ;;  %vm442_vm5 = vcmask 25600  }
  0x11   : > { %396 = vmatpush.bf16.msra.mxu1 %v387_v3  ;;  %605 = vmatpush.bf16.msra.mxu3 %v387_v3  ;;  %309 = vst.msk [vmem:[#allocation2 + $0x8] sm:$0xff] %vm307_vm1, %v690_v4  ;;  %s606_s27 = smul.u32 3, %s814_s15  ;;  %v649_v25 = vld [vmem:[%s798_s2] ss:$0 sm:$0xff] }
  0x12   : > { %311 = vst.msk [vmem:[#allocation2 + $0x10] sm:$0xf] %vm310_vm4, %v690_v4 }
  0x13   : > { %s275_s28 = sadd.s32 %s607_s26, %s606_s27 }
  0x14   : > { %s754_s29 = sshll.u32 %s275_s28, 2 }
  0x15   : > { %s277_s6 = scalar_lea.vmem %s796_s0, %s754_s29  ;;  %s292_s9 = scalar_lea.vmem %s799_s3, %s754_s29 }
  0x16   : > { %v599_v5 = vld [vmem:[%s277_s6] sm:$0xff]  ;;  %v317_v6 = vld [vmem:[%s277_s6 + $0x8] sm:$0x3]  ;;  %s301_s14 = scalar_lea.vmem %s800_s4, %s754_s29 }
  0x17   : > { %v359_v7 = vld [vmem:[%s277_s6 + $0x8] sm:$0x7]  ;;  %v324_v8 = vunpack.c.l.b16 %v317_v6  ;;  %592 = vmatmul.msk.bf16.vlgmr.msra.gmra.mxu0 %vm327_vm2, %v599_v5  ;;  %v368_v10 = vshll.u32 %v599_v5, 16  ;;  %v366_v11 = vshrl.u32 %v599_v5, 16  ;;  %v312_v21 = vld [vmem:[#allocation2] sm:$0xff] }
  0x18   : > { %v363_v9 = vunpack.c.l.b16 %v359_v7  ;;  %v601_v24 = vld [vmem:[%s292_s9] sm:$0xff]   ;;  %v313_v32 = vld [vmem:[#allocation2 + $0x8] sm:$0xff] }
  0x19   : > { %v326_v12 = vpack.c.b16 %v324_v8, %v324_v8  ;;  %v370_v14 = vrot.slane %v368_v10, 1  ;;  %v602_v28 = vunpack.c.l.bf16 %v601_v24  ;;  %v314_v29 = vld [vmem:[#allocation2 + $0x10] sm:$0xf]  ;;  %v427_v36 = vld [vmem:[%s292_s9 + $0x8] sm:$0x3]  ;;  %v603_v45 = vunpack.c.h.bf16 %v601_v24 }
  0x1a   : > { %v364_v13 = vpack.c.b16 %v363_v9, %v363_v9  ;;  %v430_v41 = vunpack.c.l.bf16 %v427_v36 }
  0x1b   : > { %593 = vmatmul.msk.bf16.vlgmr.msra.gmra.mxu2 %vm327_vm2, %v326_v12  ;;  %v371_v17 = vor.u32 %v370_v14, %v366_v11 }
  0x1c   : > { %v373_v15 = vshll.u32 %v364_v13, 16  ;;  %v377_v16 = vshrl.u32 %v364_v13, 16 }
  0x1e   : > { %v375_v18 = vrot.slane %v373_v15, 1 }
  0x20   : > { %v376_v19 = vsel %vm365_vm3, %v371_v17, %v375_v18  ;;  %v379_v20 = vor.u32 %v377_v16, %v375_v18 }
  0x21   : > { %595 = vmatmul.msk.bf16.vlgmr.msra.gmra.mxu1 %vm327_vm2, %v376_v19 }
  0x22   : > { %596 = vmatmul.msk.bf16.vlgmr.msra.gmra.mxu3 %vm327_vm2, %v379_v20 }
  0x94   : > { %v347_v22 = vpop.f32.mrf.mxu0 }
  0x95   : > { %v356_v23 = vadd.f32 %v347_v22, %v312_v21 }
  0x9c   : > { %v349_v33 = vpop.f32.mrf.mxu0 }
  0x9d   : > { %v357_v38 = vadd.f32 %v349_v33, %v313_v32 }
  0x9e   : > { %v398_v26 = vpop.f32.mrf.mxu1  ;;  %v352_v30 = vpop.f32.mrf.mxu2 }
  0x9f   : > { %v407_v27 = vadd.f32 %v398_v26, %v356_v23  ;;  %v358_v34 = vadd.f32 %v352_v30, %v314_v29 }
  0xa1   : > { %411 = vst.msk [vmem:[#allocation2] sm:$0xff] %vm307_vm1, %v407_v27  ;;  %v422_v31 = vadd.f32 %v649_v25, %v407_v27 }
  0xa3   : > { %v431_v35 = vadd.f32 %v602_v28, %v422_v31 }
  0xa5   : > { %v434_v37 = vmax.f32 %v431_v35, 0.0  ;;  %v403_v39 = vpop.f32.mrf.mxu3 }
  0xa6   : > { %v409_v40 = vadd.f32 %v403_v39, %v358_v34  ;;  %v400_v42 = vpop.f32.mrf.mxu1  ;;  %v354_v46 = vpop.f32.mrf.mxu2 }
  0xa7   : > { %v437_v43 = vpack.c.bf16 %v434_v37, %v434_v37  ;;  %v408_v44 = vadd.f32 %v400_v42, %v357_v38 }
  0xa8   : > { %414 = vst.msk [vmem:[#allocation2 + $0x10] sm:$0xf] %vm310_vm4, %v409_v40  ;;  %v424_v47 = vadd.f32 %v649_v25, %v409_v40 }
  0xa9   : > { %440 = vst.msk [vmem:[%s301_s14] sm:$0xf] %vm310_vm4, %v437_v43  ;;  %v423_v48 = vadd.f32 %v649_v25, %v408_v44 }
  0xaa   : > { %v433_v49 = vadd.f32 %v430_v41, %v424_v47  ;;  %412 = vst.msk [vmem:[#allocation2 + $0x8] sm:$0xff] %vm307_vm1, %v408_v44 }
  0xab   : > { %v432_v50 = vadd.f32 %v603_v45, %v423_v48 }
  0xac   : > { %v436_v51 = vmax.f32 %v433_v49, 0.0 }
  0xad   : > { %v435_v52 = vmax.f32 %v432_v50, 0.0  ;;  %v405_v53 = vpop.f32.mrf.mxu3 }
  0xae   : > { %v439_v54 = vpack.c.bf16 %v436_v51, %v436_v51 }
  0xaf   : > { %v438_v55 = vpack.c.bf16 %v435_v52, %v435_v52 }
  0xb0   : > { %443 = vst.msk [vmem:[%s301_s14 + $0x8] sm:$0x3] %vm442_vm5, %v439_v54 }
  0xb1   : > { %441 = vst.msk [vmem:[%s301_s14 + $0x4] sm:$0xf] %vm310_vm4, %v438_v55 }
  0xb2 PF: > { %s14_s19 = sadd.s32 1, %s688_s19   ;;  %s801_s15 = smov %s680_s17 }
  0xb3   : > { %p11_p7 = scmp.ge.s32.totalorder %s14_s19, 10   ;;  %s802_s16 = smov %s684_s18 }
  0xb4   : > { %s803_s17 = smov %s806_s20  ;;  %s804_s18 = smov %s810_s21 }
  0xb5   :  { %13 = sbr.rel (!%p11_p7) target bundleno = 3 (0x3), region = 81 }

// kernel: hourglass_forward.38
= control target key start
LH: loop header
LB: loop body
LE: loop exit
PB: predicated region body
PF: predicated region fallthrough
CT: control target
= control target key end

     0   :  { %s685_s15 = smov 0   ;;  %s687_s16 = smov 0   ;;  %s754_s0 = inlined_call_operand.vmem [shape: bf16[2,4,20,8], index: 0, kind: input, shape index: {}]   ;;  %s755_s1 = inlined_call_operand.vmem [shape: bf16[1,2,8,4], index: 1, kind: input, shape index: {}]   ;;  %s756_s2 = inlined_call_operand.vmem [shape: f32[1,4], index: 2, kind: input, shape index: {}]   ;;  %s757_s3 = inlined_call_operand.vmem [shape: bf16[2,4,16,4], index: 3, kind: input, shape index: {}]   ;;  %s758_s4 = inlined_call_operand.vmem [shape: bf16[2,4,16,4], index: 4, kind: output, shape index: {}]  }
   0x1   :  { %s689_s17 = smov 0   ;;  %s691_s18 = smov 0  }
   0x2   :  { %s693_s19 = smov 0  }
   0x3 LB: > { %s29_s20 = sadd.s32 1, %s649_s17  ;;  %s33_s21 = sadd.s32 1, %s653_s18  ;;  %s657_s19 = sphi %s693_s19, %s14_s19   ;;  %s653_s18 = sphi %s691_s18, %s762_s18   ;;  %s649_s17 = sphi %s689_s17, %s761_s17   ;;  %s645_s16 = sphi %s687_s16, %s760_s16   ;;  %s641_s15 = sphi %s685_s15, %s759_s15  }
   0x4   : > { %p31_p0 = scmp.ge.s32.totalorder %s29_s20, 4  ;;  %p548_p1 = scmp.ge.s32.totalorder %s657_s19, 1 }
   0x5   : > { %p219_p2 = scmp.lt.s32.totalorder %s657_s19, 9 }
   0x6   : > { %s764_s20 = smov (%p31_p0, %s29_s20), 0  ;;  %s766_s21 = smov (!%p31_p0, %s33_s21), %s653_s18 }
   0x7   : > { %p220_p3 = pnand %p548_p1, %p219_p2  ;;  %p35_p4 = scmp.ge.s32.totalorder %s766_s21, 2 }
   0x8   : > { %p269_p5 = scmp.lt.s32.totalorder (!%p220_p3), %s645_s16, 1  ;;  %p271_p6 = scmp.lt.s32.totalorder (!%p220_p3), %s641_s15, 3 }
   0x9   : > { %s768_s21 = smov (%p35_p4, %s766_s21), 0  ;;  %223 = sbr.rel (%p220_p3) target bundleno = 175 (0xaf), region = 36 }
   0xe   : > { %v314_v0 = vld [vmem:[%s755_s1] sm:$0xf]  ;;  %vm324_vm0 = vcmask 1043456   ;;  %v561_v2 = vld [vmem:[%s755_s1 + $0x4] sm:$0xf]  ;;  %vm307_vm1 = vcmask 31744  }
   0xf   : > { %v326_v1 = vsel %vm324_vm0, %v314_v0, 0  ;;  %s770_s16 = smov (!%p269_p5, %s645_s16), 1  ;;  %v365_v3 = vsel %vm324_vm0, %v561_v2, 0  ;;  %v659_v4 = vmov 0.0   ;;  %s772_s15 = smov (!%p271_p6, %s641_s15), 3  ;;  %vm320_vm2 = vcmask 64512  }
  0x10   : > { %335 = vmatpush.bf16.msra.mxu0 %v326_v1  ;;  %308 = vst.msk [vmem:[#allocation2] sm:$0xff] %vm307_vm1, %v659_v4  ;;  %374 = vmatpush.bf16.msra.mxu1 %v365_v3  ;;  %s576_s26 = smul.u32 12, %s770_s16  ;;  %s550_s7 = sshll.u32 %s772_s15, 1  ;;  %vm357_vm3 = vcmask 1045504   ;;  %v618_v19 = vld [vmem:[%s756_s2] ss:$0 sm:$0xff] }
  0x11   : > { %309 = vst.msk [vmem:[#allocation2 + $0x8] sm:$0xff] %vm307_vm1, %v659_v4  ;;  %s575_s27 = smul.u32 3, %s772_s15  ;;  %s551_s8 = sshll.u32 %s770_s16, 3  ;;  %vm405_vm4 = vcmask 27648  }
  0x12   : > { %s290_s9 = sadd.s32 %s551_s8, %s550_s7 }
  0x13   : > { %s275_s28 = sadd.s32 %s576_s26, %s575_s27  ;;  %s552_s10 = sshll.u32 %s290_s9, 2 }
  0x14   : > { %s549_s29 = sshll.u32 %s275_s28, 2  ;;  %s292_s13 = scalar_lea.vmem %s757_s3, %s552_s10 }
  0x15   : > { %s277_s6 = scalar_lea.vmem %s754_s0, %s549_s29  ;;  %v572_v18 = vld [vmem:[%s292_s13] sm:$0xff]   ;;  %s301_s23 = scalar_lea.vmem %s758_s4, %s552_s10 }
  0x16   : > { %v569_v5 = vld [vmem:[%s277_s6] sm:$0xff]  ;;  %v346_v8 = vld [vmem:[%s277_s6 + $0x8] sm:$0x3]  ;;  %v573_v22 = vunpack.c.l.bf16 %v572_v18  ;;  %v574_v32 = vunpack.c.h.bf16 %v572_v18 }
  0x17   : > { %v564_v6 = vld [vmem:[%s277_s6] sm:$0xc]  ;;  %v570_v7 = vld [vmem:[%s277_s6] sm:$0xf0]  ;;  %560 = vmatmul.msk.bf16.vlgmr.msra.gmra.mxu0 %vm320_vm2, %v569_v5  ;;  %v354_v10 = vunpack.c.l.b16 %v346_v8 }
  0x18   : > { %v565_v9 = vor.u32 %v570_v7, %v564_v6  ;;  %v310_v15 = vld [vmem:[#allocation2] sm:$0xff]  ;;  %v311_v24 = vld [vmem:[#allocation2 + $0x8] sm:$0xff] }
  0x19   : > { %v356_v11 = vpack.c.b16 %v354_v10, %v354_v10 }
  0x1a   : > { %v358_v12 = vrot.slane %v565_v9, 2 }
  0x1b   : > { %v359_v13 = vrot.slane %v356_v11, 2 }
  0x1d   : > { %v360_v14 = vsel %vm357_vm3, %v358_v12, %v359_v13 }
  0x1e   : > { %566 = vmatmul.msk.bf16.vlgmr.msra.gmra.mxu1 %vm320_vm2, %v360_v14 }
  0x94   : > { %v337_v16 = vpop.f32.mrf.mxu0 }
  0x95   : > { %v342_v17 = vadd.f32 %v337_v16, %v310_v15 }
  0x9b   : > { %v376_v20 = vpop.f32.mrf.mxu1 }
  0x9c   : > { %v381_v21 = vadd.f32 %v376_v20, %v342_v17  ;;  %v339_v25 = vpop.f32.mrf.mxu0 }
  0x9d   : > { %v343_v28 = vadd.f32 %v339_v25, %v311_v24 }
  0x9e   : > { %384 = vst.msk [vmem:[#allocation2] sm:$0xff] %vm307_vm1, %v381_v21  ;;  %v393_v23 = vadd.f32 %v618_v19, %v381_v21 }
  0xa0   : > { %v399_v26 = vadd.f32 %v573_v22, %v393_v23 }
  0xa2   : > { %v401_v27 = vmax.f32 %v399_v26, 0.0 }
  0xa3   : > { %v378_v29 = vpop.f32.mrf.mxu1 }
  0xa4   : > { %v403_v30 = vpack.c.bf16 %v401_v27, %v401_v27  ;;  %v382_v31 = vadd.f32 %v378_v29, %v343_v28 }
  0xa6   : > { %406 = vst.msk [vmem:[%s301_s23] sm:$0xf] %vm405_vm4, %v403_v30  ;;  %v394_v33 = vadd.f32 %v618_v19, %v382_v31 }
  0xa7   : > { %385 = vst.msk [vmem:[#allocation2 + $0x8] sm:$0xff] %vm307_vm1, %v382_v31 }
  0xa8   : > { %v400_v34 = vadd.f32 %v574_v32, %v394_v33 }
  0xaa   : > { %v402_v35 = vmax.f32 %v400_v34, 0.0 }
  0xac   : > { %v404_v36 = vpack.c.bf16 %v402_v35, %v402_v35 }
  0xae   : > { %407 = vst.msk [vmem:[%s301_s23 + $0x4] sm:$0xf] %vm405_vm4, %v404_v36 }
  0xaf PF: > { %s14_s19 = sadd.s32 1, %s657_s19   ;;  %s759_s15 = smov %s649_s17 }
  0xb0   : > { %p11_p7 = scmp.ge.s32.totalorder %s14_s19, 10   ;;  %s760_s16 = smov %s653_s18 }
  0xb1   : > { %s761_s17 = smov %s764_s20  ;;  %s762_s18 = smov %s768_s21 }
  0xb2   :  { %13 = sbr.rel (!%p11_p7) target bundleno = 3 (0x3), region = 81 }

// kernel: hourglass_forward.39
= control target key start
LH: loop header
LB: loop body
LE: loop exit
PB: predicated region body
PF: predicated region fallthrough
CT: control target
= control target key end

     0   :  { %s831_s15 = smov 0   ;;  %s833_s16 = smov 0   ;;  %s941_s0 = inlined_call_operand.vmem [shape: bf16[2,4,26,8], index: 0, kind: input, shape index: {}]   ;;  %s942_s1 = inlined_call_operand.vmem [shape: bf16[1,4,8,4], index: 1, kind: input, shape index: {}]   ;;  %s943_s2 = inlined_call_operand.vmem [shape: f32[1,4], index: 2, kind: input, shape index: {}]   ;;  %s944_s3 = inlined_call_operand.vmem [shape: bf16[2,4,20,4], index: 3, kind: input, shape index: {}]   ;;  %s945_s4 = inlined_call_operand.vmem [shape: bf16[2,4,20,4], index: 4, kind: output, shape index: {}]  }
   0x1   :  { %s835_s17 = smov 0   ;;  %s837_s18 = smov 0  }
   0x2   :  { %s839_s19 = smov 0  }
   0x3 LB: > { %s29_s20 = sadd.s32 1, %s795_s17  ;;  %s33_s21 = sadd.s32 1, %s799_s18  ;;  %s803_s19 = sphi %s839_s19, %s14_s19   ;;  %s799_s18 = sphi %s837_s18, %s949_s18   ;;  %s795_s17 = sphi %s835_s17, %s948_s17   ;;  %s791_s16 = sphi %s833_s16, %s947_s16   ;;  %s787_s15 = sphi %s831_s15, %s946_s15  }
   0x4   : > { %p31_p0 = scmp.ge.s32.totalorder %s29_s20, 4  ;;  %p688_p1 = scmp.ge.s32.totalorder %s803_s19, 1 }
   0x5   : > { %p219_p2 = scmp.lt.s32.totalorder %s803_s19, 9 }
   0x6   : > { %s951_s20 = smov (%p31_p0, %s29_s20), 0  ;;  %s953_s21 = smov (!%p31_p0, %s33_s21), %s799_s18 }
   0x7   : > { %p220_p3 = pnand %p688_p1, %p219_p2  ;;  %p35_p4 = scmp.ge.s32.totalorder %s953_s21, 2 }
   0x8   : > { %p269_p5 = scmp.lt.s32.totalorder (!%p220_p3), %s791_s16, 1  ;;  %p271_p6 = scmp.lt.s32.totalorder (!%p220_p3), %s787_s15, 3 }
   0x9   : > { %s955_s21 = smov (%p35_p4, %s953_s21), 0  ;;  %223 = sbr.rel (%p220_p3) target bundleno = 196 (0xc4), region = 36 }
   0xe   : > { %v318_v0 = vld [vmem:[%s942_s1] sm:$0xf]  ;;  %vm334_vm0 = vcmask 1043456   ;;  %v710_v1 = vld [vmem:[%s942_s1 + $0xc] sm:$0xf]  ;;  %s957_s16 = smov (!%p269_p5, %s791_s16), 1 }
   0xf   : > { %v336_v2 = vsel %vm334_vm0, %v318_v0, 0  ;;  %v491_v3 = vsel %vm334_vm0, %v710_v1, 0  ;;  %v700_v4 = vld [vmem:[%s942_s1 + $0x4] sm:$0xf]  ;;  %v703_v6 = vld [vmem:[%s942_s1 + $0x8] sm:$0xf] }
  0x10   : > { %345 = vmatpush.bf16.msra.mxu0 %v336_v2  ;;  %500 = vmatpush.bf16.msra.mxu3 %v491_v3  ;;  %v387_v5 = vsel %vm334_vm0, %v700_v4, 0  ;;  %s959_s15 = smov (!%p271_p6, %s787_s15), 3  ;;  %v451_v7 = vsel %vm334_vm0, %v703_v6, 0  ;;  %s690_s30 = sshll.u32 %s957_s16, 4  ;;  %vm307_vm1 = vcmask 31744   ;;  %vm327_vm2 = vcmask 64512  }
  0x11   : > { %396 = vmatpush.bf16.msra.mxu1 %v387_v5  ;;  %460 = vmatpush.bf16.msra.mxu2 %v451_v7  ;;  %s689_s5 = sshll.u32 %s959_s15, 2  ;;  %v805_v8 = vmov 0.0   ;;  %vm480_vm3 = vcmask 1044480   ;;  %vm365_vm4 = vsmask.f32 7424  ;;  %s721_s11 = smul.u32 3, %s959_s15 }
  0x12   : > { %s275_s6 = sadd.s32 %s690_s30, %s689_s5  ;;  %308 = vst.msk [vmem:[#allocation2] sm:$0xff] %vm307_vm1, %v805_v8  ;;  %vm426_vm5 = vsmask.f32 5376  ;;  %s722_s12 = smul.u32 12, %s957_s16  ;;  %vm310_vm6 = vcmask 27648   ;;  %vm546_vm7 = vcmask 25600  }
  0x13   : > { %s691_s7 = sshll.u32 %s275_s6, 2  ;;  %309 = vst.msk [vmem:[#allocation2 + $0x8] sm:$0xff] %vm307_vm1, %v805_v8  ;;  %v764_v62 = vld [vmem:[%s943_s2] ss:$0 sm:$0xff] }
  0x14   : > { %s882_s10 = scalar_lea.vmem %s941_s0, %s691_s7  ;;  %s901_s13 = sadd.s32 %s722_s12, %s721_s11  ;;  %311 = vst.msk [vmem:[#allocation2 + $0x10] sm:$0xf] %vm310_vm6, %v805_v8 }
  0x15   : > { %v715_v9 = vld [vmem:[%s882_s10] sm:$0xff]  ;;  %v706_v11 = vld [vmem:[%s882_s10 + $0x8] sm:$0xf]  ;;  %v716_v12 = vld [vmem:[%s882_s10 + $0x8] sm:$0x10]  ;;  %s692_s14 = sshll.u32 %s901_s13, 2 }
  0x16   : > { %v411_v10 = vld [vmem:[%s882_s10 + $0x4] sm:$0xf]  ;;  %v474_v14 = vld [vmem:[%s882_s10] sm:$0x8]  ;;  %v359_v15 = vld [vmem:[%s882_s10 + $0x8] sm:$0x7]  ;;  %698 = vmatmul.msk.bf16.vlgmr.msra.gmra.mxu0 %vm327_vm2, %v715_v9  ;;  %v707_v17 = vor.u32 %v716_v12, %v706_v11  ;;  %s911_s22 = scalar_lea.vmem %s944_s3, %s692_s14  ;;  %s301_s27 = scalar_lea.vmem %s945_s4, %s692_s14 }
  0x17   : > { %v421_v13 = vunpack.c.l.b16 %v411_v10  ;;  %v368_v16 = vshll.u32 %v715_v9, 16  ;;  %v478_v18 = vunpack.c.l.b16 %v474_v14  ;;  %v363_v19 = vunpack.c.l.b16 %v359_v15  ;;  %v410_v20 = vld [vmem:[%s882_s10] sm:$0xc]  ;;  %v317_v37 = vld [vmem:[%s882_s10 + $0x8] sm:$0x3] }
  0x18   : > { %v366_v21 = vshrl.u32 %v715_v9, 16  ;;  %v420_v22 = vunpack.c.l.b16 %v410_v20  ;;  %v482_v24 = vrot.slane %v707_v17, 3  ;;  %v436_v28 = vshrl.u32 %v707_v17, 16  ;;  %v718_v60 = vld [vmem:[%s911_s22] sm:$0xff]  }
  0x19   : > { %v479_v23 = vpack.c.b16 %v421_v13, %v478_v18  ;;  %v364_v25 = vpack.c.b16 %v363_v19, %v363_v19  ;;  %v370_v26 = vrot.slane %v368_v16, 1  ;;  %v439_v29 = vshll.u32 %v707_v17, 16  ;;  %v312_v51 = vld [vmem:[#allocation2] sm:$0xff] }
  0x1a   : > { %v424_v27 = vpack.c.b16 %v421_v13, %v420_v22  ;;  %v438_v35 = vrot.slane %v436_v28, 2  ;;  %v324_v44 = vunpack.c.l.b16 %v317_v37  ;;  %v313_v63 = vld [vmem:[#allocation2 + $0x8] sm:$0xff]  ;;  %v719_v1 = vunpack.c.l.bf16 %v718_v60 }
  0x1b   : > { %v481_v30 = vrot.slane %v479_v23, 3  ;;  %v371_v31 = vor.u32 %v370_v26, %v366_v21  ;;  %v373_v32 = vshll.u32 %v364_v25, 16  ;;  %v441_v36 = vrot.slane %v439_v29, 3  ;;  %v314_v5 = vld [vmem:[#allocation2 + $0x10] sm:$0xf] }
  0x1c   : > { %v428_v33 = vshrl.u32 %v424_v27, 16  ;;  %v431_v34 = vshll.u32 %v424_v27, 16  ;;  %v326_v47 = vpack.c.b16 %v324_v44, %v324_v44  ;;  %v377_v48 = vshrl.u32 %v364_v25, 16  ;;  %v531_v23 = vld [vmem:[%s911_s22 + $0x8] sm:$0x3] }
  0x1d   : > { %v483_v38 = vsel %vm480_vm3, %v481_v30, %v482_v24  ;;  %v375_v39 = vrot.slane %v373_v32, 1  ;;  %v442_v42 = vor.u32 %v441_v36, %v438_v35  ;;  %v720_v16 = vunpack.c.h.bf16 %v718_v60 }
  0x1e   : > { %711 = vmatmul.msk.bf16.vlgmr.msra.gmra.mxu3 %vm327_vm2, %v483_v38  ;;  %v430_v40 = vrot.slane %v428_v33, 2  ;;  %v433_v41 = vrot.slane %v431_v34, 3  ;;  %v534_v28 = vunpack.c.l.bf16 %v531_v23 }
  0x1f   : > { %v376_v43 = vsel %vm365_vm4, %v371_v31, %v375_v39  ;;  %v379_v49 = vor.u32 %v377_v48, %v375_v39 }
  0x20   : > { %701 = vmatmul.msk.bf16.vlgmr.msra.gmra.mxu1 %vm327_vm2, %v376_v43  ;;  %v434_v45 = vor.u32 %v433_v41, %v430_v40 }
  0x22   : > { %v443_v46 = vsel %vm426_vm5, %v434_v45, %v442_v42 }
  0x23   : > { %708 = vmatmul.msk.bf16.vlgmr.msra.gmra.mxu2 %vm327_vm2, %v443_v46 }
  0x26   : > { %699 = vmatmul.msk.bf16.gmra.mxu0 %vm327_vm2, %v326_v47 }
  0x2e   : > { %712 = vmatmul.msk.bf16.gmra.mxu3 %vm327_vm2, %v482_v24 }
  0x30   : > { %702 = vmatmul.msk.bf16.gmra.mxu1 %vm327_vm2, %v379_v49 }
  0x33   : > { %709 = vmatmul.msk.bf16.gmra.mxu2 %vm327_vm2, %v442_v42 }
  0x93   : > { %v347_v50 = vpop.f32.mrf.mxu0 }
  0x94   : > { %v356_v54 = vadd.f32 %v347_v50, %v312_v51 }
  0x9b   : > { %v349_v52 = vpop.f32.mrf.mxu0 }
  0x9c   : > { %v357_v3 = vadd.f32 %v349_v52, %v313_v63 }
  0x9d   : > { %v398_v53 = vpop.f32.mrf.mxu1 }
  0x9e   : > { %v407_v56 = vadd.f32 %v398_v53, %v356_v54 }
  0xa1   : > { %v502_v55 = vpop.f32.mrf.mxu3 }
  0xa3   : > { %v352_v57 = vpop.f32.mrf.mxu0 }
  0xa4   : > { %v358_v12 = vadd.f32 %v352_v57, %v314_v5 }
  0xa5   : > { %v400_v58 = vpop.f32.mrf.mxu1 }
  0xa6   : > { %v462_v59 = vpop.f32.mrf.mxu2  ;;  %v408_v7 = vadd.f32 %v400_v58, %v357_v3 }
  0xa7   : > { %v471_v61 = vadd.f32 %v462_v59, %v407_v56 }
  0xa9   : > { %v511_v0 = vadd.f32 %v502_v55, %v471_v61  ;;  %v504_v2 = vpop.f32.mrf.mxu3 }
  0xab   : > { %515 = vst.msk [vmem:[#allocation2] sm:$0xff] %vm307_vm1, %v511_v0  ;;  %v526_v4 = vadd.f32 %v764_v62, %v511_v0  ;;  %v354_v6 = vpop.f32.mrf.mxu0 }
  0xad   : > { %v535_v8 = vadd.f32 %v719_v1, %v526_v4  ;;  %v403_v9 = vpop.f32.mrf.mxu1 }
  0xae   : > { %v464_v10 = vpop.f32.mrf.mxu2  ;;  %v409_v18 = vadd.f32 %v403_v9, %v358_v12 }
  0xaf   : > { %v538_v11 = vmax.f32 %v535_v8, 0.0  ;;  %v472_v13 = vadd.f32 %v464_v10, %v408_v7 }
  0xb1   : > { %v541_v14 = vpack.c.bf16 %v538_v11, %v538_v11  ;;  %v512_v15 = vadd.f32 %v504_v2, %v472_v13  ;;  %v507_v17 = vpop.f32.mrf.mxu3 }
  0xb3   : > { %544 = vst.msk [vmem:[%s301_s27] sm:$0xf] %vm310_vm6, %v541_v14  ;;  %v527_v19 = vadd.f32 %v764_v62, %v512_v15 }
  0xb4   : > { %516 = vst.msk [vmem:[#allocation2 + $0x8] sm:$0xff] %vm307_vm1, %v512_v15 }
  0xb5   : > { %v536_v20 = vadd.f32 %v720_v16, %v527_v19  ;;  %v405_v21 = vpop.f32.mrf.mxu1 }
  0xb6   : > { %v467_v22 = vpop.f32.mrf.mxu2 }
  0xb7   : > { %v539_v24 = vmax.f32 %v536_v20, 0.0  ;;  %v473_v25 = vadd.f32 %v467_v22, %v409_v18 }
  0xb9   : > { %v542_v26 = vpack.c.bf16 %v539_v24, %v539_v24  ;;  %v513_v27 = vadd.f32 %v507_v17, %v473_v25  ;;  %v509_v29 = vpop.f32.mrf.mxu3 }
  0xbb   : > { %545 = vst.msk [vmem:[%s301_s27 + $0x4] sm:$0xf] %vm310_vm6, %v542_v26  ;;  %v528_v30 = vadd.f32 %v764_v62, %v513_v27 }
  0xbc   : > { %518 = vst.msk [vmem:[#allocation2 + $0x10] sm:$0xf] %vm310_vm6, %v513_v27 }
  0xbd   : > { %v537_v31 = vadd.f32 %v534_v28, %v528_v30 }
  0xbe   : > { %v469_v32 = vpop.f32.mrf.mxu2 }
  0xbf   : > { %v540_v33 = vmax.f32 %v537_v31, 0.0 }
  0xc1   : > { %v543_v34 = vpack.c.bf16 %v540_v33, %v540_v33 }
  0xc3   : > { %547 = vst.msk [vmem:[%s301_s27 + $0x8] sm:$0x3] %vm546_vm7, %v543_v34 }
  0xc4 PF: > { %s14_s19 = sadd.s32 1, %s803_s19   ;;  %s946_s15 = smov %s795_s17 }
  0xc5   : > { %p11_p7 = scmp.ge.s32.totalorder %s14_s19, 10   ;;  %s947_s16 = smov %s799_s18 }
  0xc6   : > { %s948_s17 = smov %s951_s20  ;;  %s949_s18 = smov %s955_s21 }
  0xc7   :  { %13 = sbr.rel (!%p11_p7) target bundleno = 3 (0x3), region = 83 }

// kernel: hourglass_forward.40
= control target key start
LH: loop header
LB: loop body
LE: loop exit
PB: predicated region body
PF: predicated region fallthrough
CT: control target
= control target key end

     0   :  { %s670_s15 = smov 0   ;;  %s672_s16 = smov 0   ;;  %s764_s0 = inlined_call_operand.vmem [shape: bf16[2,5,16,8], index: 0, kind: input, shape index: {}]   ;;  %s765_s1 = inlined_call_operand.vmem [shape: bf16[2,1,8,4], index: 1, kind: input, shape index: {}]   ;;  %s766_s2 = inlined_call_operand.vmem [shape: f32[1,4], index: 2, kind: input, shape index: {}]   ;;  %s767_s3 = inlined_call_operand.vmem [shape: bf16[2,4,16,4], index: 3, kind: input, shape index: {}]   ;;  %s768_s4 = inlined_call_operand.vmem [shape: bf16[2,4,16,4], index: 4, kind: output, shape index: {}]  }
   0x1   :  { %s674_s17 = smov 0   ;;  %s676_s18 = smov 0  }
   0x2   :  { %s678_s19 = smov 0   ;;  %s680_s20 = smov 0  }
   0x3   :  { %s682_s21 = smov 0  }
   0x4 LB: > { %s26_s22 = sadd.s32 1, %s630_s18  ;;  %s29_s23 = sadd.s32 1, %s634_s19  ;;  %s642_s21 = sphi %s682_s21, %s14_s21   ;;  %s638_s20 = sphi %s680_s20, %s778_s20   ;;  %s634_s19 = sphi %s678_s19, %s777_s19   ;;  %s630_s18 = sphi %s676_s18, %s776_s18   ;;  %s626_s17 = sphi %s674_s17, %s775_s17   ;;  %s622_s16 = sphi %s672_s16, %s774_s16   ;;  %s618_s15 = sphi %s670_s15, %s773_s15  }
   0x5   : > { %p27_p0 = scmp.ge.s32.totalorder %s26_s22, 2  ;;  %p505_p1 = scmp.ge.s32.totalorder %s642_s21, 1 }
   0x6   : > { %p218_p2 = scmp.lt.s32.totalorder %s642_s21, 17  ;;  %s33_s24 = sadd.s32 1, %s638_s20 }
   0x7   : > { %s780_s22 = smov (%p27_p0, %s26_s22), 0  ;;  %s782_s23 = smov (!%p27_p0, %s29_s23), %s634_s19 }
   0x8   : > { %p219_p3 = pnand %p505_p1, %p218_p2  ;;  %p31_p4 = scmp.ge.s32.totalorder %s782_s23, 4 }
   0x9   : > { %s266_s25 = sadd.s32 (!%p219_p3), %s618_s15, %s622_s16  ;;  %p267_p6 = scmp.lt.s32.totalorder (!%p219_p3), %s626_s17, 1 }
   0xa   : > { %s784_s23 = smov (%p31_p4, %s782_s23), 0  ;;  %s786_s24 = smov (!%p31_p4, %s33_s24), %s638_s20 }
   0xb   : > { %769 = sst [smem:[#allocation3_spill]] %s784_s23  ;;  %p35_p5 = scmp.ge.s32.totalorder %s786_s24, 2 }
   0xc   : > { %222 = sbr.rel (%p219_p3) target bundleno = 187 (0xbb), region = 36  ;;  %p269_p7 = scmp.lt.s32.totalorder (!%p219_p3), %s266_s25, 4 }
   0xd   : > { %s788_s24 = smov (%p35_p5, %s786_s24), 0  ;;  %p277_p8 = scmp.lt.s32.totalorder (!%p219_p3), %s618_s15, 1 }
   0xe   : > { %770 = sst [smem:[#allocation4_spill]] %s788_s24  ;;  %p283_p9 = scmp.lt.s32.totalorder (!%p219_p3), %s622_s16, 3 }
   0xf   : > { %p515_p10 = scmp.ne.s32.totalorder (!%p219_p3), %s618_s15, 0 }
  0x11   : > { %s790_s17 = smov (!%p267_p6, %s626_s17), 1  ;;  %s792_s25 = smov (!%p269_p7, %s266_s25), 4 }
  0x12   : > { %s529_s26 = smul.u32 10, %s790_s17  ;;  %s506_s27 = sshll.u32 %s792_s25, 1 }
  0x13   : > { %s510_s7 = sshll.u32 %s790_s17, 3  ;;  %s794_s16 = smov (!%p283_p9, %s622_s16), 3 }
  0x14   : > { %s273_s28 = sadd.s32 %s529_s26, %s506_s27  ;;  %s509_s13 = sshll.u32 %s794_s16, 1 }
  0x15   : > { %s507_s29 = sshll.u32 %s273_s28, 2  ;;  %s287_s14 = sadd.s32 %s510_s7, %s509_s13 }
  0x16   : > { %s275_s6 = scalar_lea.vmem %s764_s0, %s507_s29  ;;  %s511_s24 = sshll.u32 %s287_s14, 2 }
  0x17   : > { %s278_s8 = scalar_select %p277_p8, %s618_s15, 1 }
  0x18   : > { %s289_s26 = scalar_lea.vmem %s767_s3, %s511_s24  ;;  %s734_s30 = scalar_lea.vmem %s768_s4, %s511_s24 }
  0x19   : > { %s508_s9 = sshll.u32 %s278_s8, 2  ;;  %303 = sbr.rel (%p515_p10) target bundleno = 33 (0x21), region = 40 }
  0x1a   : > { %s280_s12 = scalar_lea.vmem %s765_s1, %s508_s9 }
  0x1e   : > { %vm304_vm0 = vcmask 31744   ;;  %v644_v0 = vmov 0.0  }
  0x1f   : > { %305 = vst.msk [vmem:[#allocation2] sm:$0xff] %vm304_vm0, %v644_v0 }
  0x20   : > { %306 = vst.msk [vmem:[#allocation2 + $0x8] sm:$0xff] %vm304_vm0, %v644_v0 }
  0x21 PF: > { %v311_v1 = vld [vmem:[%s280_s12] sm:$0xf]  ;;  %vm321_vm1 = vcmask 1043456   ;;  %vm317_vm2 = vcmask 64512   ;;  %vm341_vm3 = vcmask 31744   ;;  %p521_p11 = scmp.ne.s32.totalorder %s618_s15, 1 }
  0x22   : > { %v323_v2 = vsel %vm321_vm1, %v311_v1, 0  ;;  %v524_v3 = vld [vmem:[%s275_s6] sm:$0xff] }
  0x23   : > { %332 = vmatpush.bf16.msra.mxu0 %v323_v2 }
  0x26   : > { %520 = vmatmul.msk.bf16.vlgmr.msra.gmra.mxu0 %vm317_vm2, %v524_v3  ;;  %v307_v4 = vld [vmem:[#allocation2] sm:$0xff] }
  0x27   : > { %v308_v7 = vld [vmem:[#allocation2 + $0x8] sm:$0xff] }
  0xa3   : > { %v334_v5 = vpop.f32.mrf.mxu0 }
  0xa4   : > { %v339_v6 = vadd.f32 %v334_v5, %v307_v4 }
  0xa6   : > { %342 = vst.msk [vmem:[#allocation2] sm:$0xff] %vm341_vm3, %v339_v6 }
  0xaa   : > { %347 = sbr.rel (%p521_p11) target bundleno = 187 (0xbb), region = 44 }
  0xab   : > { %v336_v8 = vpop.f32.mrf.mxu0 }
  0xac   : > { %v340_v9 = vadd.f32 %v336_v8, %v308_v7 }
  0xae   : > { %343 = vst.msk [vmem:[#allocation2 + $0x8] sm:$0xff] %vm341_vm3, %v340_v9 }
  0xaf   : > { %v587_v10 = vld [vmem:[%s766_s2] ss:$0 sm:$0xff]  ;;  %vm364_vm4 = vcmask 27648  }
  0xb0   : > { %v526_v11 = vld [vmem:[%s289_s26] sm:$0xff]   ;;  %v352_v14 = vadd.f32 %v587_v10, %v339_v6  ;;  %v353_v15 = vadd.f32 %v587_v10, %v340_v9 }
  0xb1   : > { %v527_v12 = vunpack.c.l.bf16 %v526_v11  ;;  %v528_v13 = vunpack.c.h.bf16 %v526_v11 }
  0xb3   : > { %v358_v16 = vadd.f32 %v527_v12, %v352_v14  ;;  %v359_v17 = vadd.f32 %v528_v13, %v353_v15 }
  0xb5   : > { %v360_v18 = vmax.f32 %v358_v16, 0.0  ;;  %v361_v19 = vmax.f32 %v359_v17, 0.0 }
  0xb7   : > { %v362_v20 = vpack.c.bf16 %v360_v18, %v360_v18  ;;  %v363_v21 = vpack.c.bf16 %v361_v19, %v361_v19 }
  0xb9   : > { %365 = vst.msk [vmem:[%s734_s30] sm:$0xf] %vm364_vm4, %v362_v20 }
  0xba   : > { %366 = vst.msk [vmem:[%s734_s30 + $0x4] sm:$0xf] %vm364_vm4, %v363_v21 }
  0xbb PF: > { %s14_s21 = sadd.s32 1, %s642_s21   ;;  %s771_s23 = sld [smem:[#allocation3_spill]] }
  0xbc   : > { %p11_p12 = scmp.ge.s32.totalorder %s14_s21, 18   ;;  %s772_s24 = sld [smem:[#allocation4_spill]] }
  0xbd   : > { %s773_s15 = smov %s630_s18  ;;  %s774_s16 = smov %s634_s19 }
  0xbe   : > { %s775_s17 = smov %s638_s20  ;;  %s776_s18 = smov %s780_s22 }
  0xbf   :  { %13 = sbr.rel (!%p11_p12) target bundleno = 4 (0x4), region = 80 }
  0xc1   : > { %s777_s19 = smov %s771_s23 }
  0xc2   : > { %s778_s20 = smov %s772_s24 }

// kernel: hourglass_forward.41
= control target key start
LH: loop header
LB: loop body
LE: loop exit
PB: predicated region body
PF: predicated region fallthrough
CT: control target
= control target key end

     0   :  { %s754_s15 = smov 0   ;;  %s756_s16 = smov 0   ;;  %s862_s0 = inlined_call_operand.vmem [shape: bf16[2,5,21,8], index: 0, kind: input, shape index: {}]   ;;  %s863_s1 = inlined_call_operand.vmem [shape: bf16[2,2,8,4], index: 1, kind: input, shape index: {}]   ;;  %s864_s2 = inlined_call_operand.vmem [shape: f32[1,4], index: 2, kind: input, shape index: {}]   ;;  %s865_s3 = inlined_call_operand.vmem [shape: bf16[2,4,20,4], index: 3, kind: input, shape index: {}]   ;;  %s866_s4 = inlined_call_operand.vmem [shape: bf16[2,4,20,4], index: 4, kind: output, shape index: {}]  }
   0x1   :  { %s758_s17 = smov 0   ;;  %s760_s18 = smov 0  }
   0x2   :  { %s762_s19 = smov 0   ;;  %s764_s20 = smov 0  }
   0x3   :  { %s766_s21 = smov 0  }
   0x4 LB: > { %s26_s22 = sadd.s32 1, %s714_s18  ;;  %s29_s23 = sadd.s32 1, %s718_s19  ;;  %s726_s21 = sphi %s766_s21, %s14_s21   ;;  %s722_s20 = sphi %s764_s20, %s878_s20   ;;  %s718_s19 = sphi %s762_s19, %s877_s19   ;;  %s714_s18 = sphi %s760_s18, %s876_s18   ;;  %s710_s17 = sphi %s758_s17, %s875_s17   ;;  %s706_s16 = sphi %s756_s16, %s874_s16   ;;  %s702_s15 = sphi %s754_s15, %s873_s15  }
   0x5   : > { %p27_p0 = scmp.ge.s32.totalorder %s26_s22, 2  ;;  %p583_p1 = scmp.ge.s32.totalorder %s726_s21, 1 }
   0x6   : > { %p219_p2 = scmp.lt.s32.totalorder %s726_s21, 17  ;;  %s33_s24 = sadd.s32 1, %s722_s20 }
   0x7   : > { %s880_s22 = smov (%p27_p0, %s26_s22), 0  ;;  %s882_s23 = smov (!%p27_p0, %s29_s23), %s718_s19 }
   0x8   : > { %867 = sst [smem:[#allocation3_spill]] %s880_s22  ;;  %p220_p3 = pnand %p583_p1, %p219_p2 }
   0x9   : > { %p31_p4 = scmp.ge.s32.totalorder %s882_s23, 4  ;;  %s268_s25 = sadd.s32 (!%p220_p3), %s702_s15, %s706_s16 }
   0xa   : > { %p269_p6 = scmp.lt.s32.totalorder (!%p220_p3), %s710_s17, 1  ;;  %p271_p7 = scmp.lt.s32.totalorder (!%p220_p3), %s268_s25, 4 }
   0xb   : > { %s884_s23 = smov (%p31_p4, %s882_s23), 0  ;;  %s886_s24 = smov (!%p31_p4, %s33_s24), %s722_s20 }
   0xc   : > { %868 = sst [smem:[#allocation4_spill]] %s884_s23  ;;  %p35_p5 = scmp.ge.s32.totalorder %s886_s24, 2 }
   0xd   : > { %223 = sbr.rel (%p220_p3) target bundleno = 199 (0xc7), region = 36  ;;  %p279_p8 = scmp.lt.s32.totalorder (!%p220_p3), %s702_s15, 1 }
   0xe   : > { %s888_s24 = smov (%p35_p5, %s886_s24), 0  ;;  %p286_p9 = scmp.lt.s32.totalorder (!%p220_p3), %s706_s16, 3 }
   0xf   : > { %869 = sst [smem:[#allocation5_spill]] %s888_s24  ;;  %p589_p10 = scmp.ne.s32.totalorder (!%p220_p3), %s702_s15, 0 }
  0x12   : > { %s890_s17 = smov (!%p269_p6, %s710_s17), 1  ;;  %s892_s25 = smov (!%p271_p7, %s268_s25), 4 }
  0x13   : > { %s611_s26 = smul.u32 15, %s890_s17  ;;  %s894_s16 = smov (!%p286_p9, %s706_s16), 3 }
  0x14   : > { %s610_s27 = smul.u32 3, %s892_s25 }
  0x15   : > { %s280_s28 = scalar_select %p279_p8, %s702_s15, 1 }
  0x16   : > { %s275_s29 = sadd.s32 %s611_s26, %s610_s27  ;;  %s613_s30 = smul.u32 12, %s890_s17 }
  0x17   : > { %s584_s5 = sshll.u32 %s275_s29, 2  ;;  %s602_s6 = sshll.u32 %s280_s28, 3 }
  0x18   : > { %s277_s9 = scalar_lea.vmem %s862_s0, %s584_s5  ;;  %s283_s12 = scalar_lea.vmem %s863_s1, %s602_s6 }
  0x19   : > { %s612_s13 = smul.u32 3, %s894_s16 }
  0x1a   : > { %306 = sbr.rel (%p589_p10) target bundleno = 35 (0x23), region = 40 }
  0x1b   : > { %s290_s14 = sadd.s32 %s613_s30, %s612_s13 }
  0x1c   : > { %s587_s24 = sshll.u32 %s290_s14, 2 }
  0x1d   : > { %s815_s22 = scalar_lea.vmem %s865_s3, %s587_s24  ;;  %s820_s27 = scalar_lea.vmem %s866_s4, %s587_s24 }
  0x1f   : > { %vm307_vm0 = vcmask 31744   ;;  %vm310_vm1 = vcmask 27648   ;;  %v728_v0 = vmov 0.0  }
  0x20   : > { %308 = vst.msk [vmem:[#allocation2] sm:$0xff] %vm307_vm0, %v728_v0 }
  0x21   : > { %309 = vst.msk [vmem:[#allocation2 + $0x8] sm:$0xff] %vm307_vm0, %v728_v0 }
  0x22   : > { %311 = vst.msk [vmem:[#allocation2 + $0x10] sm:$0xf] %vm310_vm1, %v728_v0 }
  0x23 PF: > { %v318_v1 = vld [vmem:[%s283_s12] sm:$0xf]  ;;  %vm334_vm2 = vcmask 1043456   ;;  %v317_v4 = vld [vmem:[%s277_s9 + $0x8] sm:$0x3]  ;;  %vm327_vm3 = vcmask 64512  }
  0x24   : > { %v603_v2 = vld [vmem:[%s277_s9] sm:$0xff]  ;;  %v336_v3 = vsel %vm334_vm2, %v318_v1, 0  ;;  %v324_v7 = vunpack.c.l.b16 %v317_v4  ;;  %v359_v9 = vld [vmem:[%s277_s9 + $0x8] sm:$0x7]  ;;  %vm365_vm4 = vsmask.f32 7424 }
  0x25   : > { %v596_v5 = vld [vmem:[%s283_s12 + $0x4] sm:$0xf]  ;;  %345 = vmatpush.bf16.msra.mxu0 %v336_v3  ;;  %608 = vmatpush.bf16.msra.mxu2 %v336_v3  ;;  %v368_v6 = vshll.u32 %v603_v2, 16  ;;  %v363_v10 = vunpack.c.l.b16 %v359_v9  ;;  %v366_v11 = vshrl.u32 %v603_v2, 16  ;;  %vm410_vm5 = vcmask 31744   ;;  %p599_p11 = scmp.ne.s32.totalorder %s702_s15, 1 }
  0x26   : > { %v387_v8 = vsel %vm334_vm2, %v596_v5, 0  ;;  %v326_v12 = vpack.c.b16 %v324_v7, %v324_v7  ;;  %vm413_vm6 = vcmask 27648  }
  0x27   : > { %396 = vmatpush.bf16.msra.mxu1 %v387_v8  ;;  %609 = vmatpush.bf16.msra.mxu3 %v387_v8  ;;  %v370_v13 = vrot.slane %v368_v6, 1  ;;  %v364_v14 = vpack.c.b16 %v363_v10, %v363_v10  ;;  %v312_v21 = vld [vmem:[#allocation2] sm:$0xff] }
  0x28   : > { %594 = vmatmul.msk.bf16.vlgmr.msra.gmra.mxu0 %vm327_vm3, %v603_v2  ;;  %595 = vmatmul.msk.bf16.vlgmr.msra.gmra.mxu2 %vm327_vm3, %v326_v12  ;;  %v313_v29 = vld [vmem:[#allocation2 + $0x8] sm:$0xff] }
  0x29   : > { %v371_v15 = vor.u32 %v370_v13, %v366_v11  ;;  %v373_v16 = vshll.u32 %v364_v14, 16  ;;  %v377_v17 = vshrl.u32 %v364_v14, 16  ;;  %v314_v27 = vld [vmem:[#allocation2 + $0x10] sm:$0xf] }
  0x2b   : > { %v375_v18 = vrot.slane %v373_v16, 1 }
  0x2d   : > { %v376_v19 = vsel %vm365_vm4, %v371_v15, %v375_v18  ;;  %v379_v20 = vor.u32 %v377_v17, %v375_v18 }
  0x2e   : > { %597 = vmatmul.msk.bf16.vlgmr.msra.gmra.mxu1 %vm327_vm3, %v376_v19 }
  0x2f   : > { %598 = vmatmul.msk.bf16.vlgmr.msra.gmra.mxu3 %vm327_vm3, %v379_v20 }
  0xa5   : > { %v347_v22 = vpop.f32.mrf.mxu0 }
  0xa6   : > { %v356_v23 = vadd.f32 %v347_v22, %v312_v21 }
  0xab   : > { %v398_v24 = vpop.f32.mrf.mxu1  ;;  %v352_v25 = vpop.f32.mrf.mxu2 }
  0xac   : > { %v407_v26 = vadd.f32 %v398_v24, %v356_v23  ;;  %v358_v28 = vadd.f32 %v352_v25, %v314_v27 }
  0xad   : > { %v349_v30 = vpop.f32.mrf.mxu0 }
  0xae   : > { %411 = vst.msk [vmem:[#allocation2] sm:$0xff] %vm410_vm5, %v407_v26  ;;  %v357_v31 = vadd.f32 %v349_v30, %v313_v29 }
  0xb2   : > { %v403_v32 = vpop.f32.mrf.mxu3 }
  0xb3   : > { %v409_v33 = vadd.f32 %v403_v32, %v358_v28  ;;  %v400_v34 = vpop.f32.mrf.mxu1  ;;  %v354_v35 = vpop.f32.mrf.mxu2 }
  0xb4   : > { %v408_v36 = vadd.f32 %v400_v34, %v357_v31 }
  0xb5   : > { %414 = vst.msk [vmem:[#allocation2 + $0x10] sm:$0xf] %vm413_vm6, %v409_v33 }
  0xb6   : > { %412 = vst.msk [vmem:[#allocation2 + $0x8] sm:$0xff] %vm410_vm5, %v408_v36  ;;  %418 = sbr.rel (%p599_p11) target bundleno = 199 (0xc7), region = 44 }
  0xba   : > { %v405_v37 = vpop.f32.mrf.mxu3 }
  0xbb   : > { %v671_v38 = vld [vmem:[%s864_s2] ss:$0 sm:$0xff]  ;;  %v428_v42 = vld [vmem:[%s815_s22 + $0x8] sm:$0x3]  ;;  %vm443_vm7 = vcmask 25600  }
  0xbc   : > { %v605_v39 = vld [vmem:[%s815_s22] sm:$0xff]   ;;  %v423_v43 = vadd.f32 %v671_v38, %v407_v26  ;;  %v424_v44 = vadd.f32 %v671_v38, %v408_v36  ;;  %v425_v45 = vadd.f32 %v671_v38, %v409_v33  ;;  %v431_v46 = vunpack.c.l.bf16 %v428_v42 }
  0xbd   : > { %v606_v40 = vunpack.c.l.bf16 %v605_v39  ;;  %v607_v41 = vunpack.c.h.bf16 %v605_v39 }
  0xbe   : > { %v434_v49 = vadd.f32 %v431_v46, %v425_v45 }
  0xbf   : > { %v432_v47 = vadd.f32 %v606_v40, %v423_v43  ;;  %v433_v48 = vadd.f32 %v607_v41, %v424_v44 }
  0xc0   : > { %v437_v52 = vmax.f32 %v434_v49, 0.0 }
  0xc1   : > { %v435_v50 = vmax.f32 %v432_v47, 0.0  ;;  %v436_v51 = vmax.f32 %v433_v48, 0.0 }
  0xc2   : > { %v440_v55 = vpack.c.bf16 %v437_v52, %v437_v52 }
  0xc3   : > { %v438_v53 = vpack.c.bf16 %v435_v50, %v435_v50  ;;  %v439_v54 = vpack.c.bf16 %v436_v51, %v436_v51 }
  0xc4   : > { %444 = vst.msk [vmem:[%s820_s27 + $0x8] sm:$0x3] %vm443_vm7, %v440_v55 }
  0xc5   : > { %441 = vst.msk [vmem:[%s820_s27] sm:$0xf] %vm413_vm6, %v438_v53 }
  0xc6   : > { %442 = vst.msk [vmem:[%s820_s27 + $0x4] sm:$0xf] %vm413_vm6, %v439_v54 }
  0xc7 PF: > { %s14_s21 = sadd.s32 1, %s726_s21   ;;  %s870_s22 = sld [smem:[#allocation3_spill]] }
  0xc8   : > { %p11_p12 = scmp.ge.s32.totalorder %s14_s21, 18   ;;  %s871_s24 = sld [smem:[#allocation4_spill]] }
  0xc9   : > { %s872_s28 = sld [smem:[#allocation5_spill]]  ;;  %s873_s15 = smov %s714_s18 }
  0xca   : > { %s874_s16 = smov %s718_s19  ;;  %s875_s17 = smov %s722_s20 }
  0xcb   :  { %13 = sbr.rel (!%p11_p12) target bundleno = 4 (0x4), region = 81 }
  0xcd   : > { %s876_s18 = smov %s870_s22 }
  0xce   : > { %s877_s19 = smov %s871_s24 }
  0xcf   : > { %s878_s20 = smov %s872_s28 }

// kernel: hourglass_forward.42
= control target key start
LH: loop header
LB: loop body
LE: loop exit
PB: predicated region body
PF: predicated region fallthrough
CT: control target
= control target key end

     0   :  { %s721_s15 = smov 0   ;;  %s723_s16 = smov 0   ;;  %s818_s0 = inlined_call_operand.vmem [shape: bf16[2,5,20,8], index: 0, kind: input, shape index: {}]   ;;  %s819_s1 = inlined_call_operand.vmem [shape: bf16[2,2,8,4], index: 1, kind: input, shape index: {}]   ;;  %s820_s2 = inlined_call_operand.vmem [shape: f32[1,4], index: 2, kind: input, shape index: {}]   ;;  %s821_s3 = inlined_call_operand.vmem [shape: bf16[2,4,16,4], index: 3, kind: input, shape index: {}]   ;;  %s822_s4 = inlined_call_operand.vmem [shape: bf16[2,4,16,4], index: 4, kind: output, shape index: {}]  }
   0x1   :  { %s725_s17 = smov 0   ;;  %s727_s18 = smov 0  }
   0x2   :  { %s729_s19 = smov 0   ;;  %s731_s20 = smov 0  }
   0x3   :  { %s733_s21 = smov 0  }
   0x4 LB: > { %s26_s22 = sadd.s32 1, %s681_s18  ;;  %s29_s23 = sadd.s32 1, %s685_s19  ;;  %s693_s21 = sphi %s733_s21, %s14_s21   ;;  %s689_s20 = sphi %s731_s20, %s834_s20   ;;  %s685_s19 = sphi %s729_s19, %s833_s19   ;;  %s681_s18 = sphi %s727_s18, %s832_s18   ;;  %s677_s17 = sphi %s725_s17, %s831_s17   ;;  %s673_s16 = sphi %s723_s16, %s830_s16   ;;  %s669_s15 = sphi %s721_s15, %s829_s15  }
   0x5   : > { %p27_p0 = scmp.ge.s32.totalorder %s26_s22, 2  ;;  %p547_p1 = scmp.ge.s32.totalorder %s693_s21, 1 }
   0x6   : > { %p219_p2 = scmp.lt.s32.totalorder %s693_s21, 17  ;;  %s33_s24 = sadd.s32 1, %s689_s20 }
   0x7   : > { %s836_s22 = smov (%p27_p0, %s26_s22), 0  ;;  %s838_s23 = smov (!%p27_p0, %s29_s23), %s685_s19 }
   0x8   : > { %823 = sst [smem:[#allocation3_spill]] %s836_s22  ;;  %p220_p3 = pnand %p547_p1, %p219_p2 }
   0x9   : > { %p31_p4 = scmp.ge.s32.totalorder %s838_s23, 4  ;;  %s268_s25 = sadd.s32 (!%p220_p3), %s669_s15, %s673_s16 }
   0xa   : > { %p269_p6 = scmp.lt.s32.totalorder (!%p220_p3), %s677_s17, 1  ;;  %p271_p7 = scmp.lt.s32.totalorder (!%p220_p3), %s268_s25, 4 }
   0xb   : > { %s840_s23 = smov (%p31_p4, %s838_s23), 0  ;;  %s842_s24 = smov (!%p31_p4, %s33_s24), %s689_s20 }
   0xc   : > { %824 = sst [smem:[#allocation4_spill]] %s840_s23  ;;  %p35_p5 = scmp.ge.s32.totalorder %s842_s24, 2 }
   0xd   : > { %223 = sbr.rel (%p220_p3) target bundleno = 191 (0xbf), region = 36  ;;  %p279_p8 = scmp.lt.s32.totalorder (!%p220_p3), %s669_s15, 1 }
   0xe   : > { %s844_s24 = smov (%p35_p5, %s842_s24), 0  ;;  %p286_p9 = scmp.lt.s32.totalorder (!%p220_p3), %s673_s16, 3 }
   0xf   : > { %825 = sst [smem:[#allocation5_spill]] %s844_s24  ;;  %p557_p10 = scmp.ne.s32.totalorder (!%p220_p3), %s669_s15, 0 }
  0x12   : > { %s846_s17 = smov (!%p269_p6, %s677_s17), 1  ;;  %s848_s25 = smov (!%p271_p7, %s268_s25), 4 }
  0x13   : > { %s580_s26 = smul.u32 15, %s846_s17  ;;  %s552_s30 = sshll.u32 %s846_s17, 3 }
  0x14   : > { %s579_s27 = smul.u32 3, %s848_s25  ;;  %s850_s16 = smov (!%p286_p9, %s673_s16), 3 }
  0x15   : > { %s280_s28 = scalar_select %p279_p8, %s669_s15, 1 }
  0x16   : > { %s275_s29 = sadd.s32 %s580_s26, %s579_s27  ;;  %s551_s13 = sshll.u32 %s850_s16, 1 }
  0x17   : > { %s548_s5 = sshll.u32 %s275_s29, 2  ;;  %s572_s6 = sshll.u32 %s280_s28, 3 }
  0x18   : > { %s277_s9 = scalar_lea.vmem %s818_s0, %s548_s5  ;;  %s283_s12 = scalar_lea.vmem %s819_s1, %s572_s6 }
  0x19   : > { %s290_s14 = sadd.s32 %s552_s30, %s551_s13  ;;  %306 = sbr.rel (%p557_p10) target bundleno = 33 (0x21), region = 40 }
  0x1a   : > { %s553_s24 = sshll.u32 %s290_s14, 2 }
  0x1b   : > { %s782_s22 = scalar_lea.vmem %s821_s3, %s553_s24  ;;  %s787_s27 = scalar_lea.vmem %s822_s4, %s553_s24 }
  0x1e   : > { %vm307_vm0 = vcmask 31744   ;;  %v695_v0 = vmov 0.0  }
  0x1f   : > { %308 = vst.msk [vmem:[#allocation2] sm:$0xff] %vm307_vm0, %v695_v0 }
  0x20   : > { %309 = vst.msk [vmem:[#allocation2 + $0x8] sm:$0xff] %vm307_vm0, %v695_v0 }
  0x21 PF: > { %v314_v1 = vld [vmem:[%s283_s12] sm:$0xf]  ;;  %vm324_vm1 = vcmask 1043456   ;;  %v563_v4 = vld [vmem:[%s283_s12 + $0x4] sm:$0xf]  ;;  %vm320_vm2 = vcmask 64512  }
  0x22   : > { %v326_v2 = vsel %vm324_vm1, %v314_v1, 0  ;;  %v573_v3 = vld [vmem:[%s277_s9] sm:$0xff]  ;;  %v365_v6 = vsel %vm324_vm1, %v563_v4, 0  ;;  %v346_v8 = vld [vmem:[%s277_s9 + $0x8] sm:$0x3]  ;;  %vm357_vm3 = vcmask 1045504  }
  0x23   : > { %v566_v5 = vld [vmem:[%s277_s9] sm:$0xc]  ;;  %335 = vmatpush.bf16.msra.mxu0 %v326_v2  ;;  %v574_v7 = vld [vmem:[%s277_s9] sm:$0xf0]  ;;  %374 = vmatpush.bf16.msra.mxu1 %v365_v6  ;;  %v354_v9 = vunpack.c.l.b16 %v346_v8  ;;  %vm383_vm4 = vcmask 31744   ;;  %p569_p11 = scmp.ne.s32.totalorder %s669_s15, 1 }
  0x24   : > { %v567_v10 = vor.u32 %v574_v7, %v566_v5 }
  0x25   : > { %v356_v11 = vpack.c.b16 %v354_v9, %v354_v9 }
  0x26   : > { %562 = vmatmul.msk.bf16.vlgmr.msra.gmra.mxu0 %vm320_vm2, %v573_v3  ;;  %v358_v12 = vrot.slane %v567_v10, 2  ;;  %v310_v15 = vld [vmem:[#allocation2] sm:$0xff] }
  0x27   : > { %v359_v13 = vrot.slane %v356_v11, 2  ;;  %v311_v20 = vld [vmem:[#allocation2 + $0x8] sm:$0xff] }
  0x29   : > { %v360_v14 = vsel %vm357_vm3, %v358_v12, %v359_v13 }
  0x2a   : > { %568 = vmatmul.msk.bf16.vlgmr.msra.gmra.mxu1 %vm320_vm2, %v360_v14 }
  0xa3   : > { %v337_v16 = vpop.f32.mrf.mxu0 }
  0xa4   : > { %v342_v17 = vadd.f32 %v337_v16, %v310_v15 }
  0xa7   : > { %v376_v18 = vpop.f32.mrf.mxu1 }
  0xa8   : > { %v381_v19 = vadd.f32 %v376_v18, %v342_v17 }
  0xaa   : > { %384 = vst.msk [vmem:[#allocation2] sm:$0xff] %vm383_vm4, %v381_v19 }
  0xab   : > { %v339_v21 = vpop.f32.mrf.mxu0 }
  0xac   : > { %v343_v22 = vadd.f32 %v339_v21, %v311_v20 }
  0xae   : > { %389 = sbr.rel (%p569_p11) target bundleno = 191 (0xbf), region = 44 }
  0xaf   : > { %v378_v23 = vpop.f32.mrf.mxu1 }
  0xb0   : > { %v382_v24 = vadd.f32 %v378_v23, %v343_v22 }
  0xb2   : > { %385 = vst.msk [vmem:[#allocation2 + $0x8] sm:$0xff] %vm383_vm4, %v382_v24 }
  0xb3   : > { %v638_v25 = vld [vmem:[%s820_s2] ss:$0 sm:$0xff]  ;;  %vm406_vm5 = vcmask 27648  }
  0xb4   : > { %v576_v26 = vld [vmem:[%s782_s22] sm:$0xff]   ;;  %v394_v29 = vadd.f32 %v638_v25, %v381_v19  ;;  %v395_v30 = vadd.f32 %v638_v25, %v382_v24 }
  0xb5   : > { %v577_v27 = vunpack.c.l.bf16 %v576_v26  ;;  %v578_v28 = vunpack.c.h.bf16 %v576_v26 }
  0xb7   : > { %v400_v31 = vadd.f32 %v577_v27, %v394_v29  ;;  %v401_v32 = vadd.f32 %v578_v28, %v395_v30 }
  0xb9   : > { %v402_v33 = vmax.f32 %v400_v31, 0.0  ;;  %v403_v34 = vmax.f32 %v401_v32, 0.0 }
  0xbb   : > { %v404_v35 = vpack.c.bf16 %v402_v33, %v402_v33  ;;  %v405_v36 = vpack.c.bf16 %v403_v34, %v403_v34 }
  0xbd   : > { %407 = vst.msk [vmem:[%s787_s27] sm:$0xf] %vm406_vm5, %v404_v35 }
  0xbe   : > { %408 = vst.msk [vmem:[%s787_s27 + $0x4] sm:$0xf] %vm406_vm5, %v405_v36 }
  0xbf PF: > { %s14_s21 = sadd.s32 1, %s693_s21   ;;  %s826_s22 = sld [smem:[#allocation3_spill]] }
  0xc0   : > { %p11_p12 = scmp.ge.s32.totalorder %s14_s21, 18   ;;  %s827_s24 = sld [smem:[#allocation4_spill]] }
  0xc1   : > { %s828_s28 = sld [smem:[#allocation5_spill]]  ;;  %s829_s15 = smov %s681_s18 }
  0xc2   : > { %s830_s16 = smov %s685_s19  ;;  %s831_s17 = smov %s689_s20 }
  0xc3   :  { %13 = sbr.rel (!%p11_p12) target bundleno = 4 (0x4), region = 81 }
  0xc5   : > { %s832_s18 = smov %s826_s22 }
  0xc6   : > { %s833_s19 = smov %s827_s24 }
  0xc7   : > { %s834_s20 = smov %s828_s28 }

// kernel: hourglass_forward.43
= control target key start
LH: loop header
LB: loop body
LE: loop exit
PB: predicated region body
PF: predicated region fallthrough
CT: control target
= control target key end

     0   :  { %s867_s15 = smov 0   ;;  %s869_s16 = smov 0   ;;  %s997_s0 = inlined_call_operand.vmem [shape: bf16[2,5,26,8], index: 0, kind: input, shape index: {}]   ;;  %s998_s1 = inlined_call_operand.vmem [shape: bf16[2,4,8,4], index: 1, kind: input, shape index: {}]   ;;  %s999_s2 = inlined_call_operand.vmem [shape: f32[1,4], index: 2, kind: input, shape index: {}]   ;;  %s1000_s3 = inlined_call_operand.vmem [shape: bf16[2,4,20,4], index: 3, kind: input, shape index: {}]   ;;  %s1001_s4 = inlined_call_operand.vmem [shape: bf16[2,4,20,4], index: 4, kind: output, shape index: {}]  }
   0x1   :  { %s871_s17 = smov 0   ;;  %s873_s18 = smov 0  }
   0x2   :  { %s875_s19 = smov 0   ;;  %s877_s20 = smov 0  }
   0x3   :  { %s879_s21 = smov 0  }
   0x4 LB: > { %s26_s22 = sadd.s32 1, %s827_s18  ;;  %s29_s23 = sadd.s32 1, %s831_s19  ;;  %s839_s21 = sphi %s879_s21, %s14_s21   ;;  %s835_s20 = sphi %s877_s20, %s1007_s20   ;;  %s831_s19 = sphi %s875_s19, %s1006_s19   ;;  %s827_s18 = sphi %s873_s18, %s1005_s18   ;;  %s823_s17 = sphi %s871_s17, %s1004_s17   ;;  %s819_s16 = sphi %s869_s16, %s1003_s16   ;;  %s815_s15 = sphi %s867_s15, %s1002_s15  }
   0x5   : > { %p27_p0 = scmp.ge.s32.totalorder %s26_s22, 2  ;;  %p687_p1 = scmp.ge.s32.totalorder %s839_s21, 1 }
   0x6   : > { %p219_p2 = scmp.lt.s32.totalorder %s839_s21, 17  ;;  %s33_s24 = sadd.s32 1, %s835_s20 }
   0x7   : > { %s1009_s22 = smov (%p27_p0, %s26_s22), 0  ;;  %s1011_s23 = smov (!%p27_p0, %s29_s23), %s831_s19 }
   0x8   : > { %p220_p3 = pnand %p687_p1, %p219_p2  ;;  %p31_p4 = scmp.ge.s32.totalorder %s1011_s23, 4 }
   0x9   : > { %s268_s25 = sadd.s32 (!%p220_p3), %s815_s15, %s819_s16  ;;  %p269_p6 = scmp.lt.s32.totalorder (!%p220_p3), %s823_s17, 1 }
   0xa   : > { %s1013_s23 = smov (%p31_p4, %s1011_s23), 0  ;;  %s1015_s24 = smov (!%p31_p4, %s33_s24), %s835_s20 }
   0xb   : > { %p35_p5 = scmp.ge.s32.totalorder %s1015_s24, 2  ;;  %223 = sbr.rel (%p220_p3) target bundleno = 216 (0xd8), region = 36 }
   0xc   : > { %p271_p7 = scmp.lt.s32.totalorder (!%p220_p3), %s268_s25, 4  ;;  %p279_p8 = scmp.lt.s32.totalorder (!%p220_p3), %s815_s15, 1 }
   0xd   : > { %s1017_s24 = smov (%p35_p5, %s1015_s24), 0  ;;  %p286_p9 = scmp.lt.s32.totalorder (!%p220_p3), %s819_s16, 3 }
   0xe   : > { %p694_p10 = scmp.ne.s32.totalorder (!%p220_p3), %s815_s15, 0 }
  0x10   : > { %s1019_s17 = smov (!%p269_p6, %s823_s17), 1  ;;  %s1021_s25 = smov (!%p271_p7, %s268_s25), 4 }
  0x11   : > { %s724_s26 = smul.u32 20, %s1019_s17  ;;  %s688_s27 = sshll.u32 %s1021_s25, 2 }
  0x12   : > { %s726_s7 = smul.u32 12, %s1019_s17  ;;  %s1023_s16 = smov (!%p286_p9, %s819_s16), 3 }
  0x13   : > { %s275_s28 = sadd.s32 %s724_s26, %s688_s27  ;;  %s725_s13 = smul.u32 3, %s1023_s16 }
  0x14   : > { %s689_s29 = sshll.u32 %s275_s28, 2 }
  0x15   : > { %s920_s6 = scalar_lea.vmem %s997_s0, %s689_s29  ;;  %s290_s14 = sadd.s32 %s726_s7, %s725_s13 }
  0x16   : > { %s280_s8 = scalar_select %p279_p8, %s815_s15, 1 }
  0x17   : > { %s692_s25 = sshll.u32 %s290_s14, 2  ;;  %306 = sbr.rel (%p694_p10) target bundleno = 32 (0x20), region = 40 }
  0x18   : > { %s717_s9 = sshll.u32 %s280_s8, 4  ;;  %s932_s28 = scalar_lea.vmem %s1000_s3, %s692_s25 }
  0x19   : > { %s927_s12 = scalar_lea.vmem %s998_s1, %s717_s9  ;;  %s937_s17 = scalar_lea.vmem %s1001_s4, %s692_s25 }
  0x1c   : > { %vm307_vm0 = vcmask 31744   ;;  %vm310_vm1 = vcmask 27648   ;;  %v841_v0 = vmov 0.0  }
  0x1d   : > { %308 = vst.msk [vmem:[#allocation2] sm:$0xff] %vm307_vm0, %v841_v0 }
  0x1e   : > { %309 = vst.msk [vmem:[#allocation2 + $0x8] sm:$0xff] %vm307_vm0, %v841_v0 }
  0x1f   : > { %311 = vst.msk [vmem:[#allocation2 + $0x10] sm:$0xf] %vm310_vm1, %v841_v0 }
  0x20 PF: > { %v318_v1 = vld [vmem:[%s927_s12] sm:$0xf]  ;;  %vm334_vm2 = vcmask 1043456   ;;  %v711_v2 = vld [vmem:[%s927_s12 + $0xc] sm:$0xf]  ;;  %vm327_vm3 = vcmask 64512  }
  0x21   : > { %v718_v3 = vld [vmem:[%s920_s6] sm:$0xff]  ;;  %v336_v4 = vsel %vm334_vm2, %v318_v1, 0  ;;  %v491_v5 = vsel %vm334_vm2, %v711_v2, 0  ;;  %v707_v10 = vld [vmem:[%s920_s6 + $0x8] sm:$0xf]  ;;  %vm480_vm4 = vcmask 1044480  }
  0x22   : > { %v701_v6 = vld [vmem:[%s927_s12 + $0x4] sm:$0xf]  ;;  %345 = vmatpush.bf16.msra.mxu0 %v336_v4  ;;  %500 = vmatpush.bf16.msra.mxu3 %v491_v5  ;;  %v368_v8 = vshll.u32 %v718_v3, 16  ;;  %v719_v11 = vld [vmem:[%s920_s6 + $0x8] sm:$0x10]  ;;  %v366_v20 = vshrl.u32 %v718_v3, 16 }
  0x23   : > { %v387_v7 = vsel %vm334_vm2, %v701_v6, 0  ;;  %v411_v9 = vld [vmem:[%s920_s6 + $0x4] sm:$0xf]  ;;  %v474_v13 = vld [vmem:[%s920_s6] sm:$0x8]  ;;  %v708_v15 = vor.u32 %v719_v11, %v707_v10  ;;  %vm514_vm7 = vcmask 31744  }
  0x24   : > { %396 = vmatpush.bf16.msra.mxu1 %v387_v7  ;;  %v421_v12 = vunpack.c.l.b16 %v411_v9  ;;  %v704_v14 = vld [vmem:[%s927_s12 + $0x8] sm:$0xf]  ;;  %v478_v16 = vunpack.c.l.b16 %v474_v13  ;;  %v370_v21 = vrot.slane %v368_v8, 1  ;;  %v410_v22 = vld [vmem:[%s920_s6] sm:$0xc]  ;;  %vm517_vm8 = vcmask 27648  }
  0x25   : > { %v451_v17 = vsel %vm334_vm2, %v704_v14, 0  ;;  %v359_v18 = vld [vmem:[%s920_s6 + $0x8] sm:$0x7]  ;;  %699 = vmatmul.msk.bf16.vlgmr.msra.gmra.mxu0 %vm327_vm3, %v718_v3  ;;  %v482_v24 = vrot.slane %v708_v15, 3  ;;  %v420_v25 = vunpack.c.l.b16 %v410_v22  ;;  %v436_v26 = vshrl.u32 %v708_v15, 16  ;;  %v312_v51 = vld [vmem:[#allocation2] sm:$0xff] }
  0x26   : > { %460 = vmatpush.bf16.msra.mxu2 %v451_v17  ;;  %v363_v19 = vunpack.c.l.b16 %v359_v18  ;;  %v479_v23 = vpack.c.b16 %v421_v12, %v478_v16  ;;  %v439_v28 = vshll.u32 %v708_v15, 16  ;;  %v371_v32 = vor.u32 %v370_v21, %v366_v20  ;;  %v317_v38 = vld [vmem:[%s920_s6 + $0x8] sm:$0x3]  ;;  %v314_v1 = vld [vmem:[#allocation2 + $0x10] sm:$0xf]  ;;  %p714_p11 = scmp.ne.s32.totalorder %s815_s15, 1 }
  0x27   : > { %v424_v30 = vpack.c.b16 %v421_v12, %v420_v25  ;;  %v438_v31 = vrot.slane %v436_v26, 2  ;;  %vm365_vm5 = vsmask.f32 7424  ;;  %vm426_vm6 = vsmask.f32 5376  ;;  %v313_v59 = vld [vmem:[#allocation2 + $0x8] sm:$0xff] }
  0x28   : > { %v364_v27 = vpack.c.b16 %v363_v19, %v363_v19  ;;  %v481_v29 = vrot.slane %v479_v23, 3  ;;  %v441_v34 = vrot.slane %v439_v28, 3  ;;  %v324_v44 = vunpack.c.l.b16 %v317_v38 }
  0x29   : > { %v428_v36 = vshrl.u32 %v424_v30, 16  ;;  %v431_v37 = vshll.u32 %v424_v30, 16 }
  0x2a   : > { %v373_v33 = vshll.u32 %v364_v27, 16  ;;  %v483_v35 = vsel %vm480_vm4, %v481_v29, %v482_v24  ;;  %v442_v42 = vor.u32 %v441_v34, %v438_v31  ;;  %v326_v47 = vpack.c.b16 %v324_v44, %v324_v44 }
  0x2b   : > { %712 = vmatmul.msk.bf16.vlgmr.msra.gmra.mxu3 %vm327_vm3, %v483_v35  ;;  %v430_v40 = vrot.slane %v428_v36, 2  ;;  %v433_v41 = vrot.slane %v431_v37, 3  ;;  %v377_v48 = vshrl.u32 %v364_v27, 16 }
  0x2c   : > { %v375_v39 = vrot.slane %v373_v33, 1 }
  0x2d   : > { %v434_v45 = vor.u32 %v433_v41, %v430_v40 }
  0x2e   : > { %v376_v43 = vsel %vm365_vm5, %v371_v32, %v375_v39  ;;  %v379_v49 = vor.u32 %v377_v48, %v375_v39 }
  0x2f   : > { %702 = vmatmul.msk.bf16.vlgmr.msra.gmra.mxu1 %vm327_vm3, %v376_v43  ;;  %v443_v46 = vsel %vm426_vm6, %v434_v45, %v442_v42 }
  0x30   : > { %709 = vmatmul.msk.bf16.vlgmr.msra.gmra.mxu2 %vm327_vm3, %v443_v46 }
  0x35   : > { %700 = vmatmul.msk.bf16.gmra.mxu0 %vm327_vm3, %v326_v47 }
  0x3b   : > { %713 = vmatmul.msk.bf16.gmra.mxu3 %vm327_vm3, %v482_v24 }
  0x3f   : > { %703 = vmatmul.msk.bf16.gmra.mxu1 %vm327_vm3, %v379_v49 }
  0x40   : > { %710 = vmatmul.msk.bf16.gmra.mxu2 %vm327_vm3, %v442_v42 }
  0xa2   : > { %v347_v50 = vpop.f32.mrf.mxu0 }
  0xa3   : > { %v356_v54 = vadd.f32 %v347_v50, %v312_v51 }
  0xaa   : > { %v349_v52 = vpop.f32.mrf.mxu0 }
  0xab   : > { %v357_v63 = vadd.f32 %v349_v52, %v313_v59 }
  0xac   : > { %v398_v53 = vpop.f32.mrf.mxu1 }
  0xad   : > { %v407_v56 = vadd.f32 %v398_v53, %v356_v54 }
  0xae   : > { %v502_v55 = vpop.f32.mrf.mxu3 }
  0xb2   : > { %v352_v57 = vpop.f32.mrf.mxu0 }
  0xb3   : > { %v462_v60 = vpop.f32.mrf.mxu2  ;;  %v358_v6 = vadd.f32 %v352_v57, %v314_v1 }
  0xb4   : > { %v400_v58 = vpop.f32.mrf.mxu1  ;;  %v471_v61 = vadd.f32 %v462_v60, %v407_v56 }
  0xb5   : > { %v408_v3 = vadd.f32 %v400_v58, %v357_v63 }
  0xb6   : > { %v504_v62 = vpop.f32.mrf.mxu3  ;;  %v511_v0 = vadd.f32 %v502_v55, %v471_v61 }
  0xb8   : > { %515 = vst.msk [vmem:[#allocation2] sm:$0xff] %vm514_vm7, %v511_v0 }
  0xba   : > { %v354_v2 = vpop.f32.mrf.mxu0 }
  0xbb   : > { %v464_v5 = vpop.f32.mrf.mxu2 }
  0xbc   : > { %v403_v4 = vpop.f32.mrf.mxu1  ;;  %v472_v7 = vadd.f32 %v464_v5, %v408_v3 }
  0xbd   : > { %v409_v10 = vadd.f32 %v403_v4, %v358_v6 }
  0xbe   : > { %v507_v8 = vpop.f32.mrf.mxu3  ;;  %v512_v9 = vadd.f32 %v504_v62, %v472_v7 }
  0xc0   : > { %516 = vst.msk [vmem:[#allocation2 + $0x8] sm:$0xff] %vm514_vm7, %v512_v9 }
  0xc3   : > { %v467_v12 = vpop.f32.mrf.mxu2 }
  0xc4   : > { %v405_v11 = vpop.f32.mrf.mxu1  ;;  %v473_v13 = vadd.f32 %v467_v12, %v409_v10 }
  0xc6   : > { %v509_v14 = vpop.f32.mrf.mxu3  ;;  %v513_v15 = vadd.f32 %v507_v8, %v473_v13 }
  0xc7   : > { %522 = sbr.rel (%p714_p11) target bundleno = 216 (0xd8), region = 44 }
  0xc8   : > { %518 = vst.msk [vmem:[#allocation2 + $0x10] sm:$0xf] %vm517_vm8, %v513_v15 }
  0xcb   : > { %v469_v16 = vpop.f32.mrf.mxu2 }
  0xcc   : > { %v784_v17 = vld [vmem:[%s999_s2] ss:$0 sm:$0xff]  ;;  %v532_v21 = vld [vmem:[%s932_s28 + $0x8] sm:$0x3]  ;;  %vm547_vm9 = vcmask 25600  }
  0xcd   : > { %v721_v18 = vld [vmem:[%s932_s28] sm:$0xff]   ;;  %v527_v22 = vadd.f32 %v784_v17, %v511_v0  ;;  %v528_v23 = vadd.f32 %v784_v17, %v512_v9  ;;  %v529_v24 = vadd.f32 %v784_v17, %v513_v15  ;;  %v535_v25 = vunpack.c.l.bf16 %v532_v21 }
  0xce   : > { %v722_v19 = vunpack.c.l.bf16 %v721_v18  ;;  %v723_v20 = vunpack.c.h.bf16 %v721_v18 }
  0xcf   : > { %v538_v28 = vadd.f32 %v535_v25, %v529_v24 }
  0xd0   : > { %v536_v26 = vadd.f32 %v722_v19, %v527_v22  ;;  %v537_v27 = vadd.f32 %v723_v20, %v528_v23 }
  0xd1   : > { %v541_v31 = vmax.f32 %v538_v28, 0.0 }
  0xd2   : > { %v539_v29 = vmax.f32 %v536_v26, 0.0  ;;  %v540_v30 = vmax.f32 %v537_v27, 0.0 }
  0xd3   : > { %v544_v34 = vpack.c.bf16 %v541_v31, %v541_v31 }
  0xd4   : > { %v542_v32 = vpack.c.bf16 %v539_v29, %v539_v29  ;;  %v543_v33 = vpack.c.bf16 %v540_v30, %v540_v30 }
  0xd5   : > { %548 = vst.msk [vmem:[%s937_s17 + $0x8] sm:$0x3] %vm547_vm9, %v544_v34 }
  0xd6   : > { %545 = vst.msk [vmem:[%s937_s17] sm:$0xf] %vm517_vm8, %v542_v32 }
  0xd7   : > { %546 = vst.msk [vmem:[%s937_s17 + $0x4] sm:$0xf] %vm517_vm8, %v543_v33 }
  0xd8 PF: > { %s14_s21 = sadd.s32 1, %s839_s21   ;;  %s1002_s15 = smov %s827_s18 }
  0xd9   : > { %p11_p12 = scmp.ge.s32.totalorder %s14_s21, 18   ;;  %s1003_s16 = smov %s831_s19 }
  0xda   : > { %s1004_s17 = smov %s835_s20  ;;  %s1005_s18 = smov %s1009_s22 }
  0xdb   : > { %s1006_s19 = smov %s1013_s23  ;;  %s1007_s20 = smov %s1017_s24 }
  0xdc   :  { %13 = sbr.rel (!%p11_p12) target bundleno = 4 (0x4), region = 83 }

</bundles_post_ra>
